<compile_context>
chip_gen: v7x
topology: tpu7x:2x2x1
jax: 0.10.0
libtpu: 0.0.40
codegen_flags: <defaults>
</compile_context>

<pallas_src>
import functools

import jax
import jax.numpy as jnp
from jax.experimental import pallas as pl
from jax.experimental.pallas import tpu as pltpu

GROWTH = 32
BLOCK_CONFIG = (6, 12, 24)
NUM_CLASSES = 2
BN_EPS = 1e-5


def _round_up(x, m):
    return (x + m - 1) // m * m


# ----------------------------- Pallas kernels ------------------------------

def _fused_matmul_kernel(a_ref, b_ref, si_ref, bi_ref, so_ref, bo_ref, o_ref,
                         *, in_act, out_act):
    """o = [relu]( (A or relu(A*si+bi)) @ B * so + bo ), f32 accumulation in o."""
    k = pl.program_id(2)

    @pl.when(k == 0)
    def _():
        o_ref[...] = jnp.zeros_like(o_ref)

    a = a_ref[...]
    if in_act:
        # pre-activation BatchNorm + ReLU on the input tile (f32 math),
        # cast to bf16 only for the MXU.
        a = jnp.maximum(a * si_ref[...] + bi_ref[...], 0.0)
    o_ref[...] += jnp.dot(a.astype(jnp.bfloat16), b_ref[...],
                          preferred_element_type=jnp.float32)

    @pl.when(k == pl.num_programs(2) - 1)
    def _():
        out = o_ref[...] * so_ref[...] + bo_ref[...]
        if out_act:
            out = jnp.maximum(out, 0.0)
        o_ref[...] = out


def _stack_max_kernel(x_ref, o_ref):
    # x: [T, M, C] -> max over taps T
    o_ref[...] = jnp.max(x_ref[...], axis=0)


def _stack_mean_kernel(x_ref, o_ref):
    # x: [T, M, C] -> mean over taps T
    o_ref[...] = jnp.mean(x_ref[...], axis=0)


def _bn_relu_gap_kernel(x_ref, s_ref, b_ref, o_ref):
    # fused final BN + ReLU + global average pool: [N, H*W, C] -> [N, C]
    x = jnp.maximum(x_ref[...] * s_ref[...] + b_ref[...], 0.0)
    o_ref[...] = jnp.mean(x, axis=1)


# ------------------------------ Pallas wrappers -----------------------------

def fused_matmul(a, w_p, n_out, si=None, bi=None, so=None, bo=None,
                 out_act=False):
    """a: [M, K] f32 (un-padded), w_p: [Kp, Np] bf16 (pre-padded weight).

    Optional prologue (si, bi: [1, Kp] f32, per input channel) and epilogue
    (so, bo: [1, Np] f32, per output channel) affine + ReLU.
    Returns [M, n_out] f32.
    """
    M, K = a.shape
    Kp, Np = w_p.shape
    in_act = si is not None

    # Match the M tile to the real row count (16-row granule for bf16 packing);
    # 256-wide K/N tiles when the padded dims allow it (v6e/v7x MXU), else 128.
    tm = min(_round_up(M, 16), 128)
    Mp = _round_up(M, tm)
    tk = 256 if Kp % 256 == 0 else 128
    tn = 256 if Np % 256 == 0 else 128

    if not in_act:
        a = a.astype(jnp.bfloat16)          # halve A HBM traffic / VMEM
    a_p = jnp.pad(a, ((0, Mp - M), (0, Kp - K)))

    if si is None:
        si = jnp.zeros((1, Kp), jnp.float32)
        bi = jnp.zeros((1, Kp), jnp.float32)
    if so is None:
        so = jnp.ones((1, Np), jnp.float32)
    if bo is None:
        bo = jnp.zeros((1, Np), jnp.float32)

    kernel = functools.partial(_fused_matmul_kernel, in_act=in_act,
                               out_act=out_act)
    out = pl.pallas_call(
        kernel,
        out_shape=jax.ShapeDtypeStruct((Mp, Np), jnp.float32),
        grid_spec=pltpu.PrefetchScalarGridSpec(
            num_scalar_prefetch=0,
            grid=(Mp // tm, Np // tn, Kp // tk),
            in_specs=[pl.BlockSpec((tm, tk), lambda i, j, k: (i, k)),
                      pl.BlockSpec((tk, tn), lambda i, j, k: (k, j)),
                      pl.BlockSpec((1, tk), lambda i, j, k: (0, k)),
                      pl.BlockSpec((1, tk), lambda i, j, k: (0, k)),
                      pl.BlockSpec((1, tn), lambda i, j, k: (0, j)),
                      pl.BlockSpec((1, tn), lambda i, j, k: (0, j))],
            out_specs=pl.BlockSpec((tm, tn), lambda i, j, k: (i, j))),
        compiler_params=pltpu.CompilerParams(
            dimension_semantics=("parallel", "parallel", "arbitrary")),
    )(a_p, w_p, si, bi, so, bo)
    return out[:M, :n_out]


def conv_bn(x, w_p, kh, kw, cout, stride=1, pad=0,
            si=None, bi=None, so=None, bo=None, out_act=False):
    """x: [N,H,W,Cin] f32, w_p pre-padded [Kp,Np] bf16.  im2col + fused matmul."""
    N, H, W, Cin = x.shape
    Ho = (H + 2 * pad - kh) // stride + 1
    Wo = (W + 2 * pad - kw) // stride + 1
    if kh == 1 and kw == 1 and pad == 0 and stride == 1:
        cols = x.reshape(N * H * W, Cin)
    else:
        xp = jnp.pad(x, ((0, 0), (pad, pad), (pad, pad), (0, 0)))
        patches = [xp[:, dy:dy + stride * Ho:stride,
                      dx:dx + stride * Wo:stride, :]
                   for dy in range(kh) for dx in range(kw)]
        cols = jnp.concatenate(patches, axis=-1).reshape(N * Ho * Wo,
                                                         kh * kw * Cin)
    out = fused_matmul(cols, w_p, cout, si=si, bi=bi, so=so, bo=bo,
                       out_act=out_act)
    return out.reshape(N, Ho, Wo, cout)


def maxpool_3x3_s2_p1(x):
    """MaxPool2d(kernel=3, stride=2, padding=1), taps stacked into ONE input."""
    N, H, W, C = x.shape
    Ho = (H + 2 - 3) // 2 + 1
    Wo = (W + 2 - 3) // 2 + 1
    xp = jnp.pad(x, ((0, 0), (1, 1), (1, 1), (0, 0)),
                 constant_values=float("-inf"))
    views = jnp.stack(
        [xp[:, dy:dy + 2 * Ho:2, dx:dx + 2 * Wo:2, :].reshape(N * Ho * Wo, C)
         for dy in range(3) for dx in range(3)], axis=0)
    out = pl.pallas_call(
        _stack_max_kernel,
        out_shape=jax.ShapeDtypeStruct((N * Ho * Wo, C), jnp.float32),
    )(views)
    return out.reshape(N, Ho, Wo, C)


def avgpool_2x2(x):
    """AvgPool2d(kernel=2, stride=2), taps stacked into ONE input."""
    N, H, W, C = x.shape
    Ho, Wo = H // 2, W // 2
    views = jnp.stack(
        [x[:, dy::2, dx::2, :].reshape(N * Ho * Wo, C)
         for dy in range(2) for dx in range(2)], axis=0)
    out = pl.pallas_call(
        _stack_mean_kernel,
        out_shape=jax.ShapeDtypeStruct((N * Ho * Wo, C), jnp.float32),
    )(views)
    return out.reshape(N, Ho, Wo, C)


def bn_relu_gap(x, s, b):
    """Fused norm5 + relu5 + AdaptiveAvgPool2d((1,1)) -> [N, C]."""
    N, H, W, C = x.shape
    return pl.pallas_call(
        _bn_relu_gap_kernel,
        out_shape=jax.ShapeDtypeStruct((N, C), jnp.float32),
    )(x.reshape(N, H * W, C), s, b)


# ------------------------------ parameters ---------------------------------

def init_params(key):
    """Weights are reshaped to 2-D, padded to tile multiples and cast to bf16
    ONCE here; BN scale/bias vectors are pre-padded f32 rows."""
    keys = iter(jax.random.split(key, 600))

    def conv_w(kh, kw, cin, cout):
        k = next(keys)
        fan_in = kh * kw * cin
        return (jax.random.normal(k, (kh, kw, cin, cout), jnp.float32)
                / jnp.sqrt(float(fan_in)))

    def bn_p(c):
        # TODO(synk): PyTorch BatchNorm2d in train mode uses batch statistics;
        # here we use eval-mode running stats (mean=0, var=1, the init values).
        kg, kb = next(keys), next(keys)
        gamma = 1.0 + 0.1 * jax.random.normal(kg, (c,), jnp.float32)
        beta = 0.1 * jax.random.normal(kb, (c,), jnp.float32)
        scale = gamma / jnp.sqrt(1.0 + BN_EPS)
        bias = beta
        return scale, bias

    def pack_w(w_hwio):
        kh, kw, cin, cout = w_hwio.shape
        K, N = kh * kw * cin, cout
        Kp, Np = _round_up(K, 128), _round_up(N, 128)
        return jnp.pad(w_hwio.reshape(K, N),
                       ((0, Kp - K), (0, Np - N))).astype(jnp.bfloat16)

    def pad_vec(v, P):
        return jnp.pad(v, (0, P - v.shape[0])).reshape(1, P)

    p = {}
    num_init = 2 * GROWTH                                  # 64
    w0 = conv_w(7, 7, 1, num_init)                         # Conv2d(1,64,7,s2,p3)
    s0, b0 = bn_p(num_init)
    p["conv0"] = {"w": pack_w(w0),
                  "so": pad_vec(s0, _round_up(num_init, 128)),
                  "bo": pad_vec(b0, _round_up(num_init, 128))}

    in_c = num_init
    blocks, transitions = [], []
    for i, num_layers in enumerate(BLOCK_CONFIG):
        layers = []
        for j in range(num_layers):
            c = in_c + j * GROWTH
            Kp1 = _round_up(c, 128)
            s1, b1 = bn_p(c)                               # pre-activation BN1
            w1 = conv_w(1, 1, c, 4 * GROWTH)               # bottleneck 1x1
            s2, b2 = bn_p(4 * GROWTH)                      # BN2 (after conv1)
            w2 = conv_w(3, 3, 4 * GROWTH, GROWTH)          # 3x3, pad 1
            Np1 = _round_up(4 * GROWTH, 128)
            layers.append({
                "w1": pack_w(w1),
                "si1": pad_vec(s1, Kp1), "bi1": pad_vec(b1, Kp1),
                "so2": pad_vec(s2, Np1), "bo2": pad_vec(b2, Np1),
                "w2": pack_w(w2),
            })
        blocks.append(layers)
        in_c += num_layers * GROWTH
        if i != len(BLOCK_CONFIG) - 1:
            out_c = in_c // 2
            st, bt = bn_p(in_c)
            wt = conv_w(1, 1, in_c, out_c)
            Kpt = _round_up(in_c, 128)
            transitions.append({"w": pack_w(wt),
                                "si": pad_vec(st, Kpt),
                                "bi": pad_vec(bt, Kpt)})
            in_c = out_c
        else:
            transitions.append(None)
    p["blocks"] = blocks
    p["transitions"] = transitions

    s5, b5 = bn_p(in_c)
    p["bn5_s"] = s5.reshape(1, 1, in_c)
    p["bn5_b"] = b5.reshape(1, 1, in_c)

    kw_, kb_ = next(keys), next(keys)
    fc_w = (jax.random.normal(kw_, (in_c, NUM_CLASSES), jnp.float32)
            / jnp.sqrt(float(in_c)))
    fc_b = 0.1 * jax.random.normal(kb_, (NUM_CLASSES,), jnp.float32)
    NpF = _round_up(NUM_CLASSES, 128)
    p["fc_w"] = jnp.pad(fc_w, ((0, 0), (0, NpF - NUM_CLASSES))).astype(jnp.bfloat16)
    p["fc_bo"] = pad_vec(fc_b, NpF)
    return p


# ------------------------------ forward pass --------------------------------

def densenet_forward(params, x_nchw):
    p = params
    x = jnp.transpose(x_nchw, (0, 2, 3, 1)).astype(jnp.float32)  # NCHW -> NHWC

    # stem: conv7x7/s2 with fused BN0+ReLU epilogue, then maxpool3x3/s2
    x = conv_bn(x, p["conv0"]["w"], 7, 7, 2 * GROWTH, stride=2, pad=3,
                so=p["conv0"]["so"], bo=p["conv0"]["bo"], out_act=True)
    x = maxpool_3x3_s2_p1(x)

    in_c = 2 * GROWTH
    for bidx, num_layers in enumerate(BLOCK_CONFIG):
        layers = p["blocks"][bidx]
        for lidx in range(num_layers):
            lyr = layers[lidx]
            N, H, W, C = x.shape
            a = x.reshape(N * H * W, C)
            # 1x1 bottleneck: BN1+ReLU fused as prologue, BN2+ReLU as epilogue
            h = fused_matmul(a, lyr["w1"], 4 * GROWTH,
                             si=lyr["si1"], bi=lyr["bi1"],
                             so=lyr["so2"], bo=lyr["bo2"], out_act=True)
            h = h.reshape(N, H, W, 4 * GROWTH)
            # 3x3 conv, no fused activation (next layer's BN handles the concat)
            h = conv_bn(h, lyr["w2"], 3, 3, GROWTH, stride=1, pad=1)
            # TODO(synk): dense concat could write into a preallocated channel
            # buffer to avoid O(L^2) copies; negligible at this tiny resolution.
            x = jnp.concatenate([x, h], axis=-1)
        in_c += num_layers * GROWTH
        if bidx != len(BLOCK_CONFIG) - 1:
            tr = p["transitions"][bidx]
            out_c = in_c // 2
            N, H, W, C = x.shape
            a = x.reshape(N * H * W, C)
            # transition: BN+ReLU fused as prologue of the 1x1 conv, then avgpool
            t = fused_matmul(a, tr["w"], out_c, si=tr["si"], bi=tr["bi"])
            x = avgpool_2x2(t.reshape(N, H, W, out_c))
            in_c = out_c

    # norm5 + relu5 + global average pool fused into one kernel
    feat = bn_relu_gap(x, p["bn5_s"], p["bn5_b"])            # [N, 1024]

    # classifier: bias fused into the matmul epilogue (no augmented K column)
    logits = fused_matmul(feat, p["fc_w"], NUM_CLASSES, bo=p["fc_bo"])
    return logits


if __name__ == "__main__":
    key = jax.random.PRNGKey(0)
    pkey, xkey = jax.random.split(key)
    params = init_params(pkey)

    # NCHW input, like the PyTorch module (1 input channel).
    x = jax.random.normal(xkey, (2, 1, 32, 32), jnp.float32)

    fwd = jax.jit(densenet_forward)
    logits = fwd(params, x)
    jax.block_until_ready(logits)

    assert logits.shape == (2, NUM_CLASSES), logits.shape
    assert bool(jnp.all(jnp.isfinite(logits)))
    print("KERNEL_OK")
</pallas_src>

<mosaic_0001>
module attributes {stable_mosaic.version = 11 : i64} {
  func.func @_fused_matmul_kernel(%arg0: i32, %arg1: i32, %arg2: i32, %arg3: memref<128x128xbf16, #tpu.memory_space<vmem>>, %arg4: memref<128x128xbf16, #tpu.memory_space<vmem>>, %arg5: memref<1x128xf32, #tpu.memory_space<vmem>>, %arg6: memref<1x128xf32, #tpu.memory_space<vmem>>, %arg7: memref<1x128xf32, #tpu.memory_space<vmem>>, %arg8: memref<1x128xf32, #tpu.memory_space<vmem>>, %arg9: memref<128x128xf32, #tpu.memory_space<vmem>>) attributes {dimension_semantics = [#tpu.dimension_semantics<parallel>, #tpu.dimension_semantics<parallel>, #tpu.dimension_semantics<arbitrary>], iteration_bounds = array<i64: 4, 1, 1>, scalar_prefetch = 0 : i64, scratch_operands = 0 : i64, tpu.core_type = #tpu.core_type<tc>, window_params = [{transform_indices = @transform_0, window_bounds = array<i64: 128, 128>}, {transform_indices = @transform_1, window_bounds = array<i64: 128, 128>}, {transform_indices = @transform_2, window_bounds = array<i64: 1, 128>}, {transform_indices = @transform_3, window_bounds = array<i64: 1, 128>}, {transform_indices = @transform_4, window_bounds = array<i64: 1, 128>}, {transform_indices = @transform_5, window_bounds = array<i64: 1, 128>}, {transform_indices = @transform_6, window_bounds = array<i64: 128, 128>}]} {
    %c0_i32 = arith.constant 0 : i32
    %0 = arith.cmpi eq, %arg2, %c0_i32 : i32
    %1 = arith.extui %0 : i1 to i32
    %c0_i32_0 = arith.constant 0 : i32
    %2 = arith.cmpi ne, %1, %c0_i32_0 : i32
    scf.if %2 {
      %cst_10 = arith.constant 0.000000e+00 : f32
      %12 = vector.broadcast %cst_10 : f32 to vector<128x128xf32>
      %c0_11 = arith.constant 0 : index
      %c0_12 = arith.constant 0 : index
      %13 = vector.load %arg9[%c0_11, %c0_12] : memref<128x128xf32, #tpu.memory_space<vmem>>, vector<128x128xf32>
      tpu.vector_store %arg9[%c0_11, %c0_12], %12 {strides = array<i32>} : memref<128x128xf32, #tpu.memory_space<vmem>>, vector<128x128xf32>,
    } else {
    }
    %c0 = arith.constant 0 : index
    %c0_1 = arith.constant 0 : index
    %3 = vector.load %arg3[%c0, %c0_1] : memref<128x128xbf16, #tpu.memory_space<vmem>>, vector<128x128xbf16>
    %c0_2 = arith.constant 0 : index
    %c0_3 = arith.constant 0 : index
    %4 = vector.load %arg9[%c0_2, %c0_3] : memref<128x128xf32, #tpu.memory_space<vmem>>, vector<128x128xf32>
    %c0_4 = arith.constant 0 : index
    %c0_5 = arith.constant 0 : index
    %5 = vector.load %arg4[%c0_4, %c0_5] : memref<128x128xbf16, #tpu.memory_space<vmem>>, vector<128x128xbf16>
    %cst = arith.constant dense<0.000000e+00> : vector<128x128xf32>
    %6 = tpu.matmul %3, %5, %cst {dimension_numbers = #tpu.dot_dimension_numbers<[1], [0], [0], [1], [0, 0, 1, 1], [], []>} : vector<128x128xbf16>, vector<128x128xbf16>, vector<128x128xf32> -> vector<128x128xf32>
    %7 = arith.addf %4, %6 : vector<128x128xf32>
    %c0_6 = arith.constant 0 : index
    %c0_7 = arith.constant 0 : index
    %8 = vector.load %arg9[%c0_6, %c0_7] : memref<128x128xf32, #tpu.memory_space<vmem>>, vector<128x128xf32>
    tpu.vector_store %arg9[%c0_6, %c0_7], %7 {strides = array<i32>} : memref<128x128xf32, #tpu.memory_space<vmem>>, vector<128x128xf32>,
    %c0_i32_8 = arith.constant 0 : i32
    %9 = arith.cmpi eq, %arg2, %c0_i32_8 : i32
    %10 = arith.extui %9 : i1 to i32
    %c0_i32_9 = arith.constant 0 : i32
    %11 = arith.cmpi ne, %10, %c0_i32_9 : i32
    scf.if %11 {
      %c0_10 = arith.constant 0 : index
      %c0_11 = arith.constant 0 : index
      %12 = vector.load %arg9[%c0_10, %c0_11] : memref<128x128xf32, #tpu.memory_space<vmem>>, vector<128x128xf32>
      %c0_12 = arith.constant 0 : index
      %c0_13 = arith.constant 0 : index
      %13 = vector.load %arg7[%c0_12, %c0_13] : memref<1x128xf32, #tpu.memory_space<vmem>>, vector<1x128xf32>
      %14 = vector.broadcast %13 : vector<1x128xf32> to vector<128x128xf32>
      %15 = arith.mulf %12, %14 : vector<128x128xf32>
      %c0_14 = arith.constant 0 : index
      %c0_15 = arith.constant 0 : index
      %16 = vector.load %arg8[%c0_14, %c0_15] : memref<1x128xf32, #tpu.memory_space<vmem>>, vector<1x128xf32>
      %17 = vector.broadcast %16 : vector<1x128xf32> to vector<128x128xf32>
      %18 = arith.addf %15, %17 : vector<128x128xf32>
      %cst_16 = arith.constant 0.000000e+00 : f32
      %19 = vector.broadcast %cst_16 : f32 to vector<128x128xf32>
      %20 = arith.maximumf %18, %19 : vector<128x128xf32>
      %c0_17 = arith.constant 0 : index
      %c0_18 = arith.constant 0 : index
      %21 = vector.load %arg9[%c0_17, %c0_18] : memref<128x128xf32, #tpu.memory_space<vmem>>, vector<128x128xf32>
      tpu.vector_store %arg9[%c0_17, %c0_18], %20 {strides = array<i32>} : memref<128x128xf32, #tpu.memory_space<vmem>>, vector<128x128xf32>,
    } else {
    }
    return
  }
  func.func @transform_0(%arg0: i32, %arg1: i32, %arg2: i32) -> (i32, i32) {
    %c0_i32 = arith.constant 0 : i32
    return %arg0, %arg2 : i32, i32
  }
  func.func @transform_1(%arg0: i32, %arg1: i32, %arg2: i32) -> (i32, i32) {
    %c0_i32 = arith.constant 0 : i32
    return %arg2, %arg1 : i32, i32
  }
  func.func @transform_2(%arg0: i32, %arg1: i32, %arg2: i32) -> (i32, i32) {
    %c0_i32 = arith.constant 0 : i32
    %c0_i32_0 = arith.constant 0 : i32
    return %c0_i32, %arg2 : i32, i32
  }
  func.func @transform_3(%arg0: i32, %arg1: i32, %arg2: i32) -> (i32, i32) {
    %c0_i32 = arith.constant 0 : i32
    %c0_i32_0 = arith.constant 0 : i32
    return %c0_i32, %arg2 : i32, i32
  }
  func.func @transform_4(%arg0: i32, %arg1: i32, %arg2: i32) -> (i32, i32) {
    %c0_i32 = arith.constant 0 : i32
    %c0_i32_0 = arith.constant 0 : i32
    return %c0_i32, %arg1 : i32, i32
  }
  func.func @transform_5(%arg0: i32, %arg1: i32, %arg2: i32) -> (i32, i32) {
    %c0_i32 = arith.constant 0 : i32
    %c0_i32_0 = arith.constant 0 : i32
    return %c0_i32, %arg1 : i32, i32
  }
  func.func @transform_6(%arg0: i32, %arg1: i32, %arg2: i32) -> (i32, i32) {
    %c0_i32 = arith.constant 0 : i32
    return %arg0, %arg1 : i32, i32
  }
}

module attributes {stable_mosaic.version = 11 : i64} {
  func.func @_fused_matmul_kernel(%arg0: i32, %arg1: i32, %arg2: i32, %arg3: memref<128x128xf32, #tpu.memory_space<vmem>>, %arg4: memref<128x128xbf16, #tpu.memory_space<vmem>>, %arg5: memref<1x128xf32, #tpu.memory_space<vmem>>, %arg6: memref<1x128xf32, #tpu.memory_space<vmem>>, %arg7: memref<1x128xf32, #tpu.memory_space<vmem>>, %arg8: memref<1x128xf32, #tpu.memory_space<vmem>>, %arg9: memref<128x128xf32, #tpu.memory_space<vmem>>) attributes {dimension_semantics = [#tpu.dimension_semantics<parallel>, #tpu.dimension_semantics<parallel>, #tpu.dimension_semantics<arbitrary>], iteration_bounds = array<i64: 1, 1, 1>, scalar_prefetch = 0 : i64, scratch_operands = 0 : i64, tpu.core_type = #tpu.core_type<tc>, window_params = [{transform_indices = @transform_0, window_bounds = array<i64: 128, 128>}, {transform_indices = @transform_1, window_bounds = array<i64: 128, 128>}, {transform_indices = @transform_2, window_bounds = array<i64: 1, 128>}, {transform_indices = @transform_3, window_bounds = array<i64: 1, 128>}, {transform_indices = @transform_4, window_bounds = array<i64: 1, 128>}, {transform_indices = @transform_5, window_bounds = array<i64: 1, 128>}, {transform_indices = @transform_6, window_bounds = array<i64: 128, 128>}]} {
    %c0_i32 = arith.constant 0 : i32
    %0 = arith.cmpi eq, %arg2, %c0_i32 : i32
    %1 = arith.extui %0 : i1 to i32
    %c0_i32_0 = arith.constant 0 : i32
    %2 = arith.cmpi ne, %1, %c0_i32_0 : i32
    scf.if %2 {
      %cst_15 = arith.constant 0.000000e+00 : f32
      %21 = vector.broadcast %cst_15 : f32 to vector<128x128xf32>
      %c0_16 = arith.constant 0 : index
      %c0_17 = arith.constant 0 : index
      %22 = vector.load %arg9[%c0_16, %c0_17] : memref<128x128xf32, #tpu.memory_space<vmem>>, vector<128x128xf32>
      tpu.vector_store %arg9[%c0_16, %c0_17], %21 {strides = array<i32>} : memref<128x128xf32, #tpu.memory_space<vmem>>, vector<128x128xf32>,
    } else {
    }
    %c0 = arith.constant 0 : index
    %c0_1 = arith.constant 0 : index
    %3 = vector.load %arg3[%c0, %c0_1] : memref<128x128xf32, #tpu.memory_space<vmem>>, vector<128x128xf32>
    %c0_2 = arith.constant 0 : index
    %c0_3 = arith.constant 0 : index
    %4 = vector.load %arg5[%c0_2, %c0_3] : memref<1x128xf32, #tpu.memory_space<vmem>>, vector<1x128xf32>
    %5 = vector.broadcast %4 : vector<1x128xf32> to vector<128x128xf32>
    %6 = arith.mulf %3, %5 : vector<128x128xf32>
    %c0_4 = arith.constant 0 : index
    %c0_5 = arith.constant 0 : index
    %7 = vector.load %arg6[%c0_4, %c0_5] : memref<1x128xf32, #tpu.memory_space<vmem>>, vector<1x128xf32>
    %8 = vector.broadcast %7 : vector<1x128xf32> to vector<128x128xf32>
    %9 = arith.addf %6, %8 : vector<128x128xf32>
    %cst = arith.constant 0.000000e+00 : f32
    %10 = vector.broadcast %cst : f32 to vector<128x128xf32>
    %11 = arith.maximumf %9, %10 : vector<128x128xf32>
    %c0_6 = arith.constant 0 : index
    %c0_7 = arith.constant 0 : index
    %12 = vector.load %arg9[%c0_6, %c0_7] : memref<128x128xf32, #tpu.memory_space<vmem>>, vector<128x128xf32>
    %13 = arith.truncf %11 : vector<128x128xf32> to vector<128x128xbf16>
    %c0_8 = arith.constant 0 : index
    %c0_9 = arith.constant 0 : index
    %14 = vector.load %arg4[%c0_8, %c0_9] : memref<128x128xbf16, #tpu.memory_space<vmem>>, vector<128x128xbf16>
    %cst_10 = arith.constant dense<0.000000e+00> : vector<128x128xf32>
    %15 = tpu.matmul %13, %14, %cst_10 {dimension_numbers = #tpu.dot_dimension_numbers<[1], [0], [0], [1], [0, 0, 1, 1], [], []>} : vector<128x128xbf16>, vector<128x128xbf16>, vector<128x128xf32> -> vector<128x128xf32>
    %16 = arith.addf %12, %15 : vector<128x128xf32>
    %c0_11 = arith.constant 0 : index
    %c0_12 = arith.constant 0 : index
    %17 = vector.load %arg9[%c0_11, %c0_12] : memref<128x128xf32, #tpu.memory_space<vmem>>, vector<128x128xf32>
    tpu.vector_store %arg9[%c0_11, %c0_12], %16 {strides = array<i32>} : memref<128x128xf32, #tpu.memory_space<vmem>>, vector<128x128xf32>,
    %c0_i32_13 = arith.constant 0 : i32
    %18 = arith.cmpi eq, %arg2, %c0_i32_13 : i32
    %19 = arith.extui %18 : i1 to i32
    %c0_i32_14 = arith.constant 0 : i32
    %20 = arith.cmpi ne, %19, %c0_i32_14 : i32
    scf.if %20 {
      %c0_15 = arith.constant 0 : index
      %c0_16 = arith.constant 0 : index
      %21 = vector.load %arg9[%c0_15, %c0_16] : memref<128x128xf32, #tpu.memory_space<vmem>>, vector<128x128xf32>
      %c0_17 = arith.constant 0 : index
      %c0_18 = arith.constant 0 : index
      %22 = vector.load %arg7[%c0_17, %c0_18] : memref<1x128xf32, #tpu.memory_space<vmem>>, vector<1x128xf32>
      %23 = vector.broadcast %22 : vector<1x128xf32> to vector<128x128xf32>
      %24 = arith.mulf %21, %23 : vector<128x128xf32>
      %c0_19 = arith.constant 0 : index
      %c0_20 = arith.constant 0 : index
      %25 = vector.load %arg8[%c0_19, %c0_20] : memref<1x128xf32, #tpu.memory_space<vmem>>, vector<1x128xf32>
      %26 = vector.broadcast %25 : vector<1x128xf32> to vector<128x128xf32>
      %27 = arith.addf %24, %26 : vector<128x128xf32>
      %cst_21 = arith.constant 0.000000e+00 : f32
      %28 = vector.broadcast %cst_21 : f32 to vector<128x128xf32>
      %29 = arith.maximumf %27, %28 : vector<128x128xf32>
      %c0_22 = arith.constant 0 : index
      %c0_23 = arith.constant 0 : index
      %30 = vector.load %arg9[%c0_22, %c0_23] : memref<128x128xf32, #tpu.memory_space<vmem>>, vector<128x128xf32>
      tpu.vector_store %arg9[%c0_22, %c0_23], %29 {strides = array<i32>} : memref<128x128xf32, #tpu.memory_space<vmem>>, vector<128x128xf32>,
    } else {
    }
    return
  }
  func.func @transform_0(%arg0: i32, %arg1: i32, %arg2: i32) -> (i32, i32) {
    %c0_i32 = arith.constant 0 : i32
    return %arg0, %arg2 : i32, i32
  }
  func.func @transform_1(%arg0: i32, %arg1: i32, %arg2: i32) -> (i32, i32) {
    %c0_i32 = arith.constant 0 : i32
    return %arg2, %arg1 : i32, i32
  }
  func.func @transform_2(%arg0: i32, %arg1: i32, %arg2: i32) -> (i32, i32) {
    %c0_i32 = arith.constant 0 : i32
    %c0_i32_0 = arith.constant 0 : i32
    return %c0_i32, %arg2 : i32, i32
  }
  func.func @transform_3(%arg0: i32, %arg1: i32, %arg2: i32) -> (i32, i32) {
    %c0_i32 = arith.constant 0 : i32
    %c0_i32_0 = arith.constant 0 : i32
    return %c0_i32, %arg2 : i32, i32
  }
  func.func @transform_4(%arg0: i32, %arg1: i32, %arg2: i32) -> (i32, i32) {
    %c0_i32 = arith.constant 0 : i32
    %c0_i32_0 = arith.constant 0 : i32
    return %c0_i32, %arg1 : i32, i32
  }
  func.func @transform_5(%arg0: i32, %arg1: i32, %arg2: i32) -> (i32, i32) {
    %c0_i32 = arith.constant 0 : i32
    %c0_i32_0 = arith.constant 0 : i32
    return %c0_i32, %arg1 : i32, i32
  }
  func.func @transform_6(%arg0: i32, %arg1: i32, %arg2: i32) -> (i32, i32) {
    %c0_i32 = arith.constant 0 : i32
    return %arg0, %arg1 : i32, i32
  }
}

module attributes {stable_mosaic.version = 11 : i64} {
  func.func @_stack_max_kernel(%arg0: memref<9x128x64xf32, #tpu.memory_space<vmem>>, %arg1: memref<128x64xf32, #tpu.memory_space<vmem>>) attributes {dimension_semantics = [], scalar_prefetch = 0 : i64, scratch_operands = 0 : i64, tpu.core_type = #tpu.core_type<tc>} {
    %c0 = arith.constant 0 : index
    %c0_0 = arith.constant 0 : index
    %c0_1 = arith.constant 0 : index
    %0 = vector.load %arg0[%c0, %c0_0, %c0_1] : memref<9x128x64xf32, #tpu.memory_space<vmem>>, vector<9x128x64xf32>
    %cst = arith.constant dense<0xFF800000> : vector<128x64xf32>
    %1 = vector.multi_reduction <maximumf>, %0, %cst [0] : vector<9x128x64xf32> to vector<128x64xf32>
    %c0_2 = arith.constant 0 : index
    %c0_3 = arith.constant 0 : index
    %2 = vector.load %arg1[%c0_2, %c0_3] : memref<128x64xf32, #tpu.memory_space<vmem>>, vector<128x64xf32>
    tpu.vector_store %arg1[%c0_2, %c0_3], %1 {strides = array<i32>} : memref<128x64xf32, #tpu.memory_space<vmem>>, vector<128x64xf32>,
    return
  }
}

module attributes {stable_mosaic.version = 11 : i64} {
  func.func @_fused_matmul_kernel(%arg0: i32, %arg1: i32, %arg2: i32, %arg3: memref<128x128xbf16, #tpu.memory_space<vmem>>, %arg4: memref<128x128xbf16, #tpu.memory_space<vmem>>, %arg5: memref<1x128xf32, #tpu.memory_space<vmem>>, %arg6: memref<1x128xf32, #tpu.memory_space<vmem>>, %arg7: memref<1x128xf32, #tpu.memory_space<vmem>>, %arg8: memref<1x128xf32, #tpu.memory_space<vmem>>, %arg9: memref<128x128xf32, #tpu.memory_space<vmem>>) attributes {dimension_semantics = [#tpu.dimension_semantics<parallel>, #tpu.dimension_semantics<parallel>, #tpu.dimension_semantics<arbitrary>], iteration_bounds = array<i64: 1, 1, 9>, scalar_prefetch = 0 : i64, scratch_operands = 0 : i64, tpu.core_type = #tpu.core_type<tc>, window_params = [{transform_indices = @transform_0, window_bounds = array<i64: 128, 128>}, {transform_indices = @transform_1, window_bounds = array<i64: 128, 128>}, {transform_indices = @transform_2, window_bounds = array<i64: 1, 128>}, {transform_indices = @transform_3, window_bounds = array<i64: 1, 128>}, {transform_indices = @transform_4, window_bounds = array<i64: 1, 128>}, {transform_indices = @transform_5, window_bounds = array<i64: 1, 128>}, {transform_indices = @transform_6, window_bounds = array<i64: 128, 128>}]} {
    %c0_i32 = arith.constant 0 : i32
    %0 = arith.cmpi eq, %arg2, %c0_i32 : i32
    %1 = arith.extui %0 : i1 to i32
    %c0_i32_0 = arith.constant 0 : i32
    %2 = arith.cmpi ne, %1, %c0_i32_0 : i32
    scf.if %2 {
      %cst_9 = arith.constant 0.000000e+00 : f32
      %12 = vector.broadcast %cst_9 : f32 to vector<128x128xf32>
      %c0_10 = arith.constant 0 : index
      %c0_11 = arith.constant 0 : index
      %13 = vector.load %arg9[%c0_10, %c0_11] : memref<128x128xf32, #tpu.memory_space<vmem>>, vector<128x128xf32>
      tpu.vector_store %arg9[%c0_10, %c0_11], %12 {strides = array<i32>} : memref<128x128xf32, #tpu.memory_space<vmem>>, vector<128x128xf32>,
    } else {
    }
    %c0 = arith.constant 0 : index
    %c0_1 = arith.constant 0 : index
    %3 = vector.load %arg3[%c0, %c0_1] : memref<128x128xbf16, #tpu.memory_space<vmem>>, vector<128x128xbf16>
    %c0_2 = arith.constant 0 : index
    %c0_3 = arith.constant 0 : index
    %4 = vector.load %arg9[%c0_2, %c0_3] : memref<128x128xf32, #tpu.memory_space<vmem>>, vector<128x128xf32>
    %c0_4 = arith.constant 0 : index
    %c0_5 = arith.constant 0 : index
    %5 = vector.load %arg4[%c0_4, %c0_5] : memref<128x128xbf16, #tpu.memory_space<vmem>>, vector<128x128xbf16>
    %cst = arith.constant dense<0.000000e+00> : vector<128x128xf32>
    %6 = tpu.matmul %3, %5, %cst {dimension_numbers = #tpu.dot_dimension_numbers<[1], [0], [0], [1], [0, 0, 1, 1], [], []>} : vector<128x128xbf16>, vector<128x128xbf16>, vector<128x128xf32> -> vector<128x128xf32>
    %7 = arith.addf %4, %6 : vector<128x128xf32>
    %c0_6 = arith.constant 0 : index
    %c0_7 = arith.constant 0 : index
    %8 = vector.load %arg9[%c0_6, %c0_7] : memref<128x128xf32, #tpu.memory_space<vmem>>, vector<128x128xf32>
    tpu.vector_store %arg9[%c0_6, %c0_7], %7 {strides = array<i32>} : memref<128x128xf32, #tpu.memory_space<vmem>>, vector<128x128xf32>,
    %c8_i32 = arith.constant 8 : i32
    %9 = arith.cmpi eq, %arg2, %c8_i32 : i32
    %10 = arith.extui %9 : i1 to i32
    %c0_i32_8 = arith.constant 0 : i32
    %11 = arith.cmpi ne, %10, %c0_i32_8 : i32
    scf.if %11 {
      %c0_9 = arith.constant 0 : index
      %c0_10 = arith.constant 0 : index
      %12 = vector.load %arg9[%c0_9, %c0_10] : memref<128x128xf32, #tpu.memory_space<vmem>>, vector<128x128xf32>
      %c0_11 = arith.constant 0 : index
      %c0_12 = arith.constant 0 : index
      %13 = vector.load %arg7[%c0_11, %c0_12] : memref<1x128xf32, #tpu.memory_space<vmem>>, vector<1x128xf32>
      %14 = vector.broadcast %13 : vector<1x128xf32> to vector<128x128xf32>
      %15 = arith.mulf %12, %14 : vector<128x128xf32>
      %c0_13 = arith.constant 0 : index
      %c0_14 = arith.constant 0 : index
      %16 = vector.load %arg8[%c0_13, %c0_14] : memref<1x128xf32, #tpu.memory_space<vmem>>, vector<1x128xf32>
      %17 = vector.broadcast %16 : vector<1x128xf32> to vector<128x128xf32>
      %18 = arith.addf %15, %17 : vector<128x128xf32>
      %c0_15 = arith.constant 0 : index
      %c0_16 = arith.constant 0 : index
      %19 = vector.load %arg9[%c0_15, %c0_16] : memref<128x128xf32, #tpu.memory_space<vmem>>, vector<128x128xf32>
      tpu.vector_store %arg9[%c0_15, %c0_16], %18 {strides = array<i32>} : memref<128x128xf32, #tpu.memory_space<vmem>>, vector<128x128xf32>,
    } else {
    }
    return
  }
  func.func @transform_0(%arg0: i32, %arg1: i32, %arg2: i32) -> (i32, i32) {
    %c0_i32 = arith.constant 0 : i32
    return %arg0, %arg2 : i32, i32
  }
  func.func @transform_1(%arg0: i32, %arg1: i32, %arg2: i32) -> (i32, i32) {
    %c0_i32 = arith.constant 0 : i32
    return %arg2, %arg1 : i32, i32
  }
  func.func @transform_2(%arg0: i32, %arg1: i32, %arg2: i32) -> (i32, i32) {
    %c0_i32 = arith.constant 0 : i32
    %c0_i32_0 = arith.constant 0 : i32
    return %c0_i32, %arg2 : i32, i32
  }
  func.func @transform_3(%arg0: i32, %arg1: i32, %arg2: i32) -> (i32, i32) {
    %c0_i32 = arith.constant 0 : i32
    %c0_i32_0 = arith.constant 0 : i32
    return %c0_i32, %arg2 : i32, i32
  }
  func.func @transform_4(%arg0: i32, %arg1: i32, %arg2: i32) -> (i32, i32) {
    %c0_i32 = arith.constant 0 : i32
    %c0_i32_0 = arith.constant 0 : i32
    return %c0_i32, %arg1 : i32, i32
  }
  func.func @transform_5(%arg0: i32, %arg1: i32, %arg2: i32) -> (i32, i32) {
    %c0_i32 = arith.constant 0 : i32
    %c0_i32_0 = arith.constant 0 : i32
    return %c0_i32, %arg1 : i32, i32
  }
  func.func @transform_6(%arg0: i32, %arg1: i32, %arg2: i32) -> (i32, i32) {
    %c0_i32 = arith.constant 0 : i32
    return %arg0, %arg1 : i32, i32
  }
}

module attributes {stable_mosaic.version = 11 : i64} {
  func.func @_fused_matmul_kernel(%arg0: i32, %arg1: i32, %arg2: i32, %arg3: memref<128x256xf32, #tpu.memory_space<vmem>>, %arg4: memref<256x128xbf16, #tpu.memory_space<vmem>>, %arg5: memref<1x256xf32, #tpu.memory_space<vmem>>, %arg6: memref<1x256xf32, #tpu.memory_space<vmem>>, %arg7: memref<1x128xf32, #tpu.memory_space<vmem>>, %arg8: memref<1x128xf32, #tpu.memory_space<vmem>>, %arg9: memref<128x128xf32, #tpu.memory_space<vmem>>) attributes {dimension_semantics = [#tpu.dimension_semantics<parallel>, #tpu.dimension_semantics<parallel>, #tpu.dimension_semantics<arbitrary>], iteration_bounds = array<i64: 1, 1, 1>, scalar_prefetch = 0 : i64, scratch_operands = 0 : i64, tpu.core_type = #tpu.core_type<tc>, window_params = [{transform_indices = @transform_0, window_bounds = array<i64: 128, 256>}, {transform_indices = @transform_1, window_bounds = array<i64: 256, 128>}, {transform_indices = @transform_2, window_bounds = array<i64: 1, 256>}, {transform_indices = @transform_3, window_bounds = array<i64: 1, 256>}, {transform_indices = @transform_4, window_bounds = array<i64: 1, 128>}, {transform_indices = @transform_5, window_bounds = array<i64: 1, 128>}, {transform_indices = @transform_6, window_bounds = array<i64: 128, 128>}]} {
    %c0_i32 = arith.constant 0 : i32
    %0 = arith.cmpi eq, %arg2, %c0_i32 : i32
    %1 = arith.extui %0 : i1 to i32
    %c0_i32_0 = arith.constant 0 : i32
    %2 = arith.cmpi ne, %1, %c0_i32_0 : i32
    scf.if %2 {
      %cst_15 = arith.constant 0.000000e+00 : f32
      %21 = vector.broadcast %cst_15 : f32 to vector<128x128xf32>
      %c0_16 = arith.constant 0 : index
      %c0_17 = arith.constant 0 : index
      %22 = vector.load %arg9[%c0_16, %c0_17] : memref<128x128xf32, #tpu.memory_space<vmem>>, vector<128x128xf32>
      tpu.vector_store %arg9[%c0_16, %c0_17], %21 {strides = array<i32>} : memref<128x128xf32, #tpu.memory_space<vmem>>, vector<128x128xf32>,
    } else {
    }
    %c0 = arith.constant 0 : index
    %c0_1 = arith.constant 0 : index
    %3 = vector.load %arg3[%c0, %c0_1] : memref<128x256xf32, #tpu.memory_space<vmem>>, vector<128x256xf32>
    %c0_2 = arith.constant 0 : index
    %c0_3 = arith.constant 0 : index
    %4 = vector.load %arg5[%c0_2, %c0_3] : memref<1x256xf32, #tpu.memory_space<vmem>>, vector<1x256xf32>
    %5 = vector.broadcast %4 : vector<1x256xf32> to vector<128x256xf32>
    %6 = arith.mulf %3, %5 : vector<128x256xf32>
    %c0_4 = arith.constant 0 : index
    %c0_5 = arith.constant 0 : index
    %7 = vector.load %arg6[%c0_4, %c0_5] : memref<1x256xf32, #tpu.memory_space<vmem>>, vector<1x256xf32>
    %8 = vector.broadcast %7 : vector<1x256xf32> to vector<128x256xf32>
    %9 = arith.addf %6, %8 : vector<128x256xf32>
    %cst = arith.constant 0.000000e+00 : f32
    %10 = vector.broadcast %cst : f32 to vector<128x256xf32>
    %11 = arith.maximumf %9, %10 : vector<128x256xf32>
    %c0_6 = arith.constant 0 : index
    %c0_7 = arith.constant 0 : index
    %12 = vector.load %arg9[%c0_6, %c0_7] : memref<128x128xf32, #tpu.memory_space<vmem>>, vector<128x128xf32>
    %13 = arith.truncf %11 : vector<128x256xf32> to vector<128x256xbf16>
    %c0_8 = arith.constant 0 : index
    %c0_9 = arith.constant 0 : index
    %14 = vector.load %arg4[%c0_8, %c0_9] : memref<256x128xbf16, #tpu.memory_space<vmem>>, vector<256x128xbf16>
    %cst_10 = arith.constant dense<0.000000e+00> : vector<128x128xf32>
    %15 = tpu.matmul %13, %14, %cst_10 {dimension_numbers = #tpu.dot_dimension_numbers<[1], [0], [0], [1], [0, 0, 1, 1], [], []>} : vector<128x256xbf16>, vector<256x128xbf16>, vector<128x128xf32> -> vector<128x128xf32>
    %16 = arith.addf %12, %15 : vector<128x128xf32>
    %c0_11 = arith.constant 0 : index
    %c0_12 = arith.constant 0 : index
    %17 = vector.load %arg9[%c0_11, %c0_12] : memref<128x128xf32, #tpu.memory_space<vmem>>, vector<128x128xf32>
    tpu.vector_store %arg9[%c0_11, %c0_12], %16 {strides = array<i32>} : memref<128x128xf32, #tpu.memory_space<vmem>>, vector<128x128xf32>,
    %c0_i32_13 = arith.constant 0 : i32
    %18 = arith.cmpi eq, %arg2, %c0_i32_13 : i32
    %19 = arith.extui %18 : i1 to i32
    %c0_i32_14 = arith.constant 0 : i32
    %20 = arith.cmpi ne, %19, %c0_i32_14 : i32
    scf.if %20 {
      %c0_15 = arith.constant 0 : index
      %c0_16 = arith.constant 0 : index
      %21 = vector.load %arg9[%c0_15, %c0_16] : memref<128x128xf32, #tpu.memory_space<vmem>>, vector<128x128xf32>
      %c0_17 = arith.constant 0 : index
      %c0_18 = arith.constant 0 : index
      %22 = vector.load %arg7[%c0_17, %c0_18] : memref<1x128xf32, #tpu.memory_space<vmem>>, vector<1x128xf32>
      %23 = vector.broadcast %22 : vector<1x128xf32> to vector<128x128xf32>
      %24 = arith.mulf %21, %23 : vector<128x128xf32>
      %c0_19 = arith.constant 0 : index
      %c0_20 = arith.constant 0 : index
      %25 = vector.load %arg8[%c0_19, %c0_20] : memref<1x128xf32, #tpu.memory_space<vmem>>, vector<1x128xf32>
      %26 = vector.broadcast %25 : vector<1x128xf32> to vector<128x128xf32>
      %27 = arith.addf %24, %26 : vector<128x128xf32>
      %cst_21 = arith.constant 0.000000e+00 : f32
      %28 = vector.broadcast %cst_21 : f32 to vector<128x128xf32>
      %29 = arith.maximumf %27, %28 : vector<128x128xf32>
      %c0_22 = arith.constant 0 : index
      %c0_23 = arith.constant 0 : index
      %30 = vector.load %arg9[%c0_22, %c0_23] : memref<128x128xf32, #tpu.memory_space<vmem>>, vector<128x128xf32>
      tpu.vector_store %arg9[%c0_22, %c0_23], %29 {strides = array<i32>} : memref<128x128xf32, #tpu.memory_space<vmem>>, vector<128x128xf32>,
    } else {
    }
    return
  }
  func.func @transform_0(%arg0: i32, %arg1: i32, %arg2: i32) -> (i32, i32) {
    %c0_i32 = arith.constant 0 : i32
    return %arg0, %arg2 : i32, i32
  }
  func.func @transform_1(%arg0: i32, %arg1: i32, %arg2: i32) -> (i32, i32) {
    %c0_i32 = arith.constant 0 : i32
    return %arg2, %arg1 : i32, i32
  }
  func.func @transform_2(%arg0: i32, %arg1: i32, %arg2: i32) -> (i32, i32) {
    %c0_i32 = arith.constant 0 : i32
    %c0_i32_0 = arith.constant 0 : i32
    return %c0_i32, %arg2 : i32, i32
  }
  func.func @transform_3(%arg0: i32, %arg1: i32, %arg2: i32) -> (i32, i32) {
    %c0_i32 = arith.constant 0 : i32
    %c0_i32_0 = arith.constant 0 : i32
    return %c0_i32, %arg2 : i32, i32
  }
  func.func @transform_4(%arg0: i32, %arg1: i32, %arg2: i32) -> (i32, i32) {
    %c0_i32 = arith.constant 0 : i32
    %c0_i32_0 = arith.constant 0 : i32
    return %c0_i32, %arg1 : i32, i32
  }
  func.func @transform_5(%arg0: i32, %arg1: i32, %arg2: i32) -> (i32, i32) {
    %c0_i32 = arith.constant 0 : i32
    %c0_i32_0 = arith.constant 0 : i32
    return %c0_i32, %arg1 : i32, i32
  }
  func.func @transform_6(%arg0: i32, %arg1: i32, %arg2: i32) -> (i32, i32) {
    %c0_i32 = arith.constant 0 : i32
    return %arg0, %arg1 : i32, i32
  }
}

module attributes {stable_mosaic.version = 11 : i64} {
  func.func @_fused_matmul_kernel(%arg0: i32, %arg1: i32, %arg2: i32, %arg3: memref<128x256xf32, #tpu.memory_space<vmem>>, %arg4: memref<256x128xbf16, #tpu.memory_space<vmem>>, %arg5: memref<1x256xf32, #tpu.memory_space<vmem>>, %arg6: memref<1x256xf32, #tpu.memory_space<vmem>>, %arg7: memref<1x128xf32, #tpu.memory_space<vmem>>, %arg8: memref<1x128xf32, #tpu.memory_space<vmem>>, %arg9: memref<128x128xf32, #tpu.memory_space<vmem>>) attributes {dimension_semantics = [#tpu.dimension_semantics<parallel>, #tpu.dimension_semantics<parallel>, #tpu.dimension_semantics<arbitrary>], iteration_bounds = array<i64: 1, 1, 1>, scalar_prefetch = 0 : i64, scratch_operands = 0 : i64, tpu.core_type = #tpu.core_type<tc>, window_params = [{transform_indices = @transform_0, window_bounds = array<i64: 128, 256>}, {transform_indices = @transform_1, window_bounds = array<i64: 256, 128>}, {transform_indices = @transform_2, window_bounds = array<i64: 1, 256>}, {transform_indices = @transform_3, window_bounds = array<i64: 1, 256>}, {transform_indices = @transform_4, window_bounds = array<i64: 1, 128>}, {transform_indices = @transform_5, window_bounds = array<i64: 1, 128>}, {transform_indices = @transform_6, window_bounds = array<i64: 128, 128>}]} {
    %c0_i32 = arith.constant 0 : i32
    %0 = arith.cmpi eq, %arg2, %c0_i32 : i32
    %1 = arith.extui %0 : i1 to i32
    %c0_i32_0 = arith.constant 0 : i32
    %2 = arith.cmpi ne, %1, %c0_i32_0 : i32
    scf.if %2 {
      %cst_15 = arith.constant 0.000000e+00 : f32
      %21 = vector.broadcast %cst_15 : f32 to vector<128x128xf32>
      %c0_16 = arith.constant 0 : index
      %c0_17 = arith.constant 0 : index
      %22 = vector.load %arg9[%c0_16, %c0_17] : memref<128x128xf32, #tpu.memory_space<vmem>>, vector<128x128xf32>
      tpu.vector_store %arg9[%c0_16, %c0_17], %21 {strides = array<i32>} : memref<128x128xf32, #tpu.memory_space<vmem>>, vector<128x128xf32>,
    } else {
    }
    %c0 = arith.constant 0 : index
    %c0_1 = arith.constant 0 : index
    %3 = vector.load %arg3[%c0, %c0_1] : memref<128x256xf32, #tpu.memory_space<vmem>>, vector<128x256xf32>
    %c0_2 = arith.constant 0 : index
    %c0_3 = arith.constant 0 : index
    %4 = vector.load %arg5[%c0_2, %c0_3] : memref<1x256xf32, #tpu.memory_space<vmem>>, vector<1x256xf32>
    %5 = vector.broadcast %4 : vector<1x256xf32> to vector<128x256xf32>
    %6 = arith.mulf %3, %5 : vector<128x256xf32>
    %c0_4 = arith.constant 0 : index
    %c0_5 = arith.constant 0 : index
    %7 = vector.load %arg6[%c0_4, %c0_5] : memref<1x256xf32, #tpu.memory_space<vmem>>, vector<1x256xf32>
    %8 = vector.broadcast %7 : vector<1x256xf32> to vector<128x256xf32>
    %9 = arith.addf %6, %8 : vector<128x256xf32>
    %cst = arith.constant 0.000000e+00 : f32
    %10 = vector.broadcast %cst : f32 to vector<128x256xf32>
    %11 = arith.maximumf %9, %10 : vector<128x256xf32>
    %c0_6 = arith.constant 0 : index
    %c0_7 = arith.constant 0 : index
    %12 = vector.load %arg9[%c0_6, %c0_7] : memref<128x128xf32, #tpu.memory_space<vmem>>, vector<128x128xf32>
    %13 = arith.truncf %11 : vector<128x256xf32> to vector<128x256xbf16>
    %c0_8 = arith.constant 0 : index
    %c0_9 = arith.constant 0 : index
    %14 = vector.load %arg4[%c0_8, %c0_9] : memref<256x128xbf16, #tpu.memory_space<vmem>>, vector<256x128xbf16>
    %cst_10 = arith.constant dense<0.000000e+00> : vector<128x128xf32>
    %15 = tpu.matmul %13, %14, %cst_10 {dimension_numbers = #tpu.dot_dimension_numbers<[1], [0], [0], [1], [0, 0, 1, 1], [], []>} : vector<128x256xbf16>, vector<256x128xbf16>, vector<128x128xf32> -> vector<128x128xf32>
    %16 = arith.addf %12, %15 : vector<128x128xf32>
    %c0_11 = arith.constant 0 : index
    %c0_12 = arith.constant 0 : index
    %17 = vector.load %arg9[%c0_11, %c0_12] : memref<128x128xf32, #tpu.memory_space<vmem>>, vector<128x128xf32>
    tpu.vector_store %arg9[%c0_11, %c0_12], %16 {strides = array<i32>} : memref<128x128xf32, #tpu.memory_space<vmem>>, vector<128x128xf32>,
    %c0_i32_13 = arith.constant 0 : i32
    %18 = arith.cmpi eq, %arg2, %c0_i32_13 : i32
    %19 = arith.extui %18 : i1 to i32
    %c0_i32_14 = arith.constant 0 : i32
    %20 = arith.cmpi ne, %19, %c0_i32_14 : i32
    scf.if %20 {
      %c0_15 = arith.constant 0 : index
      %c0_16 = arith.constant 0 : index
      %21 = vector.load %arg9[%c0_15, %c0_16] : memref<128x128xf32, #tpu.memory_space<vmem>>, vector<128x128xf32>
      %c0_17 = arith.constant 0 : index
      %c0_18 = arith.constant 0 : index
      %22 = vector.load %arg7[%c0_17, %c0_18] : memref<1x128xf32, #tpu.memory_space<vmem>>, vector<1x128xf32>
      %23 = vector.broadcast %22 : vector<1x128xf32> to vector<128x128xf32>
      %24 = arith.mulf %21, %23 : vector<128x128xf32>
      %c0_19 = arith.constant 0 : index
      %c0_20 = arith.constant 0 : index
      %25 = vector.load %arg8[%c0_19, %c0_20] : memref<1x128xf32, #tpu.memory_space<vmem>>, vector<1x128xf32>
      %26 = vector.broadcast %25 : vector<1x128xf32> to vector<128x128xf32>
      %27 = arith.addf %24, %26 : vector<128x128xf32>
      %c0_21 = arith.constant 0 : index
      %c0_22 = arith.constant 0 : index
      %28 = vector.load %arg9[%c0_21, %c0_22] : memref<128x128xf32, #tpu.memory_space<vmem>>, vector<128x128xf32>
      tpu.vector_store %arg9[%c0_21, %c0_22], %27 {strides = array<i32>} : memref<128x128xf32, #tpu.memory_space<vmem>>, vector<128x128xf32>,
    } else {
    }
    return
  }
  func.func @transform_0(%arg0: i32, %arg1: i32, %arg2: i32) -> (i32, i32) {
    %c0_i32 = arith.constant 0 : i32
    return %arg0, %arg2 : i32, i32
  }
  func.func @transform_1(%arg0: i32, %arg1: i32, %arg2: i32) -> (i32, i32) {
    %c0_i32 = arith.constant 0 : i32
    return %arg2, %arg1 : i32, i32
  }
  func.func @transform_2(%arg0: i32, %arg1: i32, %arg2: i32) -> (i32, i32) {
    %c0_i32 = arith.constant 0 : i32
    %c0_i32_0 = arith.constant 0 : i32
    return %c0_i32, %arg2 : i32, i32
  }
  func.func @transform_3(%arg0: i32, %arg1: i32, %arg2: i32) -> (i32, i32) {
    %c0_i32 = arith.constant 0 : i32
    %c0_i32_0 = arith.constant 0 : i32
    return %c0_i32, %arg2 : i32, i32
  }
  func.func @transform_4(%arg0: i32, %arg1: i32, %arg2: i32) -> (i32, i32) {
    %c0_i32 = arith.constant 0 : i32
    %c0_i32_0 = arith.constant 0 : i32
    return %c0_i32, %arg1 : i32, i32
  }
  func.func @transform_5(%arg0: i32, %arg1: i32, %arg2: i32) -> (i32, i32) {
    %c0_i32 = arith.constant 0 : i32
    %c0_i32_0 = arith.constant 0 : i32
    return %c0_i32, %arg1 : i32, i32
  }
  func.func @transform_6(%arg0: i32, %arg1: i32, %arg2: i32) -> (i32, i32) {
    %c0_i32 = arith.constant 0 : i32
    return %arg0, %arg1 : i32, i32
  }
}

module attributes {stable_mosaic.version = 11 : i64} {
  func.func @_stack_mean_kernel(%arg0: memref<4x32x128xf32, #tpu.memory_space<vmem>>, %arg1: memref<32x128xf32, #tpu.memory_space<vmem>>) attributes {dimension_semantics = [], scalar_prefetch = 0 : i64, scratch_operands = 0 : i64, tpu.core_type = #tpu.core_type<tc>} {
    %c0 = arith.constant 0 : index
    %c0_0 = arith.constant 0 : index
    %c0_1 = arith.constant 0 : index
    %0 = vector.load %arg0[%c0, %c0_0, %c0_1] : memref<4x32x128xf32, #tpu.memory_space<vmem>>, vector<4x32x128xf32>
    %cst = arith.constant dense<0.000000e+00> : vector<32x128xf32>
    %1 = vector.multi_reduction <add>, %0, %cst [0] : vector<4x32x128xf32> to vector<32x128xf32>
    %cst_2 = arith.constant 4.000000e+00 : f32
    %2 = vector.broadcast %cst_2 : f32 to vector<32x128xf32>
    %3 = arith.divf %1, %2 : vector<32x128xf32>
    %c0_3 = arith.constant 0 : index
    %c0_4 = arith.constant 0 : index
    %4 = vector.load %arg1[%c0_3, %c0_4] : memref<32x128xf32, #tpu.memory_space<vmem>>, vector<32x128xf32>
    tpu.vector_store %arg1[%c0_3, %c0_4], %3 {strides = array<i32>} : memref<32x128xf32, #tpu.memory_space<vmem>>, vector<32x128xf32>,
    return
  }
}

module attributes {stable_mosaic.version = 11 : i64} {
  func.func @_fused_matmul_kernel(%arg0: i32, %arg1: i32, %arg2: i32, %arg3: memref<32x128xf32, #tpu.memory_space<vmem>>, %arg4: memref<128x128xbf16, #tpu.memory_space<vmem>>, %arg5: memref<1x128xf32, #tpu.memory_space<vmem>>, %arg6: memref<1x128xf32, #tpu.memory_space<vmem>>, %arg7: memref<1x128xf32, #tpu.memory_space<vmem>>, %arg8: memref<1x128xf32, #tpu.memory_space<vmem>>, %arg9: memref<32x128xf32, #tpu.memory_space<vmem>>) attributes {dimension_semantics = [#tpu.dimension_semantics<parallel>, #tpu.dimension_semantics<parallel>, #tpu.dimension_semantics<arbitrary>], iteration_bounds = array<i64: 1, 1, 1>, scalar_prefetch = 0 : i64, scratch_operands = 0 : i64, tpu.core_type = #tpu.core_type<tc>, window_params = [{transform_indices = @transform_0, window_bounds = array<i64: 32, 128>}, {transform_indices = @transform_1, window_bounds = array<i64: 128, 128>}, {transform_indices = @transform_2, window_bounds = array<i64: 1, 128>}, {transform_indices = @transform_3, window_bounds = array<i64: 1, 128>}, {transform_indices = @transform_4, window_bounds = array<i64: 1, 128>}, {transform_indices = @transform_5, window_bounds = array<i64: 1, 128>}, {transform_indices = @transform_6, window_bounds = array<i64: 32, 128>}]} {
    %c0_i32 = arith.constant 0 : i32
    %0 = arith.cmpi eq, %arg2, %c0_i32 : i32
    %1 = arith.extui %0 : i1 to i32
    %c0_i32_0 = arith.constant 0 : i32
    %2 = arith.cmpi ne, %1, %c0_i32_0 : i32
    scf.if %2 {
      %cst_15 = arith.constant 0.000000e+00 : f32
      %21 = vector.broadcast %cst_15 : f32 to vector<32x128xf32>
      %c0_16 = arith.constant 0 : index
      %c0_17 = arith.constant 0 : index
      %22 = vector.load %arg9[%c0_16, %c0_17] : memref<32x128xf32, #tpu.memory_space<vmem>>, vector<32x128xf32>
      tpu.vector_store %arg9[%c0_16, %c0_17], %21 {strides = array<i32>} : memref<32x128xf32, #tpu.memory_space<vmem>>, vector<32x128xf32>,
    } else {
    }
    %c0 = arith.constant 0 : index
    %c0_1 = arith.constant 0 : index
    %3 = vector.load %arg3[%c0, %c0_1] : memref<32x128xf32, #tpu.memory_space<vmem>>, vector<32x128xf32>
    %c0_2 = arith.constant 0 : index
    %c0_3 = arith.constant 0 : index
    %4 = vector.load %arg5[%c0_2, %c0_3] : memref<1x128xf32, #tpu.memory_space<vmem>>, vector<1x128xf32>
    %5 = vector.broadcast %4 : vector<1x128xf32> to vector<32x128xf32>
    %6 = arith.mulf %3, %5 : vector<32x128xf32>
    %c0_4 = arith.constant 0 : index
    %c0_5 = arith.constant 0 : index
    %7 = vector.load %arg6[%c0_4, %c0_5] : memref<1x128xf32, #tpu.memory_space<vmem>>, vector<1x128xf32>
    %8 = vector.broadcast %7 : vector<1x128xf32> to vector<32x128xf32>
    %9 = arith.addf %6, %8 : vector<32x128xf32>
    %cst = arith.constant 0.000000e+00 : f32
    %10 = vector.broadcast %cst : f32 to vector<32x128xf32>
    %11 = arith.maximumf %9, %10 : vector<32x128xf32>
    %c0_6 = arith.constant 0 : index
    %c0_7 = arith.constant 0 : index
    %12 = vector.load %arg9[%c0_6, %c0_7] : memref<32x128xf32, #tpu.memory_space<vmem>>, vector<32x128xf32>
    %13 = arith.truncf %11 : vector<32x128xf32> to vector<32x128xbf16>
    %c0_8 = arith.constant 0 : index
    %c0_9 = arith.constant 0 : index
    %14 = vector.load %arg4[%c0_8, %c0_9] : memref<128x128xbf16, #tpu.memory_space<vmem>>, vector<128x128xbf16>
    %cst_10 = arith.constant dense<0.000000e+00> : vector<32x128xf32>
    %15 = tpu.matmul %13, %14, %cst_10 {dimension_numbers = #tpu.dot_dimension_numbers<[1], [0], [0], [1], [0, 0, 1, 1], [], []>} : vector<32x128xbf16>, vector<128x128xbf16>, vector<32x128xf32> -> vector<32x128xf32>
    %16 = arith.addf %12, %15 : vector<32x128xf32>
    %c0_11 = arith.constant 0 : index
    %c0_12 = arith.constant 0 : index
    %17 = vector.load %arg9[%c0_11, %c0_12] : memref<32x128xf32, #tpu.memory_space<vmem>>, vector<32x128xf32>
    tpu.vector_store %arg9[%c0_11, %c0_12], %16 {strides = array<i32>} : memref<32x128xf32, #tpu.memory_space<vmem>>, vector<32x128xf32>,
    %c0_i32_13 = arith.constant 0 : i32
    %18 = arith.cmpi eq, %arg2, %c0_i32_13 : i32
    %19 = arith.extui %18 : i1 to i32
    %c0_i32_14 = arith.constant 0 : i32
    %20 = arith.cmpi ne, %19, %c0_i32_14 : i32
    scf.if %20 {
      %c0_15 = arith.constant 0 : index
      %c0_16 = arith.constant 0 : index
      %21 = vector.load %arg9[%c0_15, %c0_16] : memref<32x128xf32, #tpu.memory_space<vmem>>, vector<32x128xf32>
      %c0_17 = arith.constant 0 : index
      %c0_18 = arith.constant 0 : index
      %22 = vector.load %arg7[%c0_17, %c0_18] : memref<1x128xf32, #tpu.memory_space<vmem>>, vector<1x128xf32>
      %23 = vector.broadcast %22 : vector<1x128xf32> to vector<32x128xf32>
      %24 = arith.mulf %21, %23 : vector<32x128xf32>
      %c0_19 = arith.constant 0 : index
      %c0_20 = arith.constant 0 : index
      %25 = vector.load %arg8[%c0_19, %c0_20] : memref<1x128xf32, #tpu.memory_space<vmem>>, vector<1x128xf32>
      %26 = vector.broadcast %25 : vector<1x128xf32> to vector<32x128xf32>
      %27 = arith.addf %24, %26 : vector<32x128xf32>
      %cst_21 = arith.constant 0.000000e+00 : f32
      %28 = vector.broadcast %cst_21 : f32 to vector<32x128xf32>
      %29 = arith.maximumf %27, %28 : vector<32x128xf32>
      %c0_22 = arith.constant 0 : index
      %c0_23 = arith.constant 0 : index
      %30 = vector.load %arg9[%c0_22, %c0_23] : memref<32x128xf32, #tpu.memory_space<vmem>>, vector<32x128xf32>
      tpu.vector_store %arg9[%c0_22, %c0_23], %29 {strides = array<i32>} : memref<32x128xf32, #tpu.memory_space<vmem>>, vector<32x128xf32>,
    } else {
    }
    return
  }
  func.func @transform_0(%arg0: i32, %arg1: i32, %arg2: i32) -> (i32, i32) {
    %c0_i32 = arith.constant 0 : i32
    return %arg0, %arg2 : i32, i32
  }
  func.func @transform_1(%arg0: i32, %arg1: i32, %arg2: i32) -> (i32, i32) {
    %c0_i32 = arith.constant 0 : i32
    return %arg2, %arg1 : i32, i32
  }
  func.func @transform_2(%arg0: i32, %arg1: i32, %arg2: i32) -> (i32, i32) {
    %c0_i32 = arith.constant 0 : i32
    %c0_i32_0 = arith.constant 0 : i32
    return %c0_i32, %arg2 : i32, i32
  }
  func.func @transform_3(%arg0: i32, %arg1: i32, %arg2: i32) -> (i32, i32) {
    %c0_i32 = arith.constant 0 : i32
    %c0_i32_0 = arith.constant 0 : i32
    return %c0_i32, %arg2 : i32, i32
  }
  func.func @transform_4(%arg0: i32, %arg1: i32, %arg2: i32) -> (i32, i32) {
    %c0_i32 = arith.constant 0 : i32
    %c0_i32_0 = arith.constant 0 : i32
    return %c0_i32, %arg1 : i32, i32
  }
  func.func @transform_5(%arg0: i32, %arg1: i32, %arg2: i32) -> (i32, i32) {
    %c0_i32 = arith.constant 0 : i32
    %c0_i32_0 = arith.constant 0 : i32
    return %c0_i32, %arg1 : i32, i32
  }
  func.func @transform_6(%arg0: i32, %arg1: i32, %arg2: i32) -> (i32, i32) {
    %c0_i32 = arith.constant 0 : i32
    return %arg0, %arg1 : i32, i32
  }
}

module attributes {stable_mosaic.version = 11 : i64} {
  func.func @_fused_matmul_kernel(%arg0: i32, %arg1: i32, %arg2: i32, %arg3: memref<32x128xbf16, #tpu.memory_space<vmem>>, %arg4: memref<128x128xbf16, #tpu.memory_space<vmem>>, %arg5: memref<1x128xf32, #tpu.memory_space<vmem>>, %arg6: memref<1x128xf32, #tpu.memory_space<vmem>>, %arg7: memref<1x128xf32, #tpu.memory_space<vmem>>, %arg8: memref<1x128xf32, #tpu.memory_space<vmem>>, %arg9: memref<32x128xf32, #tpu.memory_space<vmem>>) attributes {dimension_semantics = [#tpu.dimension_semantics<parallel>, #tpu.dimension_semantics<parallel>, #tpu.dimension_semantics<arbitrary>], iteration_bounds = array<i64: 1, 1, 9>, scalar_prefetch = 0 : i64, scratch_operands = 0 : i64, tpu.core_type = #tpu.core_type<tc>, window_params = [{transform_indices = @transform_0, window_bounds = array<i64: 32, 128>}, {transform_indices = @transform_1, window_bounds = array<i64: 128, 128>}, {transform_indices = @transform_2, window_bounds = array<i64: 1, 128>}, {transform_indices = @transform_3, window_bounds = array<i64: 1, 128>}, {transform_indices = @transform_4, window_bounds = array<i64: 1, 128>}, {transform_indices = @transform_5, window_bounds = array<i64: 1, 128>}, {transform_indices = @transform_6, window_bounds = array<i64: 32, 128>}]} {
    %c0_i32 = arith.constant 0 : i32
    %0 = arith.cmpi eq, %arg2, %c0_i32 : i32
    %1 = arith.extui %0 : i1 to i32
    %c0_i32_0 = arith.constant 0 : i32
    %2 = arith.cmpi ne, %1, %c0_i32_0 : i32
    scf.if %2 {
      %cst_9 = arith.constant 0.000000e+00 : f32
      %12 = vector.broadcast %cst_9 : f32 to vector<32x128xf32>
      %c0_10 = arith.constant 0 : index
      %c0_11 = arith.constant 0 : index
      %13 = vector.load %arg9[%c0_10, %c0_11] : memref<32x128xf32, #tpu.memory_space<vmem>>, vector<32x128xf32>
      tpu.vector_store %arg9[%c0_10, %c0_11], %12 {strides = array<i32>} : memref<32x128xf32, #tpu.memory_space<vmem>>, vector<32x128xf32>,
    } else {
    }
    %c0 = arith.constant 0 : index
    %c0_1 = arith.constant 0 : index
    %3 = vector.load %arg3[%c0, %c0_1] : memref<32x128xbf16, #tpu.memory_space<vmem>>, vector<32x128xbf16>
    %c0_2 = arith.constant 0 : index
    %c0_3 = arith.constant 0 : index
    %4 = vector.load %arg9[%c0_2, %c0_3] : memref<32x128xf32, #tpu.memory_space<vmem>>, vector<32x128xf32>
    %c0_4 = arith.constant 0 : index
    %c0_5 = arith.constant 0 : index
    %5 = vector.load %arg4[%c0_4, %c0_5] : memref<128x128xbf16, #tpu.memory_space<vmem>>, vector<128x128xbf16>
    %cst = arith.constant dense<0.000000e+00> : vector<32x128xf32>
    %6 = tpu.matmul %3, %5, %cst {dimension_numbers = #tpu.dot_dimension_numbers<[1], [0], [0], [1], [0, 0, 1, 1], [], []>} : vector<32x128xbf16>, vector<128x128xbf16>, vector<32x128xf32> -> vector<32x128xf32>
    %7 = arith.addf %4, %6 : vector<32x128xf32>
    %c0_6 = arith.constant 0 : index
    %c0_7 = arith.constant 0 : index
    %8 = vector.load %arg9[%c0_6, %c0_7] : memref<32x128xf32, #tpu.memory_space<vmem>>, vector<32x128xf32>
    tpu.vector_store %arg9[%c0_6, %c0_7], %7 {strides = array<i32>} : memref<32x128xf32, #tpu.memory_space<vmem>>, vector<32x128xf32>,
    %c8_i32 = arith.constant 8 : i32
    %9 = arith.cmpi eq, %arg2, %c8_i32 : i32
    %10 = arith.extui %9 : i1 to i32
    %c0_i32_8 = arith.constant 0 : i32
    %11 = arith.cmpi ne, %10, %c0_i32_8 : i32
    scf.if %11 {
      %c0_9 = arith.constant 0 : index
      %c0_10 = arith.constant 0 : index
      %12 = vector.load %arg9[%c0_9, %c0_10] : memref<32x128xf32, #tpu.memory_space<vmem>>, vector<32x128xf32>
      %c0_11 = arith.constant 0 : index
      %c0_12 = arith.constant 0 : index
      %13 = vector.load %arg7[%c0_11, %c0_12] : memref<1x128xf32, #tpu.memory_space<vmem>>, vector<1x128xf32>
      %14 = vector.broadcast %13 : vector<1x128xf32> to vector<32x128xf32>
      %15 = arith.mulf %12, %14 : vector<32x128xf32>
      %c0_13 = arith.constant 0 : index
      %c0_14 = arith.constant 0 : index
      %16 = vector.load %arg8[%c0_13, %c0_14] : memref<1x128xf32, #tpu.memory_space<vmem>>, vector<1x128xf32>
      %17 = vector.broadcast %16 : vector<1x128xf32> to vector<32x128xf32>
      %18 = arith.addf %15, %17 : vector<32x128xf32>
      %c0_15 = arith.constant 0 : index
      %c0_16 = arith.constant 0 : index
      %19 = vector.load %arg9[%c0_15, %c0_16] : memref<32x128xf32, #tpu.memory_space<vmem>>, vector<32x128xf32>
      tpu.vector_store %arg9[%c0_15, %c0_16], %18 {strides = array<i32>} : memref<32x128xf32, #tpu.memory_space<vmem>>, vector<32x128xf32>,
    } else {
    }
    return
  }
  func.func @transform_0(%arg0: i32, %arg1: i32, %arg2: i32) -> (i32, i32) {
    %c0_i32 = arith.constant 0 : i32
    return %arg0, %arg2 : i32, i32
  }
  func.func @transform_1(%arg0: i32, %arg1: i32, %arg2: i32) -> (i32, i32) {
    %c0_i32 = arith.constant 0 : i32
    return %arg2, %arg1 : i32, i32
  }
  func.func @transform_2(%arg0: i32, %arg1: i32, %arg2: i32) -> (i32, i32) {
    %c0_i32 = arith.constant 0 : i32
    %c0_i32_0 = arith.constant 0 : i32
    return %c0_i32, %arg2 : i32, i32
  }
  func.func @transform_3(%arg0: i32, %arg1: i32, %arg2: i32) -> (i32, i32) {
    %c0_i32 = arith.constant 0 : i32
    %c0_i32_0 = arith.constant 0 : i32
    return %c0_i32, %arg2 : i32, i32
  }
  func.func @transform_4(%arg0: i32, %arg1: i32, %arg2: i32) -> (i32, i32) {
    %c0_i32 = arith.constant 0 : i32
    %c0_i32_0 = arith.constant 0 : i32
    return %c0_i32, %arg1 : i32, i32
  }
  func.func @transform_5(%arg0: i32, %arg1: i32, %arg2: i32) -> (i32, i32) {
    %c0_i32 = arith.constant 0 : i32
    %c0_i32_0 = arith.constant 0 : i32
    return %c0_i32, %arg1 : i32, i32
  }
  func.func @transform_6(%arg0: i32, %arg1: i32, %arg2: i32) -> (i32, i32) {
    %c0_i32 = arith.constant 0 : i32
    return %arg0, %arg1 : i32, i32
  }
}

module attributes {stable_mosaic.version = 11 : i64} {
  func.func @_fused_matmul_kernel(%arg0: i32, %arg1: i32, %arg2: i32, %arg3: memref<32x256xf32, #tpu.memory_space<vmem>>, %arg4: memref<256x128xbf16, #tpu.memory_space<vmem>>, %arg5: memref<1x256xf32, #tpu.memory_space<vmem>>, %arg6: memref<1x256xf32, #tpu.memory_space<vmem>>, %arg7: memref<1x128xf32, #tpu.memory_space<vmem>>, %arg8: memref<1x128xf32, #tpu.memory_space<vmem>>, %arg9: memref<32x128xf32, #tpu.memory_space<vmem>>) attributes {dimension_semantics = [#tpu.dimension_semantics<parallel>, #tpu.dimension_semantics<parallel>, #tpu.dimension_semantics<arbitrary>], iteration_bounds = array<i64: 1, 1, 1>, scalar_prefetch = 0 : i64, scratch_operands = 0 : i64, tpu.core_type = #tpu.core_type<tc>, window_params = [{transform_indices = @transform_0, window_bounds = array<i64: 32, 256>}, {transform_indices = @transform_1, window_bounds = array<i64: 256, 128>}, {transform_indices = @transform_2, window_bounds = array<i64: 1, 256>}, {transform_indices = @transform_3, window_bounds = array<i64: 1, 256>}, {transform_indices = @transform_4, window_bounds = array<i64: 1, 128>}, {transform_indices = @transform_5, window_bounds = array<i64: 1, 128>}, {transform_indices = @transform_6, window_bounds = array<i64: 32, 128>}]} {
    %c0_i32 = arith.constant 0 : i32
    %0 = arith.cmpi eq, %arg2, %c0_i32 : i32
    %1 = arith.extui %0 : i1 to i32
    %c0_i32_0 = arith.constant 0 : i32
    %2 = arith.cmpi ne, %1, %c0_i32_0 : i32
    scf.if %2 {
      %cst_15 = arith.constant 0.000000e+00 : f32
      %21 = vector.broadcast %cst_15 : f32 to vector<32x128xf32>
      %c0_16 = arith.constant 0 : index
      %c0_17 = arith.constant 0 : index
      %22 = vector.load %arg9[%c0_16, %c0_17] : memref<32x128xf32, #tpu.memory_space<vmem>>, vector<32x128xf32>
      tpu.vector_store %arg9[%c0_16, %c0_17], %21 {strides = array<i32>} : memref<32x128xf32, #tpu.memory_space<vmem>>, vector<32x128xf32>,
    } else {
    }
    %c0 = arith.constant 0 : index
    %c0_1 = arith.constant 0 : index
    %3 = vector.load %arg3[%c0, %c0_1] : memref<32x256xf32, #tpu.memory_space<vmem>>, vector<32x256xf32>
    %c0_2 = arith.constant 0 : index
    %c0_3 = arith.constant 0 : index
    %4 = vector.load %arg5[%c0_2, %c0_3] : memref<1x256xf32, #tpu.memory_space<vmem>>, vector<1x256xf32>
    %5 = vector.broadcast %4 : vector<1x256xf32> to vector<32x256xf32>
    %6 = arith.mulf %3, %5 : vector<32x256xf32>
    %c0_4 = arith.constant 0 : index
    %c0_5 = arith.constant 0 : index
    %7 = vector.load %arg6[%c0_4, %c0_5] : memref<1x256xf32, #tpu.memory_space<vmem>>, vector<1x256xf32>
    %8 = vector.broadcast %7 : vector<1x256xf32> to vector<32x256xf32>
    %9 = arith.addf %6, %8 : vector<32x256xf32>
    %cst = arith.constant 0.000000e+00 : f32
    %10 = vector.broadcast %cst : f32 to vector<32x256xf32>
    %11 = arith.maximumf %9, %10 : vector<32x256xf32>
    %c0_6 = arith.constant 0 : index
    %c0_7 = arith.constant 0 : index
    %12 = vector.load %arg9[%c0_6, %c0_7] : memref<32x128xf32, #tpu.memory_space<vmem>>, vector<32x128xf32>
    %13 = arith.truncf %11 : vector<32x256xf32> to vector<32x256xbf16>
    %c0_8 = arith.constant 0 : index
    %c0_9 = arith.constant 0 : index
    %14 = vector.load %arg4[%c0_8, %c0_9] : memref<256x128xbf16, #tpu.memory_space<vmem>>, vector<256x128xbf16>
    %cst_10 = arith.constant dense<0.000000e+00> : vector<32x128xf32>
    %15 = tpu.matmul %13, %14, %cst_10 {dimension_numbers = #tpu.dot_dimension_numbers<[1], [0], [0], [1], [0, 0, 1, 1], [], []>} : vector<32x256xbf16>, vector<256x128xbf16>, vector<32x128xf32> -> vector<32x128xf32>
    %16 = arith.addf %12, %15 : vector<32x128xf32>
    %c0_11 = arith.constant 0 : index
    %c0_12 = arith.constant 0 : index
    %17 = vector.load %arg9[%c0_11, %c0_12] : memref<32x128xf32, #tpu.memory_space<vmem>>, vector<32x128xf32>
    tpu.vector_store %arg9[%c0_11, %c0_12], %16 {strides = array<i32>} : memref<32x128xf32, #tpu.memory_space<vmem>>, vector<32x128xf32>,
    %c0_i32_13 = arith.constant 0 : i32
    %18 = arith.cmpi eq, %arg2, %c0_i32_13 : i32
    %19 = arith.extui %18 : i1 to i32
    %c0_i32_14 = arith.constant 0 : i32
    %20 = arith.cmpi ne, %19, %c0_i32_14 : i32
    scf.if %20 {
      %c0_15 = arith.constant 0 : index
      %c0_16 = arith.constant 0 : index
      %21 = vector.load %arg9[%c0_15, %c0_16] : memref<32x128xf32, #tpu.memory_space<vmem>>, vector<32x128xf32>
      %c0_17 = arith.constant 0 : index
      %c0_18 = arith.constant 0 : index
      %22 = vector.load %arg7[%c0_17, %c0_18] : memref<1x128xf32, #tpu.memory_space<vmem>>, vector<1x128xf32>
      %23 = vector.broadcast %22 : vector<1x128xf32> to vector<32x128xf32>
      %24 = arith.mulf %21, %23 : vector<32x128xf32>
      %c0_19 = arith.constant 0 : index
      %c0_20 = arith.constant 0 : index
      %25 = vector.load %arg8[%c0_19, %c0_20] : memref<1x128xf32, #tpu.memory_space<vmem>>, vector<1x128xf32>
      %26 = vector.broadcast %25 : vector<1x128xf32> to vector<32x128xf32>
      %27 = arith.addf %24, %26 : vector<32x128xf32>
      %cst_21 = arith.constant 0.000000e+00 : f32
      %28 = vector.broadcast %cst_21 : f32 to vector<32x128xf32>
      %29 = arith.maximumf %27, %28 : vector<32x128xf32>
      %c0_22 = arith.constant 0 : index
      %c0_23 = arith.constant 0 : index
      %30 = vector.load %arg9[%c0_22, %c0_23] : memref<32x128xf32, #tpu.memory_space<vmem>>, vector<32x128xf32>
      tpu.vector_store %arg9[%c0_22, %c0_23], %29 {strides = array<i32>} : memref<32x128xf32, #tpu.memory_space<vmem>>, vector<32x128xf32>,
    } else {
    }
    return
  }
  func.func @transform_0(%arg0: i32, %arg1: i32, %arg2: i32) -> (i32, i32) {
    %c0_i32 = arith.constant 0 : i32
    return %arg0, %arg2 : i32, i32
  }
  func.func @transform_1(%arg0: i32, %arg1: i32, %arg2: i32) -> (i32, i32) {
    %c0_i32 = arith.constant 0 : i32
    return %arg2, %arg1 : i32, i32
  }
  func.func @transform_2(%arg0: i32, %arg1: i32, %arg2: i32) -> (i32, i32) {
    %c0_i32 = arith.constant 0 : i32
    %c0_i32_0 = arith.constant 0 : i32
    return %c0_i32, %arg2 : i32, i32
  }
  func.func @transform_3(%arg0: i32, %arg1: i32, %arg2: i32) -> (i32, i32) {
    %c0_i32 = arith.constant 0 : i32
    %c0_i32_0 = arith.constant 0 : i32
    return %c0_i32, %arg2 : i32, i32
  }
  func.func @transform_4(%arg0: i32, %arg1: i32, %arg2: i32) -> (i32, i32) {
    %c0_i32 = arith.constant 0 : i32
    %c0_i32_0 = arith.constant 0 : i32
    return %c0_i32, %arg1 : i32, i32
  }
  func.func @transform_5(%arg0: i32, %arg1: i32, %arg2: i32) -> (i32, i32) {
    %c0_i32 = arith.constant 0 : i32
    %c0_i32_0 = arith.constant 0 : i32
    return %c0_i32, %arg1 : i32, i32
  }
  func.func @transform_6(%arg0: i32, %arg1: i32, %arg2: i32) -> (i32, i32) {
    %c0_i32 = arith.constant 0 : i32
    return %arg0, %arg1 : i32, i32
  }
}

module attributes {stable_mosaic.version = 11 : i64} {
  func.func @_fused_matmul_kernel(%arg0: i32, %arg1: i32, %arg2: i32, %arg3: memref<32x128xf32, #tpu.memory_space<vmem>>, %arg4: memref<128x128xbf16, #tpu.memory_space<vmem>>, %arg5: memref<1x128xf32, #tpu.memory_space<vmem>>, %arg6: memref<1x128xf32, #tpu.memory_space<vmem>>, %arg7: memref<1x128xf32, #tpu.memory_space<vmem>>, %arg8: memref<1x128xf32, #tpu.memory_space<vmem>>, %arg9: memref<32x128xf32, #tpu.memory_space<vmem>>) attributes {dimension_semantics = [#tpu.dimension_semantics<parallel>, #tpu.dimension_semantics<parallel>, #tpu.dimension_semantics<arbitrary>], iteration_bounds = array<i64: 1, 1, 3>, scalar_prefetch = 0 : i64, scratch_operands = 0 : i64, tpu.core_type = #tpu.core_type<tc>, window_params = [{transform_indices = @transform_0, window_bounds = array<i64: 32, 128>}, {transform_indices = @transform_1, window_bounds = array<i64: 128, 128>}, {transform_indices = @transform_2, window_bounds = array<i64: 1, 128>}, {transform_indices = @transform_3, window_bounds = array<i64: 1, 128>}, {transform_indices = @transform_4, window_bounds = array<i64: 1, 128>}, {transform_indices = @transform_5, window_bounds = array<i64: 1, 128>}, {transform_indices = @transform_6, window_bounds = array<i64: 32, 128>}]} {
    %c0_i32 = arith.constant 0 : i32
    %0 = arith.cmpi eq, %arg2, %c0_i32 : i32
    %1 = arith.extui %0 : i1 to i32
    %c0_i32_0 = arith.constant 0 : i32
    %2 = arith.cmpi ne, %1, %c0_i32_0 : i32
    scf.if %2 {
      %cst_14 = arith.constant 0.000000e+00 : f32
      %21 = vector.broadcast %cst_14 : f32 to vector<32x128xf32>
      %c0_15 = arith.constant 0 : index
      %c0_16 = arith.constant 0 : index
      %22 = vector.load %arg9[%c0_15, %c0_16] : memref<32x128xf32, #tpu.memory_space<vmem>>, vector<32x128xf32>
      tpu.vector_store %arg9[%c0_15, %c0_16], %21 {strides = array<i32>} : memref<32x128xf32, #tpu.memory_space<vmem>>, vector<32x128xf32>,
    } else {
    }
    %c0 = arith.constant 0 : index
    %c0_1 = arith.constant 0 : index
    %3 = vector.load %arg3[%c0, %c0_1] : memref<32x128xf32, #tpu.memory_space<vmem>>, vector<32x128xf32>
    %c0_2 = arith.constant 0 : index
    %c0_3 = arith.constant 0 : index
    %4 = vector.load %arg5[%c0_2, %c0_3] : memref<1x128xf32, #tpu.memory_space<vmem>>, vector<1x128xf32>
    %5 = vector.broadcast %4 : vector<1x128xf32> to vector<32x128xf32>
    %6 = arith.mulf %3, %5 : vector<32x128xf32>
    %c0_4 = arith.constant 0 : index
    %c0_5 = arith.constant 0 : index
    %7 = vector.load %arg6[%c0_4, %c0_5] : memref<1x128xf32, #tpu.memory_space<vmem>>, vector<1x128xf32>
    %8 = vector.broadcast %7 : vector<1x128xf32> to vector<32x128xf32>
    %9 = arith.addf %6, %8 : vector<32x128xf32>
    %cst = arith.constant 0.000000e+00 : f32
    %10 = vector.broadcast %cst : f32 to vector<32x128xf32>
    %11 = arith.maximumf %9, %10 : vector<32x128xf32>
    %c0_6 = arith.constant 0 : index
    %c0_7 = arith.constant 0 : index
    %12 = vector.load %arg9[%c0_6, %c0_7] : memref<32x128xf32, #tpu.memory_space<vmem>>, vector<32x128xf32>
    %13 = arith.truncf %11 : vector<32x128xf32> to vector<32x128xbf16>
    %c0_8 = arith.constant 0 : index
    %c0_9 = arith.constant 0 : index
    %14 = vector.load %arg4[%c0_8, %c0_9] : memref<128x128xbf16, #tpu.memory_space<vmem>>, vector<128x128xbf16>
    %cst_10 = arith.constant dense<0.000000e+00> : vector<32x128xf32>
    %15 = tpu.matmul %13, %14, %cst_10 {dimension_numbers = #tpu.dot_dimension_numbers<[1], [0], [0], [1], [0, 0, 1, 1], [], []>} : vector<32x128xbf16>, vector<128x128xbf16>, vector<32x128xf32> -> vector<32x128xf32>
    %16 = arith.addf %12, %15 : vector<32x128xf32>
    %c0_11 = arith.constant 0 : index
    %c0_12 = arith.constant 0 : index
    %17 = vector.load %arg9[%c0_11, %c0_12] : memref<32x128xf32, #tpu.memory_space<vmem>>, vector<32x128xf32>
    tpu.vector_store %arg9[%c0_11, %c0_12], %16 {strides = array<i32>} : memref<32x128xf32, #tpu.memory_space<vmem>>, vector<32x128xf32>,
    %c2_i32 = arith.constant 2 : i32
    %18 = arith.cmpi eq, %arg2, %c2_i32 : i32
    %19 = arith.extui %18 : i1 to i32
    %c0_i32_13 = arith.constant 0 : i32
    %20 = arith.cmpi ne, %19, %c0_i32_13 : i32
    scf.if %20 {
      %c0_14 = arith.constant 0 : index
      %c0_15 = arith.constant 0 : index
      %21 = vector.load %arg9[%c0_14, %c0_15] : memref<32x128xf32, #tpu.memory_space<vmem>>, vector<32x128xf32>
      %c0_16 = arith.constant 0 : index
      %c0_17 = arith.constant 0 : index
      %22 = vector.load %arg7[%c0_16, %c0_17] : memref<1x128xf32, #tpu.memory_space<vmem>>, vector<1x128xf32>
      %23 = vector.broadcast %22 : vector<1x128xf32> to vector<32x128xf32>
      %24 = arith.mulf %21, %23 : vector<32x128xf32>
      %c0_18 = arith.constant 0 : index
      %c0_19 = arith.constant 0 : index
      %25 = vector.load %arg8[%c0_18, %c0_19] : memref<1x128xf32, #tpu.memory_space<vmem>>, vector<1x128xf32>
      %26 = vector.broadcast %25 : vector<1x128xf32> to vector<32x128xf32>
      %27 = arith.addf %24, %26 : vector<32x128xf32>
      %cst_20 = arith.constant 0.000000e+00 : f32
      %28 = vector.broadcast %cst_20 : f32 to vector<32x128xf32>
      %29 = arith.maximumf %27, %28 : vector<32x128xf32>
      %c0_21 = arith.constant 0 : index
      %c0_22 = arith.constant 0 : index
      %30 = vector.load %arg9[%c0_21, %c0_22] : memref<32x128xf32, #tpu.memory_space<vmem>>, vector<32x128xf32>
      tpu.vector_store %arg9[%c0_21, %c0_22], %29 {strides = array<i32>} : memref<32x128xf32, #tpu.memory_space<vmem>>, vector<32x128xf32>,
    } else {
    }
    return
  }
  func.func @transform_0(%arg0: i32, %arg1: i32, %arg2: i32) -> (i32, i32) {
    %c0_i32 = arith.constant 0 : i32
    return %arg0, %arg2 : i32, i32
  }
  func.func @transform_1(%arg0: i32, %arg1: i32, %arg2: i32) -> (i32, i32) {
    %c0_i32 = arith.constant 0 : i32
    return %arg2, %arg1 : i32, i32
  }
  func.func @transform_2(%arg0: i32, %arg1: i32, %arg2: i32) -> (i32, i32) {
    %c0_i32 = arith.constant 0 : i32
    %c0_i32_0 = arith.constant 0 : i32
    return %c0_i32, %arg2 : i32, i32
  }
  func.func @transform_3(%arg0: i32, %arg1: i32, %arg2: i32) -> (i32, i32) {
    %c0_i32 = arith.constant 0 : i32
    %c0_i32_0 = arith.constant 0 : i32
    return %c0_i32, %arg2 : i32, i32
  }
  func.func @transform_4(%arg0: i32, %arg1: i32, %arg2: i32) -> (i32, i32) {
    %c0_i32 = arith.constant 0 : i32
    %c0_i32_0 = arith.constant 0 : i32
    return %c0_i32, %arg1 : i32, i32
  }
  func.func @transform_5(%arg0: i32, %arg1: i32, %arg2: i32) -> (i32, i32) {
    %c0_i32 = arith.constant 0 : i32
    %c0_i32_0 = arith.constant 0 : i32
    return %c0_i32, %arg1 : i32, i32
  }
  func.func @transform_6(%arg0: i32, %arg1: i32, %arg2: i32) -> (i32, i32) {
    %c0_i32 = arith.constant 0 : i32
    return %arg0, %arg1 : i32, i32
  }
}

module attributes {stable_mosaic.version = 11 : i64} {
  func.func @_fused_matmul_kernel(%arg0: i32, %arg1: i32, %arg2: i32, %arg3: memref<32x256xf32, #tpu.memory_space<vmem>>, %arg4: memref<256x128xbf16, #tpu.memory_space<vmem>>, %arg5: memref<1x256xf32, #tpu.memory_space<vmem>>, %arg6: memref<1x256xf32, #tpu.memory_space<vmem>>, %arg7: memref<1x128xf32, #tpu.memory_space<vmem>>, %arg8: memref<1x128xf32, #tpu.memory_space<vmem>>, %arg9: memref<32x128xf32, #tpu.memory_space<vmem>>) attributes {dimension_semantics = [#tpu.dimension_semantics<parallel>, #tpu.dimension_semantics<parallel>, #tpu.dimension_semantics<arbitrary>], iteration_bounds = array<i64: 1, 1, 2>, scalar_prefetch = 0 : i64, scratch_operands = 0 : i64, tpu.core_type = #tpu.core_type<tc>, window_params = [{transform_indices = @transform_0, window_bounds = array<i64: 32, 256>}, {transform_indices = @transform_1, window_bounds = array<i64: 256, 128>}, {transform_indices = @transform_2, window_bounds = array<i64: 1, 256>}, {transform_indices = @transform_3, window_bounds = array<i64: 1, 256>}, {transform_indices = @transform_4, window_bounds = array<i64: 1, 128>}, {transform_indices = @transform_5, window_bounds = array<i64: 1, 128>}, {transform_indices = @transform_6, window_bounds = array<i64: 32, 128>}]} {
    %c0_i32 = arith.constant 0 : i32
    %0 = arith.cmpi eq, %arg2, %c0_i32 : i32
    %1 = arith.extui %0 : i1 to i32
    %c0_i32_0 = arith.constant 0 : i32
    %2 = arith.cmpi ne, %1, %c0_i32_0 : i32
    scf.if %2 {
      %cst_14 = arith.constant 0.000000e+00 : f32
      %21 = vector.broadcast %cst_14 : f32 to vector<32x128xf32>
      %c0_15 = arith.constant 0 : index
      %c0_16 = arith.constant 0 : index
      %22 = vector.load %arg9[%c0_15, %c0_16] : memref<32x128xf32, #tpu.memory_space<vmem>>, vector<32x128xf32>
      tpu.vector_store %arg9[%c0_15, %c0_16], %21 {strides = array<i32>} : memref<32x128xf32, #tpu.memory_space<vmem>>, vector<32x128xf32>,
    } else {
    }
    %c0 = arith.constant 0 : index
    %c0_1 = arith.constant 0 : index
    %3 = vector.load %arg3[%c0, %c0_1] : memref<32x256xf32, #tpu.memory_space<vmem>>, vector<32x256xf32>
    %c0_2 = arith.constant 0 : index
    %c0_3 = arith.constant 0 : index
    %4 = vector.load %arg5[%c0_2, %c0_3] : memref<1x256xf32, #tpu.memory_space<vmem>>, vector<1x256xf32>
    %5 = vector.broadcast %4 : vector<1x256xf32> to vector<32x256xf32>
    %6 = arith.mulf %3, %5 : vector<32x256xf32>
    %c0_4 = arith.constant 0 : index
    %c0_5 = arith.constant 0 : index
    %7 = vector.load %arg6[%c0_4, %c0_5] : memref<1x256xf32, #tpu.memory_space<vmem>>, vector<1x256xf32>
    %8 = vector.broadcast %7 : vector<1x256xf32> to vector<32x256xf32>
    %9 = arith.addf %6, %8 : vector<32x256xf32>
    %cst = arith.constant 0.000000e+00 : f32
    %10 = vector.broadcast %cst : f32 to vector<32x256xf32>
    %11 = arith.maximumf %9, %10 : vector<32x256xf32>
    %c0_6 = arith.constant 0 : index
    %c0_7 = arith.constant 0 : index
    %12 = vector.load %arg9[%c0_6, %c0_7] : memref<32x128xf32, #tpu.memory_space<vmem>>, vector<32x128xf32>
    %13 = arith.truncf %11 : vector<32x256xf32> to vector<32x256xbf16>
    %c0_8 = arith.constant 0 : index
    %c0_9 = arith.constant 0 : index
    %14 = vector.load %arg4[%c0_8, %c0_9] : memref<256x128xbf16, #tpu.memory_space<vmem>>, vector<256x128xbf16>
    %cst_10 = arith.constant dense<0.000000e+00> : vector<32x128xf32>
    %15 = tpu.matmul %13, %14, %cst_10 {dimension_numbers = #tpu.dot_dimension_numbers<[1], [0], [0], [1], [0, 0, 1, 1], [], []>} : vector<32x256xbf16>, vector<256x128xbf16>, vector<32x128xf32> -> vector<32x128xf32>
    %16 = arith.addf %12, %15 : vector<32x128xf32>
    %c0_11 = arith.constant 0 : index
    %c0_12 = arith.constant 0 : index
    %17 = vector.load %arg9[%c0_11, %c0_12] : memref<32x128xf32, #tpu.memory_space<vmem>>, vector<32x128xf32>
    tpu.vector_store %arg9[%c0_11, %c0_12], %16 {strides = array<i32>} : memref<32x128xf32, #tpu.memory_space<vmem>>, vector<32x128xf32>,
    %c1_i32 = arith.constant 1 : i32
    %18 = arith.cmpi eq, %arg2, %c1_i32 : i32
    %19 = arith.extui %18 : i1 to i32
    %c0_i32_13 = arith.constant 0 : i32
    %20 = arith.cmpi ne, %19, %c0_i32_13 : i32
    scf.if %20 {
      %c0_14 = arith.constant 0 : index
      %c0_15 = arith.constant 0 : index
      %21 = vector.load %arg9[%c0_14, %c0_15] : memref<32x128xf32, #tpu.memory_space<vmem>>, vector<32x128xf32>
      %c0_16 = arith.constant 0 : index
      %c0_17 = arith.constant 0 : index
      %22 = vector.load %arg7[%c0_16, %c0_17] : memref<1x128xf32, #tpu.memory_space<vmem>>, vector<1x128xf32>
      %23 = vector.broadcast %22 : vector<1x128xf32> to vector<32x128xf32>
      %24 = arith.mulf %21, %23 : vector<32x128xf32>
      %c0_18 = arith.constant 0 : index
      %c0_19 = arith.constant 0 : index
      %25 = vector.load %arg8[%c0_18, %c0_19] : memref<1x128xf32, #tpu.memory_space<vmem>>, vector<1x128xf32>
      %26 = vector.broadcast %25 : vector<1x128xf32> to vector<32x128xf32>
      %27 = arith.addf %24, %26 : vector<32x128xf32>
      %cst_20 = arith.constant 0.000000e+00 : f32
      %28 = vector.broadcast %cst_20 : f32 to vector<32x128xf32>
      %29 = arith.maximumf %27, %28 : vector<32x128xf32>
      %c0_21 = arith.constant 0 : index
      %c0_22 = arith.constant 0 : index
      %30 = vector.load %arg9[%c0_21, %c0_22] : memref<32x128xf32, #tpu.memory_space<vmem>>, vector<32x128xf32>
      tpu.vector_store %arg9[%c0_21, %c0_22], %29 {strides = array<i32>} : memref<32x128xf32, #tpu.memory_space<vmem>>, vector<32x128xf32>,
    } else {
    }
    return
  }
  func.func @transform_0(%arg0: i32, %arg1: i32, %arg2: i32) -> (i32, i32) {
    %c0_i32 = arith.constant 0 : i32
    return %arg0, %arg2 : i32, i32
  }
  func.func @transform_1(%arg0: i32, %arg1: i32, %arg2: i32) -> (i32, i32) {
    %c0_i32 = arith.constant 0 : i32
    return %arg2, %arg1 : i32, i32
  }
  func.func @transform_2(%arg0: i32, %arg1: i32, %arg2: i32) -> (i32, i32) {
    %c0_i32 = arith.constant 0 : i32
    %c0_i32_0 = arith.constant 0 : i32
    return %c0_i32, %arg2 : i32, i32
  }
  func.func @transform_3(%arg0: i32, %arg1: i32, %arg2: i32) -> (i32, i32) {
    %c0_i32 = arith.constant 0 : i32
    %c0_i32_0 = arith.constant 0 : i32
    return %c0_i32, %arg2 : i32, i32
  }
  func.func @transform_4(%arg0: i32, %arg1: i32, %arg2: i32) -> (i32, i32) {
    %c0_i32 = arith.constant 0 : i32
    %c0_i32_0 = arith.constant 0 : i32
    return %c0_i32, %arg1 : i32, i32
  }
  func.func @transform_5(%arg0: i32, %arg1: i32, %arg2: i32) -> (i32, i32) {
    %c0_i32 = arith.constant 0 : i32
    %c0_i32_0 = arith.constant 0 : i32
    return %c0_i32, %arg1 : i32, i32
  }
  func.func @transform_6(%arg0: i32, %arg1: i32, %arg2: i32) -> (i32, i32) {
    %c0_i32 = arith.constant 0 : i32
    return %arg0, %arg1 : i32, i32
  }
}

module attributes {stable_mosaic.version = 11 : i64} {
  func.func @_fused_matmul_kernel(%arg0: i32, %arg1: i32, %arg2: i32, %arg3: memref<32x256xf32, #tpu.memory_space<vmem>>, %arg4: memref<256x256xbf16, #tpu.memory_space<vmem>>, %arg5: memref<1x256xf32, #tpu.memory_space<vmem>>, %arg6: memref<1x256xf32, #tpu.memory_space<vmem>>, %arg7: memref<1x256xf32, #tpu.memory_space<vmem>>, %arg8: memref<1x256xf32, #tpu.memory_space<vmem>>, %arg9: memref<32x256xf32, #tpu.memory_space<vmem>>) attributes {dimension_semantics = [#tpu.dimension_semantics<parallel>, #tpu.dimension_semantics<parallel>, #tpu.dimension_semantics<arbitrary>], iteration_bounds = array<i64: 1, 1, 2>, scalar_prefetch = 0 : i64, scratch_operands = 0 : i64, tpu.core_type = #tpu.core_type<tc>, window_params = [{transform_indices = @transform_0, window_bounds = array<i64: 32, 256>}, {transform_indices = @transform_1, window_bounds = array<i64: 256, 256>}, {transform_indices = @transform_2, window_bounds = array<i64: 1, 256>}, {transform_indices = @transform_3, window_bounds = array<i64: 1, 256>}, {transform_indices = @transform_4, window_bounds = array<i64: 1, 256>}, {transform_indices = @transform_5, window_bounds = array<i64: 1, 256>}, {transform_indices = @transform_6, window_bounds = array<i64: 32, 256>}]} {
    %c0_i32 = arith.constant 0 : i32
    %0 = arith.cmpi eq, %arg2, %c0_i32 : i32
    %1 = arith.extui %0 : i1 to i32
    %c0_i32_0 = arith.constant 0 : i32
    %2 = arith.cmpi ne, %1, %c0_i32_0 : i32
    scf.if %2 {
      %cst_14 = arith.constant 0.000000e+00 : f32
      %21 = vector.broadcast %cst_14 : f32 to vector<32x256xf32>
      %c0_15 = arith.constant 0 : index
      %c0_16 = arith.constant 0 : index
      %22 = vector.load %arg9[%c0_15, %c0_16] : memref<32x256xf32, #tpu.memory_space<vmem>>, vector<32x256xf32>
      tpu.vector_store %arg9[%c0_15, %c0_16], %21 {strides = array<i32>} : memref<32x256xf32, #tpu.memory_space<vmem>>, vector<32x256xf32>,
    } else {
    }
    %c0 = arith.constant 0 : index
    %c0_1 = arith.constant 0 : index
    %3 = vector.load %arg3[%c0, %c0_1] : memref<32x256xf32, #tpu.memory_space<vmem>>, vector<32x256xf32>
    %c0_2 = arith.constant 0 : index
    %c0_3 = arith.constant 0 : index
    %4 = vector.load %arg5[%c0_2, %c0_3] : memref<1x256xf32, #tpu.memory_space<vmem>>, vector<1x256xf32>
    %5 = vector.broadcast %4 : vector<1x256xf32> to vector<32x256xf32>
    %6 = arith.mulf %3, %5 : vector<32x256xf32>
    %c0_4 = arith.constant 0 : index
    %c0_5 = arith.constant 0 : index
    %7 = vector.load %arg6[%c0_4, %c0_5] : memref<1x256xf32, #tpu.memory_space<vmem>>, vector<1x256xf32>
    %8 = vector.broadcast %7 : vector<1x256xf32> to vector<32x256xf32>
    %9 = arith.addf %6, %8 : vector<32x256xf32>
    %cst = arith.constant 0.000000e+00 : f32
    %10 = vector.broadcast %cst : f32 to vector<32x256xf32>
    %11 = arith.maximumf %9, %10 : vector<32x256xf32>
    %c0_6 = arith.constant 0 : index
    %c0_7 = arith.constant 0 : index
    %12 = vector.load %arg9[%c0_6, %c0_7] : memref<32x256xf32, #tpu.memory_space<vmem>>, vector<32x256xf32>
    %13 = arith.truncf %11 : vector<32x256xf32> to vector<32x256xbf16>
    %c0_8 = arith.constant 0 : index
    %c0_9 = arith.constant 0 : index
    %14 = vector.load %arg4[%c0_8, %c0_9] : memref<256x256xbf16, #tpu.memory_space<vmem>>, vector<256x256xbf16>
    %cst_10 = arith.constant dense<0.000000e+00> : vector<32x256xf32>
    %15 = tpu.matmul %13, %14, %cst_10 {dimension_numbers = #tpu.dot_dimension_numbers<[1], [0], [0], [1], [0, 0, 1, 1], [], []>} : vector<32x256xbf16>, vector<256x256xbf16>, vector<32x256xf32> -> vector<32x256xf32>
    %16 = arith.addf %12, %15 : vector<32x256xf32>
    %c0_11 = arith.constant 0 : index
    %c0_12 = arith.constant 0 : index
    %17 = vector.load %arg9[%c0_11, %c0_12] : memref<32x256xf32, #tpu.memory_space<vmem>>, vector<32x256xf32>
    tpu.vector_store %arg9[%c0_11, %c0_12], %16 {strides = array<i32>} : memref<32x256xf32, #tpu.memory_space<vmem>>, vector<32x256xf32>,
    %c1_i32 = arith.constant 1 : i32
    %18 = arith.cmpi eq, %arg2, %c1_i32 : i32
    %19 = arith.extui %18 : i1 to i32
    %c0_i32_13 = arith.constant 0 : i32
    %20 = arith.cmpi ne, %19, %c0_i32_13 : i32
    scf.if %20 {
      %c0_14 = arith.constant 0 : index
      %c0_15 = arith.constant 0 : index
      %21 = vector.load %arg9[%c0_14, %c0_15] : memref<32x256xf32, #tpu.memory_space<vmem>>, vector<32x256xf32>
      %c0_16 = arith.constant 0 : index
      %c0_17 = arith.constant 0 : index
      %22 = vector.load %arg7[%c0_16, %c0_17] : memref<1x256xf32, #tpu.memory_space<vmem>>, vector<1x256xf32>
      %23 = vector.broadcast %22 : vector<1x256xf32> to vector<32x256xf32>
      %24 = arith.mulf %21, %23 : vector<32x256xf32>
      %c0_18 = arith.constant 0 : index
      %c0_19 = arith.constant 0 : index
      %25 = vector.load %arg8[%c0_18, %c0_19] : memref<1x256xf32, #tpu.memory_space<vmem>>, vector<1x256xf32>
      %26 = vector.broadcast %25 : vector<1x256xf32> to vector<32x256xf32>
      %27 = arith.addf %24, %26 : vector<32x256xf32>
      %c0_20 = arith.constant 0 : index
      %c0_21 = arith.constant 0 : index
      %28 = vector.load %arg9[%c0_20, %c0_21] : memref<32x256xf32, #tpu.memory_space<vmem>>, vector<32x256xf32>
      tpu.vector_store %arg9[%c0_20, %c0_21], %27 {strides = array<i32>} : memref<32x256xf32, #tpu.memory_space<vmem>>, vector<32x256xf32>,
    } else {
    }
    return
  }
  func.func @transform_0(%arg0: i32, %arg1: i32, %arg2: i32) -> (i32, i32) {
    %c0_i32 = arith.constant 0 : i32
    return %arg0, %arg2 : i32, i32
  }
  func.func @transform_1(%arg0: i32, %arg1: i32, %arg2: i32) -> (i32, i32) {
    %c0_i32 = arith.constant 0 : i32
    return %arg2, %arg1 : i32, i32
  }
  func.func @transform_2(%arg0: i32, %arg1: i32, %arg2: i32) -> (i32, i32) {
    %c0_i32 = arith.constant 0 : i32
    %c0_i32_0 = arith.constant 0 : i32
    return %c0_i32, %arg2 : i32, i32
  }
  func.func @transform_3(%arg0: i32, %arg1: i32, %arg2: i32) -> (i32, i32) {
    %c0_i32 = arith.constant 0 : i32
    %c0_i32_0 = arith.constant 0 : i32
    return %c0_i32, %arg2 : i32, i32
  }
  func.func @transform_4(%arg0: i32, %arg1: i32, %arg2: i32) -> (i32, i32) {
    %c0_i32 = arith.constant 0 : i32
    %c0_i32_0 = arith.constant 0 : i32
    return %c0_i32, %arg1 : i32, i32
  }
  func.func @transform_5(%arg0: i32, %arg1: i32, %arg2: i32) -> (i32, i32) {
    %c0_i32 = arith.constant 0 : i32
    %c0_i32_0 = arith.constant 0 : i32
    return %c0_i32, %arg1 : i32, i32
  }
  func.func @transform_6(%arg0: i32, %arg1: i32, %arg2: i32) -> (i32, i32) {
    %c0_i32 = arith.constant 0 : i32
    return %arg0, %arg1 : i32, i32
  }
}

module attributes {stable_mosaic.version = 11 : i64} {
  func.func @_stack_mean_kernel(%arg0: memref<4x8x256xf32, #tpu.memory_space<vmem>>, %arg1: memref<8x256xf32, #tpu.memory_space<vmem>>) attributes {dimension_semantics = [], scalar_prefetch = 0 : i64, scratch_operands = 0 : i64, tpu.core_type = #tpu.core_type<tc>} {
    %c0 = arith.constant 0 : index
    %c0_0 = arith.constant 0 : index
    %c0_1 = arith.constant 0 : index
    %0 = vector.load %arg0[%c0, %c0_0, %c0_1] : memref<4x8x256xf32, #tpu.memory_space<vmem>>, vector<4x8x256xf32>
    %cst = arith.constant dense<0.000000e+00> : vector<8x256xf32>
    %1 = vector.multi_reduction <add>, %0, %cst [0] : vector<4x8x256xf32> to vector<8x256xf32>
    %cst_2 = arith.constant 4.000000e+00 : f32
    %2 = vector.broadcast %cst_2 : f32 to vector<8x256xf32>
    %3 = arith.divf %1, %2 : vector<8x256xf32>
    %c0_3 = arith.constant 0 : index
    %c0_4 = arith.constant 0 : index
    %4 = vector.load %arg1[%c0_3, %c0_4] : memref<8x256xf32, #tpu.memory_space<vmem>>, vector<8x256xf32>
    tpu.vector_store %arg1[%c0_3, %c0_4], %3 {strides = array<i32>} : memref<8x256xf32, #tpu.memory_space<vmem>>, vector<8x256xf32>,
    return
  }
}

module attributes {stable_mosaic.version = 11 : i64} {
  func.func @_fused_matmul_kernel(%arg0: i32, %arg1: i32, %arg2: i32, %arg3: memref<16x256xf32, #tpu.memory_space<vmem>>, %arg4: memref<256x128xbf16, #tpu.memory_space<vmem>>, %arg5: memref<1x256xf32, #tpu.memory_space<vmem>>, %arg6: memref<1x256xf32, #tpu.memory_space<vmem>>, %arg7: memref<1x128xf32, #tpu.memory_space<vmem>>, %arg8: memref<1x128xf32, #tpu.memory_space<vmem>>, %arg9: memref<16x128xf32, #tpu.memory_space<vmem>>) attributes {dimension_semantics = [#tpu.dimension_semantics<parallel>, #tpu.dimension_semantics<parallel>, #tpu.dimension_semantics<arbitrary>], iteration_bounds = array<i64: 1, 1, 1>, scalar_prefetch = 0 : i64, scratch_operands = 0 : i64, tpu.core_type = #tpu.core_type<tc>, window_params = [{transform_indices = @transform_0, window_bounds = array<i64: 16, 256>}, {transform_indices = @transform_1, window_bounds = array<i64: 256, 128>}, {transform_indices = @transform_2, window_bounds = array<i64: 1, 256>}, {transform_indices = @transform_3, window_bounds = array<i64: 1, 256>}, {transform_indices = @transform_4, window_bounds = array<i64: 1, 128>}, {transform_indices = @transform_5, window_bounds = array<i64: 1, 128>}, {transform_indices = @transform_6, window_bounds = array<i64: 16, 128>}]} {
    %c0_i32 = arith.constant 0 : i32
    %0 = arith.cmpi eq, %arg2, %c0_i32 : i32
    %1 = arith.extui %0 : i1 to i32
    %c0_i32_0 = arith.constant 0 : i32
    %2 = arith.cmpi ne, %1, %c0_i32_0 : i32
    scf.if %2 {
      %cst_15 = arith.constant 0.000000e+00 : f32
      %21 = vector.broadcast %cst_15 : f32 to vector<16x128xf32>
      %c0_16 = arith.constant 0 : index
      %c0_17 = arith.constant 0 : index
      %22 = vector.load %arg9[%c0_16, %c0_17] : memref<16x128xf32, #tpu.memory_space<vmem>>, vector<16x128xf32>
      tpu.vector_store %arg9[%c0_16, %c0_17], %21 {strides = array<i32>} : memref<16x128xf32, #tpu.memory_space<vmem>>, vector<16x128xf32>,
    } else {
    }
    %c0 = arith.constant 0 : index
    %c0_1 = arith.constant 0 : index
    %3 = vector.load %arg3[%c0, %c0_1] : memref<16x256xf32, #tpu.memory_space<vmem>>, vector<16x256xf32>
    %c0_2 = arith.constant 0 : index
    %c0_3 = arith.constant 0 : index
    %4 = vector.load %arg5[%c0_2, %c0_3] : memref<1x256xf32, #tpu.memory_space<vmem>>, vector<1x256xf32>
    %5 = vector.broadcast %4 : vector<1x256xf32> to vector<16x256xf32>
    %6 = arith.mulf %3, %5 : vector<16x256xf32>
    %c0_4 = arith.constant 0 : index
    %c0_5 = arith.constant 0 : index
    %7 = vector.load %arg6[%c0_4, %c0_5] : memref<1x256xf32, #tpu.memory_space<vmem>>, vector<1x256xf32>
    %8 = vector.broadcast %7 : vector<1x256xf32> to vector<16x256xf32>
    %9 = arith.addf %6, %8 : vector<16x256xf32>
    %cst = arith.constant 0.000000e+00 : f32
    %10 = vector.broadcast %cst : f32 to vector<16x256xf32>
    %11 = arith.maximumf %9, %10 : vector<16x256xf32>
    %c0_6 = arith.constant 0 : index
    %c0_7 = arith.constant 0 : index
    %12 = vector.load %arg9[%c0_6, %c0_7] : memref<16x128xf32, #tpu.memory_space<vmem>>, vector<16x128xf32>
    %13 = arith.truncf %11 : vector<16x256xf32> to vector<16x256xbf16>
    %c0_8 = arith.constant 0 : index
    %c0_9 = arith.constant 0 : index
    %14 = vector.load %arg4[%c0_8, %c0_9] : memref<256x128xbf16, #tpu.memory_space<vmem>>, vector<256x128xbf16>
    %cst_10 = arith.constant dense<0.000000e+00> : vector<16x128xf32>
    %15 = tpu.matmul %13, %14, %cst_10 {dimension_numbers = #tpu.dot_dimension_numbers<[1], [0], [0], [1], [0, 0, 1, 1], [], []>} : vector<16x256xbf16>, vector<256x128xbf16>, vector<16x128xf32> -> vector<16x128xf32>
    %16 = arith.addf %12, %15 : vector<16x128xf32>
    %c0_11 = arith.constant 0 : index
    %c0_12 = arith.constant 0 : index
    %17 = vector.load %arg9[%c0_11, %c0_12] : memref<16x128xf32, #tpu.memory_space<vmem>>, vector<16x128xf32>
    tpu.vector_store %arg9[%c0_11, %c0_12], %16 {strides = array<i32>} : memref<16x128xf32, #tpu.memory_space<vmem>>, vector<16x128xf32>,
    %c0_i32_13 = arith.constant 0 : i32
    %18 = arith.cmpi eq, %arg2, %c0_i32_13 : i32
    %19 = arith.extui %18 : i1 to i32
    %c0_i32_14 = arith.constant 0 : i32
    %20 = arith.cmpi ne, %19, %c0_i32_14 : i32
    scf.if %20 {
      %c0_15 = arith.constant 0 : index
      %c0_16 = arith.constant 0 : index
      %21 = vector.load %arg9[%c0_15, %c0_16] : memref<16x128xf32, #tpu.memory_space<vmem>>, vector<16x128xf32>
      %c0_17 = arith.constant 0 : index
      %c0_18 = arith.constant 0 : index
      %22 = vector.load %arg7[%c0_17, %c0_18] : memref<1x128xf32, #tpu.memory_space<vmem>>, vector<1x128xf32>
      %23 = vector.broadcast %22 : vector<1x128xf32> to vector<16x128xf32>
      %24 = arith.mulf %21, %23 : vector<16x128xf32>
      %c0_19 = arith.constant 0 : index
      %c0_20 = arith.constant 0 : index
      %25 = vector.load %arg8[%c0_19, %c0_20] : memref<1x128xf32, #tpu.memory_space<vmem>>, vector<1x128xf32>
      %26 = vector.broadcast %25 : vector<1x128xf32> to vector<16x128xf32>
      %27 = arith.addf %24, %26 : vector<16x128xf32>
      %cst_21 = arith.constant 0.000000e+00 : f32
      %28 = vector.broadcast %cst_21 : f32 to vector<16x128xf32>
      %29 = arith.maximumf %27, %28 : vector<16x128xf32>
      %c0_22 = arith.constant 0 : index
      %c0_23 = arith.constant 0 : index
      %30 = vector.load %arg9[%c0_22, %c0_23] : memref<16x128xf32, #tpu.memory_space<vmem>>, vector<16x128xf32>
      tpu.vector_store %arg9[%c0_22, %c0_23], %29 {strides = array<i32>} : memref<16x128xf32, #tpu.memory_space<vmem>>, vector<16x128xf32>,
    } else {
    }
    return
  }
  func.func @transform_0(%arg0: i32, %arg1: i32, %arg2: i32) -> (i32, i32) {
    %c0_i32 = arith.constant 0 : i32
    return %arg0, %arg2 : i32, i32
  }
  func.func @transform_1(%arg0: i32, %arg1: i32, %arg2: i32) -> (i32, i32) {
    %c0_i32 = arith.constant 0 : i32
    return %arg2, %arg1 : i32, i32
  }
  func.func @transform_2(%arg0: i32, %arg1: i32, %arg2: i32) -> (i32, i32) {
    %c0_i32 = arith.constant 0 : i32
    %c0_i32_0 = arith.constant 0 : i32
    return %c0_i32, %arg2 : i32, i32
  }
  func.func @transform_3(%arg0: i32, %arg1: i32, %arg2: i32) -> (i32, i32) {
    %c0_i32 = arith.constant 0 : i32
    %c0_i32_0 = arith.constant 0 : i32
    return %c0_i32, %arg2 : i32, i32
  }
  func.func @transform_4(%arg0: i32, %arg1: i32, %arg2: i32) -> (i32, i32) {
    %c0_i32 = arith.constant 0 : i32
    %c0_i32_0 = arith.constant 0 : i32
    return %c0_i32, %arg1 : i32, i32
  }
  func.func @transform_5(%arg0: i32, %arg1: i32, %arg2: i32) -> (i32, i32) {
    %c0_i32 = arith.constant 0 : i32
    %c0_i32_0 = arith.constant 0 : i32
    return %c0_i32, %arg1 : i32, i32
  }
  func.func @transform_6(%arg0: i32, %arg1: i32, %arg2: i32) -> (i32, i32) {
    %c0_i32 = arith.constant 0 : i32
    return %arg0, %arg1 : i32, i32
  }
}

module attributes {stable_mosaic.version = 11 : i64} {
  func.func @_fused_matmul_kernel(%arg0: i32, %arg1: i32, %arg2: i32, %arg3: memref<16x128xbf16, #tpu.memory_space<vmem>>, %arg4: memref<128x128xbf16, #tpu.memory_space<vmem>>, %arg5: memref<1x128xf32, #tpu.memory_space<vmem>>, %arg6: memref<1x128xf32, #tpu.memory_space<vmem>>, %arg7: memref<1x128xf32, #tpu.memory_space<vmem>>, %arg8: memref<1x128xf32, #tpu.memory_space<vmem>>, %arg9: memref<16x128xf32, #tpu.memory_space<vmem>>) attributes {dimension_semantics = [#tpu.dimension_semantics<parallel>, #tpu.dimension_semantics<parallel>, #tpu.dimension_semantics<arbitrary>], iteration_bounds = array<i64: 1, 1, 9>, scalar_prefetch = 0 : i64, scratch_operands = 0 : i64, tpu.core_type = #tpu.core_type<tc>, window_params = [{transform_indices = @transform_0, window_bounds = array<i64: 16, 128>}, {transform_indices = @transform_1, window_bounds = array<i64: 128, 128>}, {transform_indices = @transform_2, window_bounds = array<i64: 1, 128>}, {transform_indices = @transform_3, window_bounds = array<i64: 1, 128>}, {transform_indices = @transform_4, window_bounds = array<i64: 1, 128>}, {transform_indices = @transform_5, window_bounds = array<i64: 1, 128>}, {transform_indices = @transform_6, window_bounds = array<i64: 16, 128>}]} {
    %c0_i32 = arith.constant 0 : i32
    %0 = arith.cmpi eq, %arg2, %c0_i32 : i32
    %1 = arith.extui %0 : i1 to i32
    %c0_i32_0 = arith.constant 0 : i32
    %2 = arith.cmpi ne, %1, %c0_i32_0 : i32
    scf.if %2 {
      %cst_9 = arith.constant 0.000000e+00 : f32
      %12 = vector.broadcast %cst_9 : f32 to vector<16x128xf32>
      %c0_10 = arith.constant 0 : index
      %c0_11 = arith.constant 0 : index
      %13 = vector.load %arg9[%c0_10, %c0_11] : memref<16x128xf32, #tpu.memory_space<vmem>>, vector<16x128xf32>
      tpu.vector_store %arg9[%c0_10, %c0_11], %12 {strides = array<i32>} : memref<16x128xf32, #tpu.memory_space<vmem>>, vector<16x128xf32>,
    } else {
    }
    %c0 = arith.constant 0 : index
    %c0_1 = arith.constant 0 : index
    %3 = vector.load %arg3[%c0, %c0_1] : memref<16x128xbf16, #tpu.memory_space<vmem>>, vector<16x128xbf16>
    %c0_2 = arith.constant 0 : index
    %c0_3 = arith.constant 0 : index
    %4 = vector.load %arg9[%c0_2, %c0_3] : memref<16x128xf32, #tpu.memory_space<vmem>>, vector<16x128xf32>
    %c0_4 = arith.constant 0 : index
    %c0_5 = arith.constant 0 : index
    %5 = vector.load %arg4[%c0_4, %c0_5] : memref<128x128xbf16, #tpu.memory_space<vmem>>, vector<128x128xbf16>
    %cst = arith.constant dense<0.000000e+00> : vector<16x128xf32>
    %6 = tpu.matmul %3, %5, %cst {dimension_numbers = #tpu.dot_dimension_numbers<[1], [0], [0], [1], [0, 0, 1, 1], [], []>} : vector<16x128xbf16>, vector<128x128xbf16>, vector<16x128xf32> -> vector<16x128xf32>
    %7 = arith.addf %4, %6 : vector<16x128xf32>
    %c0_6 = arith.constant 0 : index
    %c0_7 = arith.constant 0 : index
    %8 = vector.load %arg9[%c0_6, %c0_7] : memref<16x128xf32, #tpu.memory_space<vmem>>, vector<16x128xf32>
    tpu.vector_store %arg9[%c0_6, %c0_7], %7 {strides = array<i32>} : memref<16x128xf32, #tpu.memory_space<vmem>>, vector<16x128xf32>,
    %c8_i32 = arith.constant 8 : i32
    %9 = arith.cmpi eq, %arg2, %c8_i32 : i32
    %10 = arith.extui %9 : i1 to i32
    %c0_i32_8 = arith.constant 0 : i32
    %11 = arith.cmpi ne, %10, %c0_i32_8 : i32
    scf.if %11 {
      %c0_9 = arith.constant 0 : index
      %c0_10 = arith.constant 0 : index
      %12 = vector.load %arg9[%c0_9, %c0_10] : memref<16x128xf32, #tpu.memory_space<vmem>>, vector<16x128xf32>
      %c0_11 = arith.constant 0 : index
      %c0_12 = arith.constant 0 : index
      %13 = vector.load %arg7[%c0_11, %c0_12] : memref<1x128xf32, #tpu.memory_space<vmem>>, vector<1x128xf32>
      %14 = vector.broadcast %13 : vector<1x128xf32> to vector<16x128xf32>
      %15 = arith.mulf %12, %14 : vector<16x128xf32>
      %c0_13 = arith.constant 0 : index
      %c0_14 = arith.constant 0 : index
      %16 = vector.load %arg8[%c0_13, %c0_14] : memref<1x128xf32, #tpu.memory_space<vmem>>, vector<1x128xf32>
      %17 = vector.broadcast %16 : vector<1x128xf32> to vector<16x128xf32>
      %18 = arith.addf %15, %17 : vector<16x128xf32>
      %c0_15 = arith.constant 0 : index
      %c0_16 = arith.constant 0 : index
      %19 = vector.load %arg9[%c0_15, %c0_16] : memref<16x128xf32, #tpu.memory_space<vmem>>, vector<16x128xf32>
      tpu.vector_store %arg9[%c0_15, %c0_16], %18 {strides = array<i32>} : memref<16x128xf32, #tpu.memory_space<vmem>>, vector<16x128xf32>,
    } else {
    }
    return
  }
  func.func @transform_0(%arg0: i32, %arg1: i32, %arg2: i32) -> (i32, i32) {
    %c0_i32 = arith.constant 0 : i32
    return %arg0, %arg2 : i32, i32
  }
  func.func @transform_1(%arg0: i32, %arg1: i32, %arg2: i32) -> (i32, i32) {
    %c0_i32 = arith.constant 0 : i32
    return %arg2, %arg1 : i32, i32
  }
  func.func @transform_2(%arg0: i32, %arg1: i32, %arg2: i32) -> (i32, i32) {
    %c0_i32 = arith.constant 0 : i32
    %c0_i32_0 = arith.constant 0 : i32
    return %c0_i32, %arg2 : i32, i32
  }
  func.func @transform_3(%arg0: i32, %arg1: i32, %arg2: i32) -> (i32, i32) {
    %c0_i32 = arith.constant 0 : i32
    %c0_i32_0 = arith.constant 0 : i32
    return %c0_i32, %arg2 : i32, i32
  }
  func.func @transform_4(%arg0: i32, %arg1: i32, %arg2: i32) -> (i32, i32) {
    %c0_i32 = arith.constant 0 : i32
    %c0_i32_0 = arith.constant 0 : i32
    return %c0_i32, %arg1 : i32, i32
  }
  func.func @transform_5(%arg0: i32, %arg1: i32, %arg2: i32) -> (i32, i32) {
    %c0_i32 = arith.constant 0 : i32
    %c0_i32_0 = arith.constant 0 : i32
    return %c0_i32, %arg1 : i32, i32
  }
  func.func @transform_6(%arg0: i32, %arg1: i32, %arg2: i32) -> (i32, i32) {
    %c0_i32 = arith.constant 0 : i32
    return %arg0, %arg1 : i32, i32
  }
}

module attributes {stable_mosaic.version = 11 : i64} {
  func.func @_fused_matmul_kernel(%arg0: i32, %arg1: i32, %arg2: i32, %arg3: memref<16x128xf32, #tpu.memory_space<vmem>>, %arg4: memref<128x128xbf16, #tpu.memory_space<vmem>>, %arg5: memref<1x128xf32, #tpu.memory_space<vmem>>, %arg6: memref<1x128xf32, #tpu.memory_space<vmem>>, %arg7: memref<1x128xf32, #tpu.memory_space<vmem>>, %arg8: memref<1x128xf32, #tpu.memory_space<vmem>>, %arg9: memref<16x128xf32, #tpu.memory_space<vmem>>) attributes {dimension_semantics = [#tpu.dimension_semantics<parallel>, #tpu.dimension_semantics<parallel>, #tpu.dimension_semantics<arbitrary>], iteration_bounds = array<i64: 1, 1, 3>, scalar_prefetch = 0 : i64, scratch_operands = 0 : i64, tpu.core_type = #tpu.core_type<tc>, window_params = [{transform_indices = @transform_0, window_bounds = array<i64: 16, 128>}, {transform_indices = @transform_1, window_bounds = array<i64: 128, 128>}, {transform_indices = @transform_2, window_bounds = array<i64: 1, 128>}, {transform_indices = @transform_3, window_bounds = array<i64: 1, 128>}, {transform_indices = @transform_4, window_bounds = array<i64: 1, 128>}, {transform_indices = @transform_5, window_bounds = array<i64: 1, 128>}, {transform_indices = @transform_6, window_bounds = array<i64: 16, 128>}]} {
    %c0_i32 = arith.constant 0 : i32
    %0 = arith.cmpi eq, %arg2, %c0_i32 : i32
    %1 = arith.extui %0 : i1 to i32
    %c0_i32_0 = arith.constant 0 : i32
    %2 = arith.cmpi ne, %1, %c0_i32_0 : i32
    scf.if %2 {
      %cst_14 = arith.constant 0.000000e+00 : f32
      %21 = vector.broadcast %cst_14 : f32 to vector<16x128xf32>
      %c0_15 = arith.constant 0 : index
      %c0_16 = arith.constant 0 : index
      %22 = vector.load %arg9[%c0_15, %c0_16] : memref<16x128xf32, #tpu.memory_space<vmem>>, vector<16x128xf32>
      tpu.vector_store %arg9[%c0_15, %c0_16], %21 {strides = array<i32>} : memref<16x128xf32, #tpu.memory_space<vmem>>, vector<16x128xf32>,
    } else {
    }
    %c0 = arith.constant 0 : index
    %c0_1 = arith.constant 0 : index
    %3 = vector.load %arg3[%c0, %c0_1] : memref<16x128xf32, #tpu.memory_space<vmem>>, vector<16x128xf32>
    %c0_2 = arith.constant 0 : index
    %c0_3 = arith.constant 0 : index
    %4 = vector.load %arg5[%c0_2, %c0_3] : memref<1x128xf32, #tpu.memory_space<vmem>>, vector<1x128xf32>
    %5 = vector.broadcast %4 : vector<1x128xf32> to vector<16x128xf32>
    %6 = arith.mulf %3, %5 : vector<16x128xf32>
    %c0_4 = arith.constant 0 : index
    %c0_5 = arith.constant 0 : index
    %7 = vector.load %arg6[%c0_4, %c0_5] : memref<1x128xf32, #tpu.memory_space<vmem>>, vector<1x128xf32>
    %8 = vector.broadcast %7 : vector<1x128xf32> to vector<16x128xf32>
    %9 = arith.addf %6, %8 : vector<16x128xf32>
    %cst = arith.constant 0.000000e+00 : f32
    %10 = vector.broadcast %cst : f32 to vector<16x128xf32>
    %11 = arith.maximumf %9, %10 : vector<16x128xf32>
    %c0_6 = arith.constant 0 : index
    %c0_7 = arith.constant 0 : index
    %12 = vector.load %arg9[%c0_6, %c0_7] : memref<16x128xf32, #tpu.memory_space<vmem>>, vector<16x128xf32>
    %13 = arith.truncf %11 : vector<16x128xf32> to vector<16x128xbf16>
    %c0_8 = arith.constant 0 : index
    %c0_9 = arith.constant 0 : index
    %14 = vector.load %arg4[%c0_8, %c0_9] : memref<128x128xbf16, #tpu.memory_space<vmem>>, vector<128x128xbf16>
    %cst_10 = arith.constant dense<0.000000e+00> : vector<16x128xf32>
    %15 = tpu.matmul %13, %14, %cst_10 {dimension_numbers = #tpu.dot_dimension_numbers<[1], [0], [0], [1], [0, 0, 1, 1], [], []>} : vector<16x128xbf16>, vector<128x128xbf16>, vector<16x128xf32> -> vector<16x128xf32>
    %16 = arith.addf %12, %15 : vector<16x128xf32>
    %c0_11 = arith.constant 0 : index
    %c0_12 = arith.constant 0 : index
    %17 = vector.load %arg9[%c0_11, %c0_12] : memref<16x128xf32, #tpu.memory_space<vmem>>, vector<16x128xf32>
    tpu.vector_store %arg9[%c0_11, %c0_12], %16 {strides = array<i32>} : memref<16x128xf32, #tpu.memory_space<vmem>>, vector<16x128xf32>,
    %c2_i32 = arith.constant 2 : i32
    %18 = arith.cmpi eq, %arg2, %c2_i32 : i32
    %19 = arith.extui %18 : i1 to i32
    %c0_i32_13 = arith.constant 0 : i32
    %20 = arith.cmpi ne, %19, %c0_i32_13 : i32
    scf.if %20 {
      %c0_14 = arith.constant 0 : index
      %c0_15 = arith.constant 0 : index
      %21 = vector.load %arg9[%c0_14, %c0_15] : memref<16x128xf32, #tpu.memory_space<vmem>>, vector<16x128xf32>
      %c0_16 = arith.constant 0 : index
      %c0_17 = arith.constant 0 : index
      %22 = vector.load %arg7[%c0_16, %c0_17] : memref<1x128xf32, #tpu.memory_space<vmem>>, vector<1x128xf32>
      %23 = vector.broadcast %22 : vector<1x128xf32> to vector<16x128xf32>
      %24 = arith.mulf %21, %23 : vector<16x128xf32>
      %c0_18 = arith.constant 0 : index
      %c0_19 = arith.constant 0 : index
      %25 = vector.load %arg8[%c0_18, %c0_19] : memref<1x128xf32, #tpu.memory_space<vmem>>, vector<1x128xf32>
      %26 = vector.broadcast %25 : vector<1x128xf32> to vector<16x128xf32>
      %27 = arith.addf %24, %26 : vector<16x128xf32>
      %cst_20 = arith.constant 0.000000e+00 : f32
      %28 = vector.broadcast %cst_20 : f32 to vector<16x128xf32>
      %29 = arith.maximumf %27, %28 : vector<16x128xf32>
      %c0_21 = arith.constant 0 : index
      %c0_22 = arith.constant 0 : index
      %30 = vector.load %arg9[%c0_21, %c0_22] : memref<16x128xf32, #tpu.memory_space<vmem>>, vector<16x128xf32>
      tpu.vector_store %arg9[%c0_21, %c0_22], %29 {strides = array<i32>} : memref<16x128xf32, #tpu.memory_space<vmem>>, vector<16x128xf32>,
    } else {
    }
    return
  }
  func.func @transform_0(%arg0: i32, %arg1: i32, %arg2: i32) -> (i32, i32) {
    %c0_i32 = arith.constant 0 : i32
    return %arg0, %arg2 : i32, i32
  }
  func.func @transform_1(%arg0: i32, %arg1: i32, %arg2: i32) -> (i32, i32) {
    %c0_i32 = arith.constant 0 : i32
    return %arg2, %arg1 : i32, i32
  }
  func.func @transform_2(%arg0: i32, %arg1: i32, %arg2: i32) -> (i32, i32) {
    %c0_i32 = arith.constant 0 : i32
    %c0_i32_0 = arith.constant 0 : i32
    return %c0_i32, %arg2 : i32, i32
  }
  func.func @transform_3(%arg0: i32, %arg1: i32, %arg2: i32) -> (i32, i32) {
    %c0_i32 = arith.constant 0 : i32
    %c0_i32_0 = arith.constant 0 : i32
    return %c0_i32, %arg2 : i32, i32
  }
  func.func @transform_4(%arg0: i32, %arg1: i32, %arg2: i32) -> (i32, i32) {
    %c0_i32 = arith.constant 0 : i32
    %c0_i32_0 = arith.constant 0 : i32
    return %c0_i32, %arg1 : i32, i32
  }
  func.func @transform_5(%arg0: i32, %arg1: i32, %arg2: i32) -> (i32, i32) {
    %c0_i32 = arith.constant 0 : i32
    %c0_i32_0 = arith.constant 0 : i32
    return %c0_i32, %arg1 : i32, i32
  }
  func.func @transform_6(%arg0: i32, %arg1: i32, %arg2: i32) -> (i32, i32) {
    %c0_i32 = arith.constant 0 : i32
    return %arg0, %arg1 : i32, i32
  }
}

module attributes {stable_mosaic.version = 11 : i64} {
  func.func @_fused_matmul_kernel(%arg0: i32, %arg1: i32, %arg2: i32, %arg3: memref<16x256xf32, #tpu.memory_space<vmem>>, %arg4: memref<256x128xbf16, #tpu.memory_space<vmem>>, %arg5: memref<1x256xf32, #tpu.memory_space<vmem>>, %arg6: memref<1x256xf32, #tpu.memory_space<vmem>>, %arg7: memref<1x128xf32, #tpu.memory_space<vmem>>, %arg8: memref<1x128xf32, #tpu.memory_space<vmem>>, %arg9: memref<16x128xf32, #tpu.memory_space<vmem>>) attributes {dimension_semantics = [#tpu.dimension_semantics<parallel>, #tpu.dimension_semantics<parallel>, #tpu.dimension_semantics<arbitrary>], iteration_bounds = array<i64: 1, 1, 2>, scalar_prefetch = 0 : i64, scratch_operands = 0 : i64, tpu.core_type = #tpu.core_type<tc>, window_params = [{transform_indices = @transform_0, window_bounds = array<i64: 16, 256>}, {transform_indices = @transform_1, window_bounds = array<i64: 256, 128>}, {transform_indices = @transform_2, window_bounds = array<i64: 1, 256>}, {transform_indices = @transform_3, window_bounds = array<i64: 1, 256>}, {transform_indices = @transform_4, window_bounds = array<i64: 1, 128>}, {transform_indices = @transform_5, window_bounds = array<i64: 1, 128>}, {transform_indices = @transform_6, window_bounds = array<i64: 16, 128>}]} {
    %c0_i32 = arith.constant 0 : i32
    %0 = arith.cmpi eq, %arg2, %c0_i32 : i32
    %1 = arith.extui %0 : i1 to i32
    %c0_i32_0 = arith.constant 0 : i32
    %2 = arith.cmpi ne, %1, %c0_i32_0 : i32
    scf.if %2 {
      %cst_14 = arith.constant 0.000000e+00 : f32
      %21 = vector.broadcast %cst_14 : f32 to vector<16x128xf32>
      %c0_15 = arith.constant 0 : index
      %c0_16 = arith.constant 0 : index
      %22 = vector.load %arg9[%c0_15, %c0_16] : memref<16x128xf32, #tpu.memory_space<vmem>>, vector<16x128xf32>
      tpu.vector_store %arg9[%c0_15, %c0_16], %21 {strides = array<i32>} : memref<16x128xf32, #tpu.memory_space<vmem>>, vector<16x128xf32>,
    } else {
    }
    %c0 = arith.constant 0 : index
    %c0_1 = arith.constant 0 : index
    %3 = vector.load %arg3[%c0, %c0_1] : memref<16x256xf32, #tpu.memory_space<vmem>>, vector<16x256xf32>
    %c0_2 = arith.constant 0 : index
    %c0_3 = arith.constant 0 : index
    %4 = vector.load %arg5[%c0_2, %c0_3] : memref<1x256xf32, #tpu.memory_space<vmem>>, vector<1x256xf32>
    %5 = vector.broadcast %4 : vector<1x256xf32> to vector<16x256xf32>
    %6 = arith.mulf %3, %5 : vector<16x256xf32>
    %c0_4 = arith.constant 0 : index
    %c0_5 = arith.constant 0 : index
    %7 = vector.load %arg6[%c0_4, %c0_5] : memref<1x256xf32, #tpu.memory_space<vmem>>, vector<1x256xf32>
    %8 = vector.broadcast %7 : vector<1x256xf32> to vector<16x256xf32>
    %9 = arith.addf %6, %8 : vector<16x256xf32>
    %cst = arith.constant 0.000000e+00 : f32
    %10 = vector.broadcast %cst : f32 to vector<16x256xf32>
    %11 = arith.maximumf %9, %10 : vector<16x256xf32>
    %c0_6 = arith.constant 0 : index
    %c0_7 = arith.constant 0 : index
    %12 = vector.load %arg9[%c0_6, %c0_7] : memref<16x128xf32, #tpu.memory_space<vmem>>, vector<16x128xf32>
    %13 = arith.truncf %11 : vector<16x256xf32> to vector<16x256xbf16>
    %c0_8 = arith.constant 0 : index
    %c0_9 = arith.constant 0 : index
    %14 = vector.load %arg4[%c0_8, %c0_9] : memref<256x128xbf16, #tpu.memory_space<vmem>>, vector<256x128xbf16>
    %cst_10 = arith.constant dense<0.000000e+00> : vector<16x128xf32>
    %15 = tpu.matmul %13, %14, %cst_10 {dimension_numbers = #tpu.dot_dimension_numbers<[1], [0], [0], [1], [0, 0, 1, 1], [], []>} : vector<16x256xbf16>, vector<256x128xbf16>, vector<16x128xf32> -> vector<16x128xf32>
    %16 = arith.addf %12, %15 : vector<16x128xf32>
    %c0_11 = arith.constant 0 : index
    %c0_12 = arith.constant 0 : index
    %17 = vector.load %arg9[%c0_11, %c0_12] : memref<16x128xf32, #tpu.memory_space<vmem>>, vector<16x128xf32>
    tpu.vector_store %arg9[%c0_11, %c0_12], %16 {strides = array<i32>} : memref<16x128xf32, #tpu.memory_space<vmem>>, vector<16x128xf32>,
    %c1_i32 = arith.constant 1 : i32
    %18 = arith.cmpi eq, %arg2, %c1_i32 : i32
    %19 = arith.extui %18 : i1 to i32
    %c0_i32_13 = arith.constant 0 : i32
    %20 = arith.cmpi ne, %19, %c0_i32_13 : i32
    scf.if %20 {
      %c0_14 = arith.constant 0 : index
      %c0_15 = arith.constant 0 : index
      %21 = vector.load %arg9[%c0_14, %c0_15] : memref<16x128xf32, #tpu.memory_space<vmem>>, vector<16x128xf32>
      %c0_16 = arith.constant 0 : index
      %c0_17 = arith.constant 0 : index
      %22 = vector.load %arg7[%c0_16, %c0_17] : memref<1x128xf32, #tpu.memory_space<vmem>>, vector<1x128xf32>
      %23 = vector.broadcast %22 : vector<1x128xf32> to vector<16x128xf32>
      %24 = arith.mulf %21, %23 : vector<16x128xf32>
      %c0_18 = arith.constant 0 : index
      %c0_19 = arith.constant 0 : index
      %25 = vector.load %arg8[%c0_18, %c0_19] : memref<1x128xf32, #tpu.memory_space<vmem>>, vector<1x128xf32>
      %26 = vector.broadcast %25 : vector<1x128xf32> to vector<16x128xf32>
      %27 = arith.addf %24, %26 : vector<16x128xf32>
      %cst_20 = arith.constant 0.000000e+00 : f32
      %28 = vector.broadcast %cst_20 : f32 to vector<16x128xf32>
      %29 = arith.maximumf %27, %28 : vector<16x128xf32>
      %c0_21 = arith.constant 0 : index
      %c0_22 = arith.constant 0 : index
      %30 = vector.load %arg9[%c0_21, %c0_22] : memref<16x128xf32, #tpu.memory_space<vmem>>, vector<16x128xf32>
      tpu.vector_store %arg9[%c0_21, %c0_22], %29 {strides = array<i32>} : memref<16x128xf32, #tpu.memory_space<vmem>>, vector<16x128xf32>,
    } else {
    }
    return
  }
  func.func @transform_0(%arg0: i32, %arg1: i32, %arg2: i32) -> (i32, i32) {
    %c0_i32 = arith.constant 0 : i32
    return %arg0, %arg2 : i32, i32
  }
  func.func @transform_1(%arg0: i32, %arg1: i32, %arg2: i32) -> (i32, i32) {
    %c0_i32 = arith.constant 0 : i32
    return %arg2, %arg1 : i32, i32
  }
  func.func @transform_2(%arg0: i32, %arg1: i32, %arg2: i32) -> (i32, i32) {
    %c0_i32 = arith.constant 0 : i32
    %c0_i32_0 = arith.constant 0 : i32
    return %c0_i32, %arg2 : i32, i32
  }
  func.func @transform_3(%arg0: i32, %arg1: i32, %arg2: i32) -> (i32, i32) {
    %c0_i32 = arith.constant 0 : i32
    %c0_i32_0 = arith.constant 0 : i32
    return %c0_i32, %arg2 : i32, i32
  }
  func.func @transform_4(%arg0: i32, %arg1: i32, %arg2: i32) -> (i32, i32) {
    %c0_i32 = arith.constant 0 : i32
    %c0_i32_0 = arith.constant 0 : i32
    return %c0_i32, %arg1 : i32, i32
  }
  func.func @transform_5(%arg0: i32, %arg1: i32, %arg2: i32) -> (i32, i32) {
    %c0_i32 = arith.constant 0 : i32
    %c0_i32_0 = arith.constant 0 : i32
    return %c0_i32, %arg1 : i32, i32
  }
  func.func @transform_6(%arg0: i32, %arg1: i32, %arg2: i32) -> (i32, i32) {
    %c0_i32 = arith.constant 0 : i32
    return %arg0, %arg1 : i32, i32
  }
}

module attributes {stable_mosaic.version = 11 : i64} {
  func.func @_fused_matmul_kernel(%arg0: i32, %arg1: i32, %arg2: i32, %arg3: memref<16x128xf32, #tpu.memory_space<vmem>>, %arg4: memref<128x128xbf16, #tpu.memory_space<vmem>>, %arg5: memref<1x128xf32, #tpu.memory_space<vmem>>, %arg6: memref<1x128xf32, #tpu.memory_space<vmem>>, %arg7: memref<1x128xf32, #tpu.memory_space<vmem>>, %arg8: memref<1x128xf32, #tpu.memory_space<vmem>>, %arg9: memref<16x128xf32, #tpu.memory_space<vmem>>) attributes {dimension_semantics = [#tpu.dimension_semantics<parallel>, #tpu.dimension_semantics<parallel>, #tpu.dimension_semantics<arbitrary>], iteration_bounds = array<i64: 1, 1, 5>, scalar_prefetch = 0 : i64, scratch_operands = 0 : i64, tpu.core_type = #tpu.core_type<tc>, window_params = [{transform_indices = @transform_0, window_bounds = array<i64: 16, 128>}, {transform_indices = @transform_1, window_bounds = array<i64: 128, 128>}, {transform_indices = @transform_2, window_bounds = array<i64: 1, 128>}, {transform_indices = @transform_3, window_bounds = array<i64: 1, 128>}, {transform_indices = @transform_4, window_bounds = array<i64: 1, 128>}, {transform_indices = @transform_5, window_bounds = array<i64: 1, 128>}, {transform_indices = @transform_6, window_bounds = array<i64: 16, 128>}]} {
    %c0_i32 = arith.constant 0 : i32
    %0 = arith.cmpi eq, %arg2, %c0_i32 : i32
    %1 = arith.extui %0 : i1 to i32
    %c0_i32_0 = arith.constant 0 : i32
    %2 = arith.cmpi ne, %1, %c0_i32_0 : i32
    scf.if %2 {
      %cst_14 = arith.constant 0.000000e+00 : f32
      %21 = vector.broadcast %cst_14 : f32 to vector<16x128xf32>
      %c0_15 = arith.constant 0 : index
      %c0_16 = arith.constant 0 : index
      %22 = vector.load %arg9[%c0_15, %c0_16] : memref<16x128xf32, #tpu.memory_space<vmem>>, vector<16x128xf32>
      tpu.vector_store %arg9[%c0_15, %c0_16], %21 {strides = array<i32>} : memref<16x128xf32, #tpu.memory_space<vmem>>, vector<16x128xf32>,
    } else {
    }
    %c0 = arith.constant 0 : index
    %c0_1 = arith.constant 0 : index
    %3 = vector.load %arg3[%c0, %c0_1] : memref<16x128xf32, #tpu.memory_space<vmem>>, vector<16x128xf32>
    %c0_2 = arith.constant 0 : index
    %c0_3 = arith.constant 0 : index
    %4 = vector.load %arg5[%c0_2, %c0_3] : memref<1x128xf32, #tpu.memory_space<vmem>>, vector<1x128xf32>
    %5 = vector.broadcast %4 : vector<1x128xf32> to vector<16x128xf32>
    %6 = arith.mulf %3, %5 : vector<16x128xf32>
    %c0_4 = arith.constant 0 : index
    %c0_5 = arith.constant 0 : index
    %7 = vector.load %arg6[%c0_4, %c0_5] : memref<1x128xf32, #tpu.memory_space<vmem>>, vector<1x128xf32>
    %8 = vector.broadcast %7 : vector<1x128xf32> to vector<16x128xf32>
    %9 = arith.addf %6, %8 : vector<16x128xf32>
    %cst = arith.constant 0.000000e+00 : f32
    %10 = vector.broadcast %cst : f32 to vector<16x128xf32>
    %11 = arith.maximumf %9, %10 : vector<16x128xf32>
    %c0_6 = arith.constant 0 : index
    %c0_7 = arith.constant 0 : index
    %12 = vector.load %arg9[%c0_6, %c0_7] : memref<16x128xf32, #tpu.memory_space<vmem>>, vector<16x128xf32>
    %13 = arith.truncf %11 : vector<16x128xf32> to vector<16x128xbf16>
    %c0_8 = arith.constant 0 : index
    %c0_9 = arith.constant 0 : index
    %14 = vector.load %arg4[%c0_8, %c0_9] : memref<128x128xbf16, #tpu.memory_space<vmem>>, vector<128x128xbf16>
    %cst_10 = arith.constant dense<0.000000e+00> : vector<16x128xf32>
    %15 = tpu.matmul %13, %14, %cst_10 {dimension_numbers = #tpu.dot_dimension_numbers<[1], [0], [0], [1], [0, 0, 1, 1], [], []>} : vector<16x128xbf16>, vector<128x128xbf16>, vector<16x128xf32> -> vector<16x128xf32>
    %16 = arith.addf %12, %15 : vector<16x128xf32>
    %c0_11 = arith.constant 0 : index
    %c0_12 = arith.constant 0 : index
    %17 = vector.load %arg9[%c0_11, %c0_12] : memref<16x128xf32, #tpu.memory_space<vmem>>, vector<16x128xf32>
    tpu.vector_store %arg9[%c0_11, %c0_12], %16 {strides = array<i32>} : memref<16x128xf32, #tpu.memory_space<vmem>>, vector<16x128xf32>,
    %c4_i32 = arith.constant 4 : i32
    %18 = arith.cmpi eq, %arg2, %c4_i32 : i32
    %19 = arith.extui %18 : i1 to i32
    %c0_i32_13 = arith.constant 0 : i32
    %20 = arith.cmpi ne, %19, %c0_i32_13 : i32
    scf.if %20 {
      %c0_14 = arith.constant 0 : index
      %c0_15 = arith.constant 0 : index
      %21 = vector.load %arg9[%c0_14, %c0_15] : memref<16x128xf32, #tpu.memory_space<vmem>>, vector<16x128xf32>
      %c0_16 = arith.constant 0 : index
      %c0_17 = arith.constant 0 : index
      %22 = vector.load %arg7[%c0_16, %c0_17] : memref<1x128xf32, #tpu.memory_space<vmem>>, vector<1x128xf32>
      %23 = vector.broadcast %22 : vector<1x128xf32> to vector<16x128xf32>
      %24 = arith.mulf %21, %23 : vector<16x128xf32>
      %c0_18 = arith.constant 0 : index
      %c0_19 = arith.constant 0 : index
      %25 = vector.load %arg8[%c0_18, %c0_19] : memref<1x128xf32, #tpu.memory_space<vmem>>, vector<1x128xf32>
      %26 = vector.broadcast %25 : vector<1x128xf32> to vector<16x128xf32>
      %27 = arith.addf %24, %26 : vector<16x128xf32>
      %cst_20 = arith.constant 0.000000e+00 : f32
      %28 = vector.broadcast %cst_20 : f32 to vector<16x128xf32>
      %29 = arith.maximumf %27, %28 : vector<16x128xf32>
      %c0_21 = arith.constant 0 : index
      %c0_22 = arith.constant 0 : index
      %30 = vector.load %arg9[%c0_21, %c0_22] : memref<16x128xf32, #tpu.memory_space<vmem>>, vector<16x128xf32>
      tpu.vector_store %arg9[%c0_21, %c0_22], %29 {strides = array<i32>} : memref<16x128xf32, #tpu.memory_space<vmem>>, vector<16x128xf32>,
    } else {
    }
    return
  }
  func.func @transform_0(%arg0: i32, %arg1: i32, %arg2: i32) -> (i32, i32) {
    %c0_i32 = arith.constant 0 : i32
    return %arg0, %arg2 : i32, i32
  }
  func.func @transform_1(%arg0: i32, %arg1: i32, %arg2: i32) -> (i32, i32) {
    %c0_i32 = arith.constant 0 : i32
    return %arg2, %arg1 : i32, i32
  }
  func.func @transform_2(%arg0: i32, %arg1: i32, %arg2: i32) -> (i32, i32) {
    %c0_i32 = arith.constant 0 : i32
    %c0_i32_0 = arith.constant 0 : i32
    return %c0_i32, %arg2 : i32, i32
  }
  func.func @transform_3(%arg0: i32, %arg1: i32, %arg2: i32) -> (i32, i32) {
    %c0_i32 = arith.constant 0 : i32
    %c0_i32_0 = arith.constant 0 : i32
    return %c0_i32, %arg2 : i32, i32
  }
  func.func @transform_4(%arg0: i32, %arg1: i32, %arg2: i32) -> (i32, i32) {
    %c0_i32 = arith.constant 0 : i32
    %c0_i32_0 = arith.constant 0 : i32
    return %c0_i32, %arg1 : i32, i32
  }
  func.func @transform_5(%arg0: i32, %arg1: i32, %arg2: i32) -> (i32, i32) {
    %c0_i32 = arith.constant 0 : i32
    %c0_i32_0 = arith.constant 0 : i32
    return %c0_i32, %arg1 : i32, i32
  }
  func.func @transform_6(%arg0: i32, %arg1: i32, %arg2: i32) -> (i32, i32) {
    %c0_i32 = arith.constant 0 : i32
    return %arg0, %arg1 : i32, i32
  }
}

module attributes {stable_mosaic.version = 11 : i64} {
  func.func @_fused_matmul_kernel(%arg0: i32, %arg1: i32, %arg2: i32, %arg3: memref<16x256xf32, #tpu.memory_space<vmem>>, %arg4: memref<256x128xbf16, #tpu.memory_space<vmem>>, %arg5: memref<1x256xf32, #tpu.memory_space<vmem>>, %arg6: memref<1x256xf32, #tpu.memory_space<vmem>>, %arg7: memref<1x128xf32, #tpu.memory_space<vmem>>, %arg8: memref<1x128xf32, #tpu.memory_space<vmem>>, %arg9: memref<16x128xf32, #tpu.memory_space<vmem>>) attributes {dimension_semantics = [#tpu.dimension_semantics<parallel>, #tpu.dimension_semantics<parallel>, #tpu.dimension_semantics<arbitrary>], iteration_bounds = array<i64: 1, 1, 3>, scalar_prefetch = 0 : i64, scratch_operands = 0 : i64, tpu.core_type = #tpu.core_type<tc>, window_params = [{transform_indices = @transform_0, window_bounds = array<i64: 16, 256>}, {transform_indices = @transform_1, window_bounds = array<i64: 256, 128>}, {transform_indices = @transform_2, window_bounds = array<i64: 1, 256>}, {transform_indices = @transform_3, window_bounds = array<i64: 1, 256>}, {transform_indices = @transform_4, window_bounds = array<i64: 1, 128>}, {transform_indices = @transform_5, window_bounds = array<i64: 1, 128>}, {transform_indices = @transform_6, window_bounds = array<i64: 16, 128>}]} {
    %c0_i32 = arith.constant 0 : i32
    %0 = arith.cmpi eq, %arg2, %c0_i32 : i32
    %1 = arith.extui %0 : i1 to i32
    %c0_i32_0 = arith.constant 0 : i32
    %2 = arith.cmpi ne, %1, %c0_i32_0 : i32
    scf.if %2 {
      %cst_14 = arith.constant 0.000000e+00 : f32
      %21 = vector.broadcast %cst_14 : f32 to vector<16x128xf32>
      %c0_15 = arith.constant 0 : index
      %c0_16 = arith.constant 0 : index
      %22 = vector.load %arg9[%c0_15, %c0_16] : memref<16x128xf32, #tpu.memory_space<vmem>>, vector<16x128xf32>
      tpu.vector_store %arg9[%c0_15, %c0_16], %21 {strides = array<i32>} : memref<16x128xf32, #tpu.memory_space<vmem>>, vector<16x128xf32>,
    } else {
    }
    %c0 = arith.constant 0 : index
    %c0_1 = arith.constant 0 : index
    %3 = vector.load %arg3[%c0, %c0_1] : memref<16x256xf32, #tpu.memory_space<vmem>>, vector<16x256xf32>
    %c0_2 = arith.constant 0 : index
    %c0_3 = arith.constant 0 : index
    %4 = vector.load %arg5[%c0_2, %c0_3] : memref<1x256xf32, #tpu.memory_space<vmem>>, vector<1x256xf32>
    %5 = vector.broadcast %4 : vector<1x256xf32> to vector<16x256xf32>
    %6 = arith.mulf %3, %5 : vector<16x256xf32>
    %c0_4 = arith.constant 0 : index
    %c0_5 = arith.constant 0 : index
    %7 = vector.load %arg6[%c0_4, %c0_5] : memref<1x256xf32, #tpu.memory_space<vmem>>, vector<1x256xf32>
    %8 = vector.broadcast %7 : vector<1x256xf32> to vector<16x256xf32>
    %9 = arith.addf %6, %8 : vector<16x256xf32>
    %cst = arith.constant 0.000000e+00 : f32
    %10 = vector.broadcast %cst : f32 to vector<16x256xf32>
    %11 = arith.maximumf %9, %10 : vector<16x256xf32>
    %c0_6 = arith.constant 0 : index
    %c0_7 = arith.constant 0 : index
    %12 = vector.load %arg9[%c0_6, %c0_7] : memref<16x128xf32, #tpu.memory_space<vmem>>, vector<16x128xf32>
    %13 = arith.truncf %11 : vector<16x256xf32> to vector<16x256xbf16>
    %c0_8 = arith.constant 0 : index
    %c0_9 = arith.constant 0 : index
    %14 = vector.load %arg4[%c0_8, %c0_9] : memref<256x128xbf16, #tpu.memory_space<vmem>>, vector<256x128xbf16>
    %cst_10 = arith.constant dense<0.000000e+00> : vector<16x128xf32>
    %15 = tpu.matmul %13, %14, %cst_10 {dimension_numbers = #tpu.dot_dimension_numbers<[1], [0], [0], [1], [0, 0, 1, 1], [], []>} : vector<16x256xbf16>, vector<256x128xbf16>, vector<16x128xf32> -> vector<16x128xf32>
    %16 = arith.addf %12, %15 : vector<16x128xf32>
    %c0_11 = arith.constant 0 : index
    %c0_12 = arith.constant 0 : index
    %17 = vector.load %arg9[%c0_11, %c0_12] : memref<16x128xf32, #tpu.memory_space<vmem>>, vector<16x128xf32>
    tpu.vector_store %arg9[%c0_11, %c0_12], %16 {strides = array<i32>} : memref<16x128xf32, #tpu.memory_space<vmem>>, vector<16x128xf32>,
    %c2_i32 = arith.constant 2 : i32
    %18 = arith.cmpi eq, %arg2, %c2_i32 : i32
    %19 = arith.extui %18 : i1 to i32
    %c0_i32_13 = arith.constant 0 : i32
    %20 = arith.cmpi ne, %19, %c0_i32_13 : i32
    scf.if %20 {
      %c0_14 = arith.constant 0 : index
      %c0_15 = arith.constant 0 : index
      %21 = vector.load %arg9[%c0_14, %c0_15] : memref<16x128xf32, #tpu.memory_space<vmem>>, vector<16x128xf32>
      %c0_16 = arith.constant 0 : index
      %c0_17 = arith.constant 0 : index
      %22 = vector.load %arg7[%c0_16, %c0_17] : memref<1x128xf32, #tpu.memory_space<vmem>>, vector<1x128xf32>
      %23 = vector.broadcast %22 : vector<1x128xf32> to vector<16x128xf32>
      %24 = arith.mulf %21, %23 : vector<16x128xf32>
      %c0_18 = arith.constant 0 : index
      %c0_19 = arith.constant 0 : index
      %25 = vector.load %arg8[%c0_18, %c0_19] : memref<1x128xf32, #tpu.memory_space<vmem>>, vector<1x128xf32>
      %26 = vector.broadcast %25 : vector<1x128xf32> to vector<16x128xf32>
      %27 = arith.addf %24, %26 : vector<16x128xf32>
      %cst_20 = arith.constant 0.000000e+00 : f32
      %28 = vector.broadcast %cst_20 : f32 to vector<16x128xf32>
      %29 = arith.maximumf %27, %28 : vector<16x128xf32>
      %c0_21 = arith.constant 0 : index
      %c0_22 = arith.constant 0 : index
      %30 = vector.load %arg9[%c0_21, %c0_22] : memref<16x128xf32, #tpu.memory_space<vmem>>, vector<16x128xf32>
      tpu.vector_store %arg9[%c0_21, %c0_22], %29 {strides = array<i32>} : memref<16x128xf32, #tpu.memory_space<vmem>>, vector<16x128xf32>,
    } else {
    }
    return
  }
  func.func @transform_0(%arg0: i32, %arg1: i32, %arg2: i32) -> (i32, i32) {
    %c0_i32 = arith.constant 0 : i32
    return %arg0, %arg2 : i32, i32
  }
  func.func @transform_1(%arg0: i32, %arg1: i32, %arg2: i32) -> (i32, i32) {
    %c0_i32 = arith.constant 0 : i32
    return %arg2, %arg1 : i32, i32
  }
  func.func @transform_2(%arg0: i32, %arg1: i32, %arg2: i32) -> (i32, i32) {
    %c0_i32 = arith.constant 0 : i32
    %c0_i32_0 = arith.constant 0 : i32
    return %c0_i32, %arg2 : i32, i32
  }
  func.func @transform_3(%arg0: i32, %arg1: i32, %arg2: i32) -> (i32, i32) {
    %c0_i32 = arith.constant 0 : i32
    %c0_i32_0 = arith.constant 0 : i32
    return %c0_i32, %arg2 : i32, i32
  }
  func.func @transform_4(%arg0: i32, %arg1: i32, %arg2: i32) -> (i32, i32) {
    %c0_i32 = arith.constant 0 : i32
    %c0_i32_0 = arith.constant 0 : i32
    return %c0_i32, %arg1 : i32, i32
  }
  func.func @transform_5(%arg0: i32, %arg1: i32, %arg2: i32) -> (i32, i32) {
    %c0_i32 = arith.constant 0 : i32
    %c0_i32_0 = arith.constant 0 : i32
    return %c0_i32, %arg1 : i32, i32
  }
  func.func @transform_6(%arg0: i32, %arg1: i32, %arg2: i32) -> (i32, i32) {
    %c0_i32 = arith.constant 0 : i32
    return %arg0, %arg1 : i32, i32
  }
}

module attributes {stable_mosaic.version = 11 : i64} {
  func.func @_fused_matmul_kernel(%arg0: i32, %arg1: i32, %arg2: i32, %arg3: memref<16x128xf32, #tpu.memory_space<vmem>>, %arg4: memref<128x128xbf16, #tpu.memory_space<vmem>>, %arg5: memref<1x128xf32, #tpu.memory_space<vmem>>, %arg6: memref<1x128xf32, #tpu.memory_space<vmem>>, %arg7: memref<1x128xf32, #tpu.memory_space<vmem>>, %arg8: memref<1x128xf32, #tpu.memory_space<vmem>>, %arg9: memref<16x128xf32, #tpu.memory_space<vmem>>) attributes {dimension_semantics = [#tpu.dimension_semantics<parallel>, #tpu.dimension_semantics<parallel>, #tpu.dimension_semantics<arbitrary>], iteration_bounds = array<i64: 1, 1, 7>, scalar_prefetch = 0 : i64, scratch_operands = 0 : i64, tpu.core_type = #tpu.core_type<tc>, window_params = [{transform_indices = @transform_0, window_bounds = array<i64: 16, 128>}, {transform_indices = @transform_1, window_bounds = array<i64: 128, 128>}, {transform_indices = @transform_2, window_bounds = array<i64: 1, 128>}, {transform_indices = @transform_3, window_bounds = array<i64: 1, 128>}, {transform_indices = @transform_4, window_bounds = array<i64: 1, 128>}, {transform_indices = @transform_5, window_bounds = array<i64: 1, 128>}, {transform_indices = @transform_6, window_bounds = array<i64: 16, 128>}]} {
    %c0_i32 = arith.constant 0 : i32
    %0 = arith.cmpi eq, %arg2, %c0_i32 : i32
    %1 = arith.extui %0 : i1 to i32
    %c0_i32_0 = arith.constant 0 : i32
    %2 = arith.cmpi ne, %1, %c0_i32_0 : i32
    scf.if %2 {
      %cst_14 = arith.constant 0.000000e+00 : f32
      %21 = vector.broadcast %cst_14 : f32 to vector<16x128xf32>
      %c0_15 = arith.constant 0 : index
      %c0_16 = arith.constant 0 : index
      %22 = vector.load %arg9[%c0_15, %c0_16] : memref<16x128xf32, #tpu.memory_space<vmem>>, vector<16x128xf32>
      tpu.vector_store %arg9[%c0_15, %c0_16], %21 {strides = array<i32>} : memref<16x128xf32, #tpu.memory_space<vmem>>, vector<16x128xf32>,
    } else {
    }
    %c0 = arith.constant 0 : index
    %c0_1 = arith.constant 0 : index
    %3 = vector.load %arg3[%c0, %c0_1] : memref<16x128xf32, #tpu.memory_space<vmem>>, vector<16x128xf32>
    %c0_2 = arith.constant 0 : index
    %c0_3 = arith.constant 0 : index
    %4 = vector.load %arg5[%c0_2, %c0_3] : memref<1x128xf32, #tpu.memory_space<vmem>>, vector<1x128xf32>
    %5 = vector.broadcast %4 : vector<1x128xf32> to vector<16x128xf32>
    %6 = arith.mulf %3, %5 : vector<16x128xf32>
    %c0_4 = arith.constant 0 : index
    %c0_5 = arith.constant 0 : index
    %7 = vector.load %arg6[%c0_4, %c0_5] : memref<1x128xf32, #tpu.memory_space<vmem>>, vector<1x128xf32>
    %8 = vector.broadcast %7 : vector<1x128xf32> to vector<16x128xf32>
    %9 = arith.addf %6, %8 : vector<16x128xf32>
    %cst = arith.constant 0.000000e+00 : f32
    %10 = vector.broadcast %cst : f32 to vector<16x128xf32>
    %11 = arith.maximumf %9, %10 : vector<16x128xf32>
    %c0_6 = arith.constant 0 : index
    %c0_7 = arith.constant 0 : index
    %12 = vector.load %arg9[%c0_6, %c0_7] : memref<16x128xf32, #tpu.memory_space<vmem>>, vector<16x128xf32>
    %13 = arith.truncf %11 : vector<16x128xf32> to vector<16x128xbf16>
    %c0_8 = arith.constant 0 : index
    %c0_9 = arith.constant 0 : index
    %14 = vector.load %arg4[%c0_8, %c0_9] : memref<128x128xbf16, #tpu.memory_space<vmem>>, vector<128x128xbf16>
    %cst_10 = arith.constant dense<0.000000e+00> : vector<16x128xf32>
    %15 = tpu.matmul %13, %14, %cst_10 {dimension_numbers = #tpu.dot_dimension_numbers<[1], [0], [0], [1], [0, 0, 1, 1], [], []>} : vector<16x128xbf16>, vector<128x128xbf16>, vector<16x128xf32> -> vector<16x128xf32>
    %16 = arith.addf %12, %15 : vector<16x128xf32>
    %c0_11 = arith.constant 0 : index
    %c0_12 = arith.constant 0 : index
    %17 = vector.load %arg9[%c0_11, %c0_12] : memref<16x128xf32, #tpu.memory_space<vmem>>, vector<16x128xf32>
    tpu.vector_store %arg9[%c0_11, %c0_12], %16 {strides = array<i32>} : memref<16x128xf32, #tpu.memory_space<vmem>>, vector<16x128xf32>,
    %c6_i32 = arith.constant 6 : i32
    %18 = arith.cmpi eq, %arg2, %c6_i32 : i32
    %19 = arith.extui %18 : i1 to i32
    %c0_i32_13 = arith.constant 0 : i32
    %20 = arith.cmpi ne, %19, %c0_i32_13 : i32
    scf.if %20 {
      %c0_14 = arith.constant 0 : index
      %c0_15 = arith.constant 0 : index
      %21 = vector.load %arg9[%c0_14, %c0_15] : memref<16x128xf32, #tpu.memory_space<vmem>>, vector<16x128xf32>
      %c0_16 = arith.constant 0 : index
      %c0_17 = arith.constant 0 : index
      %22 = vector.load %arg7[%c0_16, %c0_17] : memref<1x128xf32, #tpu.memory_space<vmem>>, vector<1x128xf32>
      %23 = vector.broadcast %22 : vector<1x128xf32> to vector<16x128xf32>
      %24 = arith.mulf %21, %23 : vector<16x128xf32>
      %c0_18 = arith.constant 0 : index
      %c0_19 = arith.constant 0 : index
      %25 = vector.load %arg8[%c0_18, %c0_19] : memref<1x128xf32, #tpu.memory_space<vmem>>, vector<1x128xf32>
      %26 = vector.broadcast %25 : vector<1x128xf32> to vector<16x128xf32>
      %27 = arith.addf %24, %26 : vector<16x128xf32>
      %cst_20 = arith.constant 0.000000e+00 : f32
      %28 = vector.broadcast %cst_20 : f32 to vector<16x128xf32>
      %29 = arith.maximumf %27, %28 : vector<16x128xf32>
      %c0_21 = arith.constant 0 : index
      %c0_22 = arith.constant 0 : index
      %30 = vector.load %arg9[%c0_21, %c0_22] : memref<16x128xf32, #tpu.memory_space<vmem>>, vector<16x128xf32>
      tpu.vector_store %arg9[%c0_21, %c0_22], %29 {strides = array<i32>} : memref<16x128xf32, #tpu.memory_space<vmem>>, vector<16x128xf32>,
    } else {
    }
    return
  }
  func.func @transform_0(%arg0: i32, %arg1: i32, %arg2: i32) -> (i32, i32) {
    %c0_i32 = arith.constant 0 : i32
    return %arg0, %arg2 : i32, i32
  }
  func.func @transform_1(%arg0: i32, %arg1: i32, %arg2: i32) -> (i32, i32) {
    %c0_i32 = arith.constant 0 : i32
    return %arg2, %arg1 : i32, i32
  }
  func.func @transform_2(%arg0: i32, %arg1: i32, %arg2: i32) -> (i32, i32) {
    %c0_i32 = arith.constant 0 : i32
    %c0_i32_0 = arith.constant 0 : i32
    return %c0_i32, %arg2 : i32, i32
  }
  func.func @transform_3(%arg0: i32, %arg1: i32, %arg2: i32) -> (i32, i32) {
    %c0_i32 = arith.constant 0 : i32
    %c0_i32_0 = arith.constant 0 : i32
    return %c0_i32, %arg2 : i32, i32
  }
  func.func @transform_4(%arg0: i32, %arg1: i32, %arg2: i32) -> (i32, i32) {
    %c0_i32 = arith.constant 0 : i32
    %c0_i32_0 = arith.constant 0 : i32
    return %c0_i32, %arg1 : i32, i32
  }
  func.func @transform_5(%arg0: i32, %arg1: i32, %arg2: i32) -> (i32, i32) {
    %c0_i32 = arith.constant 0 : i32
    %c0_i32_0 = arith.constant 0 : i32
    return %c0_i32, %arg1 : i32, i32
  }
  func.func @transform_6(%arg0: i32, %arg1: i32, %arg2: i32) -> (i32, i32) {
    %c0_i32 = arith.constant 0 : i32
    return %arg0, %arg1 : i32, i32
  }
}

module attributes {stable_mosaic.version = 11 : i64} {
  func.func @_fused_matmul_kernel(%arg0: i32, %arg1: i32, %arg2: i32, %arg3: memref<16x256xf32, #tpu.memory_space<vmem>>, %arg4: memref<256x128xbf16, #tpu.memory_space<vmem>>, %arg5: memref<1x256xf32, #tpu.memory_space<vmem>>, %arg6: memref<1x256xf32, #tpu.memory_space<vmem>>, %arg7: memref<1x128xf32, #tpu.memory_space<vmem>>, %arg8: memref<1x128xf32, #tpu.memory_space<vmem>>, %arg9: memref<16x128xf32, #tpu.memory_space<vmem>>) attributes {dimension_semantics = [#tpu.dimension_semantics<parallel>, #tpu.dimension_semantics<parallel>, #tpu.dimension_semantics<arbitrary>], iteration_bounds = array<i64: 1, 1, 4>, scalar_prefetch = 0 : i64, scratch_operands = 0 : i64, tpu.core_type = #tpu.core_type<tc>, window_params = [{transform_indices = @transform_0, window_bounds = array<i64: 16, 256>}, {transform_indices = @transform_1, window_bounds = array<i64: 256, 128>}, {transform_indices = @transform_2, window_bounds = array<i64: 1, 256>}, {transform_indices = @transform_3, window_bounds = array<i64: 1, 256>}, {transform_indices = @transform_4, window_bounds = array<i64: 1, 128>}, {transform_indices = @transform_5, window_bounds = array<i64: 1, 128>}, {transform_indices = @transform_6, window_bounds = array<i64: 16, 128>}]} {
    %c0_i32 = arith.constant 0 : i32
    %0 = arith.cmpi eq, %arg2, %c0_i32 : i32
    %1 = arith.extui %0 : i1 to i32
    %c0_i32_0 = arith.constant 0 : i32
    %2 = arith.cmpi ne, %1, %c0_i32_0 : i32
    scf.if %2 {
      %cst_14 = arith.constant 0.000000e+00 : f32
      %21 = vector.broadcast %cst_14 : f32 to vector<16x128xf32>
      %c0_15 = arith.constant 0 : index
      %c0_16 = arith.constant 0 : index
      %22 = vector.load %arg9[%c0_15, %c0_16] : memref<16x128xf32, #tpu.memory_space<vmem>>, vector<16x128xf32>
      tpu.vector_store %arg9[%c0_15, %c0_16], %21 {strides = array<i32>} : memref<16x128xf32, #tpu.memory_space<vmem>>, vector<16x128xf32>,
    } else {
    }
    %c0 = arith.constant 0 : index
    %c0_1 = arith.constant 0 : index
    %3 = vector.load %arg3[%c0, %c0_1] : memref<16x256xf32, #tpu.memory_space<vmem>>, vector<16x256xf32>
    %c0_2 = arith.constant 0 : index
    %c0_3 = arith.constant 0 : index
    %4 = vector.load %arg5[%c0_2, %c0_3] : memref<1x256xf32, #tpu.memory_space<vmem>>, vector<1x256xf32>
    %5 = vector.broadcast %4 : vector<1x256xf32> to vector<16x256xf32>
    %6 = arith.mulf %3, %5 : vector<16x256xf32>
    %c0_4 = arith.constant 0 : index
    %c0_5 = arith.constant 0 : index
    %7 = vector.load %arg6[%c0_4, %c0_5] : memref<1x256xf32, #tpu.memory_space<vmem>>, vector<1x256xf32>
    %8 = vector.broadcast %7 : vector<1x256xf32> to vector<16x256xf32>
    %9 = arith.addf %6, %8 : vector<16x256xf32>
    %cst = arith.constant 0.000000e+00 : f32
    %10 = vector.broadcast %cst : f32 to vector<16x256xf32>
    %11 = arith.maximumf %9, %10 : vector<16x256xf32>
    %c0_6 = arith.constant 0 : index
    %c0_7 = arith.constant 0 : index
    %12 = vector.load %arg9[%c0_6, %c0_7] : memref<16x128xf32, #tpu.memory_space<vmem>>, vector<16x128xf32>
    %13 = arith.truncf %11 : vector<16x256xf32> to vector<16x256xbf16>
    %c0_8 = arith.constant 0 : index
    %c0_9 = arith.constant 0 : index
    %14 = vector.load %arg4[%c0_8, %c0_9] : memref<256x128xbf16, #tpu.memory_space<vmem>>, vector<256x128xbf16>
    %cst_10 = arith.constant dense<0.000000e+00> : vector<16x128xf32>
    %15 = tpu.matmul %13, %14, %cst_10 {dimension_numbers = #tpu.dot_dimension_numbers<[1], [0], [0], [1], [0, 0, 1, 1], [], []>} : vector<16x256xbf16>, vector<256x128xbf16>, vector<16x128xf32> -> vector<16x128xf32>
    %16 = arith.addf %12, %15 : vector<16x128xf32>
    %c0_11 = arith.constant 0 : index
    %c0_12 = arith.constant 0 : index
    %17 = vector.load %arg9[%c0_11, %c0_12] : memref<16x128xf32, #tpu.memory_space<vmem>>, vector<16x128xf32>
    tpu.vector_store %arg9[%c0_11, %c0_12], %16 {strides = array<i32>} : memref<16x128xf32, #tpu.memory_space<vmem>>, vector<16x128xf32>,
    %c3_i32 = arith.constant 3 : i32
    %18 = arith.cmpi eq, %arg2, %c3_i32 : i32
    %19 = arith.extui %18 : i1 to i32
    %c0_i32_13 = arith.constant 0 : i32
    %20 = arith.cmpi ne, %19, %c0_i32_13 : i32
    scf.if %20 {
      %c0_14 = arith.constant 0 : index
      %c0_15 = arith.constant 0 : index
      %21 = vector.load %arg9[%c0_14, %c0_15] : memref<16x128xf32, #tpu.memory_space<vmem>>, vector<16x128xf32>
      %c0_16 = arith.constant 0 : index
      %c0_17 = arith.constant 0 : index
      %22 = vector.load %arg7[%c0_16, %c0_17] : memref<1x128xf32, #tpu.memory_space<vmem>>, vector<1x128xf32>
      %23 = vector.broadcast %22 : vector<1x128xf32> to vector<16x128xf32>
      %24 = arith.mulf %21, %23 : vector<16x128xf32>
      %c0_18 = arith.constant 0 : index
      %c0_19 = arith.constant 0 : index
      %25 = vector.load %arg8[%c0_18, %c0_19] : memref<1x128xf32, #tpu.memory_space<vmem>>, vector<1x128xf32>
      %26 = vector.broadcast %25 : vector<1x128xf32> to vector<16x128xf32>
      %27 = arith.addf %24, %26 : vector<16x128xf32>
      %cst_20 = arith.constant 0.000000e+00 : f32
      %28 = vector.broadcast %cst_20 : f32 to vector<16x128xf32>
      %29 = arith.maximumf %27, %28 : vector<16x128xf32>
      %c0_21 = arith.constant 0 : index
      %c0_22 = arith.constant 0 : index
      %30 = vector.load %arg9[%c0_21, %c0_22] : memref<16x128xf32, #tpu.memory_space<vmem>>, vector<16x128xf32>
      tpu.vector_store %arg9[%c0_21, %c0_22], %29 {strides = array<i32>} : memref<16x128xf32, #tpu.memory_space<vmem>>, vector<16x128xf32>,
    } else {
    }
    return
  }
  func.func @transform_0(%arg0: i32, %arg1: i32, %arg2: i32) -> (i32, i32) {
    %c0_i32 = arith.constant 0 : i32
    return %arg0, %arg2 : i32, i32
  }
  func.func @transform_1(%arg0: i32, %arg1: i32, %arg2: i32) -> (i32, i32) {
    %c0_i32 = arith.constant 0 : i32
    return %arg2, %arg1 : i32, i32
  }
  func.func @transform_2(%arg0: i32, %arg1: i32, %arg2: i32) -> (i32, i32) {
    %c0_i32 = arith.constant 0 : i32
    %c0_i32_0 = arith.constant 0 : i32
    return %c0_i32, %arg2 : i32, i32
  }
  func.func @transform_3(%arg0: i32, %arg1: i32, %arg2: i32) -> (i32, i32) {
    %c0_i32 = arith.constant 0 : i32
    %c0_i32_0 = arith.constant 0 : i32
    return %c0_i32, %arg2 : i32, i32
  }
  func.func @transform_4(%arg0: i32, %arg1: i32, %arg2: i32) -> (i32, i32) {
    %c0_i32 = arith.constant 0 : i32
    %c0_i32_0 = arith.constant 0 : i32
    return %c0_i32, %arg1 : i32, i32
  }
  func.func @transform_5(%arg0: i32, %arg1: i32, %arg2: i32) -> (i32, i32) {
    %c0_i32 = arith.constant 0 : i32
    %c0_i32_0 = arith.constant 0 : i32
    return %c0_i32, %arg1 : i32, i32
  }
  func.func @transform_6(%arg0: i32, %arg1: i32, %arg2: i32) -> (i32, i32) {
    %c0_i32 = arith.constant 0 : i32
    return %arg0, %arg1 : i32, i32
  }
}

module attributes {stable_mosaic.version = 11 : i64} {
  func.func @_bn_relu_gap_kernel(%arg0: memref<2x4x1024xf32, #tpu.memory_space<vmem>>, %arg1: memref<1x1x1024xf32, #tpu.memory_space<vmem>>, %arg2: memref<1x1x1024xf32, #tpu.memory_space<vmem>>, %arg3: memref<2x1024xf32, #tpu.memory_space<vmem>>) attributes {dimension_semantics = [], scalar_prefetch = 0 : i64, scratch_operands = 0 : i64, tpu.core_type = #tpu.core_type<tc>} {
    %c0 = arith.constant 0 : index
    %c0_0 = arith.constant 0 : index
    %c0_1 = arith.constant 0 : index
    %0 = vector.load %arg0[%c0, %c0_0, %c0_1] : memref<2x4x1024xf32, #tpu.memory_space<vmem>>, vector<2x4x1024xf32>
    %c0_2 = arith.constant 0 : index
    %c0_3 = arith.constant 0 : index
    %c0_4 = arith.constant 0 : index
    %1 = vector.load %arg1[%c0_2, %c0_3, %c0_4] : memref<1x1x1024xf32, #tpu.memory_space<vmem>>, vector<1x1x1024xf32>
    %2 = vector.broadcast %1 : vector<1x1x1024xf32> to vector<2x4x1024xf32>
    %3 = arith.mulf %0, %2 : vector<2x4x1024xf32>
    %c0_5 = arith.constant 0 : index
    %c0_6 = arith.constant 0 : index
    %c0_7 = arith.constant 0 : index
    %4 = vector.load %arg2[%c0_5, %c0_6, %c0_7] : memref<1x1x1024xf32, #tpu.memory_space<vmem>>, vector<1x1x1024xf32>
    %5 = vector.broadcast %4 : vector<1x1x1024xf32> to vector<2x4x1024xf32>
    %6 = arith.addf %3, %5 : vector<2x4x1024xf32>
    %cst = arith.constant 0.000000e+00 : f32
    %7 = vector.broadcast %cst : f32 to vector<2x4x1024xf32>
    %8 = arith.maximumf %6, %7 : vector<2x4x1024xf32>
    %cst_8 = arith.constant dense<0.000000e+00> : vector<2x1024xf32>
    %9 = vector.multi_reduction <add>, %8, %cst_8 [1] : vector<2x4x1024xf32> to vector<2x1024xf32>
    %cst_9 = arith.constant 4.000000e+00 : f32
    %10 = vector.broadcast %cst_9 : f32 to vector<2x1024xf32>
    %11 = arith.divf %9, %10 : vector<2x1024xf32>
    %c0_10 = arith.constant 0 : index
    %c0_11 = arith.constant 0 : index
    %12 = vector.load %arg3[%c0_10, %c0_11] : memref<2x1024xf32, #tpu.memory_space<vmem>>, vector<2x1024xf32>
    tpu.vector_store %arg3[%c0_10, %c0_11], %11 {strides = array<i32>} : memref<2x1024xf32, #tpu.memory_space<vmem>>, vector<2x1024xf32>,
    return
  }
}

module attributes {stable_mosaic.version = 11 : i64} {
  func.func @_fused_matmul_kernel(%arg0: i32, %arg1: i32, %arg2: i32, %arg3: memref<16x256xbf16, #tpu.memory_space<vmem>>, %arg4: memref<256x128xbf16, #tpu.memory_space<vmem>>, %arg5: memref<1x256xf32, #tpu.memory_space<vmem>>, %arg6: memref<1x256xf32, #tpu.memory_space<vmem>>, %arg7: memref<1x128xf32, #tpu.memory_space<vmem>>, %arg8: memref<1x128xf32, #tpu.memory_space<vmem>>, %arg9: memref<16x128xf32, #tpu.memory_space<vmem>>) attributes {dimension_semantics = [#tpu.dimension_semantics<parallel>, #tpu.dimension_semantics<parallel>, #tpu.dimension_semantics<arbitrary>], iteration_bounds = array<i64: 1, 1, 4>, scalar_prefetch = 0 : i64, scratch_operands = 0 : i64, tpu.core_type = #tpu.core_type<tc>, window_params = [{transform_indices = @transform_0, window_bounds = array<i64: 16, 256>}, {transform_indices = @transform_1, window_bounds = array<i64: 256, 128>}, {transform_indices = @transform_2, window_bounds = array<i64: 1, 256>}, {transform_indices = @transform_3, window_bounds = array<i64: 1, 256>}, {transform_indices = @transform_4, window_bounds = array<i64: 1, 128>}, {transform_indices = @transform_5, window_bounds = array<i64: 1, 128>}, {transform_indices = @transform_6, window_bounds = array<i64: 16, 128>}]} {
    %c0_i32 = arith.constant 0 : i32
    %0 = arith.cmpi eq, %arg2, %c0_i32 : i32
    %1 = arith.extui %0 : i1 to i32
    %c0_i32_0 = arith.constant 0 : i32
    %2 = arith.cmpi ne, %1, %c0_i32_0 : i32
    scf.if %2 {
      %cst_9 = arith.constant 0.000000e+00 : f32
      %12 = vector.broadcast %cst_9 : f32 to vector<16x128xf32>
      %c0_10 = arith.constant 0 : index
      %c0_11 = arith.constant 0 : index
      %13 = vector.load %arg9[%c0_10, %c0_11] : memref<16x128xf32, #tpu.memory_space<vmem>>, vector<16x128xf32>
      tpu.vector_store %arg9[%c0_10, %c0_11], %12 {strides = array<i32>} : memref<16x128xf32, #tpu.memory_space<vmem>>, vector<16x128xf32>,
    } else {
    }
    %c0 = arith.constant 0 : index
    %c0_1 = arith.constant 0 : index
    %3 = vector.load %arg3[%c0, %c0_1] : memref<16x256xbf16, #tpu.memory_space<vmem>>, vector<16x256xbf16>
    %c0_2 = arith.constant 0 : index
    %c0_3 = arith.constant 0 : index
    %4 = vector.load %arg9[%c0_2, %c0_3] : memref<16x128xf32, #tpu.memory_space<vmem>>, vector<16x128xf32>
    %c0_4 = arith.constant 0 : index
    %c0_5 = arith.constant 0 : index
    %5 = vector.load %arg4[%c0_4, %c0_5] : memref<256x128xbf16, #tpu.memory_space<vmem>>, vector<256x128xbf16>
    %cst = arith.constant dense<0.000000e+00> : vector<16x128xf32>
    %6 = tpu.matmul %3, %5, %cst {dimension_numbers = #tpu.dot_dimension_numbers<[1], [0], [0], [1], [0, 0, 1, 1], [], []>} : vector<16x256xbf16>, vector<256x128xbf16>, vector<16x128xf32> -> vector<16x128xf32>
    %7 = arith.addf %4, %6 : vector<16x128xf32>
    %c0_6 = arith.constant 0 : index
    %c0_7 = arith.constant 0 : index
    %8 = vector.load %arg9[%c0_6, %c0_7] : memref<16x128xf32, #tpu.memory_space<vmem>>, vector<16x128xf32>
    tpu.vector_store %arg9[%c0_6, %c0_7], %7 {strides = array<i32>} : memref<16x128xf32, #tpu.memory_space<vmem>>, vector<16x128xf32>,
    %c3_i32 = arith.constant 3 : i32
    %9 = arith.cmpi eq, %arg2, %c3_i32 : i32
    %10 = arith.extui %9 : i1 to i32
    %c0_i32_8 = arith.constant 0 : i32
    %11 = arith.cmpi ne, %10, %c0_i32_8 : i32
    scf.if %11 {
      %c0_9 = arith.constant 0 : index
      %c0_10 = arith.constant 0 : index
      %12 = vector.load %arg9[%c0_9, %c0_10] : memref<16x128xf32, #tpu.memory_space<vmem>>, vector<16x128xf32>
      %c0_11 = arith.constant 0 : index
      %c0_12 = arith.constant 0 : index
      %13 = vector.load %arg7[%c0_11, %c0_12] : memref<1x128xf32, #tpu.memory_space<vmem>>, vector<1x128xf32>
      %14 = vector.broadcast %13 : vector<1x128xf32> to vector<16x128xf32>
      %15 = arith.mulf %12, %14 : vector<16x128xf32>
      %c0_13 = arith.constant 0 : index
      %c0_14 = arith.constant 0 : index
      %16 = vector.load %arg8[%c0_13, %c0_14] : memref<1x128xf32, #tpu.memory_space<vmem>>, vector<1x128xf32>
      %17 = vector.broadcast %16 : vector<1x128xf32> to vector<16x128xf32>
      %18 = arith.addf %15, %17 : vector<16x128xf32>
      %c0_15 = arith.constant 0 : index
      %c0_16 = arith.constant 0 : index
      %19 = vector.load %arg9[%c0_15, %c0_16] : memref<16x128xf32, #tpu.memory_space<vmem>>, vector<16x128xf32>
      tpu.vector_store %arg9[%c0_15, %c0_16], %18 {strides = array<i32>} : memref<16x128xf32, #tpu.memory_space<vmem>>, vector<16x128xf32>,
    } else {
    }
    return
  }
  func.func @transform_0(%arg0: i32, %arg1: i32, %arg2: i32) -> (i32, i32) {
    %c0_i32 = arith.constant 0 : i32
    return %arg0, %arg2 : i32, i32
  }
  func.func @transform_1(%arg0: i32, %arg1: i32, %arg2: i32) -> (i32, i32) {
    %c0_i32 = arith.constant 0 : i32
    return %arg2, %arg1 : i32, i32
  }
  func.func @transform_2(%arg0: i32, %arg1: i32, %arg2: i32) -> (i32, i32) {
    %c0_i32 = arith.constant 0 : i32
    %c0_i32_0 = arith.constant 0 : i32
    return %c0_i32, %arg2 : i32, i32
  }
  func.func @transform_3(%arg0: i32, %arg1: i32, %arg2: i32) -> (i32, i32) {
    %c0_i32 = arith.constant 0 : i32
    %c0_i32_0 = arith.constant 0 : i32
    return %c0_i32, %arg2 : i32, i32
  }
  func.func @transform_4(%arg0: i32, %arg1: i32, %arg2: i32) -> (i32, i32) {
    %c0_i32 = arith.constant 0 : i32
    %c0_i32_0 = arith.constant 0 : i32
    return %c0_i32, %arg1 : i32, i32
  }
  func.func @transform_5(%arg0: i32, %arg1: i32, %arg2: i32) -> (i32, i32) {
    %c0_i32 = arith.constant 0 : i32
    %c0_i32_0 = arith.constant 0 : i32
    return %c0_i32, %arg1 : i32, i32
  }
  func.func @transform_6(%arg0: i32, %arg1: i32, %arg2: i32) -> (i32, i32) {
    %c0_i32 = arith.constant 0 : i32
    return %arg0, %arg1 : i32, i32
  }
}

</mosaic_0001>

<bundles_post_ra>
// kernel: densenet_forward.92
= control target key start
LH: loop header
LB: loop body
LE: loop exit
PB: predicated region body
PF: predicated region fallthrough
CT: control target
= control target key end

     0   :  { %s1118_s21 = smov 0   ;;  %s1120_s22 = smov 0   ;;  %s1231_s0 = inlined_call_operand.vmem [shape: bf16[512,128], index: 0, kind: input, shape index: {}]   ;;  %s1232_s1 = inlined_call_operand.vmem [shape: bf16[128,128], index: 1, kind: input, shape index: {}]   ;;  %s1233_s2 = inlined_call_operand.vmem [shape: f32[1,128], index: 2, kind: input, shape index: {}, may-alias: {2,3}]   ;;  %s1234_s3 = inlined_call_operand.vmem [shape: f32[1,128], index: 3, kind: input, shape index: {}, may-alias: {2,3}]   ;;  %s1235_s4 = inlined_call_operand.vmem [shape: f32[1,128], index: 4, kind: input, shape index: {}]   ;;  %s1236_s5 = inlined_call_operand.vmem [shape: f32[1,128], index: 5, kind: input, shape index: {}]   ;;  %s1237_s6 = inlined_call_operand.vmem [shape: f32[512,128], index: 6, kind: output, shape index: {}]  }
   0x1   :  { %s1122_s23 = smov 0  }
   0x2 LB: > { %s35_s2 = sadd.s32 1, %s1077_s22  ;;  %p929_p0 = scmp.ge.s32.totalorder %s1081_s23, 1  ;;  %s1081_s23 = sphi %s1122_s23, %s16_s23   ;;  %s1077_s22 = sphi %s1120_s22, %s1239_s22   ;;  %s1073_s21 = sphi %s1118_s21, %s1238_s21  }
   0x3   : > { %p37_p1 = scmp.ge.s32.totalorder %s35_s2, 4  ;;  %p287_p2 = scmp.lt.s32.totalorder %s1081_s23, 5 }
   0x5   : > { %s1241_s2 = smov (%p37_p1, %s35_s2), 0  ;;  %p288_p3 = pnand %p929_p0, %p287_p2 }
   0x6   : > { %v1043_v0 = vld [vmem:[%s1232_s1] sm:$0xff] (!%p288_p3)   ;;  %s930_s25 = sshll.u32 (!%p288_p3), %s1073_s21, 4  ;;  %v1044_v1 = vld [vmem:[%s1232_s1 + $0x8] sm:$0xff] (!%p288_p3)   ;;  %v1045_v2 = vld [vmem:[%s1232_s1 + $0x10] sm:$0xff] (!%p288_p3)  }
   0x7   : > { %291 = sbr.rel (%p288_p3) target bundleno = 269 (0x10d), region = 44  ;;  %p344_p4 = scmp.lt.s32.totalorder (!%p288_p3), %s930_s25, 63  ;;  %970 = vmatprep.subr.bf16.mxu0 (!%p288_p3), %v1043_v0  ;;  %1002 = vmatprep.subr.bf16.mxu1 (!%p288_p3), %v1043_v0  ;;  %v1046_v3 = vld [vmem:[%s1232_s1 + $0x18] sm:$0xff] (!%p288_p3)   ;;  %v1047_v6 = vld [vmem:[%s1232_s1 + $0x20] sm:$0xff] (!%p288_p3)   ;;  %v1048_v7 = vld [vmem:[%s1232_s1 + $0x28] sm:$0xff] (!%p288_p3)  }
   0x8   : > { %971 = vmatpush3.bf16.msra.mxu0 (!%p288_p3), %v1043_v0  ;;  %1010 = vmatpush3.bf16.msra.mxu1 (!%p288_p3), %v1043_v0  ;;  %v1049_v8 = vld [vmem:[%s1232_s1 + $0x30] sm:$0xff] (!%p288_p3)   ;;  %v1050_v9 = vld [vmem:[%s1232_s1 + $0x38] sm:$0xff] (!%p288_p3)   ;;  %v950_v17 = vld [vmem:[%s1235_s4] ss:$0 sm:$0xff] (!%p288_p3) }
   0x9   : > { %972 = vmatprep.subr.bf16.mxu0 (!%p288_p3), %v1044_v1  ;;  %1003 = vmatprep.subr.bf16.mxu1 (!%p288_p3), %v1044_v1  ;;  %v1182_v21 = vld [vmem:[%s1236_s5] ss:$0 sm:$0xff] (!%p288_p3) }
   0xc   : > { %973 = vmatpush3.bf16.msra.mxu0 (!%p288_p3), %v1044_v1  ;;  %1011 = vmatpush3.bf16.msra.mxu1 (!%p288_p3), %v1044_v1 }
   0xd   : > { %974 = vmatprep.subr.bf16.mxu0 (!%p288_p3), %v1045_v2  ;;  %1004 = vmatprep.subr.bf16.mxu1 (!%p288_p3), %v1045_v2 }
   0xe   : > { %s1243_s25 = smov (!%p344_p4, %s930_s25), 63 }
   0xf   : > { %s931_s30 = sshll.u32 %s1243_s25, 2  ;;  %s933_s26 = sshll.u32 %s1243_s25, 3 }
  0x10   : > { %s1151_s9 = scalar_lea.vmem %s1231_s0, %s931_s30  ;;  %975 = vmatpush3.bf16.msra.mxu0 %v1045_v2  ;;  %1012 = vmatpush3.bf16.msra.mxu1 %v1045_v2  ;;  %s1190_s29 = scalar_lea.vmem %s1237_s6, %s933_s26 }
  0x11   : > { %v1051_v4 = vld [vmem:[%s1151_s9] sm:$0xff]   ;;  %976 = vmatprep.subr.bf16.mxu0 %v1046_v3  ;;  %1005 = vmatprep.subr.bf16.mxu1 %v1046_v3  ;;  %v1053_v10 = vld [vmem:[%s1151_s9 + $0x8] sm:$0xff]   ;;  %v1055_v12 = vld [vmem:[%s1151_s9 + $0x10] sm:$0xff]  }
  0x12   : > { %v1052_v5 = vld [vmem:[%s1151_s9 + $0x20] sm:$0xff]   ;;  %986 = vmatprep.mubr.bf16.mxu0 %v1051_v4  ;;  %v1054_v11 = vld [vmem:[%s1151_s9 + $0x28] sm:$0xff]   ;;  %v1056_v13 = vld [vmem:[%s1151_s9 + $0x30] sm:$0xff]  }
  0x13   : > { %994 = vmatprep.mubr.bf16.mxu1 %v1052_v5  ;;  %v1057_v14 = vld [vmem:[%s1151_s9 + $0x18] sm:$0xff]  }
  0x14   : > { %977 = vmatpush3.bf16.msra.mxu0 %v1046_v3  ;;  %1013 = vmatpush3.bf16.msra.mxu1 %v1046_v3  ;;  %v1058_v15 = vld [vmem:[%s1151_s9 + $0x38] sm:$0xff]  }
  0x15   : > { %978 = vmatprep.subr.bf16.mxu0 %v1047_v6  ;;  %1006 = vmatprep.subr.bf16.mxu1 %v1047_v6 }
  0x18   : > { %979 = vmatpush3.bf16.msra.mxu0 %v1047_v6  ;;  %1014 = vmatpush3.bf16.msra.mxu1 %v1047_v6 }
  0x19   : > { %980 = vmatprep.subr.bf16.mxu0 %v1048_v7  ;;  %1007 = vmatprep.subr.bf16.mxu1 %v1048_v7 }
  0x1c   : > { %981 = vmatpush3.bf16.msra.mxu0 %v1048_v7  ;;  %1015 = vmatpush3.bf16.msra.mxu1 %v1048_v7 }
  0x1d   : > { %982 = vmatprep.subr.bf16.mxu0 %v1049_v8  ;;  %1008 = vmatprep.subr.bf16.mxu1 %v1049_v8 }
  0x20   : > { %983 = vmatpush3.bf16.msra.mxu0 %v1049_v8  ;;  %1016 = vmatpush3.bf16.msra.mxu1 %v1049_v8 }
  0x21   : > { %984 = vmatprep.subr.bf16.mxu0 %v1050_v9  ;;  %1009 = vmatprep.subr.bf16.mxu1 %v1050_v9 }
  0x24   : > { %985 = vmatpush3.bf16.msra.mxu0 %v1050_v9  ;;  %1017 = vmatpush3.bf16.msra.mxu1 %v1050_v9 }
  0x27   : > { %987 = vmatmul.mubr.bf16.vlgmr.msra.gmra.mrb[0].mxu0 %v1053_v10  ;;  %995 = vmatmul.mubr.bf16.vlgmr.msra.gmra.mrb[0].mxu1 %v1054_v11 }
  0x28   : > { %990 = vmatprep.mubr.bf16.mxu0 %v1055_v12  ;;  %998 = vmatprep.mubr.bf16.mxu1 %v1056_v13 }
  0x2f   : > { %991 = vmatmul.mubr.bf16.gmra.mrb[4].mxu0 %v1057_v14  ;;  %999 = vmatmul.mubr.bf16.gmra.mrb[4].mxu1 %v1058_v15 }
  0xfa   : > { %v988_v16 = vpop.f32.mrb[0].mxu0  ;;  %v996_v18 = vpop.f32.mrb[0].mxu1 }
  0xfb   : > { %v581_v19 = vpop.f32.mrb[1].mxu0  ;;  %v613_v20 = vpop.f32.mrb[1].mxu1  ;;  %v704_v24 = vmul.f32 %v988_v16, %v950_v17  ;;  %v712_v25 = vmul.f32 %v996_v18, %v950_v17 }
  0xfc   : > { %v989_v22 = vpop.f32.mrb[2].mxu0  ;;  %v997_v23 = vpop.f32.mrb[2].mxu1  ;;  %v702_v28 = vmul.f32 %v950_v17, %v581_v19  ;;  %v710_v29 = vmul.f32 %v950_v17, %v613_v20 }
  0xfd   : > { %v584_v26 = vpop.f32.mrb[3].mxu0  ;;  %v616_v27 = vpop.f32.mrb[3].mxu1  ;;  %v727_v30 = vadd.f32 %v1182_v21, %v704_v24  ;;  %v735_v31 = vadd.f32 %v1182_v21, %v712_v25  ;;  %v705_v32 = vmul.f32 %v989_v22, %v950_v17  ;;  %v713_v33 = vmul.f32 %v997_v23, %v950_v17 }
  0xfe   : > { %v725_v34 = vadd.f32 %v1182_v21, %v702_v28  ;;  %v733_v35 = vadd.f32 %v1182_v21, %v710_v29  ;;  %v703_v36 = vmul.f32 %v950_v17, %v584_v26  ;;  %v711_v37 = vmul.f32 %v950_v17, %v616_v27 }
  0xff   : > { %v743_v38 = vmax.f32 %v727_v30, 0.0  ;;  %v751_v39 = vmax.f32 %v735_v31, 0.0  ;;  %v728_v40 = vadd.f32 %v1182_v21, %v705_v32  ;;  %v736_v41 = vadd.f32 %v1182_v21, %v713_v33 }
 0x100   : > { %v741_v42 = vmax.f32 %v725_v34, 0.0  ;;  %v749_v43 = vmax.f32 %v733_v35, 0.0  ;;  %v726_v44 = vadd.f32 %v1182_v21, %v703_v36  ;;  %v734_v45 = vadd.f32 %v1182_v21, %v711_v37 }
 0x101   : > { %759 = vst [vmem:[%s1190_s29 + $0x10] sm:$0xff] %v743_v38  ;;  %767 = vst [vmem:[%s1190_s29 + $0x50] sm:$0xff] %v751_v39  ;;  %v744_v48 = vmax.f32 %v728_v40, 0.0  ;;  %v752_v49 = vmax.f32 %v736_v41, 0.0 }
 0x102   : > { %v992_v46 = vpop.f32.mrb[4].mxu0  ;;  %v1000_v47 = vpop.f32.mrb[4].mxu1  ;;  %757 = vst [vmem:[%s1190_s29] sm:$0xff] %v741_v42  ;;  %765 = vst [vmem:[%s1190_s29 + $0x40] sm:$0xff] %v749_v43  ;;  %v742_v52 = vmax.f32 %v726_v44, 0.0  ;;  %v750_v53 = vmax.f32 %v734_v45, 0.0 }
 0x103   : > { %v597_v50 = vpop.f32.mrb[5].mxu0  ;;  %v629_v51 = vpop.f32.mrb[5].mxu1  ;;  %760 = vst [vmem:[%s1190_s29 + $0x18] sm:$0xff] %v744_v48  ;;  %768 = vst [vmem:[%s1190_s29 + $0x58] sm:$0xff] %v752_v49  ;;  %v708_v56 = vmul.f32 %v992_v46, %v950_v17  ;;  %v716_v57 = vmul.f32 %v1000_v47, %v950_v17 }
 0x104   : > { %v993_v54 = vpop.f32.mrb[6].mxu0  ;;  %v1001_v55 = vpop.f32.mrb[6].mxu1  ;;  %758 = vst [vmem:[%s1190_s29 + $0x8] sm:$0xff] %v742_v52  ;;  %766 = vst [vmem:[%s1190_s29 + $0x48] sm:$0xff] %v750_v53  ;;  %v706_v60 = vmul.f32 %v950_v17, %v597_v50  ;;  %v714_v61 = vmul.f32 %v950_v17, %v629_v51 }
 0x105   : > { %v600_v58 = vpop.f32.mrb[7].mxu0  ;;  %v632_v59 = vpop.f32.mrb[7].mxu1  ;;  %v731_v62 = vadd.f32 %v1182_v21, %v708_v56  ;;  %v739_v63 = vadd.f32 %v1182_v21, %v716_v57  ;;  %v709_v0 = vmul.f32 %v993_v54, %v950_v17  ;;  %v717_v1 = vmul.f32 %v1001_v55, %v950_v17 }
 0x106   : > { %v729_v2 = vadd.f32 %v1182_v21, %v706_v60  ;;  %v737_v3 = vadd.f32 %v1182_v21, %v714_v61  ;;  %v707_v4 = vmul.f32 %v950_v17, %v600_v58  ;;  %v715_v5 = vmul.f32 %v950_v17, %v632_v59 }
 0x107   : > { %v747_v6 = vmax.f32 %v731_v62, 0.0  ;;  %v755_v7 = vmax.f32 %v739_v63, 0.0  ;;  %v732_v8 = vadd.f32 %v1182_v21, %v709_v0  ;;  %v740_v9 = vadd.f32 %v1182_v21, %v717_v1 }
 0x108   : > { %v745_v10 = vmax.f32 %v729_v2, 0.0  ;;  %v753_v11 = vmax.f32 %v737_v3, 0.0  ;;  %v730_v12 = vadd.f32 %v1182_v21, %v707_v4  ;;  %v738_v13 = vadd.f32 %v1182_v21, %v715_v5 }
 0x109   : > { %763 = vst [vmem:[%s1190_s29 + $0x30] sm:$0xff] %v747_v6  ;;  %771 = vst [vmem:[%s1190_s29 + $0x70] sm:$0xff] %v755_v7  ;;  %v748_v14 = vmax.f32 %v732_v8, 0.0  ;;  %v756_v15 = vmax.f32 %v740_v9, 0.0 }
 0x10a   : > { %761 = vst [vmem:[%s1190_s29 + $0x20] sm:$0xff] %v745_v10  ;;  %769 = vst [vmem:[%s1190_s29 + $0x60] sm:$0xff] %v753_v11  ;;  %v746_v16 = vmax.f32 %v730_v12, 0.0  ;;  %v754_v17 = vmax.f32 %v738_v13, 0.0 }
 0x10b   : > { %764 = vst [vmem:[%s1190_s29 + $0x38] sm:$0xff] %v748_v14  ;;  %772 = vst [vmem:[%s1190_s29 + $0x78] sm:$0xff] %v756_v15 }
 0x10c   : > { %762 = vst [vmem:[%s1190_s29 + $0x28] sm:$0xff] %v746_v16  ;;  %770 = vst [vmem:[%s1190_s29 + $0x68] sm:$0xff] %v754_v17 }
 0x10d PF: > { %s16_s23 = sadd.s32 1, %s1081_s23   ;;  %s1238_s21 = smov %s1077_s22 }
 0x10e   : > { %p13_p5 = scmp.ge.s32.totalorder %s16_s23, 6   ;;  %s1239_s22 = smov %s1241_s2 }
 0x110   :  { %15 = sbr.rel (!%p13_p5) target bundleno = 2 (0x2), region = 97 }

// kernel: densenet_forward.94
= control target key start
LH: loop header
LB: loop body
LE: loop exit
PB: predicated region body
PF: predicated region fallthrough
CT: control target
= control target key end

     0   :  { %s746_s1 = inlined_call_operand.vmem [shape: bf16[128,128], index: 1, kind: input, shape index: {}]   ;;  %s747_s0 = inlined_call_operand.vmem [shape: f32[128,128], index: 0, kind: input, shape index: {}]   ;;  %s748_s2 = inlined_call_operand.vmem [shape: f32[1,128], index: 2, kind: input, shape index: {}]   ;;  %s749_s3 = inlined_call_operand.vmem [shape: f32[1,128], index: 3, kind: input, shape index: {}]   ;;  %s750_s4 = inlined_call_operand.vmem [shape: f32[1,128], index: 4, kind: input, shape index: {}]   ;;  %s751_s5 = inlined_call_operand.vmem [shape: f32[1,128], index: 5, kind: input, shape index: {}]   ;;  %s752_s6 = inlined_call_operand.vmem [shape: f32[128,128], index: 6, kind: output, shape index: {}]  }
   0x1   :  { %v517_v0 = vld [vmem:[%s746_s1] sm:$0xff]   ;;  %v518_v1 = vld [vmem:[%s746_s1 + $0x8] sm:$0xff]   ;;  %v519_v2 = vld [vmem:[%s746_s1 + $0x10] sm:$0xff]  }
   0x2   :  { %468 = vmatprep.subr.bf16.mxu0 %v517_v0  ;;  %500 = vmatprep.subr.bf16.mxu1 %v517_v0  ;;  %v520_v3 = vld [vmem:[%s746_s1 + $0x18] sm:$0xff]   ;;  %v44_v4 = vld [vmem:[%s747_s0] sm:$0xff]  ;;  %v45_v5 = vld [vmem:[%s747_s0 + $0x8] sm:$0xff] }
   0x3   :  { %469 = vmatpush3.bf16.msra.mxu0 %v517_v0  ;;  %508 = vmatpush3.bf16.msra.mxu1 %v517_v0  ;;  %v581_v6 = vld [vmem:[%s748_s2] ss:$0 sm:$0xff]  ;;  %v53_v11 = vld [vmem:[%s747_s0 + $0x48] sm:$0xff]  ;;  %v46_v21 = vld [vmem:[%s747_s0 + $0x10] sm:$0xff] }
   0x4   :  { %470 = vmatprep.subr.bf16.mxu0 %v518_v1  ;;  %501 = vmatprep.subr.bf16.mxu1 %v518_v1  ;;  %v67_v7 = vmul.f32 %v581_v6, %v44_v4  ;;  %v68_v8 = vmul.f32 %v581_v6, %v45_v5  ;;  %v588_v9 = vld [vmem:[%s749_s3] ss:$0 sm:$0xff]  ;;  %v76_v13 = vmul.f32 %v581_v6, %v53_v11  ;;  %v47_v24 = vld [vmem:[%s747_s0 + $0x18] sm:$0xff]  ;;  %v54_v25 = vld [vmem:[%s747_s0 + $0x50] sm:$0xff] }
   0x5   :  { %v52_v10 = vld [vmem:[%s747_s0 + $0x40] sm:$0xff]  ;;  %v55_v26 = vld [vmem:[%s747_s0 + $0x58] sm:$0xff]  ;;  %v522_v27 = vld [vmem:[%s746_s1 + $0x28] sm:$0xff]   ;;  %v69_v34 = vmul.f32 %v581_v6, %v46_v21  ;;  %v70_v35 = vmul.f32 %v581_v6, %v47_v24  ;;  %v77_v36 = vmul.f32 %v581_v6, %v54_v25 }
   0x6   :  { %v75_v12 = vmul.f32 %v581_v6, %v52_v10  ;;  %v90_v14 = vadd.f32 %v588_v9, %v67_v7  ;;  %v91_v15 = vadd.f32 %v588_v9, %v68_v8  ;;  %v521_v16 = vld [vmem:[%s746_s1 + $0x20] sm:$0xff]   ;;  %v99_v18 = vadd.f32 %v588_v9, %v76_v13  ;;  %v49_v31 = vld [vmem:[%s747_s0 + $0x28] sm:$0xff]  ;;  %v523_v42 = vld [vmem:[%s746_s1 + $0x30] sm:$0xff]  }
   0x7   :  { %471 = vmatpush3.bf16.msra.mxu0 %v518_v1  ;;  %509 = vmatpush3.bf16.msra.mxu1 %v518_v1  ;;  %v48_v29 = vld [vmem:[%s747_s0 + $0x20] sm:$0xff]  ;;  %v57_v33 = vld [vmem:[%s747_s0 + $0x68] sm:$0xff]  ;;  %v78_v37 = vmul.f32 %v581_v6, %v55_v26  ;;  %v72_v39 = vmul.f32 %v581_v6, %v49_v31  ;;  %v92_v43 = vadd.f32 %v588_v9, %v69_v34  ;;  %v50_v48 = vld [vmem:[%s747_s0 + $0x30] sm:$0xff] }
   0x8   :  { %472 = vmatprep.subr.bf16.mxu0 %v519_v2  ;;  %502 = vmatprep.subr.bf16.mxu1 %v519_v2  ;;  %v98_v17 = vadd.f32 %v588_v9, %v75_v12  ;;  %v106_v19 = vmax.f32 %v90_v14, 0.0  ;;  %v107_v20 = vmax.f32 %v91_v15, 0.0  ;;  %v115_v23 = vmax.f32 %v99_v18, 0.0  ;;  %v56_v32 = vld [vmem:[%s747_s0 + $0x60] sm:$0xff]  ;;  %v51_v52 = vld [vmem:[%s747_s0 + $0x38] sm:$0xff]  ;;  %v58_v53 = vld [vmem:[%s747_s0 + $0x70] sm:$0xff] }
   0x9   :  { %v71_v38 = vmul.f32 %v581_v6, %v48_v29  ;;  %v79_v40 = vmul.f32 %v581_v6, %v56_v32  ;;  %v80_v41 = vmul.f32 %v581_v6, %v57_v33  ;;  %v93_v44 = vadd.f32 %v588_v9, %v70_v35  ;;  %v59_v54 = vld [vmem:[%s747_s0 + $0x78] sm:$0xff] }
   0xa   :  { %v114_v22 = vmax.f32 %v98_v17, 0.0  ;;  %v138_v28 = vpack.c.bf16 %v107_v20, %v106_v19  ;;  %v100_v45 = vadd.f32 %v588_v9, %v77_v36  ;;  %v101_v46 = vadd.f32 %v588_v9, %v78_v37  ;;  %v524_v55 = vld [vmem:[%s746_s1 + $0x38] sm:$0xff]  }
   0xb   :  { %473 = vmatpush3.bf16.msra.mxu0 %v519_v2  ;;  %510 = vmatpush3.bf16.msra.mxu1 %v519_v2  ;;  %v94_v47 = vadd.f32 %v588_v9, %v71_v38  ;;  %v95_v49 = vadd.f32 %v588_v9, %v72_v39  ;;  %v102_v50 = vadd.f32 %v588_v9, %v79_v40  ;;  %v108_v56 = vmax.f32 %v92_v43, 0.0 }
   0xc   :  { %474 = vmatprep.subr.bf16.mxu0 %v520_v3  ;;  %503 = vmatprep.subr.bf16.mxu1 %v520_v3  ;;  %v142_v30 = vpack.c.bf16 %v115_v23, %v114_v22  ;;  %v103_v51 = vadd.f32 %v588_v9, %v80_v41  ;;  %v109_v57 = vmax.f32 %v93_v44, 0.0  ;;  %v116_v58 = vmax.f32 %v100_v45, 0.0  ;;  %v680_v23 = vld [vmem:[%s751_s5] ss:$0 sm:$0xff] }
   0xd   :  { %484 = vmatprep.mubr.bf16.mxu0 %v138_v28  ;;  %v117_v59 = vmax.f32 %v101_v46, 0.0  ;;  %v73_v60 = vmul.f32 %v581_v6, %v50_v48  ;;  %v74_v61 = vmul.f32 %v581_v6, %v51_v52  ;;  %v81_v62 = vmul.f32 %v581_v6, %v58_v53 }
   0xe   :  { %492 = vmatprep.mubr.bf16.mxu1 %v142_v30  ;;  %v82_v63 = vmul.f32 %v581_v6, %v59_v54  ;;  %v110_v0 = vmax.f32 %v94_v47, 0.0  ;;  %v111_v1 = vmax.f32 %v95_v49, 0.0  ;;  %v118_v2 = vmax.f32 %v102_v50, 0.0 }
   0xf   :  { %475 = vmatpush3.bf16.msra.mxu0 %v520_v3  ;;  %511 = vmatpush3.bf16.msra.mxu1 %v520_v3  ;;  %v119_v3 = vmax.f32 %v103_v51, 0.0  ;;  %v139_v4 = vpack.c.bf16 %v109_v57, %v108_v56  ;;  %v143_v5 = vpack.c.bf16 %v117_v59, %v116_v58  ;;  %v96_v7 = vadd.f32 %v588_v9, %v73_v60 }
  0x10   :  { %476 = vmatprep.subr.bf16.mxu0 %v521_v16  ;;  %504 = vmatprep.subr.bf16.mxu1 %v521_v16  ;;  %v97_v8 = vadd.f32 %v588_v9, %v74_v61  ;;  %v104_v10 = vadd.f32 %v588_v9, %v81_v62  ;;  %v105_v11 = vadd.f32 %v588_v9, %v82_v63  ;;  %v450_v9 = vld [vmem:[%s750_s4] ss:$0 sm:$0xff] }
  0x11   :  { %v140_v6 = vpack.c.bf16 %v111_v1, %v110_v0  ;;  %v144_v12 = vpack.c.bf16 %v119_v3, %v118_v2  ;;  %v112_v13 = vmax.f32 %v96_v7, 0.0 }
  0x12   :  { %v113_v14 = vmax.f32 %v97_v8, 0.0  ;;  %v120_v15 = vmax.f32 %v104_v10, 0.0 }
  0x13   :  { %477 = vmatpush3.bf16.msra.mxu0 %v521_v16  ;;  %512 = vmatpush3.bf16.msra.mxu1 %v521_v16  ;;  %v121_v16 = vmax.f32 %v105_v11, 0.0 }
  0x14   :  { %478 = vmatprep.subr.bf16.mxu0 %v522_v27  ;;  %505 = vmatprep.subr.bf16.mxu1 %v522_v27  ;;  %v141_v17 = vpack.c.bf16 %v113_v14, %v112_v13 }
  0x15   :  { %v145_v18 = vpack.c.bf16 %v121_v16, %v120_v15 }
  0x17   :  { %479 = vmatpush3.bf16.msra.mxu0 %v522_v27  ;;  %513 = vmatpush3.bf16.msra.mxu1 %v522_v27 }
  0x18   :  { %480 = vmatprep.subr.bf16.mxu0 %v523_v42  ;;  %506 = vmatprep.subr.bf16.mxu1 %v523_v42 }
  0x1b   :  { %481 = vmatpush3.bf16.msra.mxu0 %v523_v42  ;;  %514 = vmatpush3.bf16.msra.mxu1 %v523_v42 }
  0x1c   :  { %482 = vmatprep.subr.bf16.mxu0 %v524_v55  ;;  %507 = vmatprep.subr.bf16.mxu1 %v524_v55 }
  0x1f   :  { %483 = vmatpush3.bf16.msra.mxu0 %v524_v55  ;;  %515 = vmatpush3.bf16.msra.mxu1 %v524_v55 }
  0x22   :  { %485 = vmatmul.mubr.bf16.vlgmr.msra.gmra.mrb[0].mxu0 %v139_v4  ;;  %493 = vmatmul.mubr.bf16.vlgmr.msra.gmra.mrb[0].mxu1 %v143_v5 }
  0x23   :  { %488 = vmatprep.mubr.bf16.mxu0 %v140_v6  ;;  %496 = vmatprep.mubr.bf16.mxu1 %v144_v12 }
  0x2a   :  { %489 = vmatmul.mubr.bf16.gmra.mrb[4].mxu0 %v141_v17  ;;  %497 = vmatmul.mubr.bf16.gmra.mrb[4].mxu1 %v145_v18 }
  0xf5   :  { %v486_v19 = vpop.f32.mrb[0].mxu0  ;;  %v494_v20 = vpop.f32.mrb[0].mxu1 }
  0xf6   :  { %v244_v21 = vpop.f32.mrb[1].mxu0  ;;  %v276_v22 = vpop.f32.mrb[1].mxu1  ;;  %v367_v26 = vmul.f32 %v486_v19, %v450_v9  ;;  %v375_v27 = vmul.f32 %v494_v20, %v450_v9 }
  0xf7   :  { %v487_v24 = vpop.f32.mrb[2].mxu0  ;;  %v495_v25 = vpop.f32.mrb[2].mxu1  ;;  %v365_v30 = vmul.f32 %v450_v9, %v244_v21  ;;  %v373_v31 = vmul.f32 %v450_v9, %v276_v22 }
  0xf8   :  { %v247_v28 = vpop.f32.mrb[3].mxu0  ;;  %v279_v29 = vpop.f32.mrb[3].mxu1  ;;  %v390_v32 = vadd.f32 %v680_v23, %v367_v26  ;;  %v398_v33 = vadd.f32 %v680_v23, %v375_v27  ;;  %v368_v34 = vmul.f32 %v487_v24, %v450_v9  ;;  %v376_v35 = vmul.f32 %v495_v25, %v450_v9 }
  0xf9   :  { %v388_v36 = vadd.f32 %v680_v23, %v365_v30  ;;  %v396_v37 = vadd.f32 %v680_v23, %v373_v31  ;;  %v366_v38 = vmul.f32 %v450_v9, %v247_v28  ;;  %v374_v39 = vmul.f32 %v450_v9, %v279_v29 }
  0xfa   :  { %v406_v40 = vmax.f32 %v390_v32, 0.0  ;;  %v414_v41 = vmax.f32 %v398_v33, 0.0  ;;  %v391_v42 = vadd.f32 %v680_v23, %v368_v34  ;;  %v399_v43 = vadd.f32 %v680_v23, %v376_v35 }
  0xfb   :  { %v404_v44 = vmax.f32 %v388_v36, 0.0  ;;  %v412_v45 = vmax.f32 %v396_v37, 0.0  ;;  %v389_v46 = vadd.f32 %v680_v23, %v366_v38  ;;  %v397_v47 = vadd.f32 %v680_v23, %v374_v39 }
  0xfc   :  { %422 = vst [vmem:[%s752_s6 + $0x10] sm:$0xff] %v406_v40  ;;  %430 = vst [vmem:[%s752_s6 + $0x50] sm:$0xff] %v414_v41  ;;  %v407_v50 = vmax.f32 %v391_v42, 0.0  ;;  %v415_v51 = vmax.f32 %v399_v43, 0.0 }
  0xfd   :  { %v490_v48 = vpop.f32.mrb[4].mxu0  ;;  %v498_v49 = vpop.f32.mrb[4].mxu1  ;;  %420 = vst [vmem:[%s752_s6] sm:$0xff] %v404_v44  ;;  %428 = vst [vmem:[%s752_s6 + $0x40] sm:$0xff] %v412_v45  ;;  %v405_v54 = vmax.f32 %v389_v46, 0.0  ;;  %v413_v55 = vmax.f32 %v397_v47, 0.0 }
  0xfe   :  { %v260_v52 = vpop.f32.mrb[5].mxu0  ;;  %v292_v53 = vpop.f32.mrb[5].mxu1  ;;  %423 = vst [vmem:[%s752_s6 + $0x18] sm:$0xff] %v407_v50  ;;  %431 = vst [vmem:[%s752_s6 + $0x58] sm:$0xff] %v415_v51  ;;  %v371_v58 = vmul.f32 %v490_v48, %v450_v9  ;;  %v379_v59 = vmul.f32 %v498_v49, %v450_v9 }
  0xff   :  { %v491_v56 = vpop.f32.mrb[6].mxu0  ;;  %v499_v57 = vpop.f32.mrb[6].mxu1  ;;  %421 = vst [vmem:[%s752_s6 + $0x8] sm:$0xff] %v405_v54  ;;  %429 = vst [vmem:[%s752_s6 + $0x48] sm:$0xff] %v413_v55  ;;  %v369_v62 = vmul.f32 %v450_v9, %v260_v52  ;;  %v377_v63 = vmul.f32 %v450_v9, %v292_v53 }
 0x100   :  { %v263_v60 = vpop.f32.mrb[7].mxu0  ;;  %v295_v61 = vpop.f32.mrb[7].mxu1  ;;  %v394_v0 = vadd.f32 %v680_v23, %v371_v58  ;;  %v402_v1 = vadd.f32 %v680_v23, %v379_v59  ;;  %v372_v2 = vmul.f32 %v491_v56, %v450_v9  ;;  %v380_v3 = vmul.f32 %v499_v57, %v450_v9 }
 0x101   :  { %v392_v4 = vadd.f32 %v680_v23, %v369_v62  ;;  %v400_v5 = vadd.f32 %v680_v23, %v377_v63  ;;  %v370_v7 = vmul.f32 %v450_v9, %v263_v60  ;;  %v378_v8 = vmul.f32 %v450_v9, %v295_v61 }
 0x102   :  { %v410_v10 = vmax.f32 %v394_v0, 0.0  ;;  %v418_v11 = vmax.f32 %v402_v1, 0.0  ;;  %v395_v6 = vadd.f32 %v680_v23, %v372_v2  ;;  %v403_v12 = vadd.f32 %v680_v23, %v380_v3 }
 0x103   :  { %v408_v13 = vmax.f32 %v392_v4, 0.0  ;;  %v416_v14 = vmax.f32 %v400_v5, 0.0  ;;  %v393_v15 = vadd.f32 %v680_v23, %v370_v7  ;;  %v401_v16 = vadd.f32 %v680_v23, %v378_v8 }
 0x104   :  { %426 = vst [vmem:[%s752_s6 + $0x30] sm:$0xff] %v410_v10  ;;  %434 = vst [vmem:[%s752_s6 + $0x70] sm:$0xff] %v418_v11  ;;  %v411_v17 = vmax.f32 %v395_v6, 0.0  ;;  %v419_v18 = vmax.f32 %v403_v12, 0.0 }
 0x105   :  { %424 = vst [vmem:[%s752_s6 + $0x20] sm:$0xff] %v408_v13  ;;  %432 = vst [vmem:[%s752_s6 + $0x60] sm:$0xff] %v416_v14  ;;  %v409_v19 = vmax.f32 %v393_v15, 0.0  ;;  %v417_v9 = vmax.f32 %v401_v16, 0.0 }
 0x106   :  { %427 = vst [vmem:[%s752_s6 + $0x38] sm:$0xff] %v411_v17  ;;  %435 = vst [vmem:[%s752_s6 + $0x78] sm:$0xff] %v419_v18 }
 0x107   :  { %425 = vst [vmem:[%s752_s6 + $0x28] sm:$0xff] %v409_v19  ;;  %433 = vst [vmem:[%s752_s6 + $0x68] sm:$0xff] %v417_v9 }

// kernel: densenet_forward.93
= control target key start
LH: loop header
LB: loop body
LE: loop exit
PB: predicated region body
PF: predicated region fallthrough
CT: control target
= control target key end

     0   :  { %vm152_vm0 = vcmask 523264   ;;  %s1095_s0 = inlined_call_operand.vmem [shape: f32[9,128,64], index: 0, kind: input, shape index: {}]   ;;  %s1096_s1 = inlined_call_operand.vmem [shape: f32[128,64], index: 1, kind: output, shape index: {}]  }
   0x1   :  { %v8_v0 = vld [vmem:[%s1095_s0] sm:$0xff]  ;;  %v9_v13 = vld [vmem:[%s1095_s0 + $0x8] sm:$0xff]  ;;  %v10_v32 = vld [vmem:[%s1095_s0 + $0x10] sm:$0xff] }
   0x2   :  { %v24_v1 = vld [vmem:[%s1095_s0 + $0x80] sm:$0xff]  ;;  %v153_v5 = vsel %vm152_vm0, %v8_v0, -inf  ;;  %v25_v14 = vld [vmem:[%s1095_s0 + $0x88] sm:$0xff]  ;;  %v170_v19 = vsel %vm152_vm0, %v9_v13, -inf  ;;  %v26_v33 = vld [vmem:[%s1095_s0 + $0x90] sm:$0xff]  ;;  %v187_v38 = vsel %vm152_vm0, %v10_v32, -inf }
   0x3   :  { %v40_v2 = vld [vmem:[%s1095_s0 + $0x100] sm:$0xff]  ;;  %v154_v6 = vsel %vm152_vm0, %v24_v1, -inf  ;;  %v41_v15 = vld [vmem:[%s1095_s0 + $0x108] sm:$0xff]  ;;  %v171_v20 = vsel %vm152_vm0, %v25_v14, -inf  ;;  %v42_v34 = vld [vmem:[%s1095_s0 + $0x110] sm:$0xff]  ;;  %v188_v39 = vsel %vm152_vm0, %v26_v33, -inf }
   0x4   :  { %v56_v3 = vld [vmem:[%s1095_s0 + $0x180] sm:$0xff]  ;;  %v156_v7 = vsel %vm152_vm0, %v40_v2, -inf  ;;  %v155_v11 = vmax.f32 %v153_v5, %v154_v6  ;;  %v57_v18 = vld [vmem:[%s1095_s0 + $0x188] sm:$0xff]  ;;  %v173_v21 = vsel %vm152_vm0, %v41_v15, -inf  ;;  %v172_v27 = vmax.f32 %v170_v19, %v171_v20  ;;  %v58_v37 = vld [vmem:[%s1095_s0 + $0x190] sm:$0xff] }
   0x5   :  { %v72_v4 = vld [vmem:[%s1095_s0 + $0x200] sm:$0xff]  ;;  %v158_v12 = vsel %vm152_vm0, %v56_v3, -inf  ;;  %v73_v24 = vld [vmem:[%s1095_s0 + $0x208] sm:$0xff]  ;;  %v175_v31 = vsel %vm152_vm0, %v57_v18, -inf  ;;  %v190_v40 = vsel %vm152_vm0, %v42_v34, -inf  ;;  %v74_v45 = vld [vmem:[%s1095_s0 + $0x210] sm:$0xff]  ;;  %v189_v46 = vmax.f32 %v187_v38, %v188_v39 }
   0x6   :  { %v88_v8 = vld [vmem:[%s1095_s0 + $0x280] sm:$0xff]  ;;  %v157_v17 = vmax.f32 %v155_v11, %v156_v7  ;;  %v160_v22 = vsel %vm152_vm0, %v72_v4, -inf  ;;  %v89_v25 = vld [vmem:[%s1095_s0 + $0x288] sm:$0xff]  ;;  %v174_v36 = vmax.f32 %v172_v27, %v173_v21  ;;  %v177_v44 = vsel %vm152_vm0, %v73_v24, -inf  ;;  %v11_v51 = vld [vmem:[%s1095_s0 + $0x18] sm:$0xff] }
   0x7   :  { %v104_v9 = vld [vmem:[%s1095_s0 + $0x300] sm:$0xff]  ;;  %v162_v23 = vsel %vm152_vm0, %v88_v8, -inf  ;;  %v105_v26 = vld [vmem:[%s1095_s0 + $0x308] sm:$0xff]  ;;  %v179_v48 = vsel %vm152_vm0, %v89_v25, -inf  ;;  %v192_v50 = vsel %vm152_vm0, %v58_v37, -inf  ;;  %v27_v52 = vld [vmem:[%s1095_s0 + $0x98] sm:$0xff]  ;;  %v191_v58 = vmax.f32 %v189_v46, %v190_v40 }
   0x8   :  { %v120_v10 = vld [vmem:[%s1095_s0 + $0x380] sm:$0xff]  ;;  %v159_v28 = vmax.f32 %v157_v17, %v158_v12  ;;  %v164_v29 = vsel %vm152_vm0, %v104_v9, -inf  ;;  %v121_v35 = vld [vmem:[%s1095_s0 + $0x388] sm:$0xff]  ;;  %v176_v47 = vmax.f32 %v174_v36, %v175_v31  ;;  %v181_v49 = vsel %vm152_vm0, %v105_v26, -inf  ;;  %v43_v53 = vld [vmem:[%s1095_s0 + $0x118] sm:$0xff] }
   0x9   :  { %v136_v16 = vld [vmem:[%s1095_s0 + $0x400] sm:$0xff]  ;;  %v166_v30 = vsel %vm152_vm0, %v120_v10, -inf  ;;  %v137_v43 = vld [vmem:[%s1095_s0 + $0x408] sm:$0xff]  ;;  %v183_v55 = vsel %vm152_vm0, %v121_v35, -inf  ;;  %v90_v56 = vld [vmem:[%s1095_s0 + $0x290] sm:$0xff]  ;;  %v204_v60 = vsel %vm152_vm0, %v11_v51, -inf  ;;  %v193_v4 = vmax.f32 %v191_v58, %v192_v50 }
   0xa   :  { %v161_v41 = vmax.f32 %v159_v28, %v160_v22  ;;  %v168_v42 = vsel %vm152_vm0, %v136_v16, -inf  ;;  %v106_v57 = vld [vmem:[%s1095_s0 + $0x310] sm:$0xff]  ;;  %v59_v59 = vld [vmem:[%s1095_s0 + $0x198] sm:$0xff]  ;;  %v178_v61 = vmax.f32 %v176_v47, %v177_v44  ;;  %v194_v62 = vsel %vm152_vm0, %v74_v45, -inf  ;;  %v12_v6 = vld [vmem:[%s1095_s0 + $0x20] sm:$0xff] }
   0xb   :  { %v75_v63 = vld [vmem:[%s1095_s0 + $0x218] sm:$0xff]  ;;  %v205_v0 = vsel %vm152_vm0, %v27_v52, -inf  ;;  %v207_v1 = vsel %vm152_vm0, %v43_v53, -inf  ;;  %v185_v3 = vsel %vm152_vm0, %v137_v43, -inf  ;;  %v28_v7 = vld [vmem:[%s1095_s0 + $0xa0] sm:$0xff]  ;;  %v196_v10 = vsel %vm152_vm0, %v90_v56, -inf }
   0xc   :  { %v163_v54 = vmax.f32 %v161_v41, %v162_v23  ;;  %v206_v5 = vmax.f32 %v204_v60, %v205_v0  ;;  %v44_v8 = vld [vmem:[%s1095_s0 + $0x120] sm:$0xff]  ;;  %v180_v9 = vmax.f32 %v178_v61, %v179_v48  ;;  %v198_v11 = vsel %vm152_vm0, %v106_v57, -inf  ;;  %v122_v14 = vld [vmem:[%s1095_s0 + $0x390] sm:$0xff]  ;;  %v91_v16 = vld [vmem:[%s1095_s0 + $0x298] sm:$0xff] }
   0xd   :  { %v209_v12 = vsel %vm152_vm0, %v59_v59, -inf  ;;  %v195_v15 = vmax.f32 %v193_v4, %v194_v62  ;;  %v211_v18 = vsel %vm152_vm0, %v75_v63, -inf  ;;  %v60_v19 = vld [vmem:[%s1095_s0 + $0x1a0] sm:$0xff]  ;;  %v138_v21 = vld [vmem:[%s1095_s0 + $0x410] sm:$0xff]  ;;  %v221_v22 = vsel %vm152_vm0, %v12_v6, -inf  ;;  %v107_v27 = vld [vmem:[%s1095_s0 + $0x318] sm:$0xff] }
   0xe   :  { %v165_v2 = vmax.f32 %v163_v54, %v164_v29  ;;  %v208_v17 = vmax.f32 %v206_v5, %v207_v1  ;;  %v182_v20 = vmax.f32 %v180_v9, %v181_v49  ;;  %v222_v23 = vsel %vm152_vm0, %v28_v7, -inf  ;;  %v76_v29 = vld [vmem:[%s1095_s0 + $0x220] sm:$0xff]  ;;  %v13_v31 = vld [vmem:[%s1095_s0 + $0x28] sm:$0xff]  ;;  %v123_v39 = vld [vmem:[%s1095_s0 + $0x398] sm:$0xff] }
   0xf   :  { %v224_v24 = vsel %vm152_vm0, %v44_v8, -inf  ;;  %v197_v26 = vmax.f32 %v195_v15, %v196_v10  ;;  %v200_v33 = vsel %vm152_vm0, %v122_v14, -inf  ;;  %v213_v34 = vsel %vm152_vm0, %v91_v16, -inf  ;;  %v29_v36 = vld [vmem:[%s1095_s0 + $0xa8] sm:$0xff]  ;;  %v92_v41 = vld [vmem:[%s1095_s0 + $0x2a0] sm:$0xff]  ;;  %v139_v50 = vld [vmem:[%s1095_s0 + $0x418] sm:$0xff] }
  0x10   :  { %v167_v13 = vmax.f32 %v165_v2, %v166_v30  ;;  %v210_v28 = vmax.f32 %v208_v17, %v209_v12  ;;  %v223_v30 = vmax.f32 %v221_v22, %v222_v23  ;;  %v184_v32 = vmax.f32 %v182_v20, %v183_v55  ;;  %v45_v43 = vld [vmem:[%s1095_s0 + $0x128] sm:$0xff]  ;;  %v108_v52 = vld [vmem:[%s1095_s0 + $0x320] sm:$0xff]  ;;  %v14_v60 = vld [vmem:[%s1095_s0 + $0x30] sm:$0xff] }
  0x11   :  { %v226_v35 = vsel %vm152_vm0, %v60_v19, -inf  ;;  %v199_v37 = vmax.f32 %v197_v26, %v198_v11  ;;  %v202_v38 = vsel %vm152_vm0, %v138_v21, -inf  ;;  %v215_v45 = vsel %vm152_vm0, %v107_v27, -inf  ;;  %v61_v47 = vld [vmem:[%s1095_s0 + $0x1a8] sm:$0xff]  ;;  %v30_v61 = vld [vmem:[%s1095_s0 + $0xb0] sm:$0xff]  ;;  %v124_v0 = vld [vmem:[%s1095_s0 + $0x3a0] sm:$0xff] }
  0x12   :  { %v169_v25 = vmax.f32 %v167_v13, %v168_v42  ;;  %v212_v40 = vmax.f32 %v210_v28, %v211_v18  ;;  %v225_v42 = vmax.f32 %v223_v30, %v224_v24  ;;  %v186_v44 = vmax.f32 %v184_v32, %v185_v3  ;;  %v77_v54 = vld [vmem:[%s1095_s0 + $0x228] sm:$0xff]  ;;  %v46_v3 = vld [vmem:[%s1095_s0 + $0x130] sm:$0xff]  ;;  %v140_v11 = vld [vmem:[%s1095_s0 + $0x420] sm:$0xff] }
  0x13   :  { %v228_v46 = vsel %vm152_vm0, %v76_v29, -inf  ;;  %v238_v48 = vsel %vm152_vm0, %v13_v31, -inf  ;;  %v201_v49 = vmax.f32 %v199_v37, %v200_v33  ;;  %v239_v55 = vsel %vm152_vm0, %v29_v36, -inf  ;;  %v93_v6 = vld [vmem:[%s1095_s0 + $0x2a8] sm:$0xff]  ;;  %v62_v9 = vld [vmem:[%s1095_s0 + $0x1b0] sm:$0xff]  ;;  %v15_v21 = vld [vmem:[%s1095_s0 + $0x38] sm:$0xff] }
  0x14   :  { %425 = vst.msk [vmem:[%s1096_s1] sm:$0xff] %vm152_vm0, %v169_v25  ;;  %v214_v51 = vmax.f32 %v212_v40, %v213_v34  ;;  %v227_v53 = vmax.f32 %v225_v42, %v226_v35  ;;  %426 = vst.msk [vmem:[%s1096_s1 + $0x8] sm:$0xff] %vm152_vm0, %v186_v44  ;;  %v217_v56 = vsel %vm152_vm0, %v123_v39, -inf  ;;  %v230_v57 = vsel %vm152_vm0, %v92_v41, -inf  ;;  %v109_v13 = vld [vmem:[%s1095_s0 + $0x328] sm:$0xff]  ;;  %v78_v18 = vld [vmem:[%s1095_s0 + $0x230] sm:$0xff] }
  0x15   :  { %v240_v58 = vmax.f32 %v238_v48, %v239_v55  ;;  %v241_v59 = vsel %vm152_vm0, %v45_v43, -inf  ;;  %v203_v62 = vmax.f32 %v201_v49, %v202_v38  ;;  %v243_v2 = vsel %vm152_vm0, %v61_v47, -inf  ;;  %v31_v22 = vld [vmem:[%s1095_s0 + $0xb8] sm:$0xff]  ;;  %v125_v29 = vld [vmem:[%s1095_s0 + $0x3a8] sm:$0xff]  ;;  %v94_v32 = vld [vmem:[%s1095_s0 + $0x2b0] sm:$0xff] }
  0x16   :  { %v216_v63 = vmax.f32 %v214_v51, %v215_v45  ;;  %v229_v1 = vmax.f32 %v227_v53, %v228_v46  ;;  %v219_v4 = vsel %vm152_vm0, %v139_v50, -inf  ;;  %v232_v5 = vsel %vm152_vm0, %v108_v52, -inf  ;;  %v47_v27 = vld [vmem:[%s1095_s0 + $0x138] sm:$0xff]  ;;  %v141_v36 = vld [vmem:[%s1095_s0 + $0x428] sm:$0xff]  ;;  %v110_v37 = vld [vmem:[%s1095_s0 + $0x330] sm:$0xff] }
  0x17   :  { %v242_v7 = vmax.f32 %v240_v58, %v241_v59  ;;  %v245_v8 = vsel %vm152_vm0, %v77_v54, -inf  ;;  %427 = vst.msk [vmem:[%s1096_s1 + $0x10] sm:$0xff] %vm152_vm0, %v203_v62  ;;  %v255_v14 = vsel %vm152_vm0, %v14_v60, -inf  ;;  %v256_v15 = vsel %vm152_vm0, %v30_v61, -inf  ;;  %v63_v34 = vld [vmem:[%s1095_s0 + $0x1b8] sm:$0xff]  ;;  %v16_v46 = vld [vmem:[%s1095_s0 + $0x40] sm:$0xff] }
  0x18   :  { %v218_v10 = vmax.f32 %v216_v63, %v217_v56  ;;  %v231_v12 = vmax.f32 %v229_v1, %v230_v57  ;;  %v234_v16 = vsel %vm152_vm0, %v124_v0, -inf  ;;  %v257_v19 = vmax.f32 %v255_v14, %v256_v15  ;;  %v79_v43 = vld [vmem:[%s1095_s0 + $0x238] sm:$0xff]  ;;  %v32_v47 = vld [vmem:[%s1095_s0 + $0xc0] sm:$0xff]  ;;  %v126_v50 = vld [vmem:[%s1095_s0 + $0x3b0] sm:$0xff] }
  0x19   :  { %v244_v17 = vmax.f32 %v242_v7, %v243_v2  ;;  %v258_v20 = vsel %vm152_vm0, %v46_v3, -inf  ;;  %v247_v25 = vsel %vm152_vm0, %v93_v6, -inf  ;;  %v260_v26 = vsel %vm152_vm0, %v62_v9, -inf  ;;  %v95_v56 = vld [vmem:[%s1095_s0 + $0x2b8] sm:$0xff]  ;;  %v48_v58 = vld [vmem:[%s1095_s0 + $0x140] sm:$0xff]  ;;  %v142_v60 = vld [vmem:[%s1095_s0 + $0x430] sm:$0xff] }
  0x1a   :  { %v220_v23 = vmax.f32 %v218_v10, %v219_v4  ;;  %v233_v24 = vmax.f32 %v231_v12, %v232_v5  ;;  %v236_v28 = vsel %vm152_vm0, %v140_v11, -inf  ;;  %v249_v31 = vsel %vm152_vm0, %v109_v13, -inf  ;;  %v64_v59 = vld [vmem:[%s1095_s0 + $0x1c0] sm:$0xff]  ;;  %v111_v3 = vld [vmem:[%s1095_s0 + $0x338] sm:$0xff]  ;;  %v17_v7 = vld [vmem:[%s1095_s0 + $0x48] sm:$0xff] }
  0x1b   :  { %v246_v30 = vmax.f32 %v244_v17, %v245_v8  ;;  %v259_v33 = vmax.f32 %v257_v19, %v258_v20  ;;  %v262_v38 = vsel %vm152_vm0, %v78_v18, -inf  ;;  %v272_v39 = vsel %vm152_vm0, %v15_v21, -inf  ;;  %v80_v5 = vld [vmem:[%s1095_s0 + $0x240] sm:$0xff]  ;;  %v33_v12 = vld [vmem:[%s1095_s0 + $0xc8] sm:$0xff]  ;;  %v127_v15 = vld [vmem:[%s1095_s0 + $0x3b8] sm:$0xff] }
  0x1c   :  { %428 = vst.msk [vmem:[%s1096_s1 + $0x18] sm:$0xff] %vm152_vm0, %v220_v23  ;;  %v235_v35 = vmax.f32 %v233_v24, %v234_v16  ;;  %v273_v40 = vsel %vm152_vm0, %v31_v22, -inf  ;;  %v275_v45 = vsel %vm152_vm0, %v47_v27, -inf  ;;  %v251_v49 = vsel %vm152_vm0, %v125_v29, -inf  ;;  %v96_v17 = vld [vmem:[%s1095_s0 + $0x2c0] sm:$0xff]  ;;  %v49_v19 = vld [vmem:[%s1095_s0 + $0x148] sm:$0xff] }
  0x1d   :  { %v248_v41 = vmax.f32 %v246_v30, %v247_v25  ;;  %v261_v42 = vmax.f32 %v259_v33, %v260_v26  ;;  %v274_v44 = vmax.f32 %v272_v39, %v273_v40  ;;  %v264_v51 = vsel %vm152_vm0, %v94_v32, -inf  ;;  %v65_v23 = vld [vmem:[%s1095_s0 + $0x1c8] sm:$0xff]  ;;  %v143_v26 = vld [vmem:[%s1095_s0 + $0x438] sm:$0xff]  ;;  %v128_v40 = vld [vmem:[%s1095_s0 + $0x3c0] sm:$0xff] }
  0x1e   :  { %v237_v48 = vmax.f32 %v235_v35, %v236_v28  ;;  %v277_v52 = vsel %vm152_vm0, %v63_v34, -inf  ;;  %v253_v54 = vsel %vm152_vm0, %v141_v36, -inf  ;;  %v266_v61 = vsel %vm152_vm0, %v110_v37, -inf  ;;  %v112_v28 = vld [vmem:[%s1095_s0 + $0x340] sm:$0xff]  ;;  %v81_v30 = vld [vmem:[%s1095_s0 + $0x248] sm:$0xff]  ;;  %v18_v36 = vld [vmem:[%s1095_s0 + $0x50] sm:$0xff] }
  0x1f   :  { %v250_v53 = vmax.f32 %v248_v41, %v249_v31  ;;  %v263_v55 = vmax.f32 %v261_v42, %v262_v38  ;;  %v276_v57 = vmax.f32 %v274_v44, %v275_v45  ;;  %v279_v62 = vsel %vm152_vm0, %v79_v43, -inf  ;;  %v34_v37 = vld [vmem:[%s1095_s0 + $0xd0] sm:$0xff] }
  0x20   :  { %429 = vst.msk [vmem:[%s1096_s1 + $0x20] sm:$0xff] %vm152_vm0, %v237_v48  ;;  %v289_v63 = vsel %vm152_vm0, %v16_v46, -inf  ;;  %v290_v0 = vsel %vm152_vm0, %v32_v47, -inf  ;;  %v268_v8 = vsel %vm152_vm0, %v126_v50, -inf  ;;  %v281_v9 = vsel %vm152_vm0, %v95_v56, -inf  ;;  %v50_v43 = vld [vmem:[%s1095_s0 + $0x150] sm:$0xff] }
  0x21   :  { %v252_v1 = vmax.f32 %v250_v53, %v251_v49  ;;  %v265_v2 = vmax.f32 %v263_v55, %v264_v51  ;;  %v278_v4 = vmax.f32 %v276_v57, %v277_v52  ;;  %v291_v6 = vmax.f32 %v289_v63, %v290_v0  ;;  %v97_v46 = vld [vmem:[%s1095_s0 + $0x2c8] sm:$0xff]  ;;  %v66_v49 = vld [vmem:[%s1095_s0 + $0x1d0] sm:$0xff]  ;;  %v144_v51 = vld [vmem:[%s1095_s0 + $0x440] sm:$0xff] }
  0x22   :  { %v292_v10 = vsel %vm152_vm0, %v48_v58, -inf  ;;  %v294_v11 = vsel %vm152_vm0, %v64_v59, -inf  ;;  %v270_v20 = vsel %vm152_vm0, %v142_v60, -inf  ;;  %v283_v21 = vsel %vm152_vm0, %v111_v3, -inf  ;;  %v113_v53 = vld [vmem:[%s1095_s0 + $0x348] sm:$0xff]  ;;  %v82_v58 = vld [vmem:[%s1095_s0 + $0x250] sm:$0xff] }
  0x23   :  { %v254_v13 = vmax.f32 %v252_v1, %v253_v54  ;;  %v267_v14 = vmax.f32 %v265_v2, %v266_v61  ;;  %v280_v16 = vmax.f32 %v278_v4, %v279_v62  ;;  %v293_v18 = vmax.f32 %v291_v6, %v292_v10  ;;  %v19_v61 = vld [vmem:[%s1095_s0 + $0x58] sm:$0xff] }
  0x24   :  { %v296_v22 = vsel %vm152_vm0, %v80_v5, -inf  ;;  %v306_v24 = vsel %vm152_vm0, %v17_v7, -inf  ;;  %v307_v31 = vsel %vm152_vm0, %v33_v12, -inf  ;;  %v285_v32 = vsel %vm152_vm0, %v127_v15, -inf  ;;  %v35_v62 = vld [vmem:[%s1095_s0 + $0xd8] sm:$0xff]  ;;  %v129_v5 = vld [vmem:[%s1095_s0 + $0x3c8] sm:$0xff] }
  0x25   :  { %430 = vst.msk [vmem:[%s1096_s1 + $0x28] sm:$0xff] %vm152_vm0, %v254_v13  ;;  %v269_v25 = vmax.f32 %v267_v14, %v268_v8  ;;  %v282_v27 = vmax.f32 %v280_v16, %v281_v9  ;;  %v295_v29 = vmax.f32 %v293_v18, %v294_v11  ;;  %v298_v33 = vsel %vm152_vm0, %v96_v17, -inf  ;;  %v51_v3 = vld [vmem:[%s1095_s0 + $0x158] sm:$0xff]  ;;  %v98_v8 = vld [vmem:[%s1095_s0 + $0x2d0] sm:$0xff]  ;;  %v145_v12 = vld [vmem:[%s1095_s0 + $0x448] sm:$0xff] }
  0x26   :  { %v308_v34 = vmax.f32 %v306_v24, %v307_v31  ;;  %v309_v35 = vsel %vm152_vm0, %v49_v19, -inf  ;;  %v311_v42 = vsel %vm152_vm0, %v65_v23, -inf  ;;  %v287_v44 = vsel %vm152_vm0, %v143_v26, -inf  ;;  %v67_v10 = vld [vmem:[%s1095_s0 + $0x1d8] sm:$0xff]  ;;  %v114_v13 = vld [vmem:[%s1095_s0 + $0x350] sm:$0xff]  ;;  %v36_v23 = vld [vmem:[%s1095_s0 + $0xe0] sm:$0xff] }
  0x27   :  { %v271_v38 = vmax.f32 %v269_v25, %v270_v20  ;;  %v284_v39 = vmax.f32 %v282_v27, %v283_v21  ;;  %v297_v41 = vmax.f32 %v295_v29, %v296_v22  ;;  %v300_v45 = vsel %vm152_vm0, %v112_v28, -inf  ;;  %v83_v19 = vld [vmem:[%s1095_s0 + $0x258] sm:$0xff]  ;;  %v20_v22 = vld [vmem:[%s1095_s0 + $0x60] sm:$0xff]  ;;  %v130_v26 = vld [vmem:[%s1095_s0 + $0x3d0] sm:$0xff] }
  0x28   :  { %v310_v47 = vmax.f32 %v308_v34, %v309_v35  ;;  %v313_v48 = vsel %vm152_vm0, %v81_v30, -inf  ;;  %v323_v54 = vsel %vm152_vm0, %v18_v36, -inf  ;;  %v324_v55 = vsel %vm152_vm0, %v34_v37, -inf  ;;  %v52_v34 = vld [vmem:[%s1095_s0 + $0x160] sm:$0xff]  ;;  %v146_v36 = vld [vmem:[%s1095_s0 + $0x450] sm:$0xff] }
  0x29   :  { %431 = vst.msk [vmem:[%s1096_s1 + $0x30] sm:$0xff] %vm152_vm0, %v271_v38  ;;  %v286_v50 = vmax.f32 %v284_v39, %v285_v32  ;;  %v299_v52 = vmax.f32 %v297_v41, %v298_v33  ;;  %v302_v56 = vsel %vm152_vm0, %v128_v40, -inf  ;;  %v325_v59 = vmax.f32 %v323_v54, %v324_v55  ;;  %v99_v32 = vld [vmem:[%s1095_s0 + $0x2d8] sm:$0xff]  ;;  %v68_v35 = vld [vmem:[%s1095_s0 + $0x1e0] sm:$0xff] }
  0x2a   :  { %v312_v57 = vmax.f32 %v310_v47, %v311_v42  ;;  %v326_v60 = vsel %vm152_vm0, %v50_v43, -inf  ;;  %v315_v1 = vsel %vm152_vm0, %v97_v46, -inf  ;;  %v328_v2 = vsel %vm152_vm0, %v66_v49, -inf  ;;  %v115_v43 = vld [vmem:[%s1095_s0 + $0x358] sm:$0xff]  ;;  %v21_v47 = vld [vmem:[%s1095_s0 + $0x68] sm:$0xff] }
  0x2b   :  { %v288_v63 = vmax.f32 %v286_v50, %v287_v44  ;;  %v301_v0 = vmax.f32 %v299_v52, %v300_v45  ;;  %v304_v4 = vsel %vm152_vm0, %v144_v51, -inf  ;;  %v317_v7 = vsel %vm152_vm0, %v113_v53, -inf  ;;  %v84_v45 = vld [vmem:[%s1095_s0 + $0x260] sm:$0xff]  ;;  %v37_v52 = vld [vmem:[%s1095_s0 + $0xe8] sm:$0xff]  ;;  %v131_v55 = vld [vmem:[%s1095_s0 + $0x3d8] sm:$0xff] }
  0x2c   :  { %v314_v6 = vmax.f32 %v312_v57, %v313_v48  ;;  %v327_v9 = vmax.f32 %v325_v59, %v326_v60  ;;  %v330_v14 = vsel %vm152_vm0, %v82_v58, -inf  ;;  %v340_v15 = vsel %vm152_vm0, %v19_v61, -inf  ;;  %v100_v57 = vld [vmem:[%s1095_s0 + $0x2e0] sm:$0xff]  ;;  %v53_v59 = vld [vmem:[%s1095_s0 + $0x168] sm:$0xff] }
  0x2d   :  { %432 = vst.msk [vmem:[%s1096_s1 + $0x38] sm:$0xff] %vm152_vm0, %v288_v63  ;;  %v303_v11 = vmax.f32 %v301_v0, %v302_v56  ;;  %v341_v16 = vsel %vm152_vm0, %v35_v62, -inf  ;;  %v343_v21 = vsel %vm152_vm0, %v51_v3, -inf  ;;  %v319_v25 = vsel %vm152_vm0, %v129_v5, -inf  ;;  %v69_v63 = vld [vmem:[%s1095_s0 + $0x1e8] sm:$0xff] }
  0x2e   :  { %v316_v17 = vmax.f32 %v314_v6, %v315_v1  ;;  %v329_v18 = vmax.f32 %v327_v9, %v328_v2  ;;  %v342_v20 = vmax.f32 %v340_v15, %v341_v16  ;;  %v332_v27 = vsel %vm152_vm0, %v98_v8, -inf  ;;  %v147_v2 = vld [vmem:[%s1095_s0 + $0x458] sm:$0xff]  ;;  %v85_v6 = vld [vmem:[%s1095_s0 + $0x268] sm:$0xff]  ;;  %v132_v16 = vld [vmem:[%s1095_s0 + $0x3e0] sm:$0xff] }
  0x2f   :  { %v305_v24 = vmax.f32 %v303_v11, %v304_v4  ;;  %v345_v28 = vsel %vm152_vm0, %v67_v10, -inf  ;;  %v321_v30 = vsel %vm152_vm0, %v145_v12, -inf  ;;  %v334_v37 = vsel %vm152_vm0, %v114_v13, -inf  ;;  %v116_v4 = vld [vmem:[%s1095_s0 + $0x360] sm:$0xff]  ;;  %v22_v12 = vld [vmem:[%s1095_s0 + $0x70] sm:$0xff] }
  0x30   :  { %v318_v29 = vmax.f32 %v316_v17, %v317_v7  ;;  %v331_v31 = vmax.f32 %v329_v18, %v330_v14  ;;  %v344_v33 = vmax.f32 %v342_v20, %v343_v21  ;;  %v347_v38 = vsel %vm152_vm0, %v83_v19, -inf  ;;  %v38_v13 = vld [vmem:[%s1095_s0 + $0xf0] sm:$0xff] }
  0x31   :  { %433 = vst.msk [vmem:[%s1096_s1 + $0x40] sm:$0xff] %vm152_vm0, %v305_v24  ;;  %v357_v39 = vsel %vm152_vm0, %v20_v22, -inf  ;;  %v358_v40 = vsel %vm152_vm0, %v36_v23, -inf  ;;  %v336_v48 = vsel %vm152_vm0, %v130_v26, -inf  ;;  %v349_v49 = vsel %vm152_vm0, %v99_v32, -inf  ;;  %v54_v19 = vld [vmem:[%s1095_s0 + $0x170] sm:$0xff] }
  0x32   :  { %v320_v41 = vmax.f32 %v318_v29, %v319_v25  ;;  %v333_v42 = vmax.f32 %v331_v31, %v332_v27  ;;  %v346_v44 = vmax.f32 %v344_v33, %v345_v28  ;;  %v359_v46 = vmax.f32 %v357_v39, %v358_v40  ;;  %v101_v22 = vld [vmem:[%s1095_s0 + $0x2e8] sm:$0xff]  ;;  %v70_v25 = vld [vmem:[%s1095_s0 + $0x1f0] sm:$0xff]  ;;  %v148_v27 = vld [vmem:[%s1095_s0 + $0x460] sm:$0xff] }
  0x33   :  { %v360_v50 = vsel %vm152_vm0, %v52_v34, -inf  ;;  %v362_v51 = vsel %vm152_vm0, %v68_v35, -inf  ;;  %v338_v60 = vsel %vm152_vm0, %v146_v36, -inf  ;;  %v351_v61 = vsel %vm152_vm0, %v115_v43, -inf  ;;  %v117_v29 = vld [vmem:[%s1095_s0 + $0x368] sm:$0xff]  ;;  %v86_v34 = vld [vmem:[%s1095_s0 + $0x270] sm:$0xff] }
  0x34   :  { %v322_v53 = vmax.f32 %v320_v41, %v321_v30  ;;  %v335_v54 = vmax.f32 %v333_v42, %v334_v37  ;;  %v348_v56 = vmax.f32 %v346_v44, %v347_v38  ;;  %v361_v58 = vmax.f32 %v359_v46, %v360_v50  ;;  %v23_v37 = vld [vmem:[%s1095_s0 + $0x78] sm:$0xff] }
  0x35   :  { %v364_v62 = vsel %vm152_vm0, %v84_v45, -inf  ;;  %v374_v0 = vsel %vm152_vm0, %v21_v47, -inf  ;;  %v375_v7 = vsel %vm152_vm0, %v37_v52, -inf  ;;  %v353_v8 = vsel %vm152_vm0, %v131_v55, -inf  ;;  %v39_v38 = vld [vmem:[%s1095_s0 + $0xf8] sm:$0xff]  ;;  %v133_v45 = vld [vmem:[%s1095_s0 + $0x3e8] sm:$0xff] }
  0x36   :  { %434 = vst.msk [vmem:[%s1096_s1 + $0x48] sm:$0xff] %vm152_vm0, %v322_v53  ;;  %v337_v1 = vmax.f32 %v335_v54, %v336_v48  ;;  %v350_v3 = vmax.f32 %v348_v56, %v349_v49  ;;  %v363_v5 = vmax.f32 %v361_v58, %v362_v51  ;;  %v366_v9 = vsel %vm152_vm0, %v100_v57, -inf  ;;  %v55_v43 = vld [vmem:[%s1095_s0 + $0x178] sm:$0xff]  ;;  %v102_v48 = vld [vmem:[%s1095_s0 + $0x2f0] sm:$0xff]  ;;  %v149_v55 = vld [vmem:[%s1095_s0 + $0x468] sm:$0xff] }
  0x37   :  { %v376_v10 = vmax.f32 %v374_v0, %v375_v7  ;;  %v377_v11 = vsel %vm152_vm0, %v53_v59, -inf  ;;  %v379_v18 = vsel %vm152_vm0, %v69_v63, -inf  ;;  %v355_v20 = vsel %vm152_vm0, %v147_v2, -inf  ;;  %v71_v50 = vld [vmem:[%s1095_s0 + $0x1f8] sm:$0xff]  ;;  %v118_v57 = vld [vmem:[%s1095_s0 + $0x370] sm:$0xff] }
  0x38   :  { %v339_v14 = vmax.f32 %v337_v1, %v338_v60  ;;  %v352_v15 = vmax.f32 %v350_v3, %v351_v61  ;;  %v365_v17 = vmax.f32 %v363_v5, %v364_v62  ;;  %v368_v21 = vsel %vm152_vm0, %v116_v4, -inf  ;;  %v87_v59 = vld [vmem:[%s1095_s0 + $0x278] sm:$0xff]  ;;  %v134_v3 = vld [vmem:[%s1095_s0 + $0x3f0] sm:$0xff] }
  0x39   :  { %v378_v23 = vmax.f32 %v376_v10, %v377_v11  ;;  %v381_v24 = vsel %vm152_vm0, %v85_v6, -inf  ;;  %v391_v30 = vsel %vm152_vm0, %v22_v12, -inf  ;;  %v392_v31 = vsel %vm152_vm0, %v38_v13, -inf  ;;  %v103_v5 = vld [vmem:[%s1095_s0 + $0x2f8] sm:$0xff]  ;;  %v150_v11 = vld [vmem:[%s1095_s0 + $0x470] sm:$0xff] }
  0x3a   :  { %435 = vst.msk [vmem:[%s1096_s1 + $0x50] sm:$0xff] %vm152_vm0, %v339_v14  ;;  %v354_v26 = vmax.f32 %v352_v15, %v353_v8  ;;  %v367_v28 = vmax.f32 %v365_v17, %v366_v9  ;;  %v370_v32 = vsel %vm152_vm0, %v132_v16, -inf  ;;  %v393_v35 = vmax.f32 %v391_v30, %v392_v31  ;;  %v119_v13 = vld [vmem:[%s1095_s0 + $0x378] sm:$0xff] }
  0x3b   :  { %v380_v33 = vmax.f32 %v378_v23, %v379_v18  ;;  %v394_v36 = vsel %vm152_vm0, %v54_v19, -inf  ;;  %v383_v41 = vsel %vm152_vm0, %v101_v22, -inf  ;;  %v396_v42 = vsel %vm152_vm0, %v70_v25, -inf  ;;  %v135_v19 = vld [vmem:[%s1095_s0 + $0x3f8] sm:$0xff] }
  0x3c   :  { %v356_v39 = vmax.f32 %v354_v26, %v355_v20  ;;  %v369_v40 = vmax.f32 %v367_v28, %v368_v21  ;;  %v372_v44 = vsel %vm152_vm0, %v148_v27, -inf  ;;  %v385_v47 = vsel %vm152_vm0, %v117_v29, -inf }
  0x3d   :  { %v382_v46 = vmax.f32 %v380_v33, %v381_v24  ;;  %v395_v49 = vmax.f32 %v393_v35, %v394_v36  ;;  %v398_v52 = vsel %vm152_vm0, %v86_v34, -inf  ;;  %v408_v53 = vsel %vm152_vm0, %v23_v37, -inf  ;;  %v151_v24 = vld [vmem:[%s1095_s0 + $0x478] sm:$0xff] }
  0x3e   :  { %436 = vst.msk [vmem:[%s1096_s1 + $0x58] sm:$0xff] %vm152_vm0, %v356_v39  ;;  %v371_v51 = vmax.f32 %v369_v40, %v370_v32  ;;  %v409_v54 = vsel %vm152_vm0, %v39_v38, -inf  ;;  %v411_v61 = vsel %vm152_vm0, %v55_v43, -inf  ;;  %v387_v63 = vsel %vm152_vm0, %v133_v45, -inf }
  0x3f   :  { %v384_v56 = vmax.f32 %v382_v46, %v383_v41  ;;  %v397_v58 = vmax.f32 %v395_v49, %v396_v42  ;;  %v410_v60 = vmax.f32 %v408_v53, %v409_v54  ;;  %v400_v0 = vsel %vm152_vm0, %v102_v48, -inf }
  0x40   :  { %v373_v62 = vmax.f32 %v371_v51, %v372_v44  ;;  %v413_v1 = vsel %vm152_vm0, %v71_v50, -inf  ;;  %v389_v7 = vsel %vm152_vm0, %v149_v55, -inf  ;;  %v402_v8 = vsel %vm152_vm0, %v118_v57, -inf }
  0x41   :  { %v386_v2 = vmax.f32 %v384_v56, %v385_v47  ;;  %v399_v4 = vmax.f32 %v397_v58, %v398_v52  ;;  %v412_v6 = vmax.f32 %v410_v60, %v411_v61  ;;  %v415_v9 = vsel %vm152_vm0, %v87_v59, -inf }
  0x42   :  { %437 = vst.msk [vmem:[%s1096_s1 + $0x60] sm:$0xff] %vm152_vm0, %v373_v62  ;;  %v404_v15 = vsel %vm152_vm0, %v134_v3, -inf  ;;  %v417_v16 = vsel %vm152_vm0, %v103_v5, -inf  ;;  %v406_v21 = vsel %vm152_vm0, %v150_v11, -inf  ;;  %v419_v22 = vsel %vm152_vm0, %v119_v13, -inf }
  0x43   :  { %v388_v10 = vmax.f32 %v386_v2, %v387_v63  ;;  %v401_v12 = vmax.f32 %v399_v4, %v400_v0  ;;  %v414_v14 = vmax.f32 %v412_v6, %v413_v1  ;;  %v421_v26 = vsel %vm152_vm0, %v135_v19, -inf }
  0x44   :  { %v423_v29 = vsel %vm152_vm0, %v151_v24, -inf }
  0x45   :  { %v390_v17 = vmax.f32 %v388_v10, %v389_v7  ;;  %v403_v18 = vmax.f32 %v401_v12, %v402_v8  ;;  %v416_v20 = vmax.f32 %v414_v14, %v415_v9 }
  0x47   :  { %438 = vst.msk [vmem:[%s1096_s1 + $0x68] sm:$0xff] %vm152_vm0, %v390_v17  ;;  %v405_v23 = vmax.f32 %v403_v18, %v404_v15  ;;  %v418_v25 = vmax.f32 %v416_v20, %v417_v16 }
  0x49   :  { %v407_v27 = vmax.f32 %v405_v23, %v406_v21  ;;  %v420_v28 = vmax.f32 %v418_v25, %v419_v22 }
  0x4b   :  { %439 = vst.msk [vmem:[%s1096_s1 + $0x70] sm:$0xff] %vm152_vm0, %v407_v27  ;;  %v422_v30 = vmax.f32 %v420_v28, %v421_v26 }
  0x4d   :  { %v424_v31 = vmax.f32 %v422_v30, %v423_v29 }
  0x4f   :  { %440 = vst.msk [vmem:[%s1096_s1 + $0x78] sm:$0xff] %vm152_vm0, %v424_v31 }

// kernel: densenet_forward.95
= control target key start
LH: loop header
LB: loop body
LE: loop exit
PB: predicated region body
PF: predicated region fallthrough
CT: control target
= control target key end

     0   :  { %s1224_s21 = smov 0   ;;  %s1226_s22 = smov 0   ;;  %s1575_s0 = inlined_call_operand.vmem [shape: bf16[128,1152], index: 0, kind: input, shape index: {}]   ;;  %s1576_s1 = inlined_call_operand.vmem [shape: bf16[1152,128], index: 1, kind: input, shape index: {}]   ;;  %s1577_s2 = inlined_call_operand.vmem [shape: f32[1,1152], index: 2, kind: input, shape index: {}, may-alias: {2,3}]   ;;  %s1578_s3 = inlined_call_operand.vmem [shape: f32[1,1152], index: 3, kind: input, shape index: {}, may-alias: {2,3}]   ;;  %s1579_s4 = inlined_call_operand.vmem [shape: f32[1,128], index: 4, kind: input, shape index: {}]   ;;  %s1580_s5 = inlined_call_operand.vmem [shape: f32[1,128], index: 5, kind: input, shape index: {}]   ;;  %s1581_s6 = inlined_call_operand.vmem [shape: f32[128,128], index: 6, kind: output, shape index: {}]  }
   0x1   :  { %s1228_s23 = smov 0   ;;  %s1230_s24 = smov 0  }
   0x2   :  { %s1232_s2 = smov 0  }
   0x3 LB: > { %s28_s3 = sadd.s32 1, %s1182_s24  ;;  %p51_p1 = scmp.ne.s32.totalorder %s1174_s22, %s1170_s21  ;;  %s1186_s2 = sphi %s1232_s2, %s16_s2   ;;  %s1182_s24 = sphi %s1230_s24, %s1585_s24   ;;  %s1178_s23 = sphi %s1228_s23, %s1584_s23   ;;  %s1174_s22 = sphi %s1226_s22, %s1583_s22   ;;  %s1170_s21 = sphi %s1224_s21, %s1582_s21  }
   0x4   : > { %p29_p0 = scmp.ge.s32.totalorder %s28_s3, 9  ;;  %p52_p2 = scmp.eq.s32.totalorder %s1186_s2, 0 }
   0x5   : > { %s44_s26 = sadd.s32 1, %s1174_s22  ;;  %p996_p5 = scmp.ge.s32.totalorder %s1186_s2, 9 }
   0x6   : > { %s1587_s3 = smov (%p29_p0, %s28_s3), 0  ;;  %p53_p3 = por %p52_p2, %p51_p1 }
   0x7   : > { %s40_s25 = ssub.s32 %s1182_s24, %s1587_s3  ;;  %249 = sbr.rel (%p996_p5) target bundleno = 28 (0x1c), region = 24 }
   0x8   : > { %p42_p4 = scmp.eq.s32.totalorder %s40_s25, 0 }
   0xa   : > { %s1259_s27 = scalar_select %p42_p4, %s1174_s22, %s44_s26  }
   0xe   : > { %252 = sbr.rel (!%p53_p3) target bundleno = 28 (0x1c), region = 28  ;;  %s254_s28 = sand.u32 (%p53_p3), 1, %s1174_s22  }
   0xf   : > { %s998_s29 = sshll.u32 (%p53_p3), %s1182_s24, 2  ;;  %s997_s30 = sshll.u32 (%p53_p3), %s254_s28, 6 }
  0x10   : > { %s1267_s9 = scalar_lea.vmem (%p53_p3), %s1575_s0, %s998_s29  ;;  %s256_s10 = scalar_lea.vmem (%p53_p3), [#allocation2], %s997_s30 }
  0x11   : > { %v277_v0 = vld [vmem:[%s1267_s9] sm:$0xf] (%p53_p3)  ;;  %v279_v1 = vld [vmem:[%s1267_s9 + $0x24] sm:$0xf] (%p53_p3)  ;;  %v281_v2 = vld [vmem:[%s1267_s9 + $0x48] sm:$0xf] (%p53_p3) }
  0x12   : > { %278 = vst [vmem:[%s256_s10] sm:$0xf] (%p53_p3), %v277_v0  ;;  %280 = vst [vmem:[%s256_s10 + $0x4] sm:$0xf] (%p53_p3), %v279_v1  ;;  %v283_v3 = vld [vmem:[%s1267_s9 + $0x6c] sm:$0xf] (%p53_p3) }
  0x13   : > { %v285_v4 = vld [vmem:[%s1267_s9 + $0x90] sm:$0xf] (%p53_p3)  ;;  %282 = vst [vmem:[%s256_s10 + $0x8] sm:$0xf] (%p53_p3), %v281_v2  ;;  %284 = vst [vmem:[%s256_s10 + $0xc] sm:$0xf] (%p53_p3), %v283_v3 }
  0x14   : > { %286 = vst [vmem:[%s256_s10 + $0x10] sm:$0xf] (%p53_p3), %v285_v4  ;;  %v287_v5 = vld [vmem:[%s1267_s9 + $0xb4] sm:$0xf] (%p53_p3)  ;;  %v289_v6 = vld [vmem:[%s1267_s9 + $0xd8] sm:$0xf] (%p53_p3) }
  0x15   : > { %v291_v7 = vld [vmem:[%s1267_s9 + $0xfc] sm:$0xf]  ;;  %288 = vst [vmem:[%s256_s10 + $0x14] sm:$0xf] %v287_v5  ;;  %290 = vst [vmem:[%s256_s10 + $0x18] sm:$0xf] %v289_v6 }
  0x16   : > { %292 = vst [vmem:[%s256_s10 + $0x1c] sm:$0xf] %v291_v7  ;;  %v293_v8 = vld [vmem:[%s1267_s9 + $0x120] sm:$0xf]  ;;  %v295_v9 = vld [vmem:[%s1267_s9 + $0x144] sm:$0xf] }
  0x17   : > { %v297_v10 = vld [vmem:[%s1267_s9 + $0x168] sm:$0xf]  ;;  %294 = vst [vmem:[%s256_s10 + $0x20] sm:$0xf] %v293_v8  ;;  %296 = vst [vmem:[%s256_s10 + $0x24] sm:$0xf] %v295_v9 }
  0x18   : > { %298 = vst [vmem:[%s256_s10 + $0x28] sm:$0xf] %v297_v10  ;;  %v299_v11 = vld [vmem:[%s1267_s9 + $0x18c] sm:$0xf]  ;;  %v301_v12 = vld [vmem:[%s1267_s9 + $0x1b0] sm:$0xf] }
  0x19   : > { %v303_v13 = vld [vmem:[%s1267_s9 + $0x1d4] sm:$0xf]  ;;  %300 = vst [vmem:[%s256_s10 + $0x2c] sm:$0xf] %v299_v11  ;;  %302 = vst [vmem:[%s256_s10 + $0x30] sm:$0xf] %v301_v12 }
  0x1a   : > { %304 = vst [vmem:[%s256_s10 + $0x34] sm:$0xf] %v303_v13  ;;  %v305_v14 = vld [vmem:[%s1267_s9 + $0x1f8] sm:$0xf]  ;;  %v307_v15 = vld [vmem:[%s1267_s9 + $0x21c] sm:$0xf] }
  0x1b   : > { %306 = vst [vmem:[%s256_s10 + $0x38] sm:$0xf] %v305_v14  ;;  %308 = vst [vmem:[%s256_s10 + $0x3c] sm:$0xf] %v307_v15 }
  0x1c PF: > { %p999_p6 = scmp.ge.s32.totalorder %s1186_s2, 1  ;;  %p386_p7 = scmp.lt.s32.totalorder %s1186_s2, 10 }
  0x1e   : > { %p387_p8 = pnand %p999_p6, %p386_p7 }
  0x1f   : > { %s393_s11 = sand.u32 (!%p387_p8), 1, %s1170_s21   ;;  %s1001_s12 = sshll.u32 (!%p387_p8), %s1178_s23, 4 }
  0x20   : > { %390 = sbr.rel (%p387_p8) target bundleno = 321 (0x141), region = 81  ;;  %s1000_s13 = sshll.u32 (!%p387_p8), %s393_s11, 6 }
  0x21   : > { %p447_p9 = scmp.lt.s32.totalorder (!%p387_p8), %s1001_s12, 143  ;;  %s1294_s18 = scalar_lea.vmem (!%p387_p8), [#allocation2], %s1000_s13 }
  0x22   : > { %p1003_p10 = scmp.ne.s32.totalorder (!%p387_p8), %s1178_s23, 0 }
  0x27   : > { %s1589_s12 = smov (!%p447_p9, %s1001_s12), 143  ;;  %480 = sbr.rel (%p1003_p10) target bundleno = 49 (0x31), region = 89 }
  0x28   : > { %s1002_s14 = sshll.u32 %s1589_s12, 2  ;;  %v1188_v16 = vmov (!%p1003_p10), 0.0  }
  0x29   : > { %s1292_s17 = scalar_lea.vmem %s1576_s1, %s1002_s14  ;;  %481 = vst [vmem:[%s1581_s6] sm:$0xff] (!%p1003_p10), %v1188_v16  ;;  %482 = vst [vmem:[%s1581_s6 + $0x8] sm:$0xff] (!%p1003_p10), %v1188_v16 }
  0x2a   : > { %483 = vst [vmem:[%s1581_s6 + $0x10] sm:$0xff] (!%p1003_p10), %v1188_v16  ;;  %484 = vst [vmem:[%s1581_s6 + $0x18] sm:$0xff] (!%p1003_p10), %v1188_v16 }
  0x2b   : > { %485 = vst [vmem:[%s1581_s6 + $0x20] sm:$0xff] (!%p1003_p10), %v1188_v16  ;;  %486 = vst [vmem:[%s1581_s6 + $0x28] sm:$0xff] (!%p1003_p10), %v1188_v16 }
  0x2c   : > { %487 = vst [vmem:[%s1581_s6 + $0x30] sm:$0xff] (!%p1003_p10), %v1188_v16  ;;  %488 = vst [vmem:[%s1581_s6 + $0x38] sm:$0xff] (!%p1003_p10), %v1188_v16 }
  0x2d   : > { %489 = vst [vmem:[%s1581_s6 + $0x40] sm:$0xff] (!%p1003_p10), %v1188_v16  ;;  %490 = vst [vmem:[%s1581_s6 + $0x48] sm:$0xff] (!%p1003_p10), %v1188_v16 }
  0x2e   : > { %491 = vst [vmem:[%s1581_s6 + $0x50] sm:$0xff] %v1188_v16  ;;  %492 = vst [vmem:[%s1581_s6 + $0x58] sm:$0xff] %v1188_v16 }
  0x2f   : > { %493 = vst [vmem:[%s1581_s6 + $0x60] sm:$0xff] %v1188_v16  ;;  %494 = vst [vmem:[%s1581_s6 + $0x68] sm:$0xff] %v1188_v16 }
  0x30   : > { %495 = vst [vmem:[%s1581_s6 + $0x70] sm:$0xff] %v1188_v16  ;;  %496 = vst [vmem:[%s1581_s6 + $0x78] sm:$0xff] %v1188_v16 }
  0x31 PF: > { %v1132_v17 = vld [vmem:[%s1292_s17] sm:$0xff]   ;;  %v1133_v18 = vld [vmem:[%s1292_s17 + $0x8] sm:$0xff]   ;;  %v1134_v19 = vld [vmem:[%s1292_s17 + $0x10] sm:$0xff]   ;;  %p1020_p11 = scmp.ne.s32.totalorder %s1178_s23, 8 }
  0x32   : > { %1043 = vmatprep.subr.bf16.mxu0 %v1132_v17  ;;  %1075 = vmatprep.subr.bf16.mxu1 %v1132_v17  ;;  %v1135_v20 = vld [vmem:[%s1292_s17 + $0x18] sm:$0xff]   ;;  %v1140_v21 = vld [vmem:[%s1294_s18] sm:$0xff]   ;;  %v1137_v24 = vld [vmem:[%s1292_s17 + $0x28] sm:$0xff]  }
  0x33   : > { %1044 = vmatpush3.bf16.msra.mxu0 %v1132_v17  ;;  %1083 = vmatpush3.bf16.msra.mxu1 %v1132_v17  ;;  %v1141_v22 = vld [vmem:[%s1294_s18 + $0x20] sm:$0xff]   ;;  %v1138_v25 = vld [vmem:[%s1292_s17 + $0x30] sm:$0xff]   ;;  %v1139_v26 = vld [vmem:[%s1292_s17 + $0x38] sm:$0xff]  }
  0x34   : > { %1045 = vmatprep.subr.bf16.mxu0 %v1133_v18  ;;  %1076 = vmatprep.subr.bf16.mxu1 %v1133_v18  ;;  %v1136_v23 = vld [vmem:[%s1292_s17 + $0x20] sm:$0xff]   ;;  %v1142_v27 = vld [vmem:[%s1294_s18 + $0x8] sm:$0xff]   ;;  %v1144_v29 = vld [vmem:[%s1294_s18 + $0x10] sm:$0xff]  }
  0x35   : > { %1059 = vmatprep.mubr.bf16.mxu0 %v1140_v21  ;;  %1067 = vmatprep.mubr.bf16.mxu1 %v1141_v22  ;;  %v1143_v28 = vld [vmem:[%s1294_s18 + $0x28] sm:$0xff]   ;;  %v1145_v30 = vld [vmem:[%s1294_s18 + $0x30] sm:$0xff]   ;;  %v1146_v31 = vld [vmem:[%s1294_s18 + $0x18] sm:$0xff]  }
  0x36   : > { %v1147_v32 = vld [vmem:[%s1294_s18 + $0x38] sm:$0xff]   ;;  %v515_v33 = vld [vmem:[%s1581_s6 + $0x10] sm:$0xff]  ;;  %v513_v35 = vld [vmem:[%s1581_s6] sm:$0xff] }
  0x37   : > { %1046 = vmatpush3.bf16.msra.mxu0 %v1133_v18  ;;  %1084 = vmatpush3.bf16.msra.mxu1 %v1133_v18  ;;  %v523_v34 = vld [vmem:[%s1581_s6 + $0x50] sm:$0xff]  ;;  %v521_v36 = vld [vmem:[%s1581_s6 + $0x40] sm:$0xff]  ;;  %v516_v39 = vld [vmem:[%s1581_s6 + $0x18] sm:$0xff] }
  0x38   : > { %1047 = vmatprep.subr.bf16.mxu0 %v1134_v19  ;;  %1077 = vmatprep.subr.bf16.mxu1 %v1134_v19  ;;  %v524_v40 = vld [vmem:[%s1581_s6 + $0x58] sm:$0xff]  ;;  %v514_v45 = vld [vmem:[%s1581_s6 + $0x8] sm:$0xff]  ;;  %v519_v57 = vld [vmem:[%s1581_s6 + $0x30] sm:$0xff] }
  0x39   : > { %v522_v46 = vld [vmem:[%s1581_s6 + $0x48] sm:$0xff]  ;;  %v527_v58 = vld [vmem:[%s1581_s6 + $0x70] sm:$0xff]  ;;  %v517_v59 = vld [vmem:[%s1581_s6 + $0x20] sm:$0xff] }
  0x3a   : > { %v525_v60 = vld [vmem:[%s1581_s6 + $0x60] sm:$0xff]  ;;  %v520_v63 = vld [vmem:[%s1581_s6 + $0x38] sm:$0xff]  ;;  %v518_v5 = vld [vmem:[%s1581_s6 + $0x28] sm:$0xff] }
  0x3b   : > { %1048 = vmatpush3.bf16.msra.mxu0 %v1134_v19  ;;  %1085 = vmatpush3.bf16.msra.mxu1 %v1134_v19  ;;  %v528_v0 = vld [vmem:[%s1581_s6 + $0x78] sm:$0xff]  ;;  %v526_v6 = vld [vmem:[%s1581_s6 + $0x68] sm:$0xff]  ;;  %v1021_v18 = vld [vmem:[%s1579_s4] ss:$0 sm:$0xff] (!%p1020_p11) }
  0x3c   : > { %1049 = vmatprep.subr.bf16.mxu0 %v1135_v20  ;;  %1078 = vmatprep.subr.bf16.mxu1 %v1135_v20  ;;  %v1022_v19 = vld [vmem:[%s1580_s5] ss:$0 sm:$0xff] (!%p1020_p11) }
  0x3f   : > { %1050 = vmatpush3.bf16.msra.mxu0 %v1135_v20  ;;  %1086 = vmatpush3.bf16.msra.mxu1 %v1135_v20 }
  0x40   : > { %1051 = vmatprep.subr.bf16.mxu0 %v1136_v23  ;;  %1079 = vmatprep.subr.bf16.mxu1 %v1136_v23 }
  0x43   : > { %1052 = vmatpush3.bf16.msra.mxu0 %v1136_v23  ;;  %1087 = vmatpush3.bf16.msra.mxu1 %v1136_v23 }
  0x44   : > { %1053 = vmatprep.subr.bf16.mxu0 %v1137_v24  ;;  %1080 = vmatprep.subr.bf16.mxu1 %v1137_v24 }
  0x47   : > { %1054 = vmatpush3.bf16.msra.mxu0 %v1137_v24  ;;  %1088 = vmatpush3.bf16.msra.mxu1 %v1137_v24 }
  0x48   : > { %1055 = vmatprep.subr.bf16.mxu0 %v1138_v25  ;;  %1081 = vmatprep.subr.bf16.mxu1 %v1138_v25 }
  0x4b   : > { %1056 = vmatpush3.bf16.msra.mxu0 %v1138_v25  ;;  %1089 = vmatpush3.bf16.msra.mxu1 %v1138_v25 }
  0x4c   : > { %1057 = vmatprep.subr.bf16.mxu0 %v1139_v26  ;;  %1082 = vmatprep.subr.bf16.mxu1 %v1139_v26 }
  0x4f   : > { %1058 = vmatpush3.bf16.msra.mxu0 %v1139_v26  ;;  %1090 = vmatpush3.bf16.msra.mxu1 %v1139_v26 }
  0x52   : > { %1060 = vmatmul.mubr.bf16.vlgmr.msra.gmra.mrb[0].mxu0 %v1142_v27  ;;  %1068 = vmatmul.mubr.bf16.vlgmr.msra.gmra.mrb[0].mxu1 %v1143_v28 }
  0x53   : > { %1063 = vmatprep.mubr.bf16.mxu0 %v1144_v29  ;;  %1071 = vmatprep.mubr.bf16.mxu1 %v1145_v30 }
  0x5a   : > { %1064 = vmatmul.mubr.bf16.gmra.mrb[4].mxu0 %v1146_v31  ;;  %1072 = vmatmul.mubr.bf16.gmra.mrb[4].mxu1 %v1147_v32 }
 0x125   : > { %v1061_v37 = vpop.f32.mrb[0].mxu0  ;;  %v1069_v38 = vpop.f32.mrb[0].mxu1 }
 0x126   : > { %v740_v41 = vadd.f32 %v1061_v37, %v515_v33  ;;  %v748_v42 = vadd.f32 %v1069_v38, %v523_v34  ;;  %v675_v43 = vpop.f32.mrb[1].mxu0  ;;  %v707_v44 = vpop.f32.mrb[1].mxu1 }
 0x127   : > { %v738_v47 = vadd.f32 %v675_v43, %v513_v35  ;;  %v746_v48 = vadd.f32 %v707_v44, %v521_v36  ;;  %v1062_v49 = vpop.f32.mrb[2].mxu0  ;;  %v1070_v50 = vpop.f32.mrb[2].mxu1 }
 0x128   : > { %756 = vst [vmem:[%s1581_s6 + $0x10] sm:$0xff] %v740_v41  ;;  %764 = vst [vmem:[%s1581_s6 + $0x50] sm:$0xff] %v748_v42  ;;  %v741_v51 = vadd.f32 %v1062_v49, %v516_v39  ;;  %v749_v52 = vadd.f32 %v1070_v50, %v524_v40  ;;  %v678_v53 = vpop.f32.mrb[3].mxu0  ;;  %v710_v54 = vpop.f32.mrb[3].mxu1 }
 0x129   : > { %754 = vst [vmem:[%s1581_s6] sm:$0xff] %v738_v47  ;;  %762 = vst [vmem:[%s1581_s6 + $0x40] sm:$0xff] %v746_v48  ;;  %v739_v55 = vadd.f32 %v678_v53, %v514_v45  ;;  %v747_v56 = vadd.f32 %v710_v54, %v522_v46 }
 0x12a   : > { %757 = vst [vmem:[%s1581_s6 + $0x18] sm:$0xff] %v741_v51  ;;  %765 = vst [vmem:[%s1581_s6 + $0x58] sm:$0xff] %v749_v52 }
 0x12b   : > { %755 = vst [vmem:[%s1581_s6 + $0x8] sm:$0xff] %v739_v55  ;;  %763 = vst [vmem:[%s1581_s6 + $0x48] sm:$0xff] %v747_v56 }
 0x12d   : > { %v1065_v61 = vpop.f32.mrb[4].mxu0  ;;  %v1073_v62 = vpop.f32.mrb[4].mxu1  ;;  %773 = sbr.rel (%p1020_p11) target bundleno = 321 (0x141), region = 93 }
 0x12e   : > { %v744_v1 = vadd.f32 %v1065_v61, %v519_v57  ;;  %v752_v2 = vadd.f32 %v1073_v62, %v527_v58  ;;  %v691_v3 = vpop.f32.mrb[5].mxu0  ;;  %v723_v4 = vpop.f32.mrb[5].mxu1 }
 0x12f   : > { %v742_v7 = vadd.f32 %v691_v3, %v517_v59  ;;  %v750_v8 = vadd.f32 %v723_v4, %v525_v60  ;;  %v1066_v9 = vpop.f32.mrb[6].mxu0  ;;  %v1074_v10 = vpop.f32.mrb[6].mxu1  ;;  %v776_v22 = vld [vmem:[%s1581_s6 + $0x10] sm:$0xff] (!%p1020_p11) }
 0x130   : > { %760 = vst [vmem:[%s1581_s6 + $0x30] sm:$0xff] %v744_v1  ;;  %768 = vst [vmem:[%s1581_s6 + $0x70] sm:$0xff] %v752_v2  ;;  %v745_v11 = vadd.f32 %v1066_v9, %v520_v63  ;;  %v753_v12 = vadd.f32 %v1074_v10, %v528_v0  ;;  %v694_v13 = vpop.f32.mrb[7].mxu0  ;;  %v726_v14 = vpop.f32.mrb[7].mxu1  ;;  %v774_v17 = vld [vmem:[%s1581_s6] sm:$0xff] (!%p1020_p11)  ;;  %v799_v25 = vmul.f32 (!%p1020_p11), %v1021_v18, %v776_v22  ;;  %v784_v41 = vld [vmem:[%s1581_s6 + $0x50] sm:$0xff] (!%p1020_p11) }
 0x131   : > { %758 = vst [vmem:[%s1581_s6 + $0x20] sm:$0xff] %v742_v7  ;;  %766 = vst [vmem:[%s1581_s6 + $0x60] sm:$0xff] %v750_v8  ;;  %v743_v15 = vadd.f32 %v694_v13, %v518_v5  ;;  %v751_v16 = vadd.f32 %v726_v14, %v526_v6  ;;  %v797_v20 = vmul.f32 (!%p1020_p11), %v1021_v18, %v774_v17  ;;  %v777_v23 = vld [vmem:[%s1581_s6 + $0x18] sm:$0xff] (!%p1020_p11)  ;;  %v782_v35 = vld [vmem:[%s1581_s6 + $0x40] sm:$0xff] (!%p1020_p11) }
 0x132   : > { %761 = vst [vmem:[%s1581_s6 + $0x38] sm:$0xff] %v745_v11  ;;  %769 = vst [vmem:[%s1581_s6 + $0x78] sm:$0xff] %v753_v12  ;;  %v775_v21 = vld [vmem:[%s1581_s6 + $0x8] sm:$0xff] (!%p1020_p11)  ;;  %v800_v26 = vmul.f32 (!%p1020_p11), %v1021_v18, %v777_v23  ;;  %v822_v38 = vadd.f32 (!%p1020_p11), %v1022_v19, %v799_v25  ;;  %v785_v42 = vld [vmem:[%s1581_s6 + $0x58] sm:$0xff] (!%p1020_p11)  ;;  %v805_v47 = vmul.f32 (!%p1020_p11), %v1021_v18, %v782_v35 }
 0x133   : > { %759 = vst [vmem:[%s1581_s6 + $0x28] sm:$0xff] %v743_v15  ;;  %767 = vst [vmem:[%s1581_s6 + $0x68] sm:$0xff] %v751_v16  ;;  %v798_v24 = vmul.f32 (!%p1020_p11), %v1021_v18, %v775_v21  ;;  %v820_v30 = vadd.f32 (!%p1020_p11), %v1022_v19, %v797_v20  ;;  %v783_v36 = vld [vmem:[%s1581_s6 + $0x48] sm:$0xff] (!%p1020_p11)  ;;  %v807_v53 = vmul.f32 (!%p1020_p11), %v1021_v18, %v784_v41 }
 0x134   : > { %v823_v39 = vadd.f32 %v1022_v19, %v800_v26  ;;  %838 = vst [vmem:[%s1581_s6 + $0x10] sm:$0xff] %v822_v38  ;;  %v806_v52 = vmul.f32 %v1021_v18, %v783_v36  ;;  %v808_v54 = vmul.f32 %v1021_v18, %v785_v42  ;;  %v828_v55 = vadd.f32 %v1022_v19, %v805_v47 }
 0x135   : > { %v821_v37 = vadd.f32 %v1022_v19, %v798_v24  ;;  %836 = vst [vmem:[%s1581_s6] sm:$0xff] %v820_v30  ;;  %v830_v60 = vadd.f32 %v1022_v19, %v807_v53 }
 0x136   : > { %839 = vst [vmem:[%s1581_s6 + $0x18] sm:$0xff] %v823_v39  ;;  %v829_v59 = vadd.f32 %v1022_v19, %v806_v52  ;;  %v831_v61 = vadd.f32 %v1022_v19, %v808_v54  ;;  %844 = vst [vmem:[%s1581_s6 + $0x40] sm:$0xff] %v828_v55 }
 0x137   : > { %v780_v29 = vld [vmem:[%s1581_s6 + $0x30] sm:$0xff]  ;;  %837 = vst [vmem:[%s1581_s6 + $0x8] sm:$0xff] %v821_v37  ;;  %846 = vst [vmem:[%s1581_s6 + $0x50] sm:$0xff] %v830_v60 }
 0x138   : > { %v778_v27 = vld [vmem:[%s1581_s6 + $0x20] sm:$0xff]  ;;  %v803_v33 = vmul.f32 %v1021_v18, %v780_v29  ;;  %v788_v49 = vld [vmem:[%s1581_s6 + $0x70] sm:$0xff]  ;;  %845 = vst [vmem:[%s1581_s6 + $0x48] sm:$0xff] %v829_v59  ;;  %847 = vst [vmem:[%s1581_s6 + $0x58] sm:$0xff] %v831_v61 }
 0x139   : > { %v801_v31 = vmul.f32 %v1021_v18, %v778_v27  ;;  %v781_v34 = vld [vmem:[%s1581_s6 + $0x38] sm:$0xff]  ;;  %v786_v43 = vld [vmem:[%s1581_s6 + $0x60] sm:$0xff]  ;;  %v811_v58 = vmul.f32 %v1021_v18, %v788_v49 }
 0x13a   : > { %v779_v28 = vld [vmem:[%s1581_s6 + $0x28] sm:$0xff]  ;;  %v804_v40 = vmul.f32 %v1021_v18, %v781_v34  ;;  %v826_v46 = vadd.f32 %v1022_v19, %v803_v33  ;;  %v789_v50 = vld [vmem:[%s1581_s6 + $0x78] sm:$0xff]  ;;  %v809_v56 = vmul.f32 %v1021_v18, %v786_v43 }
 0x13b   : > { %v802_v32 = vmul.f32 %v1021_v18, %v779_v28  ;;  %v824_v44 = vadd.f32 %v1022_v19, %v801_v31  ;;  %v787_v48 = vld [vmem:[%s1581_s6 + $0x68] sm:$0xff]  ;;  %v812_v62 = vmul.f32 %v1021_v18, %v789_v50  ;;  %v834_v1 = vadd.f32 %v1022_v19, %v811_v58 }
 0x13c   : > { %v827_v51 = vadd.f32 %v1022_v19, %v804_v40  ;;  %842 = vst [vmem:[%s1581_s6 + $0x30] sm:$0xff] %v826_v46  ;;  %v810_v57 = vmul.f32 %v1021_v18, %v787_v48  ;;  %v832_v63 = vadd.f32 %v1022_v19, %v809_v56 }
 0x13d   : > { %v825_v45 = vadd.f32 %v1022_v19, %v802_v32  ;;  %840 = vst [vmem:[%s1581_s6 + $0x20] sm:$0xff] %v824_v44  ;;  %v835_v2 = vadd.f32 %v1022_v19, %v812_v62  ;;  %850 = vst [vmem:[%s1581_s6 + $0x70] sm:$0xff] %v834_v1 }
 0x13e   : > { %843 = vst [vmem:[%s1581_s6 + $0x38] sm:$0xff] %v827_v51  ;;  %v833_v0 = vadd.f32 %v1022_v19, %v810_v57  ;;  %848 = vst [vmem:[%s1581_s6 + $0x60] sm:$0xff] %v832_v63 }
 0x13f   : > { %841 = vst [vmem:[%s1581_s6 + $0x28] sm:$0xff] %v825_v45  ;;  %851 = vst [vmem:[%s1581_s6 + $0x78] sm:$0xff] %v835_v2 }
 0x140   : > { %849 = vst [vmem:[%s1581_s6 + $0x68] sm:$0xff] %v833_v0 }
 0x141 PF: > { %s16_s2 = sadd.s32 1, %s1186_s2   ;;  %s1582_s21 = smov %s1174_s22 }
 0x142   : > { %p13_p12 = scmp.ge.s32.totalorder %s16_s2, 11   ;;  %s1583_s22 = smov %s1259_s27 }
 0x143   : > { %s1584_s23 = smov %s1182_s24  ;;  %s1585_s24 = smov %s1587_s3 }
 0x144   :  { %15 = sbr.rel (!%p13_p12) target bundleno = 3 (0x3), region = 143 }

// kernel: densenet_forward.100
= control target key start
LH: loop header
LB: loop body
LE: loop exit
PB: predicated region body
PF: predicated region fallthrough
CT: control target
= control target key end

     0   :  { %v78_v5 = vlaneseq  ;;  %s1048_s1 = inlined_call_operand.vmem [shape: bf16[256,128], index: 1, kind: input, shape index: {}]   ;;  %s1049_s0 = inlined_call_operand.vmem [shape: f32[128,256], index: 0, kind: input, shape index: {}]   ;;  %s1050_s2 = inlined_call_operand.vmem [shape: f32[1,256], index: 2, kind: input, shape index: {}]   ;;  %s1051_s3 = inlined_call_operand.vmem [shape: f32[1,256], index: 3, kind: input, shape index: {}]   ;;  %s1052_s4 = inlined_call_operand.vmem [shape: f32[1,128], index: 4, kind: input, shape index: {}]   ;;  %s1053_s5 = inlined_call_operand.vmem [shape: f32[1,128], index: 5, kind: input, shape index: {}]   ;;  %s1054_s6 = inlined_call_operand.vmem [shape: f32[128,128], index: 6, kind: output, shape index: {}]  }
   0x1   :  { %v685_v0 = vld [vmem:[%s1048_s1 + $0x40] sm:$0xff]   ;;  %v687_v2 = vld [vmem:[%s1048_s1 + $0x48] sm:$0xff]   ;;  %v689_v4 = vld [vmem:[%s1048_s1 + $0x50] sm:$0xff]  }
   0x2   :  { %v686_v1 = vld [vmem:[%s1048_s1] sm:$0xff]   ;;  %604 = vmatprep.subr.bf16.mxu0 %v685_v0  ;;  %668 = vmatprep.subr.bf16.mxu1 %v685_v0  ;;  %v688_v3 = vld [vmem:[%s1048_s1 + $0x8] sm:$0xff]   ;;  %v690_v6 = vld [vmem:[%s1048_s1 + $0x10] sm:$0xff]   ;;  %v79_v8 = vshrl.u32 %v78_v5, 7 }
   0x3   :  { %605 = vmatpush3.bf16.msra.mxu0 %v686_v1  ;;  %676 = vmatpush3.bf16.msra.mxu1 %v686_v1  ;;  %v691_v7 = vld [vmem:[%s1048_s1 + $0x58] sm:$0xff]   ;;  %v693_v10 = vld [vmem:[%s1048_s1 + $0x60] sm:$0xff]   ;;  %v695_v14 = vld [vmem:[%s1048_s1 + $0x68] sm:$0xff]  }
   0x4   :  { %606 = vmatprep.subr.bf16.mxu0 %v687_v2  ;;  %669 = vmatprep.subr.bf16.mxu1 %v687_v2  ;;  %v692_v9 = vld [vmem:[%s1048_s1 + $0x18] sm:$0xff]   ;;  %v80_v11 = vsub.s32 0, %v79_v8  ;;  %v84_v12 = vsub.s32 1, %v79_v8  ;;  %v694_v13 = vld [vmem:[%s1048_s1 + $0x20] sm:$0xff]   ;;  %v45_v15 = vld [vmem:[%s1049_s0 + $0x8] sm:$0xff] }
   0x5   :  { %v47_v16 = vld [vmem:[%s1049_s0 + $0x18] sm:$0xff]  ;;  %v76_v17 = vld [vmem:[%s1050_s2] sm:$0x3]  ;;  %v61_v21 = vld [vmem:[%s1049_s0 + $0x88] sm:$0xff] }
   0x6   :  { %v778_v18 = vrot.slane %v76_v17, %v80_v11  ;;  %v780_v19 = vrot.slane %v76_v17, %v84_v12  ;;  %v120_v20 = vld [vmem:[%s1051_s3] sm:$0x3]  ;;  %v63_v22 = vld [vmem:[%s1049_s0 + $0x98] sm:$0xff]  ;;  %v46_v26 = vld [vmem:[%s1049_s0 + $0x10] sm:$0xff] }
   0x7   :  { %607 = vmatpush3.bf16.msra.mxu0 %v688_v3  ;;  %677 = vmatpush3.bf16.msra.mxu1 %v688_v3  ;;  %v791_v23 = vrot.slane %v120_v20, %v80_v11  ;;  %v793_v24 = vrot.slane %v120_v20, %v84_v12  ;;  %v44_v25 = vld [vmem:[%s1049_s0] sm:$0xff]  ;;  %v696_v28 = vld [vmem:[%s1048_s1 + $0x28] sm:$0xff]   ;;  %v62_v32 = vld [vmem:[%s1049_s0 + $0x90] sm:$0xff] }
   0x8   :  { %608 = vmatprep.subr.bf16.mxu0 %v689_v4  ;;  %670 = vmatprep.subr.bf16.mxu1 %v689_v4  ;;  %v60_v27 = vld [vmem:[%s1049_s0 + $0x80] sm:$0xff]  ;;  %v89_v29 = vmul.f32 %v780_v19, %v45_v15  ;;  %v91_v30 = vmul.f32 %v780_v19, %v47_v16  ;;  %v105_v31 = vmul.f32 %v780_v19, %v61_v21  ;;  %v697_v33 = vld [vmem:[%s1048_s1 + $0x70] sm:$0xff]   ;;  %v49_v45 = vld [vmem:[%s1049_s0 + $0x28] sm:$0xff] }
   0x9   :  { %v107_v34 = vmul.f32 %v780_v19, %v63_v22  ;;  %v88_v35 = vmul.f32 %v778_v18, %v44_v25  ;;  %v90_v36 = vmul.f32 %v778_v18, %v46_v26  ;;  %v104_v40 = vmul.f32 %v778_v18, %v60_v27  ;;  %v51_v46 = vld [vmem:[%s1049_s0 + $0x38] sm:$0xff]  ;;  %v698_v47 = vld [vmem:[%s1048_s1 + $0x30] sm:$0xff]   ;;  %v65_v52 = vld [vmem:[%s1049_s0 + $0xa8] sm:$0xff] }
   0xa   :  { %v133_v37 = vadd.f32 %v793_v24, %v89_v29  ;;  %v135_v38 = vadd.f32 %v793_v24, %v91_v30  ;;  %v149_v39 = vadd.f32 %v793_v24, %v105_v31  ;;  %v106_v44 = vmul.f32 %v778_v18, %v62_v32  ;;  %v699_v53 = vld [vmem:[%s1048_s1 + $0x78] sm:$0xff]   ;;  %v48_v63 = vld [vmem:[%s1049_s0 + $0x20] sm:$0xff]  ;;  %v50_v4 = vld [vmem:[%s1049_s0 + $0x30] sm:$0xff] }
   0xb   :  { %609 = vmatpush3.bf16.msra.mxu0 %v690_v6  ;;  %678 = vmatpush3.bf16.msra.mxu1 %v690_v6  ;;  %v151_v41 = vadd.f32 %v793_v24, %v107_v34  ;;  %v132_v42 = vadd.f32 %v791_v23, %v88_v35  ;;  %v134_v43 = vadd.f32 %v791_v23, %v90_v36  ;;  %v67_v58 = vld [vmem:[%s1049_s0 + $0xb8] sm:$0xff] }
   0xc   :  { %610 = vmatprep.subr.bf16.mxu0 %v691_v7  ;;  %671 = vmatprep.subr.bf16.mxu1 %v691_v7  ;;  %v165_v48 = vmax.f32 %v133_v37, 0.0  ;;  %v167_v49 = vmax.f32 %v135_v38, 0.0  ;;  %v181_v50 = vmax.f32 %v149_v39, 0.0  ;;  %v148_v51 = vadd.f32 %v791_v23, %v104_v40  ;;  %v700_v5 = vld [vmem:[%s1048_s1 + $0x38] sm:$0xff]   ;;  %v52_v38 = vld [vmem:[%s1049_s0 + $0x40] sm:$0xff] }
   0xd   :  { %v183_v54 = vmax.f32 %v151_v41, 0.0  ;;  %v164_v55 = vmax.f32 %v132_v42, 0.0  ;;  %v166_v56 = vmax.f32 %v134_v43, 0.0  ;;  %v150_v57 = vadd.f32 %v791_v23, %v106_v44  ;;  %v55_v21 = vld [vmem:[%s1049_s0 + $0x58] sm:$0xff]  ;;  %v54_v43 = vld [vmem:[%s1049_s0 + $0x50] sm:$0xff] }
   0xe   :  { %v213_v59 = vpack.c.bf16 %v167_v49, %v165_v48  ;;  %v180_v60 = vmax.f32 %v148_v51, 0.0  ;;  %v93_v61 = vmul.f32 %v780_v19, %v49_v45  ;;  %v95_v62 = vmul.f32 %v780_v19, %v51_v46  ;;  %v68_v48 = vld [vmem:[%s1049_s0 + $0xc0] sm:$0xff]  ;;  %v70_v49 = vld [vmem:[%s1049_s0 + $0xd0] sm:$0xff] }
   0xf   :  { %611 = vmatpush3.bf16.msra.mxu0 %v692_v9  ;;  %679 = vmatpush3.bf16.msra.mxu1 %v692_v9  ;;  %v221_v0 = vpack.c.bf16 %v183_v54, %v181_v50  ;;  %v212_v1 = vpack.c.bf16 %v166_v56, %v164_v55  ;;  %v182_v2 = vmax.f32 %v150_v57, 0.0  ;;  %v109_v3 = vmul.f32 %v780_v19, %v65_v52  ;;  %v64_v9 = vld [vmem:[%s1049_s0 + $0xa0] sm:$0xff]  ;;  %v57_v54 = vld [vmem:[%s1049_s0 + $0x68] sm:$0xff] }
  0x10   :  { %612 = vmatprep.subr.bf16.mxu0 %v693_v10  ;;  %672 = vmatprep.subr.bf16.mxu1 %v693_v10  ;;  %v137_v6 = vadd.f32 %v793_v24, %v93_v61  ;;  %v139_v7 = vadd.f32 %v793_v24, %v95_v62  ;;  %v111_v8 = vmul.f32 %v780_v19, %v67_v58  ;;  %v66_v10 = vld [vmem:[%s1049_s0 + $0xb0] sm:$0xff] }
  0x11   :  { %v220_v11 = vpack.c.bf16 %v182_v2, %v180_v60  ;;  %v153_v12 = vadd.f32 %v793_v24, %v109_v3  ;;  %388 = vmatprep.mubr.bf16.mxu0 %v213_v59  ;;  %420 = vmatprep.mubr.bf16.mxu1 %v221_v0  ;;  %v94_v20 = vmul.f32 %v778_v18, %v50_v4  ;;  %v59_v59 = vld [vmem:[%s1049_s0 + $0x78] sm:$0xff]  ;;  %v73_v0 = vld [vmem:[%s1049_s0 + $0xe8] sm:$0xff] }
  0x12   :  { %v169_v15 = vmax.f32 %v137_v6, 0.0  ;;  %v171_v16 = vmax.f32 %v139_v7, 0.0  ;;  %v155_v17 = vadd.f32 %v793_v24, %v111_v8  ;;  %v108_v26 = vmul.f32 %v778_v18, %v64_v9 }
  0x13   :  { %613 = vmatpush3.bf16.msra.mxu0 %v694_v13  ;;  %680 = vmatpush3.bf16.msra.mxu1 %v694_v13  ;;  %v92_v13 = vmul.f32 %v778_v18, %v48_v63  ;;  %v185_v22 = vmax.f32 %v153_v12, 0.0  ;;  %v110_v27 = vmul.f32 %v778_v18, %v66_v10  ;;  %v138_v31 = vadd.f32 %v791_v23, %v94_v20  ;;  %v56_v10 = vld [vmem:[%s1049_s0 + $0x60] sm:$0xff] }
  0x14   :  { %614 = vmatprep.subr.bf16.mxu0 %v695_v14  ;;  %673 = vmatprep.subr.bf16.mxu1 %v695_v14  ;;  %v53_v14 = vld [vmem:[%s1049_s0 + $0x48] sm:$0xff]  ;;  %v215_v29 = vpack.c.bf16 %v171_v16, %v169_v15  ;;  %v187_v30 = vmax.f32 %v155_v17, 0.0  ;;  %v152_v35 = vadd.f32 %v791_v23, %v108_v26  ;;  %v99_v37 = vmul.f32 %v780_v19, %v55_v21  ;;  %v58_v15 = vld [vmem:[%s1049_s0 + $0x70] sm:$0xff] }
  0x15   :  { %v136_v25 = vadd.f32 %v791_v23, %v92_v13  ;;  %v97_v32 = vmul.f32 %v780_v19, %v53_v14  ;;  %v154_v36 = vadd.f32 %v791_v23, %v110_v27  ;;  %v170_v40 = vmax.f32 %v138_v31, 0.0 }
  0x16   :  { %v223_v39 = vpack.c.bf16 %v187_v30, %v185_v22  ;;  %v184_v44 = vmax.f32 %v152_v35, 0.0  ;;  %v143_v46 = vadd.f32 %v793_v24, %v99_v37  ;;  %v98_v58 = vmul.f32 %v778_v18, %v54_v43  ;;  %v72_v22 = vld [vmem:[%s1049_s0 + $0xe0] sm:$0xff] }
  0x17   :  { %615 = vmatpush3.bf16.msra.mxu0 %v696_v28  ;;  %681 = vmatpush3.bf16.msra.mxu1 %v696_v28  ;;  %v69_v28 = vld [vmem:[%s1049_s0 + $0xc8] sm:$0xff]  ;;  %v168_v34 = vmax.f32 %v136_v25, 0.0  ;;  %v141_v41 = vadd.f32 %v793_v24, %v97_v32  ;;  %v186_v45 = vmax.f32 %v154_v36, 0.0  ;;  %v112_v62 = vmul.f32 %v778_v18, %v68_v48  ;;  %v74_v25 = vld [vmem:[%s1049_s0 + $0xf0] sm:$0xff] }
  0x18   :  { %616 = vmatprep.subr.bf16.mxu0 %v697_v33  ;;  %674 = vmatprep.subr.bf16.mxu1 %v697_v33  ;;  %v71_v33 = vld [vmem:[%s1049_s0 + $0xd8] sm:$0xff]  ;;  %v113_v42 = vmul.f32 %v780_v19, %v69_v28  ;;  %v175_v56 = vmax.f32 %v143_v46, 0.0  ;;  %v114_v63 = vmul.f32 %v778_v18, %v70_v49  ;;  %v142_v3 = vadd.f32 %v791_v23, %v98_v58 }
  0x19   :  { %v214_v50 = vpack.c.bf16 %v170_v40, %v168_v34  ;;  %v173_v51 = vmax.f32 %v141_v41, 0.0  ;;  %v222_v55 = vpack.c.bf16 %v186_v45, %v184_v44  ;;  %v101_v4 = vmul.f32 %v780_v19, %v57_v54  ;;  %v961_v54 = vld [vmem:[%s1052_s4] ss:$0 sm:$0xff] }
  0x1a   :  { %v157_v52 = vadd.f32 %v793_v24, %v113_v42  ;;  %v156_v7 = vadd.f32 %v791_v23, %v112_v62  ;;  %v158_v8 = vadd.f32 %v791_v23, %v114_v63  ;;  %v103_v9 = vmul.f32 %v780_v19, %v59_v59  ;;  %v966_v59 = vld [vmem:[%s1053_s5] ss:$0 sm:$0xff] }
  0x1b   :  { %617 = vmatpush3.bf16.msra.mxu0 %v698_v47  ;;  %682 = vmatpush3.bf16.msra.mxu1 %v698_v47  ;;  %v115_v47 = vmul.f32 %v780_v19, %v71_v33  ;;  %v174_v12 = vmax.f32 %v142_v3, 0.0  ;;  %v145_v13 = vadd.f32 %v793_v24, %v101_v4  ;;  %v117_v14 = vmul.f32 %v780_v19, %v73_v0 }
  0x1c   :  { %618 = vmatprep.subr.bf16.mxu0 %v699_v53  ;;  %675 = vmatprep.subr.bf16.mxu1 %v699_v53  ;;  %v96_v53 = vmul.f32 %v778_v18, %v52_v38  ;;  %v189_v60 = vmax.f32 %v157_v52, 0.0  ;;  %v188_v16 = vmax.f32 %v156_v7, 0.0  ;;  %v190_v17 = vmax.f32 %v158_v8, 0.0 }
  0x1d   :  { %v159_v57 = vadd.f32 %v793_v24, %v115_v47  ;;  %v147_v20 = vadd.f32 %v793_v24, %v103_v9  ;;  %v161_v26 = vadd.f32 %v793_v24, %v117_v14  ;;  %v100_v27 = vmul.f32 %v778_v18, %v56_v10 }
  0x1e   :  { %v140_v61 = vadd.f32 %v791_v23, %v96_v53  ;;  %v177_v28 = vmax.f32 %v145_v13, 0.0  ;;  %v102_v30 = vmul.f32 %v778_v18, %v58_v15  ;;  %v116_v32 = vmul.f32 %v778_v18, %v72_v22 }
  0x1f   :  { %619 = vmatpush3.bf16.msra.mxu0 %v700_v5  ;;  %683 = vmatpush3.bf16.msra.mxu1 %v700_v5  ;;  %v191_v2 = vmax.f32 %v159_v57, 0.0  ;;  %v75_v5 = vld [vmem:[%s1049_s0 + $0xf8] sm:$0xff]  ;;  %v193_v31 = vmax.f32 %v161_v26, 0.0  ;;  %v118_v33 = vmul.f32 %v778_v18, %v74_v25  ;;  %v224_v35 = vpack.c.bf16 %v190_v17, %v188_v16 }
  0x20   :  { %v172_v6 = vmax.f32 %v140_v61, 0.0  ;;  %v119_v21 = vmul.f32 %v780_v19, %v75_v5  ;;  %v144_v37 = vadd.f32 %v791_v23, %v100_v27  ;;  %v146_v38 = vadd.f32 %v791_v23, %v102_v30 }
  0x21   :  { %v162_v40 = vadd.f32 %v791_v23, %v118_v33 }
  0x22   :  { %389 = vmatmul.mubr.bf16.vlgmr.msra.gmra.mrb[0].mxu0 %v212_v1  ;;  %421 = vmatmul.mubr.bf16.vlgmr.msra.gmra.mrb[0].mxu1 %v220_v11  ;;  %v217_v1 = vpack.c.bf16 %v175_v56, %v173_v51  ;;  %v225_v11 = vpack.c.bf16 %v191_v2, %v189_v60  ;;  %v163_v19 = vadd.f32 %v793_v24, %v119_v21  ;;  %v176_v42 = vmax.f32 %v144_v37, 0.0 }
  0x23   :  { %396 = vmatprep.mubr.bf16.mxu0 %v215_v29  ;;  %428 = vmatprep.mubr.bf16.mxu1 %v223_v39  ;;  %v179_v29 = vmax.f32 %v147_v20, 0.0  ;;  %v216_v34 = vpack.c.bf16 %v174_v12, %v172_v6  ;;  %v160_v39 = vadd.f32 %v791_v23, %v116_v32  ;;  %v178_v43 = vmax.f32 %v146_v38, 0.0 }
  0x24   :  { %v195_v36 = vmax.f32 %v163_v19, 0.0  ;;  %v194_v45 = vmax.f32 %v162_v40, 0.0 }
  0x25   :  { %v219_v41 = vpack.c.bf16 %v179_v29, %v177_v28  ;;  %v192_v44 = vmax.f32 %v160_v39, 0.0  ;;  %v218_v18 = vpack.c.bf16 %v178_v43, %v176_v42 }
  0x26   :  { %v227_v24 = vpack.c.bf16 %v195_v36, %v193_v31 }
  0x27   :  { %v226_v46 = vpack.c.bf16 %v194_v45, %v192_v44 }
  0x2a   :  { %397 = vmatmul.mubr.bf16.gmra.mrb[4].mxu0 %v214_v50  ;;  %429 = vmatmul.mubr.bf16.gmra.mrb[4].mxu1 %v222_v55 }
  0x2b   :  { %404 = vmatprep.mubr.bf16.mxu0 %v217_v1  ;;  %436 = vmatprep.mubr.bf16.mxu1 %v225_v11 }
  0x32   :  { %405 = vmatmul.mubr.bf16.gmra.mrb[8].mxu0 %v216_v34  ;;  %437 = vmatmul.mubr.bf16.gmra.mrb[8].mxu1 %v224_v35 }
  0x33   :  { %412 = vmatprep.mubr.bf16.mxu0 %v219_v41  ;;  %444 = vmatprep.mubr.bf16.mxu1 %v227_v24 }
  0x3a   :  { %413 = vmatmul.mubr.bf16.gmra.mrb[12].mxu0 %v218_v18  ;;  %445 = vmatmul.mubr.bf16.gmra.mrb[12].mxu1 %v226_v46 }
  0xf5   :  { %v620_v47 = vpop.f32.mrb[0].mxu0  ;;  %v644_v48 = vpop.f32.mrb[0].mxu1 }
  0xf6   :  { %v621_v49 = vpop.f32.mrb[1].mxu0  ;;  %v645_v50 = vpop.f32.mrb[1].mxu1 }
  0xf7   :  { %v622_v51 = vadd.f32 %v621_v49, %v620_v47  ;;  %v646_v23 = vadd.f32 %v645_v50, %v644_v48  ;;  %v623_v52 = vpop.f32.mrb[2].mxu0  ;;  %v647_v53 = vpop.f32.mrb[2].mxu1 }
  0xf8   :  { %v624_v55 = vpop.f32.mrb[3].mxu0  ;;  %v648_v56 = vpop.f32.mrb[3].mxu1 }
  0xf9   :  { %v625_v57 = vadd.f32 %v624_v55, %v623_v52  ;;  %v649_v58 = vadd.f32 %v648_v56, %v647_v53  ;;  %v511_v60 = vmul.f32 %v622_v51, %v961_v54  ;;  %v519_v61 = vmul.f32 %v646_v23, %v961_v54 }
  0xfb   :  { %v534_v62 = vadd.f32 %v966_v59, %v511_v60  ;;  %v542_v63 = vadd.f32 %v966_v59, %v519_v61  ;;  %v512_v0 = vmul.f32 %v625_v57, %v961_v54  ;;  %v520_v1 = vmul.f32 %v649_v58, %v961_v54 }
  0xfd   :  { %v626_v2 = vpop.f32.mrb[4].mxu0  ;;  %v650_v3 = vpop.f32.mrb[4].mxu1  ;;  %v550_v6 = vmax.f32 %v534_v62, 0.0  ;;  %v558_v7 = vmax.f32 %v542_v63, 0.0  ;;  %v535_v8 = vadd.f32 %v966_v59, %v512_v0  ;;  %v543_v9 = vadd.f32 %v966_v59, %v520_v1 }
  0xfe   :  { %v627_v4 = vpop.f32.mrb[5].mxu0  ;;  %v651_v5 = vpop.f32.mrb[5].mxu1 }
  0xff   :  { %v629_v10 = vpop.f32.mrb[6].mxu0  ;;  %v653_v11 = vpop.f32.mrb[6].mxu1  ;;  %v628_v12 = vadd.f32 %v627_v4, %v626_v2  ;;  %v652_v13 = vadd.f32 %v651_v5, %v650_v3  ;;  %566 = vst [vmem:[%s1054_s6] sm:$0xff] %v550_v6  ;;  %574 = vst [vmem:[%s1054_s6 + $0x40] sm:$0xff] %v558_v7  ;;  %v551_v16 = vmax.f32 %v535_v8, 0.0  ;;  %v559_v17 = vmax.f32 %v543_v9, 0.0 }
 0x100   :  { %v630_v14 = vpop.f32.mrb[7].mxu0  ;;  %v654_v15 = vpop.f32.mrb[7].mxu1 }
 0x101   :  { %v631_v20 = vadd.f32 %v630_v14, %v629_v10  ;;  %v655_v21 = vadd.f32 %v654_v15, %v653_v11  ;;  %567 = vst [vmem:[%s1054_s6 + $0x8] sm:$0xff] %v551_v16  ;;  %575 = vst [vmem:[%s1054_s6 + $0x48] sm:$0xff] %v559_v17  ;;  %v513_v22 = vmul.f32 %v628_v12, %v961_v54 }
 0x102   :  { %v521_v25 = vmul.f32 %v652_v13, %v961_v54 }
 0x103   :  { %v514_v26 = vmul.f32 %v631_v20, %v961_v54  ;;  %v522_v27 = vmul.f32 %v655_v21, %v961_v54  ;;  %v536_v19 = vadd.f32 %v966_v59, %v513_v22 }
 0x104   :  { %v544_v30 = vadd.f32 %v966_v59, %v521_v25 }
 0x105   :  { %v632_v28 = vpop.f32.mrb[8].mxu0  ;;  %v656_v29 = vpop.f32.mrb[8].mxu1  ;;  %v537_v33 = vadd.f32 %v966_v59, %v514_v26  ;;  %v545_v34 = vadd.f32 %v966_v59, %v522_v27  ;;  %v552_v39 = vmax.f32 %v536_v19, 0.0 }
 0x106   :  { %v633_v31 = vpop.f32.mrb[9].mxu0  ;;  %v657_v32 = vpop.f32.mrb[9].mxu1  ;;  %v560_v40 = vmax.f32 %v544_v30, 0.0 }
 0x107   :  { %v634_v35 = vadd.f32 %v633_v31, %v632_v28  ;;  %v658_v36 = vadd.f32 %v657_v32, %v656_v29  ;;  %v635_v37 = vpop.f32.mrb[10].mxu0  ;;  %v659_v38 = vpop.f32.mrb[10].mxu1  ;;  %v553_v42 = vmax.f32 %v537_v33, 0.0  ;;  %v561_v43 = vmax.f32 %v545_v34, 0.0  ;;  %568 = vst [vmem:[%s1054_s6 + $0x10] sm:$0xff] %v552_v39 }
 0x108   :  { %v636_v41 = vpop.f32.mrb[11].mxu0  ;;  %v660_v24 = vpop.f32.mrb[11].mxu1  ;;  %576 = vst [vmem:[%s1054_s6 + $0x50] sm:$0xff] %v560_v40 }
 0x109   :  { %v637_v44 = vadd.f32 %v636_v41, %v635_v37  ;;  %v661_v45 = vadd.f32 %v660_v24, %v659_v38  ;;  %569 = vst [vmem:[%s1054_s6 + $0x18] sm:$0xff] %v553_v42  ;;  %577 = vst [vmem:[%s1054_s6 + $0x58] sm:$0xff] %v561_v43  ;;  %v515_v18 = vmul.f32 %v634_v35, %v961_v54 }
 0x10a   :  { %v523_v46 = vmul.f32 %v658_v36, %v961_v54 }
 0x10b   :  { %v538_v47 = vadd.f32 %v966_v59, %v515_v18  ;;  %v516_v51 = vmul.f32 %v637_v44, %v961_v54  ;;  %v524_v23 = vmul.f32 %v661_v45, %v961_v54 }
 0x10c   :  { %v546_v48 = vadd.f32 %v966_v59, %v523_v46 }
 0x10d   :  { %v638_v49 = vpop.f32.mrb[12].mxu0  ;;  %v662_v50 = vpop.f32.mrb[12].mxu1  ;;  %v554_v55 = vmax.f32 %v538_v47, 0.0  ;;  %v539_v62 = vadd.f32 %v966_v59, %v516_v51  ;;  %v547_v63 = vadd.f32 %v966_v59, %v524_v23 }
 0x10e   :  { %v639_v52 = vpop.f32.mrb[13].mxu0  ;;  %v663_v53 = vpop.f32.mrb[13].mxu1  ;;  %v562_v56 = vmax.f32 %v546_v48, 0.0 }
 0x10f   :  { %v640_v57 = vadd.f32 %v639_v52, %v638_v49  ;;  %v664_v58 = vadd.f32 %v663_v53, %v662_v50  ;;  %v641_v60 = vpop.f32.mrb[14].mxu0  ;;  %v665_v61 = vpop.f32.mrb[14].mxu1  ;;  %570 = vst [vmem:[%s1054_s6 + $0x20] sm:$0xff] %v554_v55  ;;  %v555_v4 = vmax.f32 %v539_v62, 0.0  ;;  %v563_v5 = vmax.f32 %v547_v63, 0.0 }
 0x110   :  { %v642_v0 = vpop.f32.mrb[15].mxu0  ;;  %v666_v1 = vpop.f32.mrb[15].mxu1  ;;  %578 = vst [vmem:[%s1054_s6 + $0x60] sm:$0xff] %v562_v56 }
 0x111   :  { %v643_v2 = vadd.f32 %v642_v0, %v641_v60  ;;  %v667_v3 = vadd.f32 %v666_v1, %v665_v61  ;;  %v517_v6 = vmul.f32 %v640_v57, %v961_v54  ;;  %v525_v7 = vmul.f32 %v664_v58, %v961_v54  ;;  %571 = vst [vmem:[%s1054_s6 + $0x28] sm:$0xff] %v555_v4 }
 0x112   :  { %579 = vst [vmem:[%s1054_s6 + $0x68] sm:$0xff] %v563_v5 }
 0x113   :  { %v540_v8 = vadd.f32 %v966_v59, %v517_v6  ;;  %v548_v9 = vadd.f32 %v966_v59, %v525_v7  ;;  %v518_v10 = vmul.f32 %v643_v2, %v961_v54  ;;  %v526_v11 = vmul.f32 %v667_v3, %v961_v54 }
 0x115   :  { %v556_v12 = vmax.f32 %v540_v8, 0.0  ;;  %v564_v13 = vmax.f32 %v548_v9, 0.0  ;;  %v541_v14 = vadd.f32 %v966_v59, %v518_v10  ;;  %v549_v15 = vadd.f32 %v966_v59, %v526_v11 }
 0x117   :  { %572 = vst [vmem:[%s1054_s6 + $0x30] sm:$0xff] %v556_v12  ;;  %580 = vst [vmem:[%s1054_s6 + $0x70] sm:$0xff] %v564_v13  ;;  %v557_v16 = vmax.f32 %v541_v14, 0.0  ;;  %v565_v17 = vmax.f32 %v549_v15, 0.0 }
 0x119   :  { %573 = vst [vmem:[%s1054_s6 + $0x38] sm:$0xff] %v557_v16  ;;  %581 = vst [vmem:[%s1054_s6 + $0x78] sm:$0xff] %v565_v17 }

// kernel: densenet_forward.107
= control target key start
LH: loop header
LB: loop body
LE: loop exit
PB: predicated region body
PF: predicated region fallthrough
CT: control target
= control target key end

     0   :  { %s119_s0 = inlined_call_operand.vmem [shape: f32[4,32,128], index: 0, kind: input, shape index: {}]   ;;  %s120_s1 = inlined_call_operand.vmem [shape: f32[32,128], index: 1, kind: output, shape index: {}]  }
   0x1   :  { %v8_v0 = vld [vmem:[%s119_s0] sm:$0xff]  ;;  %v9_v4 = vld [vmem:[%s119_s0 + $0x8] sm:$0xff]  ;;  %v10_v9 = vld [vmem:[%s119_s0 + $0x10] sm:$0xff] }
   0x2   :  { %v12_v1 = vld [vmem:[%s119_s0 + $0x20] sm:$0xff]  ;;  %v13_v5 = vld [vmem:[%s119_s0 + $0x28] sm:$0xff]  ;;  %v14_v12 = vld [vmem:[%s119_s0 + $0x30] sm:$0xff] }
   0x3   :  { %v16_v2 = vld [vmem:[%s119_s0 + $0x40] sm:$0xff]  ;;  %v24_v3 = vadd.f32 %v12_v1, %v8_v0  ;;  %v17_v7 = vld [vmem:[%s119_s0 + $0x48] sm:$0xff]  ;;  %v27_v8 = vadd.f32 %v13_v5, %v9_v4  ;;  %v18_v13 = vld [vmem:[%s119_s0 + $0x50] sm:$0xff]  ;;  %v30_v15 = vadd.f32 %v14_v12, %v10_v9 }
   0x4   :  { %v20_v6 = vld [vmem:[%s119_s0 + $0x60] sm:$0xff]  ;;  %v21_v11 = vld [vmem:[%s119_s0 + $0x68] sm:$0xff]  ;;  %v11_v16 = vld [vmem:[%s119_s0 + $0x18] sm:$0xff] }
   0x5   :  { %v25_v10 = vadd.f32 %v24_v3, %v16_v2  ;;  %v28_v14 = vadd.f32 %v27_v8, %v17_v7  ;;  %v15_v17 = vld [vmem:[%s119_s0 + $0x38] sm:$0xff]  ;;  %v22_v20 = vld [vmem:[%s119_s0 + $0x70] sm:$0xff]  ;;  %v31_v23 = vadd.f32 %v30_v15, %v18_v13 }
   0x6   :  { %v19_v18 = vld [vmem:[%s119_s0 + $0x58] sm:$0xff]  ;;  %v33_v21 = vadd.f32 %v15_v17, %v11_v16 }
   0x7   :  { %v26_v19 = vadd.f32 %v25_v10, %v20_v6  ;;  %v29_v22 = vadd.f32 %v28_v14, %v21_v11  ;;  %v23_v24 = vld [vmem:[%s119_s0 + $0x78] sm:$0xff]  ;;  %v32_v28 = vadd.f32 %v31_v23, %v22_v20 }
   0x8   :  { %v34_v26 = vadd.f32 %v33_v21, %v19_v18 }
   0x9   :  { %v37_v25 = vmul.f32 0.25, %v26_v19  ;;  %v38_v27 = vmul.f32 0.25, %v29_v22  ;;  %v39_v30 = vmul.f32 0.25, %v32_v28 }
   0xa   :  { %v35_v29 = vadd.f32 %v34_v26, %v23_v24 }
   0xb   :  { %41 = vst [vmem:[%s120_s1] sm:$0xff] %v37_v25  ;;  %42 = vst [vmem:[%s120_s1 + $0x8] sm:$0xff] %v38_v27 }
   0xc   :  { %v40_v31 = vmul.f32 0.25, %v35_v29  ;;  %43 = vst [vmem:[%s120_s1 + $0x10] sm:$0xff] %v39_v30 }
   0xe   :  { %44 = vst [vmem:[%s120_s1 + $0x18] sm:$0xff] %v40_v31 }

// kernel: densenet_forward.108
= control target key start
LH: loop header
LB: loop body
LE: loop exit
PB: predicated region body
PF: predicated region fallthrough
CT: control target
= control target key end

     0   :  { %s376_s1 = inlined_call_operand.vmem [shape: bf16[128,128], index: 1, kind: input, shape index: {}]   ;;  %s377_s0 = inlined_call_operand.vmem [shape: f32[32,128], index: 0, kind: input, shape index: {}]   ;;  %s378_s2 = inlined_call_operand.vmem [shape: f32[1,128], index: 2, kind: input, shape index: {}]   ;;  %s379_s3 = inlined_call_operand.vmem [shape: f32[1,128], index: 3, kind: input, shape index: {}]   ;;  %s380_s4 = inlined_call_operand.vmem [shape: f32[1,128], index: 4, kind: input, shape index: {}]   ;;  %s381_s5 = inlined_call_operand.vmem [shape: f32[1,128], index: 5, kind: input, shape index: {}]   ;;  %s382_s6 = inlined_call_operand.vmem [shape: f32[32,128], index: 6, kind: output, shape index: {}]  }
   0x1   :  { %v273_v0 = vld [vmem:[%s376_s1] sm:$0xff]   ;;  %v274_v1 = vld [vmem:[%s376_s1 + $0x8] sm:$0xff]   ;;  %v275_v2 = vld [vmem:[%s376_s1 + $0x10] sm:$0xff]  }
   0x2   :  { %252 = vmatprep.subr.bf16.mxu0 %v273_v0  ;;  %v276_v3 = vld [vmem:[%s376_s1 + $0x18] sm:$0xff]   ;;  %v32_v4 = vld [vmem:[%s377_s0] sm:$0xff]  ;;  %v33_v5 = vld [vmem:[%s377_s0 + $0x8] sm:$0xff] }
   0x3   :  { %253 = vmatpush3.bf16.msra.mxu0 %v273_v0  ;;  %v230_v6 = vld [vmem:[%s378_s2] ss:$0 sm:$0xff]  ;;  %v34_v16 = vld [vmem:[%s377_s0 + $0x10] sm:$0xff]  ;;  %v35_v17 = vld [vmem:[%s377_s0 + $0x18] sm:$0xff] }
   0x4   :  { %254 = vmatprep.subr.bf16.mxu0 %v274_v1  ;;  %v43_v7 = vmul.f32 %v230_v6, %v32_v4  ;;  %v44_v8 = vmul.f32 %v230_v6, %v33_v5  ;;  %v231_v9 = vld [vmem:[%s379_s3] ss:$0 sm:$0xff]  ;;  %v278_v18 = vld [vmem:[%s376_s1 + $0x28] sm:$0xff]   ;;  %v45_v19 = vmul.f32 %v230_v6, %v34_v16  ;;  %v46_v20 = vmul.f32 %v230_v6, %v35_v17  ;;  %v279_v21 = vld [vmem:[%s376_s1 + $0x30] sm:$0xff]  }
   0x5   :  { %v277_v12 = vld [vmem:[%s376_s1 + $0x20] sm:$0xff]   ;;  %v280_v24 = vld [vmem:[%s376_s1 + $0x38] sm:$0xff]  }
   0x6   :  { %v54_v10 = vadd.f32 %v231_v9, %v43_v7  ;;  %v55_v11 = vadd.f32 %v231_v9, %v44_v8  ;;  %v56_v22 = vadd.f32 %v231_v9, %v45_v19  ;;  %v57_v23 = vadd.f32 %v231_v9, %v46_v20  ;;  %v240_v29 = vld [vmem:[%s380_s4] ss:$0 sm:$0xff] }
   0x7   :  { %255 = vmatpush3.bf16.msra.mxu0 %v274_v1  ;;  %v241_v31 = vld [vmem:[%s381_s5] ss:$0 sm:$0xff] }
   0x8   :  { %256 = vmatprep.subr.bf16.mxu0 %v275_v2  ;;  %v58_v13 = vmax.f32 %v54_v10, 0.0  ;;  %v59_v14 = vmax.f32 %v55_v11, 0.0  ;;  %v60_v25 = vmax.f32 %v56_v22, 0.0  ;;  %v61_v26 = vmax.f32 %v57_v23, 0.0 }
   0xa   :  { %v66_v15 = vpack.c.bf16 %v59_v14, %v58_v13  ;;  %v67_v27 = vpack.c.bf16 %v61_v26, %v60_v25 }
   0xb   :  { %257 = vmatpush3.bf16.msra.mxu0 %v275_v2 }
   0xc   :  { %258 = vmatprep.subr.bf16.mxu0 %v276_v3  ;;  %268 = vmatprep.mubr.bf16.mxu0 %v66_v15 }
   0xf   :  { %259 = vmatpush3.bf16.msra.mxu0 %v276_v3 }
  0x10   :  { %260 = vmatprep.subr.bf16.mxu0 %v277_v12 }
  0x13   :  { %261 = vmatpush3.bf16.msra.mxu0 %v277_v12 }
  0x14   :  { %262 = vmatprep.subr.bf16.mxu0 %v278_v18 }
  0x17   :  { %263 = vmatpush3.bf16.msra.mxu0 %v278_v18 }
  0x18   :  { %264 = vmatprep.subr.bf16.mxu0 %v279_v21 }
  0x1b   :  { %265 = vmatpush3.bf16.msra.mxu0 %v279_v21 }
  0x1c   :  { %266 = vmatprep.subr.bf16.mxu0 %v280_v24 }
  0x1f   :  { %267 = vmatpush3.bf16.msra.mxu0 %v280_v24 }
  0x22   :  { %269 = vmatmul.mubr.bf16.vlgmr.msra.gmra.mrb[0].mxu0 %v67_v27 }
  0xf5   :  { %v270_v28 = vpop.f32.mrb[0].mxu0 }
  0xf6   :  { %v166_v30 = vpop.f32.mrb[1].mxu0  ;;  %v205_v33 = vmul.f32 %v270_v28, %v240_v29 }
  0xf7   :  { %v271_v32 = vpop.f32.mrb[2].mxu0  ;;  %v203_v35 = vmul.f32 %v240_v29, %v166_v30 }
  0xf8   :  { %v169_v34 = vpop.f32.mrb[3].mxu0  ;;  %v216_v36 = vadd.f32 %v241_v31, %v205_v33  ;;  %v206_v37 = vmul.f32 %v271_v32, %v240_v29 }
  0xf9   :  { %v214_v38 = vadd.f32 %v241_v31, %v203_v35  ;;  %v204_v39 = vmul.f32 %v240_v29, %v169_v34 }
  0xfa   :  { %v220_v40 = vmax.f32 %v216_v36, 0.0  ;;  %v217_v41 = vadd.f32 %v241_v31, %v206_v37 }
  0xfb   :  { %v218_v42 = vmax.f32 %v214_v38, 0.0  ;;  %v215_v43 = vadd.f32 %v241_v31, %v204_v39 }
  0xfc   :  { %224 = vst [vmem:[%s382_s6 + $0x10] sm:$0xff] %v220_v40  ;;  %v221_v44 = vmax.f32 %v217_v41, 0.0 }
  0xfd   :  { %222 = vst [vmem:[%s382_s6] sm:$0xff] %v218_v42  ;;  %v219_v45 = vmax.f32 %v215_v43, 0.0 }
  0xfe   :  { %225 = vst [vmem:[%s382_s6 + $0x18] sm:$0xff] %v221_v44 }
  0xff   :  { %223 = vst [vmem:[%s382_s6 + $0x8] sm:$0xff] %v219_v45 }

// kernel: densenet_forward.106
= control target key start
LH: loop header
LB: loop body
LE: loop exit
PB: predicated region body
PF: predicated region fallthrough
CT: control target
= control target key end

     0   :  { %v78_v5 = vlaneseq  ;;  %s1032_s1 = inlined_call_operand.vmem [shape: bf16[256,128], index: 1, kind: input, shape index: {}]   ;;  %s1033_s0 = inlined_call_operand.vmem [shape: f32[128,256], index: 0, kind: input, shape index: {}]   ;;  %s1034_s2 = inlined_call_operand.vmem [shape: f32[1,256], index: 2, kind: input, shape index: {}]   ;;  %s1035_s3 = inlined_call_operand.vmem [shape: f32[1,256], index: 3, kind: input, shape index: {}]   ;;  %s1036_s4 = inlined_call_operand.vmem [shape: f32[1,128], index: 4, kind: input, shape index: {}]   ;;  %s1037_s5 = inlined_call_operand.vmem [shape: f32[1,128], index: 5, kind: input, shape index: {}]   ;;  %s1038_s6 = inlined_call_operand.vmem [shape: f32[128,128], index: 6, kind: output, shape index: {}]  }
   0x1   :  { %v669_v0 = vld [vmem:[%s1032_s1 + $0x40] sm:$0xff]   ;;  %v671_v2 = vld [vmem:[%s1032_s1 + $0x48] sm:$0xff]   ;;  %v673_v4 = vld [vmem:[%s1032_s1 + $0x50] sm:$0xff]  }
   0x2   :  { %v670_v1 = vld [vmem:[%s1032_s1] sm:$0xff]   ;;  %588 = vmatprep.subr.bf16.mxu0 %v669_v0  ;;  %652 = vmatprep.subr.bf16.mxu1 %v669_v0  ;;  %v672_v3 = vld [vmem:[%s1032_s1 + $0x8] sm:$0xff]   ;;  %v674_v6 = vld [vmem:[%s1032_s1 + $0x10] sm:$0xff]   ;;  %v79_v8 = vshrl.u32 %v78_v5, 7 }
   0x3   :  { %589 = vmatpush3.bf16.msra.mxu0 %v670_v1  ;;  %660 = vmatpush3.bf16.msra.mxu1 %v670_v1  ;;  %v675_v7 = vld [vmem:[%s1032_s1 + $0x58] sm:$0xff]   ;;  %v677_v10 = vld [vmem:[%s1032_s1 + $0x60] sm:$0xff]   ;;  %v679_v14 = vld [vmem:[%s1032_s1 + $0x68] sm:$0xff]  }
   0x4   :  { %590 = vmatprep.subr.bf16.mxu0 %v671_v2  ;;  %653 = vmatprep.subr.bf16.mxu1 %v671_v2  ;;  %v676_v9 = vld [vmem:[%s1032_s1 + $0x18] sm:$0xff]   ;;  %v80_v11 = vsub.s32 0, %v79_v8  ;;  %v84_v12 = vsub.s32 1, %v79_v8  ;;  %v678_v13 = vld [vmem:[%s1032_s1 + $0x20] sm:$0xff]   ;;  %v45_v15 = vld [vmem:[%s1033_s0 + $0x8] sm:$0xff] }
   0x5   :  { %v47_v16 = vld [vmem:[%s1033_s0 + $0x18] sm:$0xff]  ;;  %v76_v17 = vld [vmem:[%s1034_s2] sm:$0x3]  ;;  %v61_v21 = vld [vmem:[%s1033_s0 + $0x88] sm:$0xff] }
   0x6   :  { %v762_v18 = vrot.slane %v76_v17, %v80_v11  ;;  %v764_v19 = vrot.slane %v76_v17, %v84_v12  ;;  %v120_v20 = vld [vmem:[%s1035_s3] sm:$0x3]  ;;  %v63_v22 = vld [vmem:[%s1033_s0 + $0x98] sm:$0xff]  ;;  %v46_v26 = vld [vmem:[%s1033_s0 + $0x10] sm:$0xff] }
   0x7   :  { %591 = vmatpush3.bf16.msra.mxu0 %v672_v3  ;;  %661 = vmatpush3.bf16.msra.mxu1 %v672_v3  ;;  %v775_v23 = vrot.slane %v120_v20, %v80_v11  ;;  %v777_v24 = vrot.slane %v120_v20, %v84_v12  ;;  %v44_v25 = vld [vmem:[%s1033_s0] sm:$0xff]  ;;  %v680_v28 = vld [vmem:[%s1032_s1 + $0x28] sm:$0xff]   ;;  %v62_v32 = vld [vmem:[%s1033_s0 + $0x90] sm:$0xff] }
   0x8   :  { %592 = vmatprep.subr.bf16.mxu0 %v673_v4  ;;  %654 = vmatprep.subr.bf16.mxu1 %v673_v4  ;;  %v60_v27 = vld [vmem:[%s1033_s0 + $0x80] sm:$0xff]  ;;  %v89_v29 = vmul.f32 %v764_v19, %v45_v15  ;;  %v91_v30 = vmul.f32 %v764_v19, %v47_v16  ;;  %v105_v31 = vmul.f32 %v764_v19, %v61_v21  ;;  %v681_v33 = vld [vmem:[%s1032_s1 + $0x70] sm:$0xff]   ;;  %v49_v45 = vld [vmem:[%s1033_s0 + $0x28] sm:$0xff] }
   0x9   :  { %v107_v34 = vmul.f32 %v764_v19, %v63_v22  ;;  %v88_v35 = vmul.f32 %v762_v18, %v44_v25  ;;  %v90_v36 = vmul.f32 %v762_v18, %v46_v26  ;;  %v104_v40 = vmul.f32 %v762_v18, %v60_v27  ;;  %v51_v46 = vld [vmem:[%s1033_s0 + $0x38] sm:$0xff]  ;;  %v682_v47 = vld [vmem:[%s1032_s1 + $0x30] sm:$0xff]   ;;  %v65_v52 = vld [vmem:[%s1033_s0 + $0xa8] sm:$0xff] }
   0xa   :  { %v133_v37 = vadd.f32 %v777_v24, %v89_v29  ;;  %v135_v38 = vadd.f32 %v777_v24, %v91_v30  ;;  %v149_v39 = vadd.f32 %v777_v24, %v105_v31  ;;  %v106_v44 = vmul.f32 %v762_v18, %v62_v32  ;;  %v683_v53 = vld [vmem:[%s1032_s1 + $0x78] sm:$0xff]   ;;  %v48_v63 = vld [vmem:[%s1033_s0 + $0x20] sm:$0xff]  ;;  %v50_v4 = vld [vmem:[%s1033_s0 + $0x30] sm:$0xff] }
   0xb   :  { %593 = vmatpush3.bf16.msra.mxu0 %v674_v6  ;;  %662 = vmatpush3.bf16.msra.mxu1 %v674_v6  ;;  %v151_v41 = vadd.f32 %v777_v24, %v107_v34  ;;  %v132_v42 = vadd.f32 %v775_v23, %v88_v35  ;;  %v134_v43 = vadd.f32 %v775_v23, %v90_v36  ;;  %v67_v58 = vld [vmem:[%s1033_s0 + $0xb8] sm:$0xff] }
   0xc   :  { %594 = vmatprep.subr.bf16.mxu0 %v675_v7  ;;  %655 = vmatprep.subr.bf16.mxu1 %v675_v7  ;;  %v165_v48 = vmax.f32 %v133_v37, 0.0  ;;  %v167_v49 = vmax.f32 %v135_v38, 0.0  ;;  %v181_v50 = vmax.f32 %v149_v39, 0.0  ;;  %v148_v51 = vadd.f32 %v775_v23, %v104_v40  ;;  %v684_v5 = vld [vmem:[%s1032_s1 + $0x38] sm:$0xff]   ;;  %v52_v38 = vld [vmem:[%s1033_s0 + $0x40] sm:$0xff] }
   0xd   :  { %v183_v54 = vmax.f32 %v151_v41, 0.0  ;;  %v164_v55 = vmax.f32 %v132_v42, 0.0  ;;  %v166_v56 = vmax.f32 %v134_v43, 0.0  ;;  %v150_v57 = vadd.f32 %v775_v23, %v106_v44  ;;  %v55_v21 = vld [vmem:[%s1033_s0 + $0x58] sm:$0xff]  ;;  %v54_v43 = vld [vmem:[%s1033_s0 + $0x50] sm:$0xff] }
   0xe   :  { %v213_v59 = vpack.c.bf16 %v167_v49, %v165_v48  ;;  %v180_v60 = vmax.f32 %v148_v51, 0.0  ;;  %v93_v61 = vmul.f32 %v764_v19, %v49_v45  ;;  %v95_v62 = vmul.f32 %v764_v19, %v51_v46  ;;  %v68_v48 = vld [vmem:[%s1033_s0 + $0xc0] sm:$0xff]  ;;  %v70_v49 = vld [vmem:[%s1033_s0 + $0xd0] sm:$0xff] }
   0xf   :  { %595 = vmatpush3.bf16.msra.mxu0 %v676_v9  ;;  %663 = vmatpush3.bf16.msra.mxu1 %v676_v9  ;;  %v221_v0 = vpack.c.bf16 %v183_v54, %v181_v50  ;;  %v212_v1 = vpack.c.bf16 %v166_v56, %v164_v55  ;;  %v182_v2 = vmax.f32 %v150_v57, 0.0  ;;  %v109_v3 = vmul.f32 %v764_v19, %v65_v52  ;;  %v64_v9 = vld [vmem:[%s1033_s0 + $0xa0] sm:$0xff]  ;;  %v57_v54 = vld [vmem:[%s1033_s0 + $0x68] sm:$0xff] }
  0x10   :  { %596 = vmatprep.subr.bf16.mxu0 %v677_v10  ;;  %656 = vmatprep.subr.bf16.mxu1 %v677_v10  ;;  %v137_v6 = vadd.f32 %v777_v24, %v93_v61  ;;  %v139_v7 = vadd.f32 %v777_v24, %v95_v62  ;;  %v111_v8 = vmul.f32 %v764_v19, %v67_v58  ;;  %v66_v10 = vld [vmem:[%s1033_s0 + $0xb0] sm:$0xff] }
  0x11   :  { %v220_v11 = vpack.c.bf16 %v182_v2, %v180_v60  ;;  %v153_v12 = vadd.f32 %v777_v24, %v109_v3  ;;  %388 = vmatprep.mubr.bf16.mxu0 %v213_v59  ;;  %420 = vmatprep.mubr.bf16.mxu1 %v221_v0  ;;  %v94_v20 = vmul.f32 %v762_v18, %v50_v4  ;;  %v59_v59 = vld [vmem:[%s1033_s0 + $0x78] sm:$0xff]  ;;  %v73_v0 = vld [vmem:[%s1033_s0 + $0xe8] sm:$0xff] }
  0x12   :  { %v169_v15 = vmax.f32 %v137_v6, 0.0  ;;  %v171_v16 = vmax.f32 %v139_v7, 0.0  ;;  %v155_v17 = vadd.f32 %v777_v24, %v111_v8  ;;  %v108_v26 = vmul.f32 %v762_v18, %v64_v9 }
  0x13   :  { %597 = vmatpush3.bf16.msra.mxu0 %v678_v13  ;;  %664 = vmatpush3.bf16.msra.mxu1 %v678_v13  ;;  %v92_v13 = vmul.f32 %v762_v18, %v48_v63  ;;  %v185_v22 = vmax.f32 %v153_v12, 0.0  ;;  %v110_v27 = vmul.f32 %v762_v18, %v66_v10  ;;  %v138_v31 = vadd.f32 %v775_v23, %v94_v20  ;;  %v56_v10 = vld [vmem:[%s1033_s0 + $0x60] sm:$0xff] }
  0x14   :  { %598 = vmatprep.subr.bf16.mxu0 %v679_v14  ;;  %657 = vmatprep.subr.bf16.mxu1 %v679_v14  ;;  %v53_v14 = vld [vmem:[%s1033_s0 + $0x48] sm:$0xff]  ;;  %v215_v29 = vpack.c.bf16 %v171_v16, %v169_v15  ;;  %v187_v30 = vmax.f32 %v155_v17, 0.0  ;;  %v152_v35 = vadd.f32 %v775_v23, %v108_v26  ;;  %v99_v37 = vmul.f32 %v764_v19, %v55_v21  ;;  %v58_v15 = vld [vmem:[%s1033_s0 + $0x70] sm:$0xff] }
  0x15   :  { %v136_v25 = vadd.f32 %v775_v23, %v92_v13  ;;  %v97_v32 = vmul.f32 %v764_v19, %v53_v14  ;;  %v154_v36 = vadd.f32 %v775_v23, %v110_v27  ;;  %v170_v40 = vmax.f32 %v138_v31, 0.0 }
  0x16   :  { %v223_v39 = vpack.c.bf16 %v187_v30, %v185_v22  ;;  %v184_v44 = vmax.f32 %v152_v35, 0.0  ;;  %v143_v46 = vadd.f32 %v777_v24, %v99_v37  ;;  %v98_v58 = vmul.f32 %v762_v18, %v54_v43  ;;  %v72_v22 = vld [vmem:[%s1033_s0 + $0xe0] sm:$0xff] }
  0x17   :  { %599 = vmatpush3.bf16.msra.mxu0 %v680_v28  ;;  %665 = vmatpush3.bf16.msra.mxu1 %v680_v28  ;;  %v69_v28 = vld [vmem:[%s1033_s0 + $0xc8] sm:$0xff]  ;;  %v168_v34 = vmax.f32 %v136_v25, 0.0  ;;  %v141_v41 = vadd.f32 %v777_v24, %v97_v32  ;;  %v186_v45 = vmax.f32 %v154_v36, 0.0  ;;  %v112_v62 = vmul.f32 %v762_v18, %v68_v48  ;;  %v74_v25 = vld [vmem:[%s1033_s0 + $0xf0] sm:$0xff] }
  0x18   :  { %600 = vmatprep.subr.bf16.mxu0 %v681_v33  ;;  %658 = vmatprep.subr.bf16.mxu1 %v681_v33  ;;  %v71_v33 = vld [vmem:[%s1033_s0 + $0xd8] sm:$0xff]  ;;  %v113_v42 = vmul.f32 %v764_v19, %v69_v28  ;;  %v175_v56 = vmax.f32 %v143_v46, 0.0  ;;  %v114_v63 = vmul.f32 %v762_v18, %v70_v49  ;;  %v142_v3 = vadd.f32 %v775_v23, %v98_v58 }
  0x19   :  { %v214_v50 = vpack.c.bf16 %v170_v40, %v168_v34  ;;  %v173_v51 = vmax.f32 %v141_v41, 0.0  ;;  %v222_v55 = vpack.c.bf16 %v186_v45, %v184_v44  ;;  %v101_v4 = vmul.f32 %v764_v19, %v57_v54  ;;  %v945_v54 = vld [vmem:[%s1036_s4] ss:$0 sm:$0xff] }
  0x1a   :  { %v157_v52 = vadd.f32 %v777_v24, %v113_v42  ;;  %v156_v7 = vadd.f32 %v775_v23, %v112_v62  ;;  %v158_v8 = vadd.f32 %v775_v23, %v114_v63  ;;  %v103_v9 = vmul.f32 %v764_v19, %v59_v59  ;;  %v950_v59 = vld [vmem:[%s1037_s5] ss:$0 sm:$0xff] }
  0x1b   :  { %601 = vmatpush3.bf16.msra.mxu0 %v682_v47  ;;  %666 = vmatpush3.bf16.msra.mxu1 %v682_v47  ;;  %v115_v47 = vmul.f32 %v764_v19, %v71_v33  ;;  %v174_v12 = vmax.f32 %v142_v3, 0.0  ;;  %v145_v13 = vadd.f32 %v777_v24, %v101_v4  ;;  %v117_v14 = vmul.f32 %v764_v19, %v73_v0 }
  0x1c   :  { %602 = vmatprep.subr.bf16.mxu0 %v683_v53  ;;  %659 = vmatprep.subr.bf16.mxu1 %v683_v53  ;;  %v96_v53 = vmul.f32 %v762_v18, %v52_v38  ;;  %v189_v60 = vmax.f32 %v157_v52, 0.0  ;;  %v188_v16 = vmax.f32 %v156_v7, 0.0  ;;  %v190_v17 = vmax.f32 %v158_v8, 0.0 }
  0x1d   :  { %v159_v57 = vadd.f32 %v777_v24, %v115_v47  ;;  %v147_v20 = vadd.f32 %v777_v24, %v103_v9  ;;  %v161_v26 = vadd.f32 %v777_v24, %v117_v14  ;;  %v100_v27 = vmul.f32 %v762_v18, %v56_v10 }
  0x1e   :  { %v140_v61 = vadd.f32 %v775_v23, %v96_v53  ;;  %v177_v28 = vmax.f32 %v145_v13, 0.0  ;;  %v102_v30 = vmul.f32 %v762_v18, %v58_v15  ;;  %v116_v32 = vmul.f32 %v762_v18, %v72_v22 }
  0x1f   :  { %603 = vmatpush3.bf16.msra.mxu0 %v684_v5  ;;  %667 = vmatpush3.bf16.msra.mxu1 %v684_v5  ;;  %v191_v2 = vmax.f32 %v159_v57, 0.0  ;;  %v75_v5 = vld [vmem:[%s1033_s0 + $0xf8] sm:$0xff]  ;;  %v193_v31 = vmax.f32 %v161_v26, 0.0  ;;  %v118_v33 = vmul.f32 %v762_v18, %v74_v25  ;;  %v224_v35 = vpack.c.bf16 %v190_v17, %v188_v16 }
  0x20   :  { %v172_v6 = vmax.f32 %v140_v61, 0.0  ;;  %v119_v21 = vmul.f32 %v764_v19, %v75_v5  ;;  %v144_v37 = vadd.f32 %v775_v23, %v100_v27  ;;  %v146_v38 = vadd.f32 %v775_v23, %v102_v30 }
  0x21   :  { %v162_v40 = vadd.f32 %v775_v23, %v118_v33 }
  0x22   :  { %389 = vmatmul.mubr.bf16.vlgmr.msra.gmra.mrb[0].mxu0 %v212_v1  ;;  %421 = vmatmul.mubr.bf16.vlgmr.msra.gmra.mrb[0].mxu1 %v220_v11  ;;  %v217_v1 = vpack.c.bf16 %v175_v56, %v173_v51  ;;  %v225_v11 = vpack.c.bf16 %v191_v2, %v189_v60  ;;  %v163_v19 = vadd.f32 %v777_v24, %v119_v21  ;;  %v176_v42 = vmax.f32 %v144_v37, 0.0 }
  0x23   :  { %396 = vmatprep.mubr.bf16.mxu0 %v215_v29  ;;  %428 = vmatprep.mubr.bf16.mxu1 %v223_v39  ;;  %v179_v29 = vmax.f32 %v147_v20, 0.0  ;;  %v216_v34 = vpack.c.bf16 %v174_v12, %v172_v6  ;;  %v160_v39 = vadd.f32 %v775_v23, %v116_v32  ;;  %v178_v43 = vmax.f32 %v146_v38, 0.0 }
  0x24   :  { %v195_v36 = vmax.f32 %v163_v19, 0.0  ;;  %v194_v45 = vmax.f32 %v162_v40, 0.0 }
  0x25   :  { %v219_v41 = vpack.c.bf16 %v179_v29, %v177_v28  ;;  %v192_v44 = vmax.f32 %v160_v39, 0.0  ;;  %v218_v18 = vpack.c.bf16 %v178_v43, %v176_v42 }
  0x26   :  { %v227_v24 = vpack.c.bf16 %v195_v36, %v193_v31 }
  0x27   :  { %v226_v46 = vpack.c.bf16 %v194_v45, %v192_v44 }
  0x2a   :  { %397 = vmatmul.mubr.bf16.gmra.mrb[4].mxu0 %v214_v50  ;;  %429 = vmatmul.mubr.bf16.gmra.mrb[4].mxu1 %v222_v55 }
  0x2b   :  { %404 = vmatprep.mubr.bf16.mxu0 %v217_v1  ;;  %436 = vmatprep.mubr.bf16.mxu1 %v225_v11 }
  0x32   :  { %405 = vmatmul.mubr.bf16.gmra.mrb[8].mxu0 %v216_v34  ;;  %437 = vmatmul.mubr.bf16.gmra.mrb[8].mxu1 %v224_v35 }
  0x33   :  { %412 = vmatprep.mubr.bf16.mxu0 %v219_v41  ;;  %444 = vmatprep.mubr.bf16.mxu1 %v227_v24 }
  0x3a   :  { %413 = vmatmul.mubr.bf16.gmra.mrb[12].mxu0 %v218_v18  ;;  %445 = vmatmul.mubr.bf16.gmra.mrb[12].mxu1 %v226_v46 }
  0xf5   :  { %v604_v47 = vpop.f32.mrb[0].mxu0  ;;  %v628_v48 = vpop.f32.mrb[0].mxu1 }
  0xf6   :  { %v605_v49 = vpop.f32.mrb[1].mxu0  ;;  %v629_v50 = vpop.f32.mrb[1].mxu1 }
  0xf7   :  { %v606_v51 = vadd.f32 %v605_v49, %v604_v47  ;;  %v630_v23 = vadd.f32 %v629_v50, %v628_v48  ;;  %v607_v52 = vpop.f32.mrb[2].mxu0  ;;  %v631_v53 = vpop.f32.mrb[2].mxu1 }
  0xf8   :  { %v608_v55 = vpop.f32.mrb[3].mxu0  ;;  %v632_v56 = vpop.f32.mrb[3].mxu1 }
  0xf9   :  { %v609_v57 = vadd.f32 %v608_v55, %v607_v52  ;;  %v633_v58 = vadd.f32 %v632_v56, %v631_v53  ;;  %v511_v60 = vmul.f32 %v606_v51, %v945_v54  ;;  %v519_v61 = vmul.f32 %v630_v23, %v945_v54 }
  0xfb   :  { %v534_v62 = vadd.f32 %v950_v59, %v511_v60  ;;  %v542_v63 = vadd.f32 %v950_v59, %v519_v61  ;;  %v512_v0 = vmul.f32 %v609_v57, %v945_v54  ;;  %v520_v1 = vmul.f32 %v633_v58, %v945_v54 }
  0xfd   :  { %v610_v2 = vpop.f32.mrb[4].mxu0  ;;  %v634_v3 = vpop.f32.mrb[4].mxu1  ;;  %550 = vst [vmem:[%s1038_s6] sm:$0xff] %v534_v62  ;;  %558 = vst [vmem:[%s1038_s6 + $0x40] sm:$0xff] %v542_v63  ;;  %v535_v6 = vadd.f32 %v950_v59, %v512_v0  ;;  %v543_v7 = vadd.f32 %v950_v59, %v520_v1 }
  0xfe   :  { %v611_v4 = vpop.f32.mrb[5].mxu0  ;;  %v635_v5 = vpop.f32.mrb[5].mxu1 }
  0xff   :  { %v612_v8 = vadd.f32 %v611_v4, %v610_v2  ;;  %v636_v9 = vadd.f32 %v635_v5, %v634_v3  ;;  %v613_v10 = vpop.f32.mrb[6].mxu0  ;;  %v637_v11 = vpop.f32.mrb[6].mxu1  ;;  %551 = vst [vmem:[%s1038_s6 + $0x8] sm:$0xff] %v535_v6  ;;  %559 = vst [vmem:[%s1038_s6 + $0x48] sm:$0xff] %v543_v7 }
 0x100   :  { %v614_v12 = vpop.f32.mrb[7].mxu0  ;;  %v638_v13 = vpop.f32.mrb[7].mxu1 }
 0x101   :  { %v615_v14 = vadd.f32 %v614_v12, %v613_v10  ;;  %v639_v15 = vadd.f32 %v638_v13, %v637_v11  ;;  %v513_v16 = vmul.f32 %v612_v8, %v945_v54  ;;  %v521_v17 = vmul.f32 %v636_v9, %v945_v54 }
 0x103   :  { %v536_v20 = vadd.f32 %v950_v59, %v513_v16  ;;  %v544_v21 = vadd.f32 %v950_v59, %v521_v17  ;;  %v514_v22 = vmul.f32 %v615_v14, %v945_v54  ;;  %v522_v25 = vmul.f32 %v639_v15, %v945_v54 }
 0x105   :  { %v616_v26 = vpop.f32.mrb[8].mxu0  ;;  %v640_v27 = vpop.f32.mrb[8].mxu1  ;;  %552 = vst [vmem:[%s1038_s6 + $0x10] sm:$0xff] %v536_v20  ;;  %560 = vst [vmem:[%s1038_s6 + $0x50] sm:$0xff] %v544_v21  ;;  %v537_v19 = vadd.f32 %v950_v59, %v514_v22  ;;  %v545_v30 = vadd.f32 %v950_v59, %v522_v25 }
 0x106   :  { %v617_v28 = vpop.f32.mrb[9].mxu0  ;;  %v641_v29 = vpop.f32.mrb[9].mxu1 }
 0x107   :  { %v618_v31 = vadd.f32 %v617_v28, %v616_v26  ;;  %v642_v32 = vadd.f32 %v641_v29, %v640_v27  ;;  %v619_v33 = vpop.f32.mrb[10].mxu0  ;;  %v643_v34 = vpop.f32.mrb[10].mxu1  ;;  %553 = vst [vmem:[%s1038_s6 + $0x18] sm:$0xff] %v537_v19  ;;  %561 = vst [vmem:[%s1038_s6 + $0x58] sm:$0xff] %v545_v30 }
 0x108   :  { %v620_v35 = vpop.f32.mrb[11].mxu0  ;;  %v644_v36 = vpop.f32.mrb[11].mxu1 }
 0x109   :  { %v621_v37 = vadd.f32 %v620_v35, %v619_v33  ;;  %v645_v38 = vadd.f32 %v644_v36, %v643_v34  ;;  %v515_v39 = vmul.f32 %v618_v31, %v945_v54  ;;  %v523_v40 = vmul.f32 %v642_v32, %v945_v54 }
 0x10b   :  { %v538_v41 = vadd.f32 %v950_v59, %v515_v39  ;;  %v546_v24 = vadd.f32 %v950_v59, %v523_v40  ;;  %v516_v42 = vmul.f32 %v621_v37, %v945_v54  ;;  %v524_v43 = vmul.f32 %v645_v38, %v945_v54 }
 0x10d   :  { %v622_v44 = vpop.f32.mrb[12].mxu0  ;;  %v646_v45 = vpop.f32.mrb[12].mxu1  ;;  %554 = vst [vmem:[%s1038_s6 + $0x20] sm:$0xff] %v538_v41  ;;  %562 = vst [vmem:[%s1038_s6 + $0x60] sm:$0xff] %v546_v24  ;;  %v539_v47 = vadd.f32 %v950_v59, %v516_v42  ;;  %v547_v48 = vadd.f32 %v950_v59, %v524_v43 }
 0x10e   :  { %v623_v18 = vpop.f32.mrb[13].mxu0  ;;  %v647_v46 = vpop.f32.mrb[13].mxu1 }
 0x10f   :  { %v624_v49 = vadd.f32 %v623_v18, %v622_v44  ;;  %v648_v50 = vadd.f32 %v647_v46, %v646_v45  ;;  %v625_v51 = vpop.f32.mrb[14].mxu0  ;;  %v649_v23 = vpop.f32.mrb[14].mxu1  ;;  %555 = vst [vmem:[%s1038_s6 + $0x28] sm:$0xff] %v539_v47  ;;  %563 = vst [vmem:[%s1038_s6 + $0x68] sm:$0xff] %v547_v48 }
 0x110   :  { %v626_v52 = vpop.f32.mrb[15].mxu0  ;;  %v650_v53 = vpop.f32.mrb[15].mxu1 }
 0x111   :  { %v627_v55 = vadd.f32 %v626_v52, %v625_v51  ;;  %v651_v56 = vadd.f32 %v650_v53, %v649_v23  ;;  %v517_v57 = vmul.f32 %v624_v49, %v945_v54  ;;  %v525_v58 = vmul.f32 %v648_v50, %v945_v54 }
 0x113   :  { %v540_v60 = vadd.f32 %v950_v59, %v517_v57  ;;  %v548_v61 = vadd.f32 %v950_v59, %v525_v58  ;;  %v518_v62 = vmul.f32 %v627_v55, %v945_v54  ;;  %v526_v63 = vmul.f32 %v651_v56, %v945_v54 }
 0x115   :  { %556 = vst [vmem:[%s1038_s6 + $0x30] sm:$0xff] %v540_v60  ;;  %564 = vst [vmem:[%s1038_s6 + $0x70] sm:$0xff] %v548_v61  ;;  %v541_v0 = vadd.f32 %v950_v59, %v518_v62  ;;  %v549_v1 = vadd.f32 %v950_v59, %v526_v63 }
 0x117   :  { %557 = vst [vmem:[%s1038_s6 + $0x38] sm:$0xff] %v541_v0  ;;  %565 = vst [vmem:[%s1038_s6 + $0x78] sm:$0xff] %v549_v1 }

// kernel: densenet_forward.109
= control target key start
LH: loop header
LB: loop body
LE: loop exit
PB: predicated region body
PF: predicated region fallthrough
CT: control target
= control target key end

     0   :  { %s938_s21 = smov 0   ;;  %s940_s22 = smov 0   ;;  %s1088_s0 = inlined_call_operand.vmem [shape: bf16[32,1152], index: 0, kind: input, shape index: {}]   ;;  %s1089_s1 = inlined_call_operand.vmem [shape: bf16[1152,128], index: 1, kind: input, shape index: {}]   ;;  %s1090_s2 = inlined_call_operand.vmem [shape: f32[1,1152], index: 2, kind: input, shape index: {}, may-alias: {2,3}]   ;;  %s1091_s3 = inlined_call_operand.vmem [shape: f32[1,1152], index: 3, kind: input, shape index: {}, may-alias: {2,3}]   ;;  %s1092_s4 = inlined_call_operand.vmem [shape: f32[1,128], index: 4, kind: input, shape index: {}]   ;;  %s1093_s5 = inlined_call_operand.vmem [shape: f32[1,128], index: 5, kind: input, shape index: {}]   ;;  %s1094_s6 = inlined_call_operand.vmem [shape: f32[32,128], index: 6, kind: output, shape index: {}]  }
   0x1   :  { %s942_s23 = smov 0   ;;  %s944_s24 = smov 0  }
   0x2   :  { %s946_s2 = smov 0  }
   0x3 LB: > { %s28_s3 = sadd.s32 1, %s896_s24  ;;  %p51_p1 = scmp.ne.s32.totalorder %s888_s22, %s884_s21  ;;  %s900_s2 = sphi %s946_s2, %s16_s2   ;;  %s896_s24 = sphi %s944_s24, %s1098_s24   ;;  %s892_s23 = sphi %s942_s23, %s1097_s23   ;;  %s888_s22 = sphi %s940_s22, %s1096_s22   ;;  %s884_s21 = sphi %s938_s21, %s1095_s21  }
   0x4   : > { %p29_p0 = scmp.ge.s32.totalorder %s28_s3, 9  ;;  %p52_p2 = scmp.eq.s32.totalorder %s900_s2, 0 }
   0x5   : > { %s44_s26 = sadd.s32 1, %s888_s22  ;;  %p756_p5 = scmp.ge.s32.totalorder %s900_s2, 9 }
   0x6   : > { %s1100_s3 = smov (%p29_p0, %s28_s3), 0  ;;  %p53_p3 = por %p52_p2, %p51_p1 }
   0x7   : > { %s40_s25 = ssub.s32 %s896_s24, %s1100_s3  ;;  %249 = sbr.rel (%p756_p5) target bundleno = 21 (0x15), region = 24 }
   0x8   : > { %p42_p4 = scmp.eq.s32.totalorder %s40_s25, 0 }
   0xa   : > { %s973_s27 = scalar_select %p42_p4, %s888_s22, %s44_s26  }
   0xe   : > { %252 = sbr.rel (!%p53_p3) target bundleno = 21 (0x15), region = 28  ;;  %s254_s28 = sand.u32 (%p53_p3), 1, %s888_s22  }
   0xf   : > { %s758_s29 = sshll.u32 (%p53_p3), %s896_s24, 2  ;;  %s757_s30 = sshll.u32 (%p53_p3), %s254_s28, 4 }
  0x10   : > { %s261_s9 = scalar_lea.vmem (%p53_p3), %s1088_s0, %s758_s29  ;;  %s256_s10 = scalar_lea.vmem (%p53_p3), [#allocation2], %s757_s30 }
  0x11   : > { %v277_v0 = vld [vmem:[%s261_s9] sm:$0xf] (%p53_p3)  ;;  %v279_v1 = vld [vmem:[%s261_s9 + $0x24] sm:$0xf] (%p53_p3)  ;;  %v281_v2 = vld [vmem:[%s261_s9 + $0x48] sm:$0xf] (%p53_p3) }
  0x12   : > { %278 = vst [vmem:[%s256_s10] sm:$0xf] (%p53_p3), %v277_v0  ;;  %280 = vst [vmem:[%s256_s10 + $0x4] sm:$0xf] (%p53_p3), %v279_v1  ;;  %v283_v3 = vld [vmem:[%s261_s9 + $0x6c] sm:$0xf] (%p53_p3) }
  0x13   : > { %282 = vst [vmem:[%s256_s10 + $0x8] sm:$0xf] (%p53_p3), %v281_v2  ;;  %284 = vst [vmem:[%s256_s10 + $0xc] sm:$0xf] (%p53_p3), %v283_v3 }
  0x15 PF: > { %p759_p6 = scmp.ge.s32.totalorder %s900_s2, 1  ;;  %p338_p7 = scmp.lt.s32.totalorder %s900_s2, 10 }
  0x17   : > { %p339_p8 = pnand %p759_p6, %p338_p7 }
  0x18   : > { %s345_s11 = sand.u32 (!%p339_p8), 1, %s884_s21   ;;  %s761_s12 = sshll.u32 (!%p339_p8), %s892_s23, 4 }
  0x19   : > { %342 = sbr.rel (%p339_p8) target bundleno = 302 (0x12e), region = 81  ;;  %s985_s13 = sshll.u32 (!%p339_p8), %s345_s11, 4 }
  0x1a   : > { %p399_p9 = scmp.lt.s32.totalorder (!%p339_p8), %s761_s12, 143  ;;  %s347_s18 = scalar_lea.vmem (!%p339_p8), [#allocation2], %s985_s13 }
  0x1b   : > { %p763_p10 = scmp.ne.s32.totalorder (!%p339_p8), %s892_s23, 0 }
  0x20   : > { %s1102_s12 = smov (!%p399_p9, %s761_s12), 143  ;;  %432 = sbr.rel (%p763_p10) target bundleno = 39 (0x27), region = 89 }
  0x21   : > { %s762_s14 = sshll.u32 %s1102_s12, 2  ;;  %v902_v4 = vmov (!%p763_p10), 0.0  }
  0x22   : > { %s990_s17 = scalar_lea.vmem %s1089_s1, %s762_s14  ;;  %433 = vst [vmem:[%s1094_s6] sm:$0xff] (!%p763_p10), %v902_v4  ;;  %434 = vst [vmem:[%s1094_s6 + $0x8] sm:$0xff] (!%p763_p10), %v902_v4 }
  0x23   : > { %435 = vst [vmem:[%s1094_s6 + $0x10] sm:$0xff] (!%p763_p10), %v902_v4  ;;  %436 = vst [vmem:[%s1094_s6 + $0x18] sm:$0xff] (!%p763_p10), %v902_v4 }
  0x27 PF: > { %v852_v5 = vld [vmem:[%s990_s17] sm:$0xff]   ;;  %v853_v6 = vld [vmem:[%s990_s17 + $0x8] sm:$0xff]   ;;  %v854_v7 = vld [vmem:[%s990_s17 + $0x10] sm:$0xff]   ;;  %p774_p11 = scmp.ne.s32.totalorder %s892_s23, 8 }
  0x28   : > { %791 = vmatprep.subr.bf16.mxu0 %v852_v5  ;;  %v855_v8 = vld [vmem:[%s990_s17 + $0x18] sm:$0xff]   ;;  %v860_v9 = vld [vmem:[%s347_s18] sm:$0xff]   ;;  %v857_v11 = vld [vmem:[%s990_s17 + $0x28] sm:$0xff]  }
  0x29   : > { %792 = vmatpush3.bf16.msra.mxu0 %v852_v5  ;;  %807 = vmatprep.mubr.bf16.mxu0 %v860_v9  ;;  %v856_v10 = vld [vmem:[%s990_s17 + $0x20] sm:$0xff]   ;;  %v858_v12 = vld [vmem:[%s990_s17 + $0x30] sm:$0xff]   ;;  %v859_v13 = vld [vmem:[%s990_s17 + $0x38] sm:$0xff]  }
  0x2a   : > { %793 = vmatprep.subr.bf16.mxu0 %v853_v6  ;;  %v861_v14 = vld [vmem:[%s347_s18 + $0x8] sm:$0xff]   ;;  %v443_v15 = vld [vmem:[%s1094_s6 + $0x10] sm:$0xff]  ;;  %v441_v16 = vld [vmem:[%s1094_s6] sm:$0xff] }
  0x2b   : > { %v444_v18 = vld [vmem:[%s1094_s6 + $0x18] sm:$0xff]  ;;  %v442_v21 = vld [vmem:[%s1094_s6 + $0x8] sm:$0xff]  ;;  %v775_v28 = vld [vmem:[%s1092_s4] ss:$0 sm:$0xff] (!%p774_p11) }
  0x2c   : > { %v776_v29 = vld [vmem:[%s1093_s5] ss:$0 sm:$0xff] (!%p774_p11) }
  0x2d   : > { %794 = vmatpush3.bf16.msra.mxu0 %v853_v6 }
  0x2e   : > { %795 = vmatprep.subr.bf16.mxu0 %v854_v7 }
  0x31   : > { %796 = vmatpush3.bf16.msra.mxu0 %v854_v7 }
  0x32   : > { %797 = vmatprep.subr.bf16.mxu0 %v855_v8 }
  0x35   : > { %798 = vmatpush3.bf16.msra.mxu0 %v855_v8 }
  0x36   : > { %799 = vmatprep.subr.bf16.mxu0 %v856_v10 }
  0x39   : > { %800 = vmatpush3.bf16.msra.mxu0 %v856_v10 }
  0x3a   : > { %801 = vmatprep.subr.bf16.mxu0 %v857_v11 }
  0x3d   : > { %802 = vmatpush3.bf16.msra.mxu0 %v857_v11 }
  0x3e   : > { %803 = vmatprep.subr.bf16.mxu0 %v858_v12 }
  0x41   : > { %804 = vmatpush3.bf16.msra.mxu0 %v858_v12 }
  0x42   : > { %805 = vmatprep.subr.bf16.mxu0 %v859_v13 }
  0x45   : > { %806 = vmatpush3.bf16.msra.mxu0 %v859_v13 }
  0x48   : > { %808 = vmatmul.mubr.bf16.vlgmr.msra.gmra.mrb[0].mxu0 %v861_v14 }
 0x11b   : > { %v809_v17 = vpop.f32.mrb[0].mxu0  ;;  %581 = sbr.rel (%p774_p11) target bundleno = 302 (0x12e), region = 93 }
 0x11c   : > { %v572_v19 = vadd.f32 %v809_v17, %v443_v15  ;;  %v555_v20 = vpop.f32.mrb[1].mxu0 }
 0x11d   : > { %v570_v22 = vadd.f32 %v555_v20, %v441_v16  ;;  %v810_v23 = vpop.f32.mrb[2].mxu0 }
 0x11e   : > { %576 = vst [vmem:[%s1094_s6 + $0x10] sm:$0xff] %v572_v19  ;;  %v573_v24 = vadd.f32 %v810_v23, %v444_v18  ;;  %v558_v25 = vpop.f32.mrb[3].mxu0 }
 0x11f   : > { %574 = vst [vmem:[%s1094_s6] sm:$0xff] %v570_v22  ;;  %v571_v26 = vadd.f32 %v558_v25, %v442_v21 }
 0x120   : > { %577 = vst [vmem:[%s1094_s6 + $0x18] sm:$0xff] %v573_v24 }
 0x121   : > { %575 = vst [vmem:[%s1094_s6 + $0x8] sm:$0xff] %v571_v26 }
 0x125   : > { %v584_v32 = vld [vmem:[%s1094_s6 + $0x10] sm:$0xff] }
 0x126   : > { %v582_v27 = vld [vmem:[%s1094_s6] sm:$0xff]  ;;  %v595_v35 = vmul.f32 %v775_v28, %v584_v32 }
 0x127   : > { %v593_v30 = vmul.f32 %v775_v28, %v582_v27  ;;  %v585_v33 = vld [vmem:[%s1094_s6 + $0x18] sm:$0xff] }
 0x128   : > { %v583_v31 = vld [vmem:[%s1094_s6 + $0x8] sm:$0xff]  ;;  %v596_v36 = vmul.f32 %v775_v28, %v585_v33  ;;  %v606_v39 = vadd.f32 %v776_v29, %v595_v35 }
 0x129   : > { %v594_v34 = vmul.f32 %v775_v28, %v583_v31  ;;  %v604_v37 = vadd.f32 %v776_v29, %v593_v30 }
 0x12a   : > { %v607_v40 = vadd.f32 %v776_v29, %v596_v36  ;;  %610 = vst [vmem:[%s1094_s6 + $0x10] sm:$0xff] %v606_v39 }
 0x12b   : > { %v605_v38 = vadd.f32 %v776_v29, %v594_v34  ;;  %608 = vst [vmem:[%s1094_s6] sm:$0xff] %v604_v37 }
 0x12c   : > { %611 = vst [vmem:[%s1094_s6 + $0x18] sm:$0xff] %v607_v40 }
 0x12d   : > { %609 = vst [vmem:[%s1094_s6 + $0x8] sm:$0xff] %v605_v38 }
 0x12e PF: > { %s16_s2 = sadd.s32 1, %s900_s2   ;;  %s1095_s21 = smov %s888_s22 }
 0x12f   : > { %p13_p12 = scmp.ge.s32.totalorder %s16_s2, 11   ;;  %s1096_s22 = smov %s973_s27 }
 0x130   : > { %s1097_s23 = smov %s896_s24  ;;  %s1098_s24 = smov %s1100_s3 }
 0x131   :  { %15 = sbr.rel (!%p13_p12) target bundleno = 3 (0x3), region = 143 }

// kernel: densenet_forward.110
= control target key start
LH: loop header
LB: loop body
LE: loop exit
PB: predicated region body
PF: predicated region fallthrough
CT: control target
= control target key end

     0   :  { %v42_v5 = vlaneseq  ;;  %s532_s1 = inlined_call_operand.vmem [shape: bf16[256,128], index: 1, kind: input, shape index: {}]   ;;  %s533_s0 = inlined_call_operand.vmem [shape: f32[32,256], index: 0, kind: input, shape index: {}]   ;;  %s534_s2 = inlined_call_operand.vmem [shape: f32[1,256], index: 2, kind: input, shape index: {}]   ;;  %s535_s3 = inlined_call_operand.vmem [shape: f32[1,256], index: 3, kind: input, shape index: {}]   ;;  %s536_s4 = inlined_call_operand.vmem [shape: f32[1,128], index: 4, kind: input, shape index: {}]   ;;  %s537_s5 = inlined_call_operand.vmem [shape: f32[1,128], index: 5, kind: input, shape index: {}]   ;;  %s538_s6 = inlined_call_operand.vmem [shape: f32[32,128], index: 6, kind: output, shape index: {}]  }
   0x1   :  { %v385_v0 = vld [vmem:[%s532_s1 + $0x40] sm:$0xff]   ;;  %v387_v2 = vld [vmem:[%s532_s1 + $0x48] sm:$0xff]   ;;  %v389_v4 = vld [vmem:[%s532_s1 + $0x50] sm:$0xff]  }
   0x2   :  { %v386_v1 = vld [vmem:[%s532_s1] sm:$0xff]   ;;  %340 = vmatprep.subr.bf16.mxu0 %v385_v0  ;;  %368 = vmatprep.subr.bf16.mxu1 %v385_v0  ;;  %v388_v3 = vld [vmem:[%s532_s1 + $0x8] sm:$0xff]   ;;  %v390_v6 = vld [vmem:[%s532_s1 + $0x10] sm:$0xff]   ;;  %v43_v8 = vshrl.u32 %v42_v5, 7 }
   0x3   :  { %341 = vmatpush3.bf16.msra.mxu0 %v386_v1  ;;  %376 = vmatpush3.bf16.msra.mxu1 %v386_v1  ;;  %v391_v7 = vld [vmem:[%s532_s1 + $0x58] sm:$0xff]   ;;  %v393_v10 = vld [vmem:[%s532_s1 + $0x60] sm:$0xff]   ;;  %v395_v14 = vld [vmem:[%s532_s1 + $0x68] sm:$0xff]  }
   0x4   :  { %342 = vmatprep.subr.bf16.mxu0 %v387_v2  ;;  %369 = vmatprep.subr.bf16.mxu1 %v387_v2  ;;  %v392_v9 = vld [vmem:[%s532_s1 + $0x18] sm:$0xff]   ;;  %v44_v11 = vsub.s32 0, %v43_v8  ;;  %v48_v12 = vsub.s32 1, %v43_v8  ;;  %v394_v13 = vld [vmem:[%s532_s1 + $0x20] sm:$0xff]   ;;  %v33_v15 = vld [vmem:[%s533_s0 + $0x8] sm:$0xff] }
   0x5   :  { %v35_v16 = vld [vmem:[%s533_s0 + $0x18] sm:$0xff]  ;;  %v40_v17 = vld [vmem:[%s534_s2] sm:$0x3]  ;;  %v37_v21 = vld [vmem:[%s533_s0 + $0x28] sm:$0xff] }
   0x6   :  { %v45_v18 = vrot.slane %v40_v17, %v44_v11  ;;  %v49_v19 = vrot.slane %v40_v17, %v48_v12  ;;  %v60_v20 = vld [vmem:[%s535_s3] sm:$0x3]  ;;  %v39_v22 = vld [vmem:[%s533_s0 + $0x38] sm:$0xff]  ;;  %v34_v26 = vld [vmem:[%s533_s0 + $0x10] sm:$0xff] }
   0x7   :  { %343 = vmatpush3.bf16.msra.mxu0 %v388_v3  ;;  %377 = vmatpush3.bf16.msra.mxu1 %v388_v3  ;;  %v65_v23 = vrot.slane %v60_v20, %v44_v11  ;;  %v69_v24 = vrot.slane %v60_v20, %v48_v12  ;;  %v32_v25 = vld [vmem:[%s533_s0] sm:$0xff]  ;;  %v396_v28 = vld [vmem:[%s532_s1 + $0x28] sm:$0xff]   ;;  %v38_v32 = vld [vmem:[%s533_s0 + $0x30] sm:$0xff] }
   0x8   :  { %344 = vmatprep.subr.bf16.mxu0 %v389_v4  ;;  %370 = vmatprep.subr.bf16.mxu1 %v389_v4  ;;  %v36_v27 = vld [vmem:[%s533_s0 + $0x20] sm:$0xff]  ;;  %v53_v29 = vmul.f32 %v49_v19, %v33_v15  ;;  %v55_v30 = vmul.f32 %v49_v19, %v35_v16  ;;  %v57_v31 = vmul.f32 %v49_v19, %v37_v21  ;;  %v397_v33 = vld [vmem:[%s532_s1 + $0x70] sm:$0xff]   ;;  %v399_v50 = vld [vmem:[%s532_s1 + $0x78] sm:$0xff]  }
   0x9   :  { %v59_v34 = vmul.f32 %v49_v19, %v39_v22  ;;  %v52_v35 = vmul.f32 %v45_v18, %v32_v25  ;;  %v54_v36 = vmul.f32 %v45_v18, %v34_v26  ;;  %v56_v40 = vmul.f32 %v45_v18, %v36_v27  ;;  %v398_v45 = vld [vmem:[%s532_s1 + $0x30] sm:$0xff]   ;;  %v400_v59 = vld [vmem:[%s532_s1 + $0x38] sm:$0xff]   ;;  %v339_v11 = vld [vmem:[%s537_s5] ss:$0 sm:$0xff] }
   0xa   :  { %v73_v37 = vadd.f32 %v69_v24, %v53_v29  ;;  %v75_v38 = vadd.f32 %v69_v24, %v55_v30  ;;  %v77_v39 = vadd.f32 %v69_v24, %v57_v31  ;;  %v58_v44 = vmul.f32 %v45_v18, %v38_v32 }
   0xb   :  { %345 = vmatpush3.bf16.msra.mxu0 %v390_v6  ;;  %378 = vmatpush3.bf16.msra.mxu1 %v390_v6  ;;  %v79_v41 = vadd.f32 %v69_v24, %v59_v34  ;;  %v72_v42 = vadd.f32 %v65_v23, %v52_v35  ;;  %v74_v43 = vadd.f32 %v65_v23, %v54_v36  ;;  %v338_v6 = vld [vmem:[%s536_s4] ss:$0 sm:$0xff] }
   0xc   :  { %346 = vmatprep.subr.bf16.mxu0 %v391_v7  ;;  %371 = vmatprep.subr.bf16.mxu1 %v391_v7  ;;  %v81_v46 = vmax.f32 %v73_v37, 0.0  ;;  %v83_v47 = vmax.f32 %v75_v38, 0.0  ;;  %v85_v48 = vmax.f32 %v77_v39, 0.0  ;;  %v76_v49 = vadd.f32 %v65_v23, %v56_v40 }
   0xd   :  { %v87_v51 = vmax.f32 %v79_v41, 0.0  ;;  %v78_v52 = vadd.f32 %v65_v23, %v58_v44  ;;  %v80_v54 = vmax.f32 %v72_v42, 0.0  ;;  %v82_v56 = vmax.f32 %v74_v43, 0.0 }
   0xe   :  { %v93_v53 = vpack.c.bf16 %v83_v47, %v81_v46  ;;  %v84_v57 = vmax.f32 %v76_v49, 0.0 }
   0xf   :  { %347 = vmatpush3.bf16.msra.mxu0 %v392_v9  ;;  %379 = vmatpush3.bf16.msra.mxu1 %v392_v9  ;;  %v95_v55 = vpack.c.bf16 %v87_v51, %v85_v48  ;;  %v86_v58 = vmax.f32 %v78_v52, 0.0  ;;  %v92_v60 = vpack.c.bf16 %v82_v56, %v80_v54 }
  0x10   :  { %348 = vmatprep.subr.bf16.mxu0 %v393_v10  ;;  %372 = vmatprep.subr.bf16.mxu1 %v393_v10 }
  0x11   :  { %256 = vmatprep.mubr.bf16.mxu0 %v93_v53  ;;  %264 = vmatprep.mubr.bf16.mxu1 %v95_v55  ;;  %v94_v61 = vpack.c.bf16 %v86_v58, %v84_v57 }
  0x13   :  { %349 = vmatpush3.bf16.msra.mxu0 %v394_v13  ;;  %380 = vmatpush3.bf16.msra.mxu1 %v394_v13 }
  0x14   :  { %350 = vmatprep.subr.bf16.mxu0 %v395_v14  ;;  %373 = vmatprep.subr.bf16.mxu1 %v395_v14 }
  0x17   :  { %351 = vmatpush3.bf16.msra.mxu0 %v396_v28  ;;  %381 = vmatpush3.bf16.msra.mxu1 %v396_v28 }
  0x18   :  { %352 = vmatprep.subr.bf16.mxu0 %v397_v33  ;;  %374 = vmatprep.subr.bf16.mxu1 %v397_v33 }
  0x1b   :  { %353 = vmatpush3.bf16.msra.mxu0 %v398_v45  ;;  %382 = vmatpush3.bf16.msra.mxu1 %v398_v45 }
  0x1c   :  { %354 = vmatprep.subr.bf16.mxu0 %v399_v50  ;;  %375 = vmatprep.subr.bf16.mxu1 %v399_v50 }
  0x1f   :  { %355 = vmatpush3.bf16.msra.mxu0 %v400_v59  ;;  %383 = vmatpush3.bf16.msra.mxu1 %v400_v59 }
  0x22   :  { %257 = vmatmul.mubr.bf16.vlgmr.msra.gmra.mrb[0].mxu0 %v92_v60  ;;  %265 = vmatmul.mubr.bf16.vlgmr.msra.gmra.mrb[0].mxu1 %v94_v61 }
  0xf5   :  { %v356_v62 = vpop.f32.mrb[0].mxu0  ;;  %v362_v63 = vpop.f32.mrb[0].mxu1 }
  0xf6   :  { %v357_v0 = vpop.f32.mrb[1].mxu0  ;;  %v363_v1 = vpop.f32.mrb[1].mxu1 }
  0xf7   :  { %v358_v2 = vadd.f32 %v357_v0, %v356_v62  ;;  %v364_v3 = vadd.f32 %v363_v1, %v362_v63  ;;  %v359_v4 = vpop.f32.mrb[2].mxu0  ;;  %v365_v5 = vpop.f32.mrb[2].mxu1 }
  0xf8   :  { %v360_v7 = vpop.f32.mrb[3].mxu0  ;;  %v366_v8 = vpop.f32.mrb[3].mxu1 }
  0xf9   :  { %v361_v9 = vadd.f32 %v360_v7, %v359_v4  ;;  %v367_v10 = vadd.f32 %v366_v8, %v365_v5  ;;  %v295_v12 = vmul.f32 %v358_v2, %v338_v6  ;;  %v297_v13 = vmul.f32 %v364_v3, %v338_v6 }
  0xfb   :  { %v306_v14 = vadd.f32 %v339_v11, %v295_v12  ;;  %v308_v15 = vadd.f32 %v339_v11, %v297_v13  ;;  %v296_v16 = vmul.f32 %v361_v9, %v338_v6  ;;  %v298_v17 = vmul.f32 %v367_v10, %v338_v6 }
  0xfd   :  { %v310_v18 = vmax.f32 %v306_v14, 0.0  ;;  %v312_v19 = vmax.f32 %v308_v15, 0.0  ;;  %v307_v20 = vadd.f32 %v339_v11, %v296_v16  ;;  %v309_v21 = vadd.f32 %v339_v11, %v298_v17 }
  0xff   :  { %314 = vst [vmem:[%s538_s6] sm:$0xff] %v310_v18  ;;  %316 = vst [vmem:[%s538_s6 + $0x10] sm:$0xff] %v312_v19  ;;  %v311_v22 = vmax.f32 %v307_v20, 0.0  ;;  %v313_v23 = vmax.f32 %v309_v21, 0.0 }
 0x101   :  { %315 = vst [vmem:[%s538_s6 + $0x8] sm:$0xff] %v311_v22  ;;  %317 = vst [vmem:[%s538_s6 + $0x18] sm:$0xff] %v313_v23 }

// kernel: densenet_forward.118
= control target key start
LH: loop header
LB: loop body
LE: loop exit
PB: predicated region body
PF: predicated region fallthrough
CT: control target
= control target key end

     0   :  { %s949_s21 = smov 0   ;;  %s951_s22 = smov 0   ;;  %s1106_s0 = inlined_call_operand.vmem [shape: f32[32,384], index: 0, kind: input, shape index: {}]   ;;  %s1107_s1 = inlined_call_operand.vmem [shape: bf16[384,128], index: 1, kind: input, shape index: {}]   ;;  %s1108_s2 = inlined_call_operand.vmem [shape: f32[1,384], index: 2, kind: input, shape index: {}]   ;;  %s1109_s3 = inlined_call_operand.vmem [shape: f32[1,384], index: 3, kind: input, shape index: {}]   ;;  %s1110_s4 = inlined_call_operand.vmem [shape: f32[1,128], index: 4, kind: input, shape index: {}]   ;;  %s1111_s5 = inlined_call_operand.vmem [shape: f32[1,128], index: 5, kind: input, shape index: {}]   ;;  %s1112_s6 = inlined_call_operand.vmem [shape: f32[32,128], index: 6, kind: output, shape index: {}]  }
   0x1   :  { %s953_s23 = smov 0   ;;  %s955_s24 = smov 0  }
   0x2   :  { %s957_s25 = smov 0  }
   0x3 LB: > { %s28_s26 = sadd.s32 1, %s907_s24  ;;  %p51_p1 = scmp.ne.s32.totalorder %s899_s22, %s895_s21  ;;  %s911_s25 = sphi %s957_s25, %s16_s25   ;;  %s907_s24 = sphi %s955_s24, %s1116_s24   ;;  %s903_s23 = sphi %s953_s23, %s1115_s23   ;;  %s899_s22 = sphi %s951_s22, %s1114_s22   ;;  %s895_s21 = sphi %s949_s21, %s1113_s21  }
   0x4   : > { %p29_p0 = scmp.ge.s32.totalorder %s28_s26, 3  ;;  %p52_p2 = scmp.eq.s32.totalorder %s911_s25, 0 }
   0x5   : > { %s44_s28 = sadd.s32 1, %s899_s22  ;;  %p769_p5 = scmp.ge.s32.totalorder %s911_s25, 3 }
   0x6   : > { %s1118_s26 = smov (%p29_p0, %s28_s26), 0  ;;  %p53_p3 = por %p52_p2, %p51_p1 }
   0x7   : > { %s40_s27 = ssub.s32 %s907_s24, %s1118_s26  ;;  %249 = sbr.rel (%p769_p5) target bundleno = 21 (0x15), region = 24 }
   0x8   : > { %p42_p4 = scmp.eq.s32.totalorder %s40_s27, 0 }
   0xa   : > { %s984_s29 = scalar_select %p42_p4, %s899_s22, %s44_s28  }
   0xe   : > { %252 = sbr.rel (!%p53_p3) target bundleno = 21 (0x15), region = 28  ;;  %s254_s30 = sand.u32 (%p53_p3), 1, %s899_s22  }
   0xf   : > { %s771_s7 = sshll.u32 (%p53_p3), %s907_s24, 3  ;;  %s770_s8 = sshll.u32 (%p53_p3), %s254_s30, 5 }
  0x10   : > { %s261_s11 = scalar_lea.vmem (%p53_p3), %s1106_s0, %s771_s7  ;;  %s256_s12 = scalar_lea.vmem (%p53_p3), [#allocation2], %s770_s8 }
  0x11   : > { %v295_v0 = vld [vmem:[%s261_s11] sm:$0xff] (%p53_p3)  ;;  %v297_v1 = vld [vmem:[%s261_s11 + $0x18] sm:$0xff] (%p53_p3)  ;;  %v299_v2 = vld [vmem:[%s261_s11 + $0x30] sm:$0xff] (%p53_p3) }
  0x12   : > { %296 = vst [vmem:[%s256_s12] sm:$0xff] (%p53_p3), %v295_v0  ;;  %298 = vst [vmem:[%s256_s12 + $0x8] sm:$0xff] (%p53_p3), %v297_v1  ;;  %v301_v3 = vld [vmem:[%s261_s11 + $0x48] sm:$0xff] (%p53_p3) }
  0x13   : > { %300 = vst [vmem:[%s256_s12 + $0x10] sm:$0xff] (%p53_p3), %v299_v2  ;;  %302 = vst [vmem:[%s256_s12 + $0x18] sm:$0xff] (%p53_p3), %v301_v3 }
  0x15 PF: > { %p772_p6 = scmp.ge.s32.totalorder %s911_s25, 1  ;;  %p331_p7 = scmp.lt.s32.totalorder %s911_s25, 4 }
  0x17   : > { %p332_p8 = pnand %p772_p6, %p331_p7 }
  0x18   : > { %s338_s13 = sand.u32 (!%p332_p8), 1, %s895_s21   ;;  %s774_s14 = sshll.u32 (!%p332_p8), %s903_s23, 4 }
  0x19   : > { %335 = sbr.rel (%p332_p8) target bundleno = 304 (0x130), region = 78  ;;  %s773_s15 = sshll.u32 (!%p332_p8), %s338_s13, 5 }
  0x1a   : > { %p392_p9 = scmp.lt.s32.totalorder (!%p332_p8), %s774_s14, 47  ;;  %p400_p10 = scmp.lt.s32.totalorder (!%p332_p8), %s903_s23, 2 }
  0x1b   : > { %s1009_s9 = scalar_lea.vmem (!%p332_p8), [#allocation2], %s773_s15  ;;  %p776_p11 = scmp.ne.s32.totalorder (!%p332_p8), %s903_s23, 0 }
  0x20   : > { %s1120_s14 = smov (!%p392_p9, %s774_s14), 47  ;;  %425 = sbr.rel (%p776_p11) target bundleno = 39 (0x27), region = 86 }
  0x21   : > { %s401_s16 = scalar_select %p400_p10, %s903_s23, 2 }
  0x22   : > { %s775_s17 = sshll.u32 %s1120_s14, 2  ;;  %v913_v4 = vmov (!%p776_p11), 0.0  }
  0x23   : > { %s1001_s20 = scalar_lea.vmem %s1107_s1, %s775_s17  ;;  %s402_s30 = scalar_lea.vmem %s1108_s2, %s401_s16  ;;  %426 = vst [vmem:[%s1112_s6] sm:$0xff] (!%p776_p11), %v913_v4  ;;  %427 = vst [vmem:[%s1112_s6 + $0x8] sm:$0xff] (!%p776_p11), %v913_v4 }
  0x24   : > { %s405_s21 = scalar_lea.vmem %s1109_s3, %s401_s16  ;;  %428 = vst [vmem:[%s1112_s6 + $0x10] sm:$0xff] (!%p776_p11), %v913_v4  ;;  %429 = vst [vmem:[%s1112_s6 + $0x18] sm:$0xff] (!%p776_p11), %v913_v4 }
  0x27 PF: > { %v865_v5 = vld [vmem:[%s1001_s20] sm:$0xff]   ;;  %v866_v6 = vld [vmem:[%s1001_s20 + $0x8] sm:$0xff]   ;;  %v867_v7 = vld [vmem:[%s1001_s20 + $0x10] sm:$0xff]   ;;  %p787_p12 = scmp.ne.s32.totalorder %s903_s23, 2 }
  0x28   : > { %804 = vmatprep.subr.bf16.mxu0 %v865_v5  ;;  %v868_v8 = vld [vmem:[%s1001_s20 + $0x18] sm:$0xff]   ;;  %v430_v9 = vld [vmem:[%s1009_s9] sm:$0xff]  ;;  %v431_v10 = vld [vmem:[%s1009_s9 + $0x8] sm:$0xff] }
  0x29   : > { %805 = vmatpush3.bf16.msra.mxu0 %v865_v5  ;;  %v777_v11 = vld [vmem:[%s402_s30] ss:$0 sm:$0xff]  ;;  %v432_v21 = vld [vmem:[%s1009_s9 + $0x10] sm:$0xff]  ;;  %v433_v22 = vld [vmem:[%s1009_s9 + $0x18] sm:$0xff] }
  0x2a   : > { %806 = vmatprep.subr.bf16.mxu0 %v866_v6  ;;  %v441_v12 = vmul.f32 %v777_v11, %v430_v9  ;;  %v442_v13 = vmul.f32 %v777_v11, %v431_v10  ;;  %v778_v14 = vld [vmem:[%s405_s21] ss:$0 sm:$0xff]  ;;  %v870_v23 = vld [vmem:[%s1001_s20 + $0x28] sm:$0xff]   ;;  %v443_v24 = vmul.f32 %v777_v11, %v432_v21  ;;  %v444_v25 = vmul.f32 %v777_v11, %v433_v22  ;;  %v871_v26 = vld [vmem:[%s1001_s20 + $0x30] sm:$0xff]  }
  0x2b   : > { %v869_v17 = vld [vmem:[%s1001_s20 + $0x20] sm:$0xff]   ;;  %v872_v29 = vld [vmem:[%s1001_s20 + $0x38] sm:$0xff]   ;;  %v462_v33 = vld [vmem:[%s1112_s6 + $0x10] sm:$0xff] }
  0x2c   : > { %v452_v15 = vadd.f32 %v778_v14, %v441_v12  ;;  %v453_v16 = vadd.f32 %v778_v14, %v442_v13  ;;  %v454_v27 = vadd.f32 %v778_v14, %v443_v24  ;;  %v455_v28 = vadd.f32 %v778_v14, %v444_v25  ;;  %v460_v34 = vld [vmem:[%s1112_s6] sm:$0xff]  ;;  %v463_v36 = vld [vmem:[%s1112_s6 + $0x18] sm:$0xff]  ;;  %v461_v39 = vld [vmem:[%s1112_s6 + $0x8] sm:$0xff] }
  0x2d   : > { %807 = vmatpush3.bf16.msra.mxu0 %v866_v6  ;;  %v788_v46 = vld [vmem:[%s1110_s4] ss:$0 sm:$0xff] (!%p787_p12) }
  0x2e   : > { %808 = vmatprep.subr.bf16.mxu0 %v867_v7  ;;  %v456_v18 = vmax.f32 %v452_v15, 0.0  ;;  %v457_v19 = vmax.f32 %v453_v16, 0.0  ;;  %v458_v30 = vmax.f32 %v454_v27, 0.0  ;;  %v459_v31 = vmax.f32 %v455_v28, 0.0  ;;  %v789_v47 = vld [vmem:[%s1111_s5] ss:$0 sm:$0xff] (!%p787_p12) }
  0x30   : > { %v464_v20 = vpack.c.bf16 %v457_v19, %v456_v18  ;;  %v465_v32 = vpack.c.bf16 %v459_v31, %v458_v30 }
  0x31   : > { %809 = vmatpush3.bf16.msra.mxu0 %v867_v7 }
  0x32   : > { %810 = vmatprep.subr.bf16.mxu0 %v868_v8  ;;  %820 = vmatprep.mubr.bf16.mxu0 %v464_v20 }
  0x35   : > { %811 = vmatpush3.bf16.msra.mxu0 %v868_v8 }
  0x36   : > { %812 = vmatprep.subr.bf16.mxu0 %v869_v17 }
  0x39   : > { %813 = vmatpush3.bf16.msra.mxu0 %v869_v17 }
  0x3a   : > { %814 = vmatprep.subr.bf16.mxu0 %v870_v23 }
  0x3d   : > { %815 = vmatpush3.bf16.msra.mxu0 %v870_v23 }
  0x3e   : > { %816 = vmatprep.subr.bf16.mxu0 %v871_v26 }
  0x41   : > { %817 = vmatpush3.bf16.msra.mxu0 %v871_v26 }
  0x42   : > { %818 = vmatprep.subr.bf16.mxu0 %v872_v29 }
  0x45   : > { %819 = vmatpush3.bf16.msra.mxu0 %v872_v29 }
  0x48   : > { %821 = vmatmul.mubr.bf16.vlgmr.msra.gmra.mrb[0].mxu0 %v465_v32 }
 0x11b   : > { %v822_v35 = vpop.f32.mrb[0].mxu0  ;;  %590 = sbr.rel (%p787_p12) target bundleno = 304 (0x130), region = 90 }
 0x11c   : > { %v581_v37 = vadd.f32 %v822_v35, %v462_v33  ;;  %v564_v38 = vpop.f32.mrb[1].mxu0 }
 0x11d   : > { %v579_v40 = vadd.f32 %v564_v38, %v460_v34  ;;  %v823_v41 = vpop.f32.mrb[2].mxu0 }
 0x11e   : > { %585 = vst [vmem:[%s1112_s6 + $0x10] sm:$0xff] %v581_v37  ;;  %v582_v42 = vadd.f32 %v823_v41, %v463_v36  ;;  %v567_v43 = vpop.f32.mrb[3].mxu0 }
 0x11f   : > { %583 = vst [vmem:[%s1112_s6] sm:$0xff] %v579_v40  ;;  %v580_v44 = vadd.f32 %v567_v43, %v461_v39 }
 0x120   : > { %586 = vst [vmem:[%s1112_s6 + $0x18] sm:$0xff] %v582_v42 }
 0x121   : > { %584 = vst [vmem:[%s1112_s6 + $0x8] sm:$0xff] %v580_v44 }
 0x125   : > { %v593_v50 = vld [vmem:[%s1112_s6 + $0x10] sm:$0xff] }
 0x126   : > { %v591_v45 = vld [vmem:[%s1112_s6] sm:$0xff]  ;;  %v604_v53 = vmul.f32 %v788_v46, %v593_v50 }
 0x127   : > { %v602_v48 = vmul.f32 %v788_v46, %v591_v45  ;;  %v594_v51 = vld [vmem:[%s1112_s6 + $0x18] sm:$0xff] }
 0x128   : > { %v592_v49 = vld [vmem:[%s1112_s6 + $0x8] sm:$0xff]  ;;  %v605_v54 = vmul.f32 %v788_v46, %v594_v51  ;;  %v615_v57 = vadd.f32 %v789_v47, %v604_v53 }
 0x129   : > { %v603_v52 = vmul.f32 %v788_v46, %v592_v49  ;;  %v613_v55 = vadd.f32 %v789_v47, %v602_v48 }
 0x12a   : > { %v616_v58 = vadd.f32 %v789_v47, %v605_v54  ;;  %v619_v61 = vmax.f32 %v615_v57, 0.0 }
 0x12b   : > { %v614_v56 = vadd.f32 %v789_v47, %v603_v52  ;;  %v617_v59 = vmax.f32 %v613_v55, 0.0 }
 0x12c   : > { %v620_v62 = vmax.f32 %v616_v58, 0.0  ;;  %623 = vst [vmem:[%s1112_s6 + $0x10] sm:$0xff] %v619_v61 }
 0x12d   : > { %v618_v60 = vmax.f32 %v614_v56, 0.0  ;;  %621 = vst [vmem:[%s1112_s6] sm:$0xff] %v617_v59 }
 0x12e   : > { %624 = vst [vmem:[%s1112_s6 + $0x18] sm:$0xff] %v620_v62 }
 0x12f   : > { %622 = vst [vmem:[%s1112_s6 + $0x8] sm:$0xff] %v618_v60 }
 0x130 PF: > { %s16_s25 = sadd.s32 1, %s911_s25   ;;  %s1113_s21 = smov %s899_s22 }
 0x131   : > { %p13_p13 = scmp.ge.s32.totalorder %s16_s25, 5   ;;  %s1114_s22 = smov %s984_s29 }
 0x132   : > { %s1115_s23 = smov %s907_s24  ;;  %s1116_s24 = smov %s1118_s26 }
 0x133   :  { %15 = sbr.rel (!%p13_p13) target bundleno = 3 (0x3), region = 140 }

// kernel: densenet_forward.126
= control target key start
LH: loop header
LB: loop body
LE: loop exit
PB: predicated region body
PF: predicated region fallthrough
CT: control target
= control target key end

     0   :  { %s1073_s21 = smov 0   ;;  %s1075_s22 = smov 0   ;;  %s1255_s0 = inlined_call_operand.vmem [shape: f32[32,512], index: 0, kind: input, shape index: {}]   ;;  %s1256_s1 = inlined_call_operand.vmem [shape: bf16[512,128], index: 1, kind: input, shape index: {}]   ;;  %s1257_s2 = inlined_call_operand.vmem [shape: f32[1,512], index: 2, kind: input, shape index: {}]   ;;  %s1258_s3 = inlined_call_operand.vmem [shape: f32[1,512], index: 3, kind: input, shape index: {}]   ;;  %s1259_s4 = inlined_call_operand.vmem [shape: f32[1,128], index: 4, kind: input, shape index: {}]   ;;  %s1260_s5 = inlined_call_operand.vmem [shape: f32[1,128], index: 5, kind: input, shape index: {}]   ;;  %s1261_s6 = inlined_call_operand.vmem [shape: f32[32,128], index: 6, kind: output, shape index: {}]  }
   0x1   :  { %s1077_s23 = smov 0   ;;  %s1079_s24 = smov 0  }
   0x2   :  { %s1081_s25 = smov 0  }
   0x3 LB: > { %s28_s26 = sadd.s32 1, %s1031_s24  ;;  %p51_p1 = scmp.ne.s32.totalorder %s1023_s22, %s1019_s21  ;;  %s1035_s25 = sphi %s1081_s25, %s16_s25   ;;  %s1031_s24 = sphi %s1079_s24, %s1265_s24   ;;  %s1027_s23 = sphi %s1077_s23, %s1264_s23   ;;  %s1023_s22 = sphi %s1075_s22, %s1263_s22   ;;  %s1019_s21 = sphi %s1073_s21, %s1262_s21  }
   0x4   : > { %p29_p0 = scmp.ge.s32.totalorder %s28_s26, 2  ;;  %p52_p2 = scmp.eq.s32.totalorder %s1035_s25, 0 }
   0x5   : > { %s44_s28 = sadd.s32 1, %s1023_s22  ;;  %p861_p5 = scmp.ge.s32.totalorder %s1035_s25, 2 }
   0x6   : > { %s1267_s26 = smov (%p29_p0, %s28_s26), 0  ;;  %p53_p3 = por %p52_p2, %p51_p1 }
   0x7   : > { %s40_s27 = ssub.s32 %s1031_s24, %s1267_s26  ;;  %249 = sbr.rel (%p861_p5) target bundleno = 22 (0x16), region = 24 }
   0x8   : > { %p42_p4 = scmp.eq.s32.totalorder %s40_s27, 0 }
   0xa   : > { %s1108_s29 = scalar_select %p42_p4, %s1023_s22, %s44_s28  }
   0xe   : > { %252 = sbr.rel (!%p53_p3) target bundleno = 22 (0x16), region = 28  ;;  %s254_s30 = sand.u32 (%p53_p3), 1, %s1023_s22  }
   0xf   : > { %s895_s7 = sshll.u32 (%p53_p3), %s1031_s24, 4  ;;  %s862_s8 = sshll.u32 (%p53_p3), %s254_s30, 6 }
  0x10   : > { %s262_s11 = scalar_lea.vmem (%p53_p3), %s1255_s0, %s895_s7  ;;  %s256_s12 = scalar_lea.vmem (%p53_p3), [#allocation2], %s862_s8 }
  0x11   : > { %v275_v0 = vld [vmem:[%s262_s11] sm:$0xff] (%p53_p3)  ;;  %v277_v1 = vld [vmem:[%s262_s11 + $0x8] sm:$0xff] (%p53_p3) }
  0x12   : > { %v279_v2 = vld [vmem:[%s262_s11 + $0x20] sm:$0xff] (%p53_p3)  ;;  %276 = vst [vmem:[%s256_s12] sm:$0xff] (%p53_p3), %v275_v0  ;;  %278 = vst [vmem:[%s256_s12 + $0x8] sm:$0xff] (%p53_p3), %v277_v1  ;;  %v281_v3 = vld [vmem:[%s262_s11 + $0x28] sm:$0xff] (%p53_p3) }
  0x13   : > { %280 = vst [vmem:[%s256_s12 + $0x10] sm:$0xff] (%p53_p3), %v279_v2  ;;  %v283_v4 = vld [vmem:[%s262_s11 + $0x40] sm:$0xff] (%p53_p3)  ;;  %v285_v5 = vld [vmem:[%s262_s11 + $0x48] sm:$0xff] (%p53_p3)  ;;  %282 = vst [vmem:[%s256_s12 + $0x18] sm:$0xff] (%p53_p3), %v281_v3 }
  0x14   : > { %284 = vst [vmem:[%s256_s12 + $0x20] sm:$0xff] (%p53_p3), %v283_v4  ;;  %286 = vst [vmem:[%s256_s12 + $0x28] sm:$0xff] (%p53_p3), %v285_v5  ;;  %v287_v6 = vld [vmem:[%s262_s11 + $0x60] sm:$0xff] (%p53_p3)  ;;  %v289_v7 = vld [vmem:[%s262_s11 + $0x68] sm:$0xff] (%p53_p3) }
  0x15   : > { %288 = vst [vmem:[%s256_s12 + $0x30] sm:$0xff] %v287_v6  ;;  %290 = vst [vmem:[%s256_s12 + $0x38] sm:$0xff] %v289_v7 }
  0x16 PF: > { %p865_p6 = scmp.ge.s32.totalorder %s1035_s25, 1  ;;  %p323_p7 = scmp.lt.s32.totalorder %s1035_s25, 3 }
  0x18   : > { %p324_p8 = pnand %p865_p6, %p323_p7 }
  0x19   : > { %s330_s13 = sand.u32 (!%p324_p8), 1, %s1019_s21   ;;  %s867_s14 = sshll.u32 (!%p324_p8), %s1027_s23, 5 }
  0x1a   : > { %327 = sbr.rel (%p324_p8) target bundleno = 310 (0x136), region = 63  ;;  %s866_s15 = sshll.u32 (!%p324_p8), %s330_s13, 6 }
  0x1b   : > { %p387_p9 = scmp.lt.s32.totalorder (!%p324_p8), %s867_s14, 63  ;;  %s869_s16 = sshll.u32 (!%p324_p8), %s1027_s23, 1 }
  0x1c   : > { %p396_p10 = scmp.lt.s32.totalorder (!%p324_p8), %s869_s16, 3  ;;  %s1136_s9 = scalar_lea.vmem (!%p324_p8), [#allocation2], %s866_s15 }
  0x1d   : > { %p871_p11 = scmp.ne.s32.totalorder (!%p324_p8), %s1027_s23, 0 }
  0x21   : > { %s1269_s14 = smov (!%p387_p9, %s867_s14), 63  ;;  %s1271_s16 = smov (!%p396_p10, %s869_s16), 3 }
  0x22   : > { %s868_s17 = sshll.u32 %s1269_s14, 2  ;;  %s398_s21 = scalar_lea.vmem %s1257_s2, %s1271_s16  ;;  %v1037_v8 = vmov (!%p871_p11), 0.0  }
  0x23   : > { %s1124_s20 = scalar_lea.vmem %s1256_s1, %s868_s17  ;;  %s403_s8 = scalar_lea.vmem %s1258_s3, %s1271_s16  ;;  %425 = vst [vmem:[%s1261_s6] sm:$0xff] (!%p871_p11), %v1037_v8  ;;  %426 = vst [vmem:[%s1261_s6 + $0x8] sm:$0xff] (!%p871_p11), %v1037_v8 }
  0x24   : > { %424 = sbr.rel (%p871_p11) target bundleno = 43 (0x2b), region = 71  ;;  %427 = vst [vmem:[%s1261_s6 + $0x10] sm:$0xff] (!%p871_p11), %v1037_v8  ;;  %428 = vst [vmem:[%s1261_s6 + $0x18] sm:$0xff] (!%p871_p11), %v1037_v8 }
  0x2b PF: > { %v981_v9 = vld [vmem:[%s1124_s20 + $0x40] sm:$0xff]   ;;  %v983_v11 = vld [vmem:[%s1124_s20 + $0x48] sm:$0xff]   ;;  %v985_v13 = vld [vmem:[%s1124_s20 + $0x50] sm:$0xff]   ;;  %v439_v14 = vlaneseq  ;;  %p888_p12 = scmp.ne.s32.totalorder %s1027_s23, 1 }
  0x2c   : > { %v982_v10 = vld [vmem:[%s1124_s20] sm:$0xff]   ;;  %896 = vmatprep.subr.bf16.mxu0 %v981_v9  ;;  %924 = vmatprep.subr.bf16.mxu1 %v981_v9  ;;  %v984_v12 = vld [vmem:[%s1124_s20 + $0x8] sm:$0xff]   ;;  %v986_v15 = vld [vmem:[%s1124_s20 + $0x10] sm:$0xff]  }
  0x2d   : > { %897 = vmatpush3.bf16.msra.mxu0 %v982_v10  ;;  %932 = vmatpush3.bf16.msra.mxu1 %v982_v10  ;;  %v987_v16 = vld [vmem:[%s1124_s20 + $0x58] sm:$0xff]   ;;  %v440_v17 = vshrl.u32 %v439_v14, 7  ;;  %v989_v19 = vld [vmem:[%s1124_s20 + $0x60] sm:$0xff]   ;;  %v991_v23 = vld [vmem:[%s1124_s20 + $0x68] sm:$0xff]  }
  0x2e   : > { %898 = vmatprep.subr.bf16.mxu0 %v983_v11  ;;  %925 = vmatprep.subr.bf16.mxu1 %v983_v11  ;;  %v988_v18 = vld [vmem:[%s1124_s20 + $0x18] sm:$0xff]   ;;  %v990_v22 = vld [vmem:[%s1124_s20 + $0x20] sm:$0xff]   ;;  %v430_v24 = vld [vmem:[%s1136_s9 + $0x8] sm:$0xff] }
  0x2f   : > { %v441_v20 = vsub.s32 0, %v440_v17  ;;  %v445_v21 = vsub.s32 1, %v440_v17  ;;  %v432_v25 = vld [vmem:[%s1136_s9 + $0x18] sm:$0xff]  ;;  %v437_v26 = vld [vmem:[%s398_s21] sm:$0x3]  ;;  %v434_v30 = vld [vmem:[%s1136_s9 + $0x28] sm:$0xff] }
  0x30   : > { %v457_v29 = vld [vmem:[%s403_s8] sm:$0x3]  ;;  %v436_v31 = vld [vmem:[%s1136_s9 + $0x38] sm:$0xff]  ;;  %v431_v35 = vld [vmem:[%s1136_s9 + $0x10] sm:$0xff] }
  0x31   : > { %899 = vmatpush3.bf16.msra.mxu0 %v984_v12  ;;  %933 = vmatpush3.bf16.msra.mxu1 %v984_v12  ;;  %v442_v27 = vrot.slane %v437_v26, %v441_v20  ;;  %v446_v28 = vrot.slane %v437_v26, %v445_v21  ;;  %v462_v32 = vrot.slane %v457_v29, %v441_v20  ;;  %v429_v34 = vld [vmem:[%s1136_s9] sm:$0xff]  ;;  %v992_v37 = vld [vmem:[%s1124_s20 + $0x28] sm:$0xff]   ;;  %v435_v41 = vld [vmem:[%s1136_s9 + $0x30] sm:$0xff] }
  0x32   : > { %900 = vmatprep.subr.bf16.mxu0 %v985_v13  ;;  %926 = vmatprep.subr.bf16.mxu1 %v985_v13  ;;  %v466_v33 = vrot.slane %v457_v29, %v445_v21  ;;  %v433_v36 = vld [vmem:[%s1136_s9 + $0x20] sm:$0xff]  ;;  %v993_v42 = vld [vmem:[%s1124_s20 + $0x70] sm:$0xff]   ;;  %v995_v59 = vld [vmem:[%s1124_s20 + $0x78] sm:$0xff]  }
  0x33   : > { %v450_v38 = vmul.f32 %v446_v28, %v430_v24  ;;  %v452_v39 = vmul.f32 %v446_v28, %v432_v25  ;;  %v454_v40 = vmul.f32 %v446_v28, %v434_v30  ;;  %v456_v43 = vmul.f32 %v446_v28, %v436_v31  ;;  %v994_v54 = vld [vmem:[%s1124_s20 + $0x30] sm:$0xff]   ;;  %v996_v4 = vld [vmem:[%s1124_s20 + $0x38] sm:$0xff]   ;;  %v485_v9 = vld [vmem:[%s1261_s6] sm:$0xff] }
  0x34   : > { %v449_v44 = vmul.f32 %v442_v27, %v429_v34  ;;  %v451_v45 = vmul.f32 %v442_v27, %v431_v35  ;;  %v453_v49 = vmul.f32 %v442_v27, %v433_v36  ;;  %v455_v53 = vmul.f32 %v442_v27, %v435_v41  ;;  %v487_v11 = vld [vmem:[%s1261_s6 + $0x10] sm:$0xff]  ;;  %v486_v17 = vld [vmem:[%s1261_s6 + $0x8] sm:$0xff]  ;;  %v889_v28 = vld [vmem:[%s1259_s4] ss:$0 sm:$0xff] (!%p888_p12) }
  0x35   : > { %901 = vmatpush3.bf16.msra.mxu0 %v986_v15  ;;  %934 = vmatpush3.bf16.msra.mxu1 %v986_v15  ;;  %v470_v46 = vadd.f32 %v466_v33, %v450_v38  ;;  %v472_v47 = vadd.f32 %v466_v33, %v452_v39  ;;  %v474_v48 = vadd.f32 %v466_v33, %v454_v40  ;;  %v890_v29 = vld [vmem:[%s1260_s5] ss:$0 sm:$0xff] (!%p888_p12) }
  0x36   : > { %902 = vmatprep.subr.bf16.mxu0 %v987_v16  ;;  %927 = vmatprep.subr.bf16.mxu1 %v987_v16  ;;  %v476_v50 = vadd.f32 %v466_v33, %v456_v43  ;;  %v469_v51 = vadd.f32 %v462_v32, %v449_v44  ;;  %v471_v52 = vadd.f32 %v462_v32, %v451_v45 }
  0x37   : > { %v478_v55 = vmax.f32 %v470_v46, 0.0  ;;  %v480_v56 = vmax.f32 %v472_v47, 0.0  ;;  %v482_v57 = vmax.f32 %v474_v48, 0.0  ;;  %v473_v58 = vadd.f32 %v462_v32, %v453_v49 }
  0x38   : > { %v484_v60 = vmax.f32 %v476_v50, 0.0  ;;  %v475_v61 = vadd.f32 %v462_v32, %v455_v53  ;;  %v477_v63 = vmax.f32 %v469_v51, 0.0  ;;  %v479_v1 = vmax.f32 %v471_v52, 0.0 }
  0x39   : > { %903 = vmatpush3.bf16.msra.mxu0 %v988_v18  ;;  %935 = vmatpush3.bf16.msra.mxu1 %v988_v18  ;;  %v490_v62 = vpack.c.bf16 %v480_v56, %v478_v55  ;;  %v481_v2 = vmax.f32 %v473_v58, 0.0 }
  0x3a   : > { %904 = vmatprep.subr.bf16.mxu0 %v989_v19  ;;  %928 = vmatprep.subr.bf16.mxu1 %v989_v19  ;;  %v492_v0 = vpack.c.bf16 %v484_v60, %v482_v57  ;;  %v483_v3 = vmax.f32 %v475_v61, 0.0  ;;  %v489_v5 = vpack.c.bf16 %v479_v1, %v477_v63  ;;  %v488_v19 = vld [vmem:[%s1261_s6 + $0x18] sm:$0xff] }
  0x3b   : > { %653 = vmatprep.mubr.bf16.mxu0 %v490_v62 }
  0x3c   : > { %661 = vmatprep.mubr.bf16.mxu1 %v492_v0  ;;  %v491_v6 = vpack.c.bf16 %v483_v3, %v481_v2 }
  0x3d   : > { %905 = vmatpush3.bf16.msra.mxu0 %v990_v22  ;;  %936 = vmatpush3.bf16.msra.mxu1 %v990_v22 }
  0x3e   : > { %906 = vmatprep.subr.bf16.mxu0 %v991_v23  ;;  %929 = vmatprep.subr.bf16.mxu1 %v991_v23 }
  0x41   : > { %907 = vmatpush3.bf16.msra.mxu0 %v992_v37  ;;  %937 = vmatpush3.bf16.msra.mxu1 %v992_v37 }
  0x42   : > { %908 = vmatprep.subr.bf16.mxu0 %v993_v42  ;;  %930 = vmatprep.subr.bf16.mxu1 %v993_v42 }
  0x45   : > { %909 = vmatpush3.bf16.msra.mxu0 %v994_v54  ;;  %938 = vmatpush3.bf16.msra.mxu1 %v994_v54 }
  0x46   : > { %910 = vmatprep.subr.bf16.mxu0 %v995_v59  ;;  %931 = vmatprep.subr.bf16.mxu1 %v995_v59 }
  0x49   : > { %911 = vmatpush3.bf16.msra.mxu0 %v996_v4  ;;  %939 = vmatpush3.bf16.msra.mxu1 %v996_v4 }
  0x4c   : > { %654 = vmatmul.mubr.bf16.vlgmr.msra.gmra.mrb[0].mxu0 %v489_v5  ;;  %662 = vmatmul.mubr.bf16.vlgmr.msra.gmra.mrb[0].mxu1 %v491_v6 }
 0x11f   : > { %v912_v7 = vpop.f32.mrb[0].mxu0  ;;  %v918_v8 = vpop.f32.mrb[0].mxu1 }
 0x120   : > { %v913_v10 = vpop.f32.mrb[1].mxu0  ;;  %v919_v12 = vpop.f32.mrb[1].mxu1 }
 0x121   : > { %v914_v13 = vadd.f32 %v913_v10, %v912_v7  ;;  %v920_v14 = vadd.f32 %v919_v12, %v918_v8  ;;  %v915_v15 = vpop.f32.mrb[2].mxu0  ;;  %v921_v16 = vpop.f32.mrb[2].mxu1  ;;  %681 = sbr.rel (%p888_p12) target bundleno = 310 (0x136), region = 75 }
 0x122   : > { %v916_v18 = vpop.f32.mrb[3].mxu0  ;;  %v922_v20 = vpop.f32.mrb[3].mxu1 }
 0x123   : > { %v670_v21 = vadd.f32 %v914_v13, %v485_v9  ;;  %v672_v22 = vadd.f32 %v920_v14, %v487_v11  ;;  %v917_v23 = vadd.f32 %v916_v18, %v915_v15  ;;  %v923_v24 = vadd.f32 %v922_v20, %v921_v16 }
 0x125   : > { %674 = vst [vmem:[%s1261_s6] sm:$0xff] %v670_v21  ;;  %676 = vst [vmem:[%s1261_s6 + $0x10] sm:$0xff] %v672_v22  ;;  %v671_v25 = vadd.f32 %v917_v23, %v486_v17  ;;  %v673_v26 = vadd.f32 %v923_v24, %v488_v19 }
 0x127   : > { %675 = vst [vmem:[%s1261_s6 + $0x8] sm:$0xff] %v671_v25  ;;  %677 = vst [vmem:[%s1261_s6 + $0x18] sm:$0xff] %v673_v26 }
 0x12c   : > { %v682_v27 = vld [vmem:[%s1261_s6] sm:$0xff]  ;;  %v684_v32 = vld [vmem:[%s1261_s6 + $0x10] sm:$0xff] }
 0x12d   : > { %v693_v30 = vmul.f32 %v889_v28, %v682_v27  ;;  %v695_v35 = vmul.f32 %v889_v28, %v684_v32 }
 0x12e   : > { %v683_v31 = vld [vmem:[%s1261_s6 + $0x8] sm:$0xff]  ;;  %v685_v33 = vld [vmem:[%s1261_s6 + $0x18] sm:$0xff] }
 0x12f   : > { %v694_v34 = vmul.f32 %v889_v28, %v683_v31  ;;  %v696_v36 = vmul.f32 %v889_v28, %v685_v33  ;;  %v704_v37 = vadd.f32 %v890_v29, %v693_v30  ;;  %v706_v39 = vadd.f32 %v890_v29, %v695_v35 }
 0x131   : > { %v705_v38 = vadd.f32 %v890_v29, %v694_v34  ;;  %v707_v40 = vadd.f32 %v890_v29, %v696_v36  ;;  %v708_v41 = vmax.f32 %v704_v37, 0.0  ;;  %v710_v43 = vmax.f32 %v706_v39, 0.0 }
 0x133   : > { %v709_v42 = vmax.f32 %v705_v38, 0.0  ;;  %v711_v44 = vmax.f32 %v707_v40, 0.0  ;;  %712 = vst [vmem:[%s1261_s6] sm:$0xff] %v708_v41  ;;  %714 = vst [vmem:[%s1261_s6 + $0x10] sm:$0xff] %v710_v43 }
 0x135   : > { %713 = vst [vmem:[%s1261_s6 + $0x8] sm:$0xff] %v709_v42  ;;  %715 = vst [vmem:[%s1261_s6 + $0x18] sm:$0xff] %v711_v44 }
 0x136 PF: > { %s16_s25 = sadd.s32 1, %s1035_s25   ;;  %s1262_s21 = smov %s1023_s22 }
 0x137   : > { %p13_p13 = scmp.ge.s32.totalorder %s16_s25, 4   ;;  %s1263_s22 = smov %s1108_s29 }
 0x138   : > { %s1264_s23 = smov %s1031_s24  ;;  %s1265_s24 = smov %s1267_s26 }
 0x139   :  { %15 = sbr.rel (!%p13_p13) target bundleno = 3 (0x3), region = 125 }

// kernel: densenet_forward.132
= control target key start
LH: loop header
LB: loop body
LE: loop exit
PB: predicated region body
PF: predicated region fallthrough
CT: control target
= control target key end

     0   :  { %s1249_s21 = smov 0   ;;  %s1251_s22 = smov 0   ;;  %s1527_s0 = inlined_call_operand.vmem [shape: f32[32,512], index: 0, kind: input, shape index: {}]   ;;  %s1528_s1 = inlined_call_operand.vmem [shape: bf16[512,256], index: 1, kind: input, shape index: {}]   ;;  %s1529_s2 = inlined_call_operand.vmem [shape: f32[1,512], index: 2, kind: input, shape index: {}]   ;;  %s1530_s3 = inlined_call_operand.vmem [shape: f32[1,512], index: 3, kind: input, shape index: {}]   ;;  %s1531_s4 = inlined_call_operand.vmem [shape: f32[1,256], index: 4, kind: input, shape index: {}]   ;;  %s1532_s5 = inlined_call_operand.vmem [shape: f32[1,256], index: 5, kind: input, shape index: {}]   ;;  %s1533_s6 = inlined_call_operand.vmem [shape: f32[32,256], index: 6, kind: output, shape index: {}]  }
   0x1   :  { %s1253_s23 = smov 0   ;;  %s1255_s24 = smov 0  }
   0x2   :  { %s1257_s25 = smov 0  }
   0x3 LB: > { %s28_s26 = sadd.s32 1, %s1207_s24  ;;  %p51_p1 = scmp.ne.s32.totalorder %s1199_s22, %s1195_s21  ;;  %s1211_s25 = sphi %s1257_s25, %s16_s25   ;;  %s1207_s24 = sphi %s1255_s24, %s1537_s24   ;;  %s1203_s23 = sphi %s1253_s23, %s1536_s23   ;;  %s1199_s22 = sphi %s1251_s22, %s1535_s22   ;;  %s1195_s21 = sphi %s1249_s21, %s1534_s21  }
   0x4   : > { %p29_p0 = scmp.ge.s32.totalorder %s28_s26, 2  ;;  %p52_p2 = scmp.eq.s32.totalorder %s1211_s25, 0 }
   0x5   : > { %s44_s28 = sadd.s32 1, %s1199_s22  ;;  %p1001_p5 = scmp.ge.s32.totalorder %s1211_s25, 2 }
   0x6   : > { %s1539_s26 = smov (%p29_p0, %s28_s26), 0  ;;  %p53_p3 = por %p52_p2, %p51_p1 }
   0x7   : > { %s40_s27 = ssub.s32 %s1207_s24, %s1539_s26  ;;  %253 = sbr.rel (%p1001_p5) target bundleno = 22 (0x16), region = 24 }
   0x8   : > { %p42_p4 = scmp.eq.s32.totalorder %s40_s27, 0 }
   0xa   : > { %s1284_s29 = scalar_select %p42_p4, %s1199_s22, %s44_s28  }
   0xe   : > { %256 = sbr.rel (!%p53_p3) target bundleno = 22 (0x16), region = 28  ;;  %s258_s30 = sand.u32 (%p53_p3), 1, %s1199_s22  }
   0xf   : > { %s1050_s7 = sshll.u32 (%p53_p3), %s1207_s24, 4  ;;  %s1002_s8 = sshll.u32 (%p53_p3), %s258_s30, 6 }
  0x10   : > { %s266_s11 = scalar_lea.vmem (%p53_p3), %s1527_s0, %s1050_s7  ;;  %s260_s12 = scalar_lea.vmem (%p53_p3), [#allocation2], %s1002_s8 }
  0x11   : > { %v279_v0 = vld [vmem:[%s266_s11] sm:$0xff] (%p53_p3)  ;;  %v281_v1 = vld [vmem:[%s266_s11 + $0x8] sm:$0xff] (%p53_p3) }
  0x12   : > { %v283_v2 = vld [vmem:[%s266_s11 + $0x20] sm:$0xff] (%p53_p3)  ;;  %280 = vst [vmem:[%s260_s12] sm:$0xff] (%p53_p3), %v279_v0  ;;  %282 = vst [vmem:[%s260_s12 + $0x8] sm:$0xff] (%p53_p3), %v281_v1  ;;  %v285_v3 = vld [vmem:[%s266_s11 + $0x28] sm:$0xff] (%p53_p3) }
  0x13   : > { %284 = vst [vmem:[%s260_s12 + $0x10] sm:$0xff] (%p53_p3), %v283_v2  ;;  %v287_v4 = vld [vmem:[%s266_s11 + $0x40] sm:$0xff] (%p53_p3)  ;;  %v289_v5 = vld [vmem:[%s266_s11 + $0x48] sm:$0xff] (%p53_p3)  ;;  %286 = vst [vmem:[%s260_s12 + $0x18] sm:$0xff] (%p53_p3), %v285_v3 }
  0x14   : > { %288 = vst [vmem:[%s260_s12 + $0x20] sm:$0xff] (%p53_p3), %v287_v4  ;;  %290 = vst [vmem:[%s260_s12 + $0x28] sm:$0xff] (%p53_p3), %v289_v5  ;;  %v291_v6 = vld [vmem:[%s266_s11 + $0x60] sm:$0xff] (%p53_p3)  ;;  %v293_v7 = vld [vmem:[%s266_s11 + $0x68] sm:$0xff] (%p53_p3) }
  0x15   : > { %292 = vst [vmem:[%s260_s12 + $0x30] sm:$0xff] %v291_v6  ;;  %294 = vst [vmem:[%s260_s12 + $0x38] sm:$0xff] %v293_v7 }
  0x16 PF: > { %p1005_p6 = scmp.ge.s32.totalorder %s1211_s25, 1  ;;  %p330_p7 = scmp.lt.s32.totalorder %s1211_s25, 3 }
  0x18   : > { %p331_p8 = pnand %p1005_p6, %p330_p7 }
  0x19   : > { %s337_s13 = sand.u32 (!%p331_p8), 1, %s1195_s21   ;;  %s1007_s14 = sshll.u32 (!%p331_p8), %s1203_s23, 5 }
  0x1a   : > { %334 = sbr.rel (%p331_p8) target bundleno = 339 (0x153), region = 63  ;;  %s1006_s15 = sshll.u32 (!%p331_p8), %s337_s13, 6 }
  0x1b   : > { %p401_p9 = scmp.lt.s32.totalorder (!%p331_p8), %s1007_s14, 63  ;;  %s1010_s16 = sshll.u32 (!%p331_p8), %s1203_s23, 1 }
  0x1c   : > { %p412_p10 = scmp.lt.s32.totalorder (!%p331_p8), %s1010_s16, 3  ;;  %s1312_s9 = scalar_lea.vmem (!%p331_p8), [#allocation2], %s1006_s15 }
  0x1d   : > { %p1012_p11 = scmp.ne.s32.totalorder (!%p331_p8), %s1203_s23, 0 }
  0x21   : > { %s1541_s14 = smov (!%p401_p9, %s1007_s14), 63  ;;  %s1543_s16 = smov (!%p412_p10, %s1010_s16), 3 }
  0x22   : > { %s1051_s17 = sshll.u32 %s1541_s14, 3  ;;  %s414_s21 = scalar_lea.vmem %s1529_s2, %s1543_s16  ;;  %v1213_v8 = vmov (!%p1012_p11), 0.0  }
  0x23   : > { %s1300_s20 = scalar_lea.vmem %s1528_s1, %s1051_s17  ;;  %s419_s8 = scalar_lea.vmem %s1530_s3, %s1543_s16  ;;  %447 = vst [vmem:[%s1533_s6] sm:$0xff] (!%p1012_p11), %v1213_v8  ;;  %448 = vst [vmem:[%s1533_s6 + $0x8] sm:$0xff] (!%p1012_p11), %v1213_v8 }
  0x24   : > { %446 = sbr.rel (%p1012_p11) target bundleno = 43 (0x2b), region = 71  ;;  %449 = vst [vmem:[%s1533_s6 + $0x10] sm:$0xff] (!%p1012_p11), %v1213_v8  ;;  %450 = vst [vmem:[%s1533_s6 + $0x18] sm:$0xff] (!%p1012_p11), %v1213_v8 }
  0x25   : > { %451 = vst [vmem:[%s1533_s6 + $0x20] sm:$0xff] (!%p1012_p11), %v1213_v8  ;;  %452 = vst [vmem:[%s1533_s6 + $0x28] sm:$0xff] (!%p1012_p11), %v1213_v8 }
  0x26   : > { %453 = vst [vmem:[%s1533_s6 + $0x30] sm:$0xff] (!%p1012_p11), %v1213_v8  ;;  %454 = vst [vmem:[%s1533_s6 + $0x38] sm:$0xff] (!%p1012_p11), %v1213_v8 }
  0x2b PF: > { %v1125_v9 = vld [vmem:[%s1300_s20 + $0x4] ss:$8 sps:$4 sm:$0xff]   ;;  %v1127_v10 = vld [vmem:[%s1300_s20] ss:$8 sps:$4 sm:$0xff]   ;;  %v1128_v11 = vld [vmem:[%s1300_s20 + $0x14] ss:$8 sps:$4 sm:$0xff]   ;;  %v465_v17 = vlaneseq }
  0x2c   : > { %715 = vmatprep.subr.bf16.mxu0 %v1125_v9  ;;  %1052 = vmatprep.subr.bf16.mxu1 %v1125_v9  ;;  %v1130_v12 = vld [vmem:[%s1300_s20 + $0x10] ss:$8 sps:$4 sm:$0xff]   ;;  %v1131_v13 = vld [vmem:[%s1300_s20 + $0x24] ss:$8 sps:$4 sm:$0xff]   ;;  %v1133_v14 = vld [vmem:[%s1300_s20 + $0x20] ss:$8 sps:$4 sm:$0xff]  }
  0x2d   : > { %716 = vmatpush1.bf16.msra.mxu0 %v1127_v10  ;;  %1068 = vmatpush1.bf16.msra.mxu1 %v1127_v10  ;;  %v1134_v15 = vld [vmem:[%s1300_s20 + $0x34] ss:$8 sps:$4 sm:$0xff]   ;;  %v1136_v16 = vld [vmem:[%s1300_s20 + $0x30] ss:$8 sps:$4 sm:$0xff]   ;;  %v1137_v18 = vld [vmem:[%s1300_s20 + $0x44] ss:$8 sps:$4 sm:$0xff]  }
  0x2e   : > { %717 = vmatprep.subr.bf16.mxu0 %v1128_v11  ;;  %1053 = vmatprep.subr.bf16.mxu1 %v1128_v11  ;;  %v1139_v19 = vld [vmem:[%s1300_s20 + $0x40] ss:$8 sps:$4 sm:$0xff]   ;;  %v1349_v20 = vshrl.u32 %v465_v17, 7  ;;  %v1140_v21 = vld [vmem:[%s1300_s20 + $0x54] ss:$8 sps:$4 sm:$0xff]   ;;  %p1045_p12 = scmp.ne.s32.totalorder %s1203_s23, 1 }
  0x2f   : > { %v1142_v22 = vld [vmem:[%s1300_s20 + $0x50] ss:$8 sps:$4 sm:$0xff]   ;;  %v1143_v24 = vld [vmem:[%s1300_s20 + $0x64] ss:$8 sps:$4 sm:$0xff]   ;;  %v463_v27 = vld [vmem:[%s414_s21] sm:$0x3] }
  0x30   : > { %v1354_v23 = vsub.s32 1, %v1349_v20  ;;  %v456_v25 = vld [vmem:[%s1312_s9 + $0x8] sm:$0xff]  ;;  %v458_v26 = vld [vmem:[%s1312_s9 + $0x18] sm:$0xff]  ;;  %v1369_v28 = vld [vmem:[%s419_s8] sm:$0x3]  ;;  %v1387_v57 = vsub.s32 0, %v1349_v20 }
  0x31   : > { %718 = vmatpush1.bf16.msra.mxu0 %v1130_v12  ;;  %1069 = vmatpush1.bf16.msra.mxu1 %v1130_v12  ;;  %v460_v29 = vld [vmem:[%s1312_s9 + $0x28] sm:$0xff]  ;;  %v462_v32 = vld [vmem:[%s1312_s9 + $0x38] sm:$0xff]  ;;  %v455_v62 = vld [vmem:[%s1312_s9] sm:$0xff] }
  0x32   : > { %719 = vmatprep.subr.bf16.mxu0 %v1131_v13  ;;  %1054 = vmatprep.subr.bf16.mxu1 %v1131_v13  ;;  %v1145_v30 = vld [vmem:[%s1300_s20 + $0x60] ss:$8 sps:$4 sm:$0xff]   ;;  %v472_v31 = vrot.slane %v463_v27, %v1354_v23  ;;  %v1146_v33 = vld [vmem:[%s1300_s20 + $0x74] ss:$8 sps:$4 sm:$0xff]   ;;  %v492_v34 = vrot.slane %v1369_v28, %v1354_v23  ;;  %v1148_v39 = vld [vmem:[%s1300_s20 + $0x70] ss:$8 sps:$4 sm:$0xff]   ;;  %v468_v61 = vrot.slane %v463_v27, %v1387_v57 }
  0x33   : > { %v1149_v43 = vld [vmem:[%s1300_s20 + $0x84] ss:$8 sps:$4 sm:$0xff]   ;;  %v1151_v49 = vld [vmem:[%s1300_s20 + $0x80] ss:$8 sps:$4 sm:$0xff]   ;;  %v1152_v51 = vld [vmem:[%s1300_s20 + $0x94] ss:$8 sps:$4 sm:$0xff]   ;;  %v488_v3 = vrot.slane %v1369_v28, %v1387_v57 }
  0x34   : > { %v476_v35 = vmul.f32 %v472_v31, %v456_v25  ;;  %v478_v36 = vmul.f32 %v472_v31, %v458_v26  ;;  %v480_v37 = vmul.f32 %v472_v31, %v460_v29  ;;  %v482_v38 = vmul.f32 %v472_v31, %v462_v32  ;;  %v1154_v53 = vld [vmem:[%s1300_s20 + $0x90] ss:$8 sps:$4 sm:$0xff]   ;;  %v1155_v54 = vld [vmem:[%s1300_s20 + $0xa4] ss:$8 sps:$4 sm:$0xff]   ;;  %v1157_v55 = vld [vmem:[%s1300_s20 + $0xa0] ss:$8 sps:$4 sm:$0xff]  }
  0x35   : > { %720 = vmatpush1.bf16.msra.mxu0 %v1133_v14  ;;  %1070 = vmatpush1.bf16.msra.mxu1 %v1133_v14  ;;  %v1158_v56 = vld [vmem:[%s1300_s20 + $0xb4] ss:$8 sps:$4 sm:$0xff]   ;;  %v1160_v58 = vld [vmem:[%s1300_s20 + $0xb0] ss:$8 sps:$4 sm:$0xff]   ;;  %v1161_v59 = vld [vmem:[%s1300_s20 + $0xc4] ss:$8 sps:$4 sm:$0xff]   ;;  %v475_v4 = vmul.f32 %v468_v61, %v455_v62 }
  0x36   : > { %721 = vmatprep.subr.bf16.mxu0 %v1134_v15  ;;  %1055 = vmatprep.subr.bf16.mxu1 %v1134_v15  ;;  %v496_v40 = vadd.f32 %v492_v34, %v476_v35  ;;  %v498_v41 = vadd.f32 %v492_v34, %v478_v36  ;;  %v500_v42 = vadd.f32 %v492_v34, %v480_v37  ;;  %v1163_v60 = vld [vmem:[%s1300_s20 + $0xc0] ss:$8 sps:$4 sm:$0xff]   ;;  %v457_v63 = vld [vmem:[%s1312_s9 + $0x10] sm:$0xff]  ;;  %v1167_v9 = vld [vmem:[%s1300_s20 + $0xe4] ss:$8 sps:$4 sm:$0xff]  }
  0x37   : > { %v502_v44 = vadd.f32 %v492_v34, %v482_v38  ;;  %v459_v0 = vld [vmem:[%s1312_s9 + $0x20] sm:$0xff]  ;;  %v461_v1 = vld [vmem:[%s1312_s9 + $0x30] sm:$0xff]  ;;  %v477_v5 = vmul.f32 %v468_v61, %v457_v63  ;;  %v495_v10 = vadd.f32 %v488_v3, %v475_v4  ;;  %v512_v26 = vld [vmem:[%s1533_s6 + $0x8] sm:$0xff] }
  0x38   : > { %v504_v45 = vmax.f32 %v496_v40, 0.0  ;;  %v506_v46 = vmax.f32 %v498_v41, 0.0  ;;  %v508_v47 = vmax.f32 %v500_v42, 0.0  ;;  %v1164_v2 = vld [vmem:[%s1300_s20 + $0xd4] ss:$8 sps:$4 sm:$0xff]   ;;  %v479_v6 = vmul.f32 %v468_v61, %v459_v0  ;;  %v515_v25 = vld [vmem:[%s1533_s6 + $0x20] sm:$0xff] }
  0x39   : > { %722 = vmatpush1.bf16.msra.mxu0 %v1136_v16  ;;  %1071 = vmatpush1.bf16.msra.mxu1 %v1136_v16  ;;  %v510_v48 = vmax.f32 %v502_v44, 0.0  ;;  %v481_v7 = vmul.f32 %v468_v61, %v461_v1  ;;  %v1166_v8 = vld [vmem:[%s1300_s20 + $0xd0] ss:$8 sps:$4 sm:$0xff]   ;;  %v497_v11 = vadd.f32 %v488_v3, %v477_v5  ;;  %v1169_v14 = vld [vmem:[%s1300_s20 + $0xe0] ss:$8 sps:$4 sm:$0xff]   ;;  %v503_v16 = vmax.f32 %v495_v10, 0.0 }
  0x3a   : > { %723 = vmatprep.subr.bf16.mxu0 %v1137_v18  ;;  %1056 = vmatprep.subr.bf16.mxu1 %v1137_v18  ;;  %v520_v50 = vpack.c.bf16 %v506_v46, %v504_v45  ;;  %v499_v12 = vadd.f32 %v488_v3, %v479_v6  ;;  %v1170_v15 = vld [vmem:[%s1300_s20 + $0xf4] ss:$8 sps:$4 sm:$0xff]   ;;  %v1172_v20 = vld [vmem:[%s1300_s20 + $0xf0] ss:$8 sps:$4 sm:$0xff]   ;;  %v516_v27 = vld [vmem:[%s1533_s6 + $0x28] sm:$0xff] }
  0x3b   : > { %v522_v52 = vpack.c.bf16 %v510_v48, %v508_v47  ;;  %v501_v13 = vadd.f32 %v488_v3, %v481_v7  ;;  %v505_v17 = vmax.f32 %v497_v11, 0.0  ;;  %v517_v31 = vld [vmem:[%s1533_s6 + $0x30] sm:$0xff]  ;;  %v514_v36 = vld [vmem:[%s1533_s6 + $0x18] sm:$0xff] }
  0x3c   : > { %747 = vmatprep.mubr.bf16.mxu0 %v520_v50  ;;  %v507_v18 = vmax.f32 %v499_v12, 0.0  ;;  %v518_v37 = vld [vmem:[%s1533_s6 + $0x38] sm:$0xff]  ;;  %v816_v50 = vld [vmem:[%s1532_s5] sm:$0x3] (!%p1045_p12) }
  0x3d   : > { %724 = vmatpush1.bf16.msra.mxu0 %v1139_v19  ;;  %1072 = vmatpush1.bf16.msra.mxu1 %v1139_v19  ;;  %v509_v19 = vmax.f32 %v501_v13, 0.0 }
  0x3e   : > { %725 = vmatprep.subr.bf16.mxu0 %v1140_v21  ;;  %1057 = vmatprep.subr.bf16.mxu1 %v1140_v21  ;;  %v519_v21 = vpack.c.bf16 %v505_v17, %v503_v16 }
  0x3f   : > { %757 = vmatprep.mubr.bf16.mxu1 %v522_v52  ;;  %v821_v52 = vrot.slane (!%p1045_p12), %v816_v50, %v1387_v57 }
  0x41   : > { %726 = vmatpush1.bf16.msra.mxu0 %v1142_v22  ;;  %1073 = vmatpush1.bf16.msra.mxu1 %v1142_v22  ;;  %v521_v22 = vpack.c.bf16 %v509_v19, %v507_v18 }
  0x42   : > { %727 = vmatprep.subr.bf16.mxu0 %v1143_v24  ;;  %1058 = vmatprep.subr.bf16.mxu1 %v1143_v24  ;;  %v511_v24 = vld [vmem:[%s1533_s6] sm:$0xff] }
  0x45   : > { %728 = vmatpush1.bf16.msra.mxu0 %v1145_v30  ;;  %1074 = vmatpush1.bf16.msra.mxu1 %v1145_v30  ;;  %v513_v30 = vld [vmem:[%s1533_s6 + $0x10] sm:$0xff] }
  0x46   : > { %729 = vmatprep.subr.bf16.mxu0 %v1146_v33  ;;  %1059 = vmatprep.subr.bf16.mxu1 %v1146_v33 }
  0x49   : > { %730 = vmatpush1.bf16.msra.mxu0 %v1148_v39  ;;  %1075 = vmatpush1.bf16.msra.mxu1 %v1148_v39 }
  0x4a   : > { %731 = vmatprep.subr.bf16.mxu0 %v1149_v43  ;;  %1060 = vmatprep.subr.bf16.mxu1 %v1149_v43 }
  0x4d   : > { %732 = vmatpush1.bf16.msra.mxu0 %v1151_v49  ;;  %1076 = vmatpush1.bf16.msra.mxu1 %v1151_v49  ;;  %v796_v49 = vld [vmem:[%s1531_s4] sm:$0x3] (!%p1045_p12) }
  0x4e   : > { %733 = vmatprep.subr.bf16.mxu0 %v1152_v51  ;;  %1061 = vmatprep.subr.bf16.mxu1 %v1152_v51  ;;  %v801_v51 = vrot.slane (!%p1045_p12), %v796_v49, %v1387_v57 }
  0x51   : > { %734 = vmatpush1.bf16.msra.mxu0 %v1154_v53  ;;  %1077 = vmatpush1.bf16.msra.mxu1 %v1154_v53 }
  0x52   : > { %735 = vmatprep.subr.bf16.mxu0 %v1155_v54  ;;  %1062 = vmatprep.subr.bf16.mxu1 %v1155_v54  ;;  %v805_v54 = vrot.slane (!%p1045_p12), %v796_v49, %v1354_v23 }
  0x55   : > { %736 = vmatpush1.bf16.msra.mxu0 %v1157_v55  ;;  %1078 = vmatpush1.bf16.msra.mxu1 %v1157_v55  ;;  %v825_v55 = vrot.slane (!%p1045_p12), %v816_v50, %v1354_v23 }
  0x56   : > { %737 = vmatprep.subr.bf16.mxu0 %v1158_v56  ;;  %1063 = vmatprep.subr.bf16.mxu1 %v1158_v56 }
  0x59   : > { %738 = vmatpush1.bf16.msra.mxu0 %v1160_v58  ;;  %1079 = vmatpush1.bf16.msra.mxu1 %v1160_v58 }
  0x5a   : > { %739 = vmatprep.subr.bf16.mxu0 %v1161_v59  ;;  %1064 = vmatprep.subr.bf16.mxu1 %v1161_v59 }
  0x5d   : > { %740 = vmatpush1.bf16.msra.mxu0 %v1163_v60  ;;  %1080 = vmatpush1.bf16.msra.mxu1 %v1163_v60 }
  0x5e   : > { %741 = vmatprep.subr.bf16.mxu0 %v1164_v2  ;;  %1065 = vmatprep.subr.bf16.mxu1 %v1164_v2 }
  0x61   : > { %742 = vmatpush1.bf16.msra.mxu0 %v1166_v8  ;;  %1081 = vmatpush1.bf16.msra.mxu1 %v1166_v8 }
  0x62   : > { %743 = vmatprep.subr.bf16.mxu0 %v1167_v9  ;;  %1066 = vmatprep.subr.bf16.mxu1 %v1167_v9 }
  0x65   : > { %744 = vmatpush1.bf16.msra.mxu0 %v1169_v14  ;;  %1082 = vmatpush1.bf16.msra.mxu1 %v1169_v14 }
  0x66   : > { %745 = vmatprep.subr.bf16.mxu0 %v1170_v15  ;;  %1067 = vmatprep.subr.bf16.mxu1 %v1170_v15 }
  0x69   : > { %746 = vmatpush1.bf16.msra.mxu0 %v1172_v20  ;;  %1083 = vmatpush1.bf16.msra.mxu1 %v1172_v20 }
  0x6c   : > { %748 = vmatmul.mubr.bf16.vlgmr.msra.gmra.mrb[0].mxu0 %v519_v21  ;;  %758 = vmatmul.mubr.bf16.vlgmr.msra.gmra.mrb[0].mxu1 %v521_v22 }
 0x13f   : > { %v749_v28 = vpop.f32.mrb[0].mxu0  ;;  %v759_v29 = vpop.f32.mrb[0].mxu1  ;;  %787 = sbr.rel (%p1045_p12) target bundleno = 339 (0x153), region = 75 }
 0x140   : > { %v768_v32 = vadd.f32 %v749_v28, %v511_v24  ;;  %v772_v33 = vadd.f32 %v759_v29, %v515_v25  ;;  %v751_v34 = vpop.f32.mrb[1].mxu0  ;;  %v761_v35 = vpop.f32.mrb[1].mxu1 }
 0x141   : > { %v769_v38 = vadd.f32 %v751_v34, %v512_v26  ;;  %v773_v39 = vadd.f32 %v761_v35, %v516_v27  ;;  %v753_v40 = vpop.f32.mrb[2].mxu0  ;;  %v763_v41 = vpop.f32.mrb[2].mxu1 }
 0x142   : > { %776 = vst [vmem:[%s1533_s6] sm:$0xff] %v768_v32  ;;  %780 = vst [vmem:[%s1533_s6 + $0x20] sm:$0xff] %v772_v33  ;;  %v770_v42 = vadd.f32 %v753_v40, %v513_v30  ;;  %v774_v43 = vadd.f32 %v763_v41, %v517_v31  ;;  %v755_v44 = vpop.f32.mrb[3].mxu0  ;;  %v765_v45 = vpop.f32.mrb[3].mxu1 }
 0x143   : > { %777 = vst [vmem:[%s1533_s6 + $0x8] sm:$0xff] %v769_v38  ;;  %781 = vst [vmem:[%s1533_s6 + $0x28] sm:$0xff] %v773_v39  ;;  %v771_v46 = vadd.f32 %v755_v44, %v514_v36  ;;  %v775_v47 = vadd.f32 %v765_v45, %v518_v37 }
 0x144   : > { %778 = vst [vmem:[%s1533_s6 + $0x10] sm:$0xff] %v770_v42  ;;  %782 = vst [vmem:[%s1533_s6 + $0x30] sm:$0xff] %v774_v43 }
 0x145   : > { %779 = vst [vmem:[%s1533_s6 + $0x18] sm:$0xff] %v771_v46  ;;  %783 = vst [vmem:[%s1533_s6 + $0x38] sm:$0xff] %v775_v47 }
 0x149   : > { %v788_v48 = vld [vmem:[%s1533_s6] sm:$0xff] }
 0x14a   : > { %v789_v53 = vld [vmem:[%s1533_s6 + $0x8] sm:$0xff]  ;;  %v792_v57 = vld [vmem:[%s1533_s6 + $0x20] sm:$0xff]  ;;  %v808_v60 = vmul.f32 %v801_v51, %v788_v48 }
 0x14b   : > { %v790_v56 = vld [vmem:[%s1533_s6 + $0x10] sm:$0xff]  ;;  %v793_v59 = vld [vmem:[%s1533_s6 + $0x28] sm:$0xff]  ;;  %v809_v61 = vmul.f32 %v805_v54, %v789_v53  ;;  %v812_v1 = vmul.f32 %v801_v51, %v792_v57 }
 0x14c   : > { %v791_v58 = vld [vmem:[%s1533_s6 + $0x18] sm:$0xff]  ;;  %v794_v23 = vld [vmem:[%s1533_s6 + $0x30] sm:$0xff]  ;;  %v810_v62 = vmul.f32 %v801_v51, %v790_v56  ;;  %v813_v2 = vmul.f32 %v805_v54, %v793_v59  ;;  %v828_v5 = vadd.f32 %v821_v52, %v808_v60 }
 0x14d   : > { %v811_v63 = vmul.f32 %v805_v54, %v791_v58  ;;  %v795_v0 = vld [vmem:[%s1533_s6 + $0x38] sm:$0xff]  ;;  %v814_v3 = vmul.f32 %v801_v51, %v794_v23  ;;  %v829_v6 = vadd.f32 %v825_v55, %v809_v61  ;;  %v832_v9 = vadd.f32 %v821_v52, %v812_v1 }
 0x14e   : > { %v815_v4 = vmul.f32 %v805_v54, %v795_v0  ;;  %v830_v7 = vadd.f32 %v821_v52, %v810_v62  ;;  %v833_v10 = vadd.f32 %v825_v55, %v813_v2  ;;  %836 = vst [vmem:[%s1533_s6] sm:$0xff] %v828_v5 }
 0x14f   : > { %v831_v8 = vadd.f32 %v825_v55, %v811_v63  ;;  %v834_v11 = vadd.f32 %v821_v52, %v814_v3  ;;  %837 = vst [vmem:[%s1533_s6 + $0x8] sm:$0xff] %v829_v6  ;;  %840 = vst [vmem:[%s1533_s6 + $0x20] sm:$0xff] %v832_v9 }
 0x150   : > { %v835_v12 = vadd.f32 %v825_v55, %v815_v4  ;;  %838 = vst [vmem:[%s1533_s6 + $0x10] sm:$0xff] %v830_v7  ;;  %841 = vst [vmem:[%s1533_s6 + $0x28] sm:$0xff] %v833_v10 }
 0x151   : > { %839 = vst [vmem:[%s1533_s6 + $0x18] sm:$0xff] %v831_v8  ;;  %842 = vst [vmem:[%s1533_s6 + $0x30] sm:$0xff] %v834_v11 }
 0x152   : > { %843 = vst [vmem:[%s1533_s6 + $0x38] sm:$0xff] %v835_v12 }
 0x153 PF: > { %s16_s25 = sadd.s32 1, %s1211_s25   ;;  %s1534_s21 = smov %s1199_s22 }
 0x154   : > { %p13_p13 = scmp.ge.s32.totalorder %s16_s25, 4   ;;  %s1535_s22 = smov %s1284_s29 }
 0x155   : > { %s1536_s23 = smov %s1207_s24  ;;  %s1537_s24 = smov %s1539_s26 }
 0x156   :  { %15 = sbr.rel (!%p13_p13) target bundleno = 3 (0x3), region = 125 }

// kernel: densenet_forward.133
= control target key start
LH: loop header
LB: loop body
LE: loop exit
PB: predicated region body
PF: predicated region fallthrough
CT: control target
= control target key end

     0   :  { %s71_s0 = inlined_call_operand.vmem [shape: f32[4,8,256], index: 0, kind: input, shape index: {}]   ;;  %s72_s1 = inlined_call_operand.vmem [shape: f32[8,256], index: 1, kind: output, shape index: {}]  }
   0x1   :  { %v8_v0 = vld [vmem:[%s71_s0] sm:$0xff]  ;;  %v10_v1 = vld [vmem:[%s71_s0 + $0x10] sm:$0xff]  ;;  %v9_v4 = vld [vmem:[%s71_s0 + $0x8] sm:$0xff] }
   0x2   :  { %v12_v2 = vld [vmem:[%s71_s0 + $0x20] sm:$0xff]  ;;  %v16_v3 = vadd.f32 %v10_v1, %v8_v0  ;;  %v11_v5 = vld [vmem:[%s71_s0 + $0x18] sm:$0xff]  ;;  %v14_v6 = vld [vmem:[%s71_s0 + $0x30] sm:$0xff] }
   0x3   :  { %v13_v7 = vld [vmem:[%s71_s0 + $0x28] sm:$0xff]  ;;  %v19_v8 = vadd.f32 %v11_v5, %v9_v4  ;;  %v15_v10 = vld [vmem:[%s71_s0 + $0x38] sm:$0xff] }
   0x4   :  { %v17_v9 = vadd.f32 %v16_v3, %v12_v2 }
   0x5   :  { %v20_v11 = vadd.f32 %v19_v8, %v13_v7 }
   0x6   :  { %v18_v12 = vadd.f32 %v17_v9, %v14_v6 }
   0x7   :  { %v21_v13 = vadd.f32 %v20_v11, %v15_v10 }
   0x8   :  { %v23_v14 = vmul.f32 0.25, %v18_v12 }
   0x9   :  { %v24_v15 = vmul.f32 0.25, %v21_v13 }
   0xa   :  { %25 = vst [vmem:[%s72_s1] sm:$0xff] %v23_v14 }
   0xb   :  { %26 = vst [vmem:[%s72_s1 + $0x8] sm:$0xff] %v24_v15 }

// kernel: densenet_forward.134
= control target key start
LH: loop header
LB: loop body
LE: loop exit
PB: predicated region body
PF: predicated region fallthrough
CT: control target
= control target key end

     0   :  { %v36_v5 = vlaneseq  ;;  %s448_s1 = inlined_call_operand.vmem [shape: bf16[256,128], index: 1, kind: input, shape index: {}]   ;;  %s449_s0 = inlined_call_operand.vmem [shape: f32[16,256], index: 0, kind: input, shape index: {}]   ;;  %s450_s2 = inlined_call_operand.vmem [shape: f32[1,256], index: 2, kind: input, shape index: {}]   ;;  %s451_s3 = inlined_call_operand.vmem [shape: f32[1,256], index: 3, kind: input, shape index: {}]   ;;  %s452_s4 = inlined_call_operand.vmem [shape: f32[1,128], index: 4, kind: input, shape index: {}]   ;;  %s453_s5 = inlined_call_operand.vmem [shape: f32[1,128], index: 5, kind: input, shape index: {}]   ;;  %s454_s6 = inlined_call_operand.vmem [shape: f32[16,128], index: 6, kind: output, shape index: {}]  }
   0x1   :  { %v319_v0 = vld [vmem:[%s448_s1 + $0x40] sm:$0xff]   ;;  %v321_v2 = vld [vmem:[%s448_s1 + $0x48] sm:$0xff]   ;;  %v323_v4 = vld [vmem:[%s448_s1 + $0x50] sm:$0xff]  }
   0x2   :  { %v320_v1 = vld [vmem:[%s448_s1] sm:$0xff]   ;;  %296 = vmatprep.subr.bf16.mxu0 %v319_v0  ;;  %v322_v3 = vld [vmem:[%s448_s1 + $0x8] sm:$0xff]   ;;  %v324_v6 = vld [vmem:[%s448_s1 + $0x10] sm:$0xff]   ;;  %v37_v8 = vshrl.u32 %v36_v5, 7 }
   0x3   :  { %297 = vmatpush3.bf16.msra.mxu0 %v320_v1  ;;  %v325_v7 = vld [vmem:[%s448_s1 + $0x58] sm:$0xff]   ;;  %v327_v10 = vld [vmem:[%s448_s1 + $0x60] sm:$0xff]   ;;  %v329_v14 = vld [vmem:[%s448_s1 + $0x68] sm:$0xff]  }
   0x4   :  { %298 = vmatprep.subr.bf16.mxu0 %v321_v2  ;;  %v326_v9 = vld [vmem:[%s448_s1 + $0x18] sm:$0xff]   ;;  %v38_v11 = vsub.s32 0, %v37_v8  ;;  %v42_v12 = vsub.s32 1, %v37_v8  ;;  %v328_v13 = vld [vmem:[%s448_s1 + $0x20] sm:$0xff]   ;;  %v31_v15 = vld [vmem:[%s449_s0 + $0x8] sm:$0xff] }
   0x5   :  { %v33_v16 = vld [vmem:[%s449_s0 + $0x18] sm:$0xff]  ;;  %v34_v17 = vld [vmem:[%s450_s2] sm:$0x3]  ;;  %v32_v22 = vld [vmem:[%s449_s0 + $0x10] sm:$0xff] }
   0x6   :  { %v39_v18 = vrot.slane %v34_v17, %v38_v11  ;;  %v43_v19 = vrot.slane %v34_v17, %v42_v12  ;;  %v50_v20 = vld [vmem:[%s451_s3] sm:$0x3]  ;;  %v330_v25 = vld [vmem:[%s448_s1 + $0x28] sm:$0xff]   ;;  %v331_v30 = vld [vmem:[%s448_s1 + $0x70] sm:$0xff]  }
   0x7   :  { %299 = vmatpush3.bf16.msra.mxu0 %v322_v3  ;;  %v30_v21 = vld [vmem:[%s449_s0] sm:$0xff]  ;;  %v55_v23 = vrot.slane %v50_v20, %v38_v11  ;;  %v59_v24 = vrot.slane %v50_v20, %v42_v12  ;;  %v332_v35 = vld [vmem:[%s448_s1 + $0x30] sm:$0xff]   ;;  %v333_v38 = vld [vmem:[%s448_s1 + $0x78] sm:$0xff]  }
   0x8   :  { %300 = vmatprep.subr.bf16.mxu0 %v323_v4  ;;  %v47_v26 = vmul.f32 %v43_v19, %v31_v15  ;;  %v49_v27 = vmul.f32 %v43_v19, %v33_v16  ;;  %v46_v28 = vmul.f32 %v39_v18, %v30_v21  ;;  %v48_v29 = vmul.f32 %v39_v18, %v32_v22  ;;  %v334_v42 = vld [vmem:[%s448_s1 + $0x38] sm:$0xff]   ;;  %v294_v48 = vld [vmem:[%s452_s4] ss:$0 sm:$0xff] }
   0x9   :  { %v295_v51 = vld [vmem:[%s453_s5] ss:$0 sm:$0xff] }
   0xa   :  { %v63_v31 = vadd.f32 %v59_v24, %v47_v26  ;;  %v65_v32 = vadd.f32 %v59_v24, %v49_v27  ;;  %v62_v33 = vadd.f32 %v55_v23, %v46_v28  ;;  %v64_v34 = vadd.f32 %v55_v23, %v48_v29 }
   0xb   :  { %301 = vmatpush3.bf16.msra.mxu0 %v324_v6 }
   0xc   :  { %302 = vmatprep.subr.bf16.mxu0 %v325_v7  ;;  %v67_v36 = vmax.f32 %v63_v31, 0.0  ;;  %v69_v37 = vmax.f32 %v65_v32, 0.0  ;;  %v66_v40 = vmax.f32 %v62_v33, 0.0  ;;  %v68_v41 = vmax.f32 %v64_v34, 0.0 }
   0xe   :  { %v73_v39 = vpack.c.bf16 %v69_v37, %v67_v36  ;;  %v72_v43 = vpack.c.bf16 %v68_v41, %v66_v40 }
   0xf   :  { %303 = vmatpush3.bf16.msra.mxu0 %v326_v9 }
  0x10   :  { %304 = vmatprep.subr.bf16.mxu0 %v327_v10  ;;  %234 = vmatprep.mubr.bf16.mxu0 %v73_v39 }
  0x13   :  { %305 = vmatpush3.bf16.msra.mxu0 %v328_v13 }
  0x14   :  { %306 = vmatprep.subr.bf16.mxu0 %v329_v14 }
  0x17   :  { %307 = vmatpush3.bf16.msra.mxu0 %v330_v25 }
  0x18   :  { %308 = vmatprep.subr.bf16.mxu0 %v331_v30 }
  0x1b   :  { %309 = vmatpush3.bf16.msra.mxu0 %v332_v35 }
  0x1c   :  { %310 = vmatprep.subr.bf16.mxu0 %v333_v38 }
  0x1f   :  { %311 = vmatpush3.bf16.msra.mxu0 %v334_v42 }
  0x22   :  { %235 = vmatmul.mubr.bf16.vlgmr.msra.gmra.mrb[0].mxu0 %v72_v43 }
  0xf5   :  { %v312_v44 = vpop.f32.mrb[0].mxu0 }
  0xf6   :  { %v313_v45 = vpop.f32.mrb[1].mxu0 }
  0xf7   :  { %v314_v46 = vadd.f32 %v313_v45, %v312_v44  ;;  %v315_v47 = vpop.f32.mrb[2].mxu0 }
  0xf8   :  { %v316_v49 = vpop.f32.mrb[3].mxu0 }
  0xf9   :  { %v317_v50 = vadd.f32 %v316_v49, %v315_v47  ;;  %v259_v52 = vmul.f32 %v314_v46, %v294_v48 }
  0xfb   :  { %v268_v53 = vadd.f32 %v295_v51, %v259_v52  ;;  %v260_v54 = vmul.f32 %v317_v50, %v294_v48 }
  0xfd   :  { %v270_v55 = vmax.f32 %v268_v53, 0.0  ;;  %v269_v56 = vadd.f32 %v295_v51, %v260_v54 }
  0xff   :  { %272 = vst [vmem:[%s454_s6] sm:$0xff] %v270_v55  ;;  %v271_v57 = vmax.f32 %v269_v56, 0.0 }
 0x101   :  { %273 = vst [vmem:[%s454_s6 + $0x8] sm:$0xff] %v271_v57 }

// kernel: densenet_forward.136
= control target key start
LH: loop header
LB: loop body
LE: loop exit
PB: predicated region body
PF: predicated region fallthrough
CT: control target
= control target key end

     0   :  { %s909_s21 = smov 0   ;;  %s911_s22 = smov 0   ;;  %s1042_s0 = inlined_call_operand.vmem [shape: f32[16,384], index: 0, kind: input, shape index: {}]   ;;  %s1043_s1 = inlined_call_operand.vmem [shape: bf16[384,128], index: 1, kind: input, shape index: {}]   ;;  %s1044_s2 = inlined_call_operand.vmem [shape: f32[1,384], index: 2, kind: input, shape index: {}]   ;;  %s1045_s3 = inlined_call_operand.vmem [shape: f32[1,384], index: 3, kind: input, shape index: {}]   ;;  %s1046_s4 = inlined_call_operand.vmem [shape: f32[1,128], index: 4, kind: input, shape index: {}]   ;;  %s1047_s5 = inlined_call_operand.vmem [shape: f32[1,128], index: 5, kind: input, shape index: {}]   ;;  %s1048_s6 = inlined_call_operand.vmem [shape: f32[16,128], index: 6, kind: output, shape index: {}]  }
   0x1   :  { %s913_s23 = smov 0   ;;  %s915_s24 = smov 0  }
   0x2   :  { %s917_s25 = smov 0  }
   0x3 LB: > { %s28_s26 = sadd.s32 1, %s865_s24  ;;  %p51_p1 = scmp.ne.s32.totalorder %s857_s22, %s853_s21  ;;  %s869_s25 = sphi %s917_s25, %s16_s25   ;;  %s865_s24 = sphi %s915_s24, %s1052_s24   ;;  %s861_s23 = sphi %s913_s23, %s1051_s23   ;;  %s857_s22 = sphi %s911_s22, %s1050_s22   ;;  %s853_s21 = sphi %s909_s21, %s1049_s21  }
   0x4   : > { %p29_p0 = scmp.ge.s32.totalorder %s28_s26, 3  ;;  %p52_p2 = scmp.eq.s32.totalorder %s869_s25, 0 }
   0x5   : > { %s44_s28 = sadd.s32 1, %s857_s22  ;;  %p726_p5 = scmp.ge.s32.totalorder %s869_s25, 3 }
   0x6   : > { %s1054_s26 = smov (%p29_p0, %s28_s26), 0  ;;  %p53_p3 = por %p52_p2, %p51_p1 }
   0x7   : > { %s40_s27 = ssub.s32 %s865_s24, %s1054_s26  ;;  %249 = sbr.rel (%p726_p5) target bundleno = 21 (0x15), region = 24 }
   0x8   : > { %p42_p4 = scmp.eq.s32.totalorder %s40_s27, 0 }
   0xa   : > { %s944_s29 = scalar_select %p42_p4, %s857_s22, %s44_s28  }
   0xe   : > { %252 = sbr.rel (!%p53_p3) target bundleno = 21 (0x15), region = 28  ;;  %s254_s30 = sand.u32 (%p53_p3), 1, %s857_s22  }
   0xf   : > { %s728_s7 = sshll.u32 (%p53_p3), %s865_s24, 3  ;;  %s727_s8 = sshll.u32 (%p53_p3), %s254_s30, 4 }
  0x10   : > { %s261_s11 = scalar_lea.vmem (%p53_p3), %s1042_s0, %s728_s7  ;;  %s256_s12 = scalar_lea.vmem (%p53_p3), [#allocation2], %s727_s8 }
  0x11   : > { %v291_v0 = vld [vmem:[%s261_s11] sm:$0xff] (%p53_p3)  ;;  %v293_v1 = vld [vmem:[%s261_s11 + $0x18] sm:$0xff] (%p53_p3) }
  0x12   : > { %292 = vst [vmem:[%s256_s12] sm:$0xff] (%p53_p3), %v291_v0  ;;  %294 = vst [vmem:[%s256_s12 + $0x8] sm:$0xff] (%p53_p3), %v293_v1 }
  0x15 PF: > { %p729_p6 = scmp.ge.s32.totalorder %s869_s25, 1  ;;  %p323_p7 = scmp.lt.s32.totalorder %s869_s25, 4 }
  0x17   : > { %p324_p8 = pnand %p729_p6, %p323_p7 }
  0x18   : > { %s330_s13 = sand.u32 (!%p324_p8), 1, %s853_s21   ;;  %s731_s14 = sshll.u32 (!%p324_p8), %s861_s23, 4 }
  0x19   : > { %327 = sbr.rel (%p324_p8) target bundleno = 303 (0x12f), region = 78  ;;  %s956_s15 = sshll.u32 (!%p324_p8), %s330_s13, 4 }
  0x1a   : > { %p384_p9 = scmp.lt.s32.totalorder (!%p324_p8), %s731_s14, 47  ;;  %p392_p10 = scmp.lt.s32.totalorder (!%p324_p8), %s861_s23, 2 }
  0x1b   : > { %s332_s9 = scalar_lea.vmem (!%p324_p8), [#allocation2], %s956_s15  ;;  %p733_p11 = scmp.ne.s32.totalorder (!%p324_p8), %s861_s23, 0 }
  0x20   : > { %s1056_s14 = smov (!%p384_p9, %s731_s14), 47  ;;  %417 = sbr.rel (%p733_p11) target bundleno = 39 (0x27), region = 86 }
  0x21   : > { %s960_s16 = scalar_select %p392_p10, %s861_s23, 2 }
  0x22   : > { %s732_s17 = sshll.u32 %s1056_s14, 2  ;;  %v871_v2 = vmov (!%p733_p11), 0.0  }
  0x23   : > { %s965_s20 = scalar_lea.vmem %s1043_s1, %s732_s17  ;;  %s394_s21 = scalar_lea.vmem %s1044_s2, %s960_s16  ;;  %418 = vst [vmem:[%s1048_s6] sm:$0xff] (!%p733_p11), %v871_v2  ;;  %419 = vst [vmem:[%s1048_s6 + $0x8] sm:$0xff] (!%p733_p11), %v871_v2 }
  0x24   : > { %s397_s8 = scalar_lea.vmem %s1045_s3, %s960_s16 }
  0x27 PF: > { %v823_v3 = vld [vmem:[%s965_s20] sm:$0xff]   ;;  %v872_v4 = vmov 0.0   ;;  %v824_v5 = vld [vmem:[%s965_s20 + $0x8] sm:$0xff]   ;;  %vm873_vm0 = vmmov 0   ;;  %v825_v6 = vld [vmem:[%s965_s20 + $0x10] sm:$0xff]   ;;  %p744_p12 = scmp.ne.s32.totalorder %s861_s23, 2 }
  0x28   : > { %760 = vmatprep.subr.bf16.mxu0 %v872_v4  ;;  %776 = vmatprep.mubr.msk.bf16.mxu0 %vm873_vm0, %v872_v4  ;;  %v826_v7 = vld [vmem:[%s965_s20 + $0x18] sm:$0xff]   ;;  %v827_v8 = vld [vmem:[%s965_s20 + $0x20] sm:$0xff]   ;;  %v828_v14 = vld [vmem:[%s965_s20 + $0x28] sm:$0xff]  }
  0x29   : > { %761 = vmatpush3.bf16.msra.mxu0 %v823_v3  ;;  %v420_v9 = vld [vmem:[%s332_s9] sm:$0xff]  ;;  %v421_v10 = vld [vmem:[%s332_s9 + $0x8] sm:$0xff] }
  0x2a   : > { %762 = vmatprep.subr.bf16.mxu0 %v872_v4  ;;  %v734_v11 = vld [vmem:[%s394_s21] ss:$0 sm:$0xff]  ;;  %v829_v18 = vld [vmem:[%s965_s20 + $0x30] sm:$0xff]   ;;  %v830_v21 = vld [vmem:[%s965_s20 + $0x38] sm:$0xff]  }
  0x2b   : > { %v429_v12 = vmul.f32 %v734_v11, %v420_v9  ;;  %v430_v13 = vmul.f32 %v734_v11, %v421_v10  ;;  %v735_v15 = vld [vmem:[%s397_s8] ss:$0 sm:$0xff]  ;;  %v443_v25 = vld [vmem:[%s1048_s6 + $0x8] sm:$0xff] }
  0x2c   : > { %v442_v23 = vld [vmem:[%s1048_s6] sm:$0xff] }
  0x2d   : > { %763 = vmatpush3.bf16.msra.mxu0 %v824_v5  ;;  %v438_v16 = vadd.f32 %v735_v15, %v429_v12  ;;  %v439_v17 = vadd.f32 %v735_v15, %v430_v13  ;;  %v745_v32 = vld [vmem:[%s1046_s4] ss:$0 sm:$0xff] (!%p744_p12) }
  0x2e   : > { %764 = vmatprep.subr.bf16.mxu0 %v872_v4  ;;  %v746_v33 = vld [vmem:[%s1047_s5] ss:$0 sm:$0xff] (!%p744_p12) }
  0x2f   : > { %v440_v19 = vmax.f32 %v438_v16, 0.0  ;;  %v441_v20 = vmax.f32 %v439_v17, 0.0 }
  0x31   : > { %765 = vmatpush3.bf16.msra.mxu0 %v825_v6  ;;  %v444_v22 = vpack.c.bf16 %v441_v20, %v440_v19 }
  0x32   : > { %766 = vmatprep.subr.bf16.mxu0 %v872_v4 }
  0x35   : > { %767 = vmatpush3.bf16.msra.mxu0 %v826_v7 }
  0x36   : > { %768 = vmatprep.subr.bf16.mxu0 %v872_v4 }
  0x39   : > { %769 = vmatpush3.bf16.msra.mxu0 %v827_v8 }
  0x3a   : > { %770 = vmatprep.subr.bf16.mxu0 %v872_v4 }
  0x3d   : > { %771 = vmatpush3.bf16.msra.mxu0 %v828_v14 }
  0x3e   : > { %772 = vmatprep.subr.bf16.mxu0 %v872_v4 }
  0x41   : > { %773 = vmatpush3.bf16.msra.mxu0 %v829_v18 }
  0x42   : > { %774 = vmatprep.subr.bf16.mxu0 %v872_v4 }
  0x45   : > { %775 = vmatpush3.bf16.msra.mxu0 %v830_v21 }
  0x48   : > { %777 = vmatmul.mubr.bf16.vlgmr.msra.gmra.mrb[0].mxu0 %v444_v22 }
 0x11a   : > { %557 = sbr.rel (%p744_p12) target bundleno = 303 (0x12f), region = 90 }
 0x11b   : > { %v543_v24 = vpop.f32.mrb[0].mxu0 }
 0x11c   : > { %v550_v26 = vadd.f32 %v543_v24, %v442_v23  ;;  %v778_v27 = vpop.f32.mrb[1].mxu0 }
 0x11d   : > { %v546_v28 = vpop.f32.mrb[2].mxu0 }
 0x11e   : > { %552 = vst [vmem:[%s1048_s6] sm:$0xff] %v550_v26  ;;  %v551_v29 = vadd.f32 %v546_v28, %v443_v25  ;;  %v779_v30 = vpop.f32.mrb[3].mxu0 }
 0x120   : > { %553 = vst [vmem:[%s1048_s6 + $0x8] sm:$0xff] %v551_v29 }
 0x125   : > { %v558_v31 = vld [vmem:[%s1048_s6] sm:$0xff] }
 0x126   : > { %v567_v34 = vmul.f32 %v745_v32, %v558_v31 }
 0x127   : > { %v559_v35 = vld [vmem:[%s1048_s6 + $0x8] sm:$0xff] }
 0x128   : > { %v568_v36 = vmul.f32 %v745_v32, %v559_v35  ;;  %v576_v37 = vadd.f32 %v746_v33, %v567_v34 }
 0x12a   : > { %v577_v38 = vadd.f32 %v746_v33, %v568_v36  ;;  %v578_v39 = vmax.f32 %v576_v37, 0.0 }
 0x12c   : > { %v579_v40 = vmax.f32 %v577_v38, 0.0  ;;  %580 = vst [vmem:[%s1048_s6] sm:$0xff] %v578_v39 }
 0x12e   : > { %581 = vst [vmem:[%s1048_s6 + $0x8] sm:$0xff] %v579_v40 }
 0x12f PF: > { %s16_s25 = sadd.s32 1, %s869_s25   ;;  %s1049_s21 = smov %s857_s22 }
 0x130   : > { %p13_p13 = scmp.ge.s32.totalorder %s16_s25, 5   ;;  %s1050_s22 = smov %s944_s29 }
 0x131   : > { %s1051_s23 = smov %s865_s24  ;;  %s1052_s24 = smov %s1054_s26 }
 0x132   :  { %15 = sbr.rel (!%p13_p13) target bundleno = 3 (0x3), region = 140 }

// kernel: densenet_forward.135
= control target key start
LH: loop header
LB: loop body
LE: loop exit
PB: predicated region body
PF: predicated region fallthrough
CT: control target
= control target key end

     0   :  { %s899_s21 = smov 0   ;;  %s901_s22 = smov 0   ;;  %s1017_s0 = inlined_call_operand.vmem [shape: bf16[16,1152], index: 0, kind: input, shape index: {}]   ;;  %s1018_s1 = inlined_call_operand.vmem [shape: bf16[1152,128], index: 1, kind: input, shape index: {}]   ;;  %s1019_s2 = inlined_call_operand.vmem [shape: f32[1,1152], index: 2, kind: input, shape index: {}, may-alias: {2,3}]   ;;  %s1020_s3 = inlined_call_operand.vmem [shape: f32[1,1152], index: 3, kind: input, shape index: {}, may-alias: {2,3}]   ;;  %s1021_s4 = inlined_call_operand.vmem [shape: f32[1,128], index: 4, kind: input, shape index: {}]   ;;  %s1022_s5 = inlined_call_operand.vmem [shape: f32[1,128], index: 5, kind: input, shape index: {}]   ;;  %s1023_s6 = inlined_call_operand.vmem [shape: f32[16,128], index: 6, kind: output, shape index: {}]  }
   0x1   :  { %s903_s23 = smov 0   ;;  %s905_s24 = smov 0  }
   0x2   :  { %s907_s2 = smov 0  }
   0x3 LB: > { %s28_s3 = sadd.s32 1, %s855_s24  ;;  %p51_p1 = scmp.ne.s32.totalorder %s847_s22, %s843_s21  ;;  %s859_s2 = sphi %s907_s2, %s16_s2   ;;  %s855_s24 = sphi %s905_s24, %s1027_s24   ;;  %s851_s23 = sphi %s903_s23, %s1026_s23   ;;  %s847_s22 = sphi %s901_s22, %s1025_s22   ;;  %s843_s21 = sphi %s899_s21, %s1024_s21  }
   0x4   : > { %p29_p0 = scmp.ge.s32.totalorder %s28_s3, 9  ;;  %p52_p2 = scmp.eq.s32.totalorder %s859_s2, 0 }
   0x5   : > { %s44_s26 = sadd.s32 1, %s847_s22  ;;  %p716_p5 = scmp.ge.s32.totalorder %s859_s2, 9 }
   0x6   : > { %s1029_s3 = smov (%p29_p0, %s28_s3), 0  ;;  %p53_p3 = por %p52_p2, %p51_p1 }
   0x7   : > { %s40_s25 = ssub.s32 %s855_s24, %s1029_s3  ;;  %249 = sbr.rel (%p716_p5) target bundleno = 21 (0x15), region = 24 }
   0x8   : > { %p42_p4 = scmp.eq.s32.totalorder %s40_s25, 0 }
   0xa   : > { %s934_s27 = scalar_select %p42_p4, %s847_s22, %s44_s26  }
   0xe   : > { %252 = sbr.rel (!%p53_p3) target bundleno = 21 (0x15), region = 28  ;;  %s254_s28 = sand.u32 (%p53_p3), 1, %s847_s22  }
   0xf   : > { %s718_s29 = sshll.u32 (%p53_p3), %s855_s24, 2  ;;  %s717_s30 = sshll.u32 (%p53_p3), %s254_s28, 3 }
  0x10   : > { %s261_s9 = scalar_lea.vmem (%p53_p3), %s1017_s0, %s718_s29  ;;  %s256_s10 = scalar_lea.vmem (%p53_p3), [#allocation2], %s717_s30 }
  0x11   : > { %v277_v0 = vld [vmem:[%s261_s9] sm:$0xf] (%p53_p3)  ;;  %v279_v1 = vld [vmem:[%s261_s9 + $0x24] sm:$0xf] (%p53_p3) }
  0x12   : > { %278 = vst [vmem:[%s256_s10] sm:$0xf] (%p53_p3), %v277_v0  ;;  %280 = vst [vmem:[%s256_s10 + $0x4] sm:$0xf] (%p53_p3), %v279_v1 }
  0x15 PF: > { %p719_p6 = scmp.ge.s32.totalorder %s859_s2, 1  ;;  %p330_p7 = scmp.lt.s32.totalorder %s859_s2, 10 }
  0x17   : > { %p331_p8 = pnand %p719_p6, %p330_p7 }
  0x18   : > { %s337_s11 = sand.u32 (!%p331_p8), 1, %s843_s21   ;;  %s721_s12 = sshll.u32 (!%p331_p8), %s851_s23, 4 }
  0x19   : > { %334 = sbr.rel (%p331_p8) target bundleno = 301 (0x12d), region = 81  ;;  %s946_s13 = sshll.u32 (!%p331_p8), %s337_s11, 3 }
  0x1a   : > { %p391_p9 = scmp.lt.s32.totalorder (!%p331_p8), %s721_s12, 143  ;;  %s339_s18 = scalar_lea.vmem (!%p331_p8), [#allocation2], %s946_s13 }
  0x1b   : > { %p723_p10 = scmp.ne.s32.totalorder (!%p331_p8), %s851_s23, 0 }
  0x20   : > { %s1031_s12 = smov (!%p391_p9, %s721_s12), 143  ;;  %424 = sbr.rel (%p723_p10) target bundleno = 39 (0x27), region = 89 }
  0x21   : > { %s722_s14 = sshll.u32 %s1031_s12, 2  ;;  %v861_v2 = vmov (!%p723_p10), 0.0  }
  0x22   : > { %s951_s17 = scalar_lea.vmem %s1018_s1, %s722_s14  ;;  %425 = vst [vmem:[%s1023_s6] sm:$0xff] (!%p723_p10), %v861_v2  ;;  %426 = vst [vmem:[%s1023_s6 + $0x8] sm:$0xff] (!%p723_p10), %v861_v2 }
  0x27 PF: > { %v812_v3 = vld [vmem:[%s951_s17] sm:$0xff]   ;;  %v862_v4 = vmov 0.0   ;;  %v813_v5 = vld [vmem:[%s951_s17 + $0x8] sm:$0xff]   ;;  %vm863_vm0 = vmmov 0   ;;  %v814_v6 = vld [vmem:[%s951_s17 + $0x10] sm:$0xff]   ;;  %p733_p11 = scmp.ne.s32.totalorder %s851_s23, 8 }
  0x28   : > { %749 = vmatprep.subr.bf16.mxu0 %v862_v4  ;;  %765 = vmatprep.mubr.msk.bf16.mxu0 %vm863_vm0, %v862_v4  ;;  %v815_v7 = vld [vmem:[%s951_s17 + $0x18] sm:$0xff]   ;;  %v816_v8 = vld [vmem:[%s951_s17 + $0x20] sm:$0xff]   ;;  %v817_v9 = vld [vmem:[%s951_s17 + $0x28] sm:$0xff]  }
  0x29   : > { %750 = vmatpush3.bf16.msra.mxu0 %v812_v3  ;;  %v818_v10 = vld [vmem:[%s951_s17 + $0x30] sm:$0xff]   ;;  %v819_v11 = vld [vmem:[%s951_s17 + $0x38] sm:$0xff]   ;;  %v820_v12 = vld [vmem:[%s339_s18] sm:$0xff]  }
  0x2a   : > { %751 = vmatprep.subr.bf16.mxu0 %v862_v4  ;;  %v429_v13 = vld [vmem:[%s1023_s6] sm:$0xff]  ;;  %v430_v15 = vld [vmem:[%s1023_s6 + $0x8] sm:$0xff] }
  0x2b   : > { %v734_v22 = vld [vmem:[%s1021_s4] ss:$0 sm:$0xff] (!%p733_p11) }
  0x2c   : > { %v735_v23 = vld [vmem:[%s1022_s5] ss:$0 sm:$0xff] (!%p733_p11) }
  0x2d   : > { %752 = vmatpush3.bf16.msra.mxu0 %v813_v5 }
  0x2e   : > { %753 = vmatprep.subr.bf16.mxu0 %v862_v4 }
  0x31   : > { %754 = vmatpush3.bf16.msra.mxu0 %v814_v6 }
  0x32   : > { %755 = vmatprep.subr.bf16.mxu0 %v862_v4 }
  0x35   : > { %756 = vmatpush3.bf16.msra.mxu0 %v815_v7 }
  0x36   : > { %757 = vmatprep.subr.bf16.mxu0 %v862_v4 }
  0x39   : > { %758 = vmatpush3.bf16.msra.mxu0 %v816_v8 }
  0x3a   : > { %759 = vmatprep.subr.bf16.mxu0 %v862_v4 }
  0x3d   : > { %760 = vmatpush3.bf16.msra.mxu0 %v817_v9 }
  0x3e   : > { %761 = vmatprep.subr.bf16.mxu0 %v862_v4 }
  0x41   : > { %762 = vmatpush3.bf16.msra.mxu0 %v818_v10 }
  0x42   : > { %763 = vmatprep.subr.bf16.mxu0 %v862_v4 }
  0x45   : > { %764 = vmatpush3.bf16.msra.mxu0 %v819_v11 }
  0x48   : > { %766 = vmatmul.mubr.bf16.vlgmr.msra.gmra.mrb[0].mxu0 %v820_v12 }
 0x11a   : > { %549 = sbr.rel (%p733_p11) target bundleno = 301 (0x12d), region = 93 }
 0x11b   : > { %v535_v14 = vpop.f32.mrb[0].mxu0 }
 0x11c   : > { %v542_v16 = vadd.f32 %v535_v14, %v429_v13  ;;  %v767_v17 = vpop.f32.mrb[1].mxu0 }
 0x11d   : > { %v538_v18 = vpop.f32.mrb[2].mxu0 }
 0x11e   : > { %544 = vst [vmem:[%s1023_s6] sm:$0xff] %v542_v16  ;;  %v543_v19 = vadd.f32 %v538_v18, %v430_v15  ;;  %v768_v20 = vpop.f32.mrb[3].mxu0 }
 0x120   : > { %545 = vst [vmem:[%s1023_s6 + $0x8] sm:$0xff] %v543_v19 }
 0x125   : > { %v550_v21 = vld [vmem:[%s1023_s6] sm:$0xff] }
 0x126   : > { %v559_v24 = vmul.f32 %v734_v22, %v550_v21 }
 0x127   : > { %v551_v25 = vld [vmem:[%s1023_s6 + $0x8] sm:$0xff] }
 0x128   : > { %v560_v26 = vmul.f32 %v734_v22, %v551_v25  ;;  %v568_v27 = vadd.f32 %v735_v23, %v559_v24 }
 0x12a   : > { %v569_v28 = vadd.f32 %v735_v23, %v560_v26  ;;  %570 = vst [vmem:[%s1023_s6] sm:$0xff] %v568_v27 }
 0x12c   : > { %571 = vst [vmem:[%s1023_s6 + $0x8] sm:$0xff] %v569_v28 }
 0x12d PF: > { %s16_s2 = sadd.s32 1, %s859_s2   ;;  %s1024_s21 = smov %s847_s22 }
 0x12e   : > { %p13_p12 = scmp.ge.s32.totalorder %s16_s2, 11   ;;  %s1025_s22 = smov %s934_s27 }
 0x12f   : > { %s1026_s23 = smov %s855_s24  ;;  %s1027_s24 = smov %s1029_s3 }
 0x130   :  { %15 = sbr.rel (!%p13_p12) target bundleno = 3 (0x3), region = 143 }

// kernel: densenet_forward.144
= control target key start
LH: loop header
LB: loop body
LE: loop exit
PB: predicated region body
PF: predicated region fallthrough
CT: control target
= control target key end

     0   :  { %s999_s21 = smov 0   ;;  %s1001_s22 = smov 0   ;;  %s1147_s0 = inlined_call_operand.vmem [shape: f32[16,512], index: 0, kind: input, shape index: {}]   ;;  %s1148_s1 = inlined_call_operand.vmem [shape: bf16[512,128], index: 1, kind: input, shape index: {}]   ;;  %s1149_s2 = inlined_call_operand.vmem [shape: f32[1,512], index: 2, kind: input, shape index: {}]   ;;  %s1150_s3 = inlined_call_operand.vmem [shape: f32[1,512], index: 3, kind: input, shape index: {}]   ;;  %s1151_s4 = inlined_call_operand.vmem [shape: f32[1,128], index: 4, kind: input, shape index: {}]   ;;  %s1152_s5 = inlined_call_operand.vmem [shape: f32[1,128], index: 5, kind: input, shape index: {}]   ;;  %s1153_s6 = inlined_call_operand.vmem [shape: f32[16,128], index: 6, kind: output, shape index: {}]  }
   0x1   :  { %s1003_s23 = smov 0   ;;  %s1005_s24 = smov 0  }
   0x2   :  { %s1007_s25 = smov 0  }
   0x3 LB: > { %s28_s26 = sadd.s32 1, %s957_s24  ;;  %p51_p1 = scmp.ne.s32.totalorder %s949_s22, %s945_s21  ;;  %s961_s25 = sphi %s1007_s25, %s16_s25   ;;  %s957_s24 = sphi %s1005_s24, %s1157_s24   ;;  %s953_s23 = sphi %s1003_s23, %s1156_s23   ;;  %s949_s22 = sphi %s1001_s22, %s1155_s22   ;;  %s945_s21 = sphi %s999_s21, %s1154_s21  }
   0x4   : > { %p29_p0 = scmp.ge.s32.totalorder %s28_s26, 2  ;;  %p52_p2 = scmp.eq.s32.totalorder %s961_s25, 0 }
   0x5   : > { %s44_s28 = sadd.s32 1, %s949_s22  ;;  %p809_p5 = scmp.ge.s32.totalorder %s961_s25, 2 }
   0x6   : > { %s1159_s26 = smov (%p29_p0, %s28_s26), 0  ;;  %p53_p3 = por %p52_p2, %p51_p1 }
   0x7   : > { %s40_s27 = ssub.s32 %s957_s24, %s1159_s26  ;;  %249 = sbr.rel (%p809_p5) target bundleno = 21 (0x15), region = 24 }
   0x8   : > { %p42_p4 = scmp.eq.s32.totalorder %s40_s27, 0 }
   0xa   : > { %s1034_s29 = scalar_select %p42_p4, %s949_s22, %s44_s28  }
   0xe   : > { %252 = sbr.rel (!%p53_p3) target bundleno = 21 (0x15), region = 28  ;;  %s254_s30 = sand.u32 (%p53_p3), 1, %s949_s22  }
   0xf   : > { %s843_s7 = sshll.u32 (%p53_p3), %s957_s24, 4  ;;  %s810_s8 = sshll.u32 (%p53_p3), %s254_s30, 5 }
  0x10   : > { %s262_s11 = scalar_lea.vmem (%p53_p3), %s1147_s0, %s843_s7  ;;  %s256_s12 = scalar_lea.vmem (%p53_p3), [#allocation2], %s810_s8 }
  0x11   : > { %v275_v0 = vld [vmem:[%s262_s11] sm:$0xff] (%p53_p3)  ;;  %v277_v1 = vld [vmem:[%s262_s11 + $0x8] sm:$0xff] (%p53_p3) }
  0x12   : > { %v279_v2 = vld [vmem:[%s262_s11 + $0x20] sm:$0xff] (%p53_p3)  ;;  %276 = vst [vmem:[%s256_s12] sm:$0xff] (%p53_p3), %v275_v0  ;;  %278 = vst [vmem:[%s256_s12 + $0x8] sm:$0xff] (%p53_p3), %v277_v1  ;;  %v281_v3 = vld [vmem:[%s262_s11 + $0x28] sm:$0xff] (%p53_p3) }
  0x13   : > { %280 = vst [vmem:[%s256_s12 + $0x10] sm:$0xff] (%p53_p3), %v279_v2  ;;  %282 = vst [vmem:[%s256_s12 + $0x18] sm:$0xff] (%p53_p3), %v281_v3 }
  0x15 PF: > { %p813_p6 = scmp.ge.s32.totalorder %s961_s25, 1  ;;  %p315_p7 = scmp.lt.s32.totalorder %s961_s25, 3 }
  0x17   : > { %p316_p8 = pnand %p813_p6, %p315_p7 }
  0x18   : > { %s322_s13 = sand.u32 (!%p316_p8), 1, %s945_s21   ;;  %s815_s14 = sshll.u32 (!%p316_p8), %s953_s23, 5 }
  0x19   : > { %319 = sbr.rel (%p316_p8) target bundleno = 309 (0x135), region = 63  ;;  %s814_s15 = sshll.u32 (!%p316_p8), %s322_s13, 5 }
  0x1a   : > { %p379_p9 = scmp.lt.s32.totalorder (!%p316_p8), %s815_s14, 63  ;;  %s817_s16 = sshll.u32 (!%p316_p8), %s953_s23, 1 }
  0x1b   : > { %p388_p10 = scmp.lt.s32.totalorder (!%p316_p8), %s817_s16, 3  ;;  %s1062_s9 = scalar_lea.vmem (!%p316_p8), [#allocation2], %s814_s15 }
  0x1c   : > { %p819_p11 = scmp.ne.s32.totalorder (!%p316_p8), %s953_s23, 0 }
  0x20   : > { %s1161_s14 = smov (!%p379_p9, %s815_s14), 63  ;;  %s1163_s16 = smov (!%p388_p10, %s817_s16), 3 }
  0x21   : > { %s816_s17 = sshll.u32 %s1161_s14, 2  ;;  %s390_s21 = scalar_lea.vmem %s1149_s2, %s1163_s16  ;;  %v963_v4 = vmov (!%p819_p11), 0.0  }
  0x22   : > { %s1050_s20 = scalar_lea.vmem %s1148_s1, %s816_s17  ;;  %s395_s8 = scalar_lea.vmem %s1150_s3, %s1163_s16  ;;  %417 = vst [vmem:[%s1153_s6] sm:$0xff] (!%p819_p11), %v963_v4  ;;  %418 = vst [vmem:[%s1153_s6 + $0x8] sm:$0xff] (!%p819_p11), %v963_v4 }
  0x23   : > { %416 = sbr.rel (%p819_p11) target bundleno = 42 (0x2a), region = 71 }
  0x2a PF: > { %v907_v5 = vld [vmem:[%s1050_s20 + $0x40] sm:$0xff]   ;;  %v909_v7 = vld [vmem:[%s1050_s20 + $0x48] sm:$0xff]   ;;  %v911_v9 = vld [vmem:[%s1050_s20 + $0x50] sm:$0xff]   ;;  %v425_v10 = vlaneseq  ;;  %p836_p12 = scmp.ne.s32.totalorder %s953_s23, 1 }
  0x2b   : > { %v908_v6 = vld [vmem:[%s1050_s20] sm:$0xff]   ;;  %844 = vmatprep.subr.bf16.mxu0 %v907_v5  ;;  %v910_v8 = vld [vmem:[%s1050_s20 + $0x8] sm:$0xff]   ;;  %v912_v11 = vld [vmem:[%s1050_s20 + $0x10] sm:$0xff]  }
  0x2c   : > { %845 = vmatpush3.bf16.msra.mxu0 %v908_v6  ;;  %v913_v12 = vld [vmem:[%s1050_s20 + $0x58] sm:$0xff]   ;;  %v426_v13 = vshrl.u32 %v425_v10, 7  ;;  %v915_v15 = vld [vmem:[%s1050_s20 + $0x60] sm:$0xff]   ;;  %v917_v19 = vld [vmem:[%s1050_s20 + $0x68] sm:$0xff]  }
  0x2d   : > { %846 = vmatprep.subr.bf16.mxu0 %v909_v7  ;;  %v914_v14 = vld [vmem:[%s1050_s20 + $0x18] sm:$0xff]   ;;  %v916_v18 = vld [vmem:[%s1050_s20 + $0x20] sm:$0xff]   ;;  %v420_v20 = vld [vmem:[%s1062_s9 + $0x8] sm:$0xff] }
  0x2e   : > { %v427_v16 = vsub.s32 0, %v426_v13  ;;  %v431_v17 = vsub.s32 1, %v426_v13  ;;  %v422_v21 = vld [vmem:[%s1062_s9 + $0x18] sm:$0xff]  ;;  %v423_v22 = vld [vmem:[%s390_s21] sm:$0x3]  ;;  %v421_v27 = vld [vmem:[%s1062_s9 + $0x10] sm:$0xff] }
  0x2f   : > { %v439_v25 = vld [vmem:[%s395_s8] sm:$0x3]  ;;  %v918_v30 = vld [vmem:[%s1050_s20 + $0x28] sm:$0xff]   ;;  %v919_v35 = vld [vmem:[%s1050_s20 + $0x70] sm:$0xff]  }
  0x30   : > { %847 = vmatpush3.bf16.msra.mxu0 %v910_v8  ;;  %v428_v23 = vrot.slane %v423_v22, %v427_v16  ;;  %v432_v24 = vrot.slane %v423_v22, %v431_v17  ;;  %v419_v26 = vld [vmem:[%s1062_s9] sm:$0xff]  ;;  %v444_v28 = vrot.slane %v439_v25, %v427_v16  ;;  %v448_v29 = vrot.slane %v439_v25, %v431_v17  ;;  %v920_v40 = vld [vmem:[%s1050_s20 + $0x30] sm:$0xff]   ;;  %v921_v43 = vld [vmem:[%s1050_s20 + $0x78] sm:$0xff]  }
  0x31   : > { %848 = vmatprep.subr.bf16.mxu0 %v911_v9  ;;  %v922_v47 = vld [vmem:[%s1050_s20 + $0x38] sm:$0xff]   ;;  %v459_v50 = vld [vmem:[%s1153_s6] sm:$0xff]  ;;  %v460_v54 = vld [vmem:[%s1153_s6 + $0x8] sm:$0xff] }
  0x32   : > { %v436_v31 = vmul.f32 %v432_v24, %v420_v20  ;;  %v438_v32 = vmul.f32 %v432_v24, %v422_v21  ;;  %v435_v33 = vmul.f32 %v428_v23, %v419_v26  ;;  %v437_v34 = vmul.f32 %v428_v23, %v421_v27  ;;  %v837_v60 = vld [vmem:[%s1151_s4] ss:$0 sm:$0xff] (!%p836_p12) }
  0x33   : > { %v838_v61 = vld [vmem:[%s1152_s5] ss:$0 sm:$0xff] (!%p836_p12) }
  0x34   : > { %849 = vmatpush3.bf16.msra.mxu0 %v912_v11  ;;  %v452_v36 = vadd.f32 %v448_v29, %v436_v31  ;;  %v454_v37 = vadd.f32 %v448_v29, %v438_v32  ;;  %v451_v38 = vadd.f32 %v444_v28, %v435_v33  ;;  %v453_v39 = vadd.f32 %v444_v28, %v437_v34 }
  0x35   : > { %850 = vmatprep.subr.bf16.mxu0 %v913_v12 }
  0x36   : > { %v456_v41 = vmax.f32 %v452_v36, 0.0  ;;  %v458_v42 = vmax.f32 %v454_v37, 0.0  ;;  %v455_v45 = vmax.f32 %v451_v38, 0.0  ;;  %v457_v46 = vmax.f32 %v453_v39, 0.0 }
  0x38   : > { %851 = vmatpush3.bf16.msra.mxu0 %v914_v14  ;;  %v462_v44 = vpack.c.bf16 %v458_v42, %v456_v41  ;;  %v461_v48 = vpack.c.bf16 %v457_v46, %v455_v45 }
  0x39   : > { %852 = vmatprep.subr.bf16.mxu0 %v915_v15 }
  0x3a   : > { %623 = vmatprep.mubr.bf16.mxu0 %v462_v44 }
  0x3c   : > { %853 = vmatpush3.bf16.msra.mxu0 %v916_v18 }
  0x3d   : > { %854 = vmatprep.subr.bf16.mxu0 %v917_v19 }
  0x40   : > { %855 = vmatpush3.bf16.msra.mxu0 %v918_v30 }
  0x41   : > { %856 = vmatprep.subr.bf16.mxu0 %v919_v35 }
  0x44   : > { %857 = vmatpush3.bf16.msra.mxu0 %v920_v40 }
  0x45   : > { %858 = vmatprep.subr.bf16.mxu0 %v921_v43 }
  0x48   : > { %859 = vmatpush3.bf16.msra.mxu0 %v922_v47 }
  0x4b   : > { %624 = vmatmul.mubr.bf16.vlgmr.msra.gmra.mrb[0].mxu0 %v461_v48 }
 0x11e   : > { %v860_v49 = vpop.f32.mrb[0].mxu0 }
 0x11f   : > { %v861_v51 = vpop.f32.mrb[1].mxu0 }
 0x120   : > { %v862_v52 = vadd.f32 %v861_v51, %v860_v49  ;;  %v863_v53 = vpop.f32.mrb[2].mxu0  ;;  %639 = sbr.rel (%p836_p12) target bundleno = 309 (0x135), region = 75 }
 0x121   : > { %v864_v55 = vpop.f32.mrb[3].mxu0 }
 0x122   : > { %v632_v56 = vadd.f32 %v862_v52, %v459_v50  ;;  %v865_v57 = vadd.f32 %v864_v55, %v863_v53 }
 0x124   : > { %634 = vst [vmem:[%s1153_s6] sm:$0xff] %v632_v56  ;;  %v633_v58 = vadd.f32 %v865_v57, %v460_v54 }
 0x126   : > { %635 = vst [vmem:[%s1153_s6 + $0x8] sm:$0xff] %v633_v58 }
 0x12b   : > { %v640_v59 = vld [vmem:[%s1153_s6] sm:$0xff] }
 0x12c   : > { %v649_v62 = vmul.f32 %v837_v60, %v640_v59 }
 0x12d   : > { %v641_v63 = vld [vmem:[%s1153_s6 + $0x8] sm:$0xff] }
 0x12e   : > { %v650_v0 = vmul.f32 %v837_v60, %v641_v63  ;;  %v658_v1 = vadd.f32 %v838_v61, %v649_v62 }
 0x130   : > { %v659_v2 = vadd.f32 %v838_v61, %v650_v0  ;;  %v660_v3 = vmax.f32 %v658_v1, 0.0 }
 0x132   : > { %v661_v4 = vmax.f32 %v659_v2, 0.0  ;;  %662 = vst [vmem:[%s1153_s6] sm:$0xff] %v660_v3 }
 0x134   : > { %663 = vst [vmem:[%s1153_s6 + $0x8] sm:$0xff] %v661_v4 }
 0x135 PF: > { %s16_s25 = sadd.s32 1, %s961_s25   ;;  %s1154_s21 = smov %s949_s22 }
 0x136   : > { %p13_p13 = scmp.ge.s32.totalorder %s16_s25, 4   ;;  %s1155_s22 = smov %s1034_s29 }
 0x137   : > { %s1156_s23 = smov %s957_s24  ;;  %s1157_s24 = smov %s1159_s26 }
 0x138   :  { %15 = sbr.rel (!%p13_p13) target bundleno = 3 (0x3), region = 125 }

// kernel: densenet_forward.152
= control target key start
LH: loop header
LB: loop body
LE: loop exit
PB: predicated region body
PF: predicated region fallthrough
CT: control target
= control target key end

     0   :  { %s909_s21 = smov 0   ;;  %s911_s22 = smov 0   ;;  %s1042_s0 = inlined_call_operand.vmem [shape: f32[16,640], index: 0, kind: input, shape index: {}]   ;;  %s1043_s1 = inlined_call_operand.vmem [shape: bf16[640,128], index: 1, kind: input, shape index: {}]   ;;  %s1044_s2 = inlined_call_operand.vmem [shape: f32[1,640], index: 2, kind: input, shape index: {}]   ;;  %s1045_s3 = inlined_call_operand.vmem [shape: f32[1,640], index: 3, kind: input, shape index: {}]   ;;  %s1046_s4 = inlined_call_operand.vmem [shape: f32[1,128], index: 4, kind: input, shape index: {}]   ;;  %s1047_s5 = inlined_call_operand.vmem [shape: f32[1,128], index: 5, kind: input, shape index: {}]   ;;  %s1048_s6 = inlined_call_operand.vmem [shape: f32[16,128], index: 6, kind: output, shape index: {}]  }
   0x1   :  { %s913_s23 = smov 0   ;;  %s915_s24 = smov 0  }
   0x2   :  { %s917_s25 = smov 0  }
   0x3 LB: > { %s28_s26 = sadd.s32 1, %s865_s24  ;;  %p51_p1 = scmp.ne.s32.totalorder %s857_s22, %s853_s21  ;;  %s869_s25 = sphi %s917_s25, %s16_s25   ;;  %s865_s24 = sphi %s915_s24, %s1052_s24   ;;  %s861_s23 = sphi %s913_s23, %s1051_s23   ;;  %s857_s22 = sphi %s911_s22, %s1050_s22   ;;  %s853_s21 = sphi %s909_s21, %s1049_s21  }
   0x4   : > { %p29_p0 = scmp.ge.s32.totalorder %s28_s26, 5  ;;  %p52_p2 = scmp.eq.s32.totalorder %s869_s25, 0 }
   0x5   : > { %s44_s28 = sadd.s32 1, %s857_s22  ;;  %p726_p5 = scmp.ge.s32.totalorder %s869_s25, 5 }
   0x6   : > { %s1054_s26 = smov (%p29_p0, %s28_s26), 0  ;;  %p53_p3 = por %p52_p2, %p51_p1 }
   0x7   : > { %s40_s27 = ssub.s32 %s865_s24, %s1054_s26  ;;  %249 = sbr.rel (%p726_p5) target bundleno = 21 (0x15), region = 24 }
   0x8   : > { %p42_p4 = scmp.eq.s32.totalorder %s40_s27, 0 }
   0xa   : > { %s944_s29 = scalar_select %p42_p4, %s857_s22, %s44_s28  }
   0xe   : > { %252 = sbr.rel (!%p53_p3) target bundleno = 21 (0x15), region = 28  ;;  %s254_s30 = sand.u32 (%p53_p3), 1, %s857_s22  }
   0xf   : > { %s728_s7 = sshll.u32 (%p53_p3), %s865_s24, 3  ;;  %s727_s8 = sshll.u32 (%p53_p3), %s254_s30, 4 }
  0x10   : > { %s261_s11 = scalar_lea.vmem (%p53_p3), %s1042_s0, %s728_s7  ;;  %s256_s12 = scalar_lea.vmem (%p53_p3), [#allocation2], %s727_s8 }
  0x11   : > { %v291_v0 = vld [vmem:[%s261_s11] sm:$0xff] (%p53_p3)  ;;  %v293_v1 = vld [vmem:[%s261_s11 + $0x28] sm:$0xff] (%p53_p3) }
  0x12   : > { %292 = vst [vmem:[%s256_s12] sm:$0xff] (%p53_p3), %v291_v0  ;;  %294 = vst [vmem:[%s256_s12 + $0x8] sm:$0xff] (%p53_p3), %v293_v1 }
  0x15 PF: > { %p729_p6 = scmp.ge.s32.totalorder %s869_s25, 1  ;;  %p323_p7 = scmp.lt.s32.totalorder %s869_s25, 6 }
  0x17   : > { %p324_p8 = pnand %p729_p6, %p323_p7 }
  0x18   : > { %s330_s13 = sand.u32 (!%p324_p8), 1, %s853_s21   ;;  %s731_s14 = sshll.u32 (!%p324_p8), %s861_s23, 4 }
  0x19   : > { %327 = sbr.rel (%p324_p8) target bundleno = 303 (0x12f), region = 78  ;;  %s956_s15 = sshll.u32 (!%p324_p8), %s330_s13, 4 }
  0x1a   : > { %p384_p9 = scmp.lt.s32.totalorder (!%p324_p8), %s731_s14, 79  ;;  %p392_p10 = scmp.lt.s32.totalorder (!%p324_p8), %s861_s23, 4 }
  0x1b   : > { %s332_s9 = scalar_lea.vmem (!%p324_p8), [#allocation2], %s956_s15  ;;  %p733_p11 = scmp.ne.s32.totalorder (!%p324_p8), %s861_s23, 0 }
  0x20   : > { %s1056_s14 = smov (!%p384_p9, %s731_s14), 79  ;;  %417 = sbr.rel (%p733_p11) target bundleno = 39 (0x27), region = 86 }
  0x21   : > { %s960_s16 = scalar_select %p392_p10, %s861_s23, 4 }
  0x22   : > { %s732_s17 = sshll.u32 %s1056_s14, 2  ;;  %v871_v2 = vmov (!%p733_p11), 0.0  }
  0x23   : > { %s965_s20 = scalar_lea.vmem %s1043_s1, %s732_s17  ;;  %s394_s21 = scalar_lea.vmem %s1044_s2, %s960_s16  ;;  %418 = vst [vmem:[%s1048_s6] sm:$0xff] (!%p733_p11), %v871_v2  ;;  %419 = vst [vmem:[%s1048_s6 + $0x8] sm:$0xff] (!%p733_p11), %v871_v2 }
  0x24   : > { %s397_s8 = scalar_lea.vmem %s1045_s3, %s960_s16 }
  0x27 PF: > { %v823_v3 = vld [vmem:[%s965_s20] sm:$0xff]   ;;  %v872_v4 = vmov 0.0   ;;  %v824_v5 = vld [vmem:[%s965_s20 + $0x8] sm:$0xff]   ;;  %vm873_vm0 = vmmov 0   ;;  %v825_v6 = vld [vmem:[%s965_s20 + $0x10] sm:$0xff]   ;;  %p744_p12 = scmp.ne.s32.totalorder %s861_s23, 4 }
  0x28   : > { %760 = vmatprep.subr.bf16.mxu0 %v872_v4  ;;  %776 = vmatprep.mubr.msk.bf16.mxu0 %vm873_vm0, %v872_v4  ;;  %v826_v7 = vld [vmem:[%s965_s20 + $0x18] sm:$0xff]   ;;  %v827_v8 = vld [vmem:[%s965_s20 + $0x20] sm:$0xff]   ;;  %v828_v14 = vld [vmem:[%s965_s20 + $0x28] sm:$0xff]  }
  0x29   : > { %761 = vmatpush3.bf16.msra.mxu0 %v823_v3  ;;  %v420_v9 = vld [vmem:[%s332_s9] sm:$0xff]  ;;  %v421_v10 = vld [vmem:[%s332_s9 + $0x8] sm:$0xff] }
  0x2a   : > { %762 = vmatprep.subr.bf16.mxu0 %v872_v4  ;;  %v734_v11 = vld [vmem:[%s394_s21] ss:$0 sm:$0xff]  ;;  %v829_v18 = vld [vmem:[%s965_s20 + $0x30] sm:$0xff]   ;;  %v830_v21 = vld [vmem:[%s965_s20 + $0x38] sm:$0xff]  }
  0x2b   : > { %v429_v12 = vmul.f32 %v734_v11, %v420_v9  ;;  %v430_v13 = vmul.f32 %v734_v11, %v421_v10  ;;  %v735_v15 = vld [vmem:[%s397_s8] ss:$0 sm:$0xff]  ;;  %v443_v25 = vld [vmem:[%s1048_s6 + $0x8] sm:$0xff] }
  0x2c   : > { %v442_v23 = vld [vmem:[%s1048_s6] sm:$0xff] }
  0x2d   : > { %763 = vmatpush3.bf16.msra.mxu0 %v824_v5  ;;  %v438_v16 = vadd.f32 %v735_v15, %v429_v12  ;;  %v439_v17 = vadd.f32 %v735_v15, %v430_v13  ;;  %v745_v32 = vld [vmem:[%s1046_s4] ss:$0 sm:$0xff] (!%p744_p12) }
  0x2e   : > { %764 = vmatprep.subr.bf16.mxu0 %v872_v4  ;;  %v746_v33 = vld [vmem:[%s1047_s5] ss:$0 sm:$0xff] (!%p744_p12) }
  0x2f   : > { %v440_v19 = vmax.f32 %v438_v16, 0.0  ;;  %v441_v20 = vmax.f32 %v439_v17, 0.0 }
  0x31   : > { %765 = vmatpush3.bf16.msra.mxu0 %v825_v6  ;;  %v444_v22 = vpack.c.bf16 %v441_v20, %v440_v19 }
  0x32   : > { %766 = vmatprep.subr.bf16.mxu0 %v872_v4 }
  0x35   : > { %767 = vmatpush3.bf16.msra.mxu0 %v826_v7 }
  0x36   : > { %768 = vmatprep.subr.bf16.mxu0 %v872_v4 }
  0x39   : > { %769 = vmatpush3.bf16.msra.mxu0 %v827_v8 }
  0x3a   : > { %770 = vmatprep.subr.bf16.mxu0 %v872_v4 }
  0x3d   : > { %771 = vmatpush3.bf16.msra.mxu0 %v828_v14 }
  0x3e   : > { %772 = vmatprep.subr.bf16.mxu0 %v872_v4 }
  0x41   : > { %773 = vmatpush3.bf16.msra.mxu0 %v829_v18 }
  0x42   : > { %774 = vmatprep.subr.bf16.mxu0 %v872_v4 }
  0x45   : > { %775 = vmatpush3.bf16.msra.mxu0 %v830_v21 }
  0x48   : > { %777 = vmatmul.mubr.bf16.vlgmr.msra.gmra.mrb[0].mxu0 %v444_v22 }
 0x11a   : > { %557 = sbr.rel (%p744_p12) target bundleno = 303 (0x12f), region = 90 }
 0x11b   : > { %v543_v24 = vpop.f32.mrb[0].mxu0 }
 0x11c   : > { %v550_v26 = vadd.f32 %v543_v24, %v442_v23  ;;  %v778_v27 = vpop.f32.mrb[1].mxu0 }
 0x11d   : > { %v546_v28 = vpop.f32.mrb[2].mxu0 }
 0x11e   : > { %552 = vst [vmem:[%s1048_s6] sm:$0xff] %v550_v26  ;;  %v551_v29 = vadd.f32 %v546_v28, %v443_v25  ;;  %v779_v30 = vpop.f32.mrb[3].mxu0 }
 0x120   : > { %553 = vst [vmem:[%s1048_s6 + $0x8] sm:$0xff] %v551_v29 }
 0x125   : > { %v558_v31 = vld [vmem:[%s1048_s6] sm:$0xff] }
 0x126   : > { %v567_v34 = vmul.f32 %v745_v32, %v558_v31 }
 0x127   : > { %v559_v35 = vld [vmem:[%s1048_s6 + $0x8] sm:$0xff] }
 0x128   : > { %v568_v36 = vmul.f32 %v745_v32, %v559_v35  ;;  %v576_v37 = vadd.f32 %v746_v33, %v567_v34 }
 0x12a   : > { %v577_v38 = vadd.f32 %v746_v33, %v568_v36  ;;  %v578_v39 = vmax.f32 %v576_v37, 0.0 }
 0x12c   : > { %v579_v40 = vmax.f32 %v577_v38, 0.0  ;;  %580 = vst [vmem:[%s1048_s6] sm:$0xff] %v578_v39 }
 0x12e   : > { %581 = vst [vmem:[%s1048_s6 + $0x8] sm:$0xff] %v579_v40 }
 0x12f PF: > { %s16_s25 = sadd.s32 1, %s869_s25   ;;  %s1049_s21 = smov %s857_s22 }
 0x130   : > { %p13_p13 = scmp.ge.s32.totalorder %s16_s25, 7   ;;  %s1050_s22 = smov %s944_s29 }
 0x131   : > { %s1051_s23 = smov %s865_s24  ;;  %s1052_s24 = smov %s1054_s26 }
 0x132   :  { %15 = sbr.rel (!%p13_p13) target bundleno = 3 (0x3), region = 140 }

// kernel: densenet_forward.160
= control target key start
LH: loop header
LB: loop body
LE: loop exit
PB: predicated region body
PF: predicated region fallthrough
CT: control target
= control target key end

     0   :  { %s999_s21 = smov 0   ;;  %s1001_s22 = smov 0   ;;  %s1147_s0 = inlined_call_operand.vmem [shape: f32[16,768], index: 0, kind: input, shape index: {}]   ;;  %s1148_s1 = inlined_call_operand.vmem [shape: bf16[768,128], index: 1, kind: input, shape index: {}]   ;;  %s1149_s2 = inlined_call_operand.vmem [shape: f32[1,768], index: 2, kind: input, shape index: {}]   ;;  %s1150_s3 = inlined_call_operand.vmem [shape: f32[1,768], index: 3, kind: input, shape index: {}]   ;;  %s1151_s4 = inlined_call_operand.vmem [shape: f32[1,128], index: 4, kind: input, shape index: {}]   ;;  %s1152_s5 = inlined_call_operand.vmem [shape: f32[1,128], index: 5, kind: input, shape index: {}]   ;;  %s1153_s6 = inlined_call_operand.vmem [shape: f32[16,128], index: 6, kind: output, shape index: {}]  }
   0x1   :  { %s1003_s23 = smov 0   ;;  %s1005_s24 = smov 0  }
   0x2   :  { %s1007_s25 = smov 0  }
   0x3 LB: > { %s28_s26 = sadd.s32 1, %s957_s24  ;;  %p51_p1 = scmp.ne.s32.totalorder %s949_s22, %s945_s21  ;;  %s961_s25 = sphi %s1007_s25, %s16_s25   ;;  %s957_s24 = sphi %s1005_s24, %s1157_s24   ;;  %s953_s23 = sphi %s1003_s23, %s1156_s23   ;;  %s949_s22 = sphi %s1001_s22, %s1155_s22   ;;  %s945_s21 = sphi %s999_s21, %s1154_s21  }
   0x4   : > { %p29_p0 = scmp.ge.s32.totalorder %s28_s26, 3  ;;  %p52_p2 = scmp.eq.s32.totalorder %s961_s25, 0 }
   0x5   : > { %s44_s28 = sadd.s32 1, %s949_s22  ;;  %p809_p5 = scmp.ge.s32.totalorder %s961_s25, 3 }
   0x6   : > { %s1159_s26 = smov (%p29_p0, %s28_s26), 0  ;;  %p53_p3 = por %p52_p2, %p51_p1 }
   0x7   : > { %s40_s27 = ssub.s32 %s957_s24, %s1159_s26  ;;  %249 = sbr.rel (%p809_p5) target bundleno = 21 (0x15), region = 24 }
   0x8   : > { %p42_p4 = scmp.eq.s32.totalorder %s40_s27, 0 }
   0xa   : > { %s1034_s29 = scalar_select %p42_p4, %s949_s22, %s44_s28  }
   0xe   : > { %252 = sbr.rel (!%p53_p3) target bundleno = 21 (0x15), region = 28  ;;  %s254_s30 = sand.u32 (%p53_p3), 1, %s949_s22  }
   0xf   : > { %s843_s7 = sshll.u32 (%p53_p3), %s957_s24, 4  ;;  %s810_s8 = sshll.u32 (%p53_p3), %s254_s30, 5 }
  0x10   : > { %s262_s11 = scalar_lea.vmem (%p53_p3), %s1147_s0, %s843_s7  ;;  %s256_s12 = scalar_lea.vmem (%p53_p3), [#allocation2], %s810_s8 }
  0x11   : > { %v275_v0 = vld [vmem:[%s262_s11] sm:$0xff] (%p53_p3)  ;;  %v277_v1 = vld [vmem:[%s262_s11 + $0x8] sm:$0xff] (%p53_p3)  ;;  %v279_v2 = vld [vmem:[%s262_s11 + $0x30] sm:$0xff] (%p53_p3) }
  0x12   : > { %276 = vst [vmem:[%s256_s12] sm:$0xff] (%p53_p3), %v275_v0  ;;  %278 = vst [vmem:[%s256_s12 + $0x8] sm:$0xff] (%p53_p3), %v277_v1  ;;  %v281_v3 = vld [vmem:[%s262_s11 + $0x38] sm:$0xff] (%p53_p3) }
  0x13   : > { %280 = vst [vmem:[%s256_s12 + $0x10] sm:$0xff] (%p53_p3), %v279_v2  ;;  %282 = vst [vmem:[%s256_s12 + $0x18] sm:$0xff] (%p53_p3), %v281_v3 }
  0x15 PF: > { %p813_p6 = scmp.ge.s32.totalorder %s961_s25, 1  ;;  %p315_p7 = scmp.lt.s32.totalorder %s961_s25, 4 }
  0x17   : > { %p316_p8 = pnand %p813_p6, %p315_p7 }
  0x18   : > { %s322_s13 = sand.u32 (!%p316_p8), 1, %s945_s21   ;;  %s815_s14 = sshll.u32 (!%p316_p8), %s953_s23, 5 }
  0x19   : > { %319 = sbr.rel (%p316_p8) target bundleno = 309 (0x135), region = 63  ;;  %s814_s15 = sshll.u32 (!%p316_p8), %s322_s13, 5 }
  0x1a   : > { %p379_p9 = scmp.lt.s32.totalorder (!%p316_p8), %s815_s14, 95  ;;  %s817_s16 = sshll.u32 (!%p316_p8), %s953_s23, 1 }
  0x1b   : > { %p388_p10 = scmp.lt.s32.totalorder (!%p316_p8), %s817_s16, 5  ;;  %s1062_s9 = scalar_lea.vmem (!%p316_p8), [#allocation2], %s814_s15 }
  0x1c   : > { %p819_p11 = scmp.ne.s32.totalorder (!%p316_p8), %s953_s23, 0 }
  0x20   : > { %s1161_s14 = smov (!%p379_p9, %s815_s14), 95  ;;  %s1163_s16 = smov (!%p388_p10, %s817_s16), 5 }
  0x21   : > { %s816_s17 = sshll.u32 %s1161_s14, 2  ;;  %s390_s21 = scalar_lea.vmem %s1149_s2, %s1163_s16  ;;  %v963_v4 = vmov (!%p819_p11), 0.0  }
  0x22   : > { %s1050_s20 = scalar_lea.vmem %s1148_s1, %s816_s17  ;;  %s395_s8 = scalar_lea.vmem %s1150_s3, %s1163_s16  ;;  %417 = vst [vmem:[%s1153_s6] sm:$0xff] (!%p819_p11), %v963_v4  ;;  %418 = vst [vmem:[%s1153_s6 + $0x8] sm:$0xff] (!%p819_p11), %v963_v4 }
  0x23   : > { %416 = sbr.rel (%p819_p11) target bundleno = 42 (0x2a), region = 71 }
  0x2a PF: > { %v907_v5 = vld [vmem:[%s1050_s20 + $0x40] sm:$0xff]   ;;  %v909_v7 = vld [vmem:[%s1050_s20 + $0x48] sm:$0xff]   ;;  %v911_v9 = vld [vmem:[%s1050_s20 + $0x50] sm:$0xff]   ;;  %v425_v10 = vlaneseq  ;;  %p836_p12 = scmp.ne.s32.totalorder %s953_s23, 2 }
  0x2b   : > { %v908_v6 = vld [vmem:[%s1050_s20] sm:$0xff]   ;;  %844 = vmatprep.subr.bf16.mxu0 %v907_v5  ;;  %v910_v8 = vld [vmem:[%s1050_s20 + $0x8] sm:$0xff]   ;;  %v912_v11 = vld [vmem:[%s1050_s20 + $0x10] sm:$0xff]  }
  0x2c   : > { %845 = vmatpush3.bf16.msra.mxu0 %v908_v6  ;;  %v913_v12 = vld [vmem:[%s1050_s20 + $0x58] sm:$0xff]   ;;  %v426_v13 = vshrl.u32 %v425_v10, 7  ;;  %v915_v15 = vld [vmem:[%s1050_s20 + $0x60] sm:$0xff]   ;;  %v917_v19 = vld [vmem:[%s1050_s20 + $0x68] sm:$0xff]  }
  0x2d   : > { %846 = vmatprep.subr.bf16.mxu0 %v909_v7  ;;  %v914_v14 = vld [vmem:[%s1050_s20 + $0x18] sm:$0xff]   ;;  %v916_v18 = vld [vmem:[%s1050_s20 + $0x20] sm:$0xff]   ;;  %v420_v20 = vld [vmem:[%s1062_s9 + $0x8] sm:$0xff] }
  0x2e   : > { %v427_v16 = vsub.s32 0, %v426_v13  ;;  %v431_v17 = vsub.s32 1, %v426_v13  ;;  %v422_v21 = vld [vmem:[%s1062_s9 + $0x18] sm:$0xff]  ;;  %v423_v22 = vld [vmem:[%s390_s21] sm:$0x3]  ;;  %v421_v27 = vld [vmem:[%s1062_s9 + $0x10] sm:$0xff] }
  0x2f   : > { %v439_v25 = vld [vmem:[%s395_s8] sm:$0x3]  ;;  %v918_v30 = vld [vmem:[%s1050_s20 + $0x28] sm:$0xff]   ;;  %v919_v35 = vld [vmem:[%s1050_s20 + $0x70] sm:$0xff]  }
  0x30   : > { %847 = vmatpush3.bf16.msra.mxu0 %v910_v8  ;;  %v428_v23 = vrot.slane %v423_v22, %v427_v16  ;;  %v432_v24 = vrot.slane %v423_v22, %v431_v17  ;;  %v419_v26 = vld [vmem:[%s1062_s9] sm:$0xff]  ;;  %v444_v28 = vrot.slane %v439_v25, %v427_v16  ;;  %v448_v29 = vrot.slane %v439_v25, %v431_v17  ;;  %v920_v40 = vld [vmem:[%s1050_s20 + $0x30] sm:$0xff]   ;;  %v921_v43 = vld [vmem:[%s1050_s20 + $0x78] sm:$0xff]  }
  0x31   : > { %848 = vmatprep.subr.bf16.mxu0 %v911_v9  ;;  %v922_v47 = vld [vmem:[%s1050_s20 + $0x38] sm:$0xff]   ;;  %v459_v50 = vld [vmem:[%s1153_s6] sm:$0xff]  ;;  %v460_v54 = vld [vmem:[%s1153_s6 + $0x8] sm:$0xff] }
  0x32   : > { %v436_v31 = vmul.f32 %v432_v24, %v420_v20  ;;  %v438_v32 = vmul.f32 %v432_v24, %v422_v21  ;;  %v435_v33 = vmul.f32 %v428_v23, %v419_v26  ;;  %v437_v34 = vmul.f32 %v428_v23, %v421_v27  ;;  %v837_v60 = vld [vmem:[%s1151_s4] ss:$0 sm:$0xff] (!%p836_p12) }
  0x33   : > { %v838_v61 = vld [vmem:[%s1152_s5] ss:$0 sm:$0xff] (!%p836_p12) }
  0x34   : > { %849 = vmatpush3.bf16.msra.mxu0 %v912_v11  ;;  %v452_v36 = vadd.f32 %v448_v29, %v436_v31  ;;  %v454_v37 = vadd.f32 %v448_v29, %v438_v32  ;;  %v451_v38 = vadd.f32 %v444_v28, %v435_v33  ;;  %v453_v39 = vadd.f32 %v444_v28, %v437_v34 }
  0x35   : > { %850 = vmatprep.subr.bf16.mxu0 %v913_v12 }
  0x36   : > { %v456_v41 = vmax.f32 %v452_v36, 0.0  ;;  %v458_v42 = vmax.f32 %v454_v37, 0.0  ;;  %v455_v45 = vmax.f32 %v451_v38, 0.0  ;;  %v457_v46 = vmax.f32 %v453_v39, 0.0 }
  0x38   : > { %851 = vmatpush3.bf16.msra.mxu0 %v914_v14  ;;  %v462_v44 = vpack.c.bf16 %v458_v42, %v456_v41  ;;  %v461_v48 = vpack.c.bf16 %v457_v46, %v455_v45 }
  0x39   : > { %852 = vmatprep.subr.bf16.mxu0 %v915_v15 }
  0x3a   : > { %623 = vmatprep.mubr.bf16.mxu0 %v462_v44 }
  0x3c   : > { %853 = vmatpush3.bf16.msra.mxu0 %v916_v18 }
  0x3d   : > { %854 = vmatprep.subr.bf16.mxu0 %v917_v19 }
  0x40   : > { %855 = vmatpush3.bf16.msra.mxu0 %v918_v30 }
  0x41   : > { %856 = vmatprep.subr.bf16.mxu0 %v919_v35 }
  0x44   : > { %857 = vmatpush3.bf16.msra.mxu0 %v920_v40 }
  0x45   : > { %858 = vmatprep.subr.bf16.mxu0 %v921_v43 }
  0x48   : > { %859 = vmatpush3.bf16.msra.mxu0 %v922_v47 }
  0x4b   : > { %624 = vmatmul.mubr.bf16.vlgmr.msra.gmra.mrb[0].mxu0 %v461_v48 }
 0x11e   : > { %v860_v49 = vpop.f32.mrb[0].mxu0 }
 0x11f   : > { %v861_v51 = vpop.f32.mrb[1].mxu0 }
 0x120   : > { %v862_v52 = vadd.f32 %v861_v51, %v860_v49  ;;  %v863_v53 = vpop.f32.mrb[2].mxu0  ;;  %639 = sbr.rel (%p836_p12) target bundleno = 309 (0x135), region = 75 }
 0x121   : > { %v864_v55 = vpop.f32.mrb[3].mxu0 }
 0x122   : > { %v632_v56 = vadd.f32 %v862_v52, %v459_v50  ;;  %v865_v57 = vadd.f32 %v864_v55, %v863_v53 }
 0x124   : > { %634 = vst [vmem:[%s1153_s6] sm:$0xff] %v632_v56  ;;  %v633_v58 = vadd.f32 %v865_v57, %v460_v54 }
 0x126   : > { %635 = vst [vmem:[%s1153_s6 + $0x8] sm:$0xff] %v633_v58 }
 0x12b   : > { %v640_v59 = vld [vmem:[%s1153_s6] sm:$0xff] }
 0x12c   : > { %v649_v62 = vmul.f32 %v837_v60, %v640_v59 }
 0x12d   : > { %v641_v63 = vld [vmem:[%s1153_s6 + $0x8] sm:$0xff] }
 0x12e   : > { %v650_v0 = vmul.f32 %v837_v60, %v641_v63  ;;  %v658_v1 = vadd.f32 %v838_v61, %v649_v62 }
 0x130   : > { %v659_v2 = vadd.f32 %v838_v61, %v650_v0  ;;  %v660_v3 = vmax.f32 %v658_v1, 0.0 }
 0x132   : > { %v661_v4 = vmax.f32 %v659_v2, 0.0  ;;  %662 = vst [vmem:[%s1153_s6] sm:$0xff] %v660_v3 }
 0x134   : > { %663 = vst [vmem:[%s1153_s6 + $0x8] sm:$0xff] %v661_v4 }
 0x135 PF: > { %s16_s25 = sadd.s32 1, %s961_s25   ;;  %s1154_s21 = smov %s949_s22 }
 0x136   : > { %p13_p13 = scmp.ge.s32.totalorder %s16_s25, 5   ;;  %s1155_s22 = smov %s1034_s29 }
 0x137   : > { %s1156_s23 = smov %s957_s24  ;;  %s1157_s24 = smov %s1159_s26 }
 0x138   :  { %15 = sbr.rel (!%p13_p13) target bundleno = 3 (0x3), region = 125 }

// kernel: densenet_forward.168
= control target key start
LH: loop header
LB: loop body
LE: loop exit
PB: predicated region body
PF: predicated region fallthrough
CT: control target
= control target key end

     0   :  { %s909_s21 = smov 0   ;;  %s911_s22 = smov 0   ;;  %s1042_s0 = inlined_call_operand.vmem [shape: f32[16,896], index: 0, kind: input, shape index: {}]   ;;  %s1043_s1 = inlined_call_operand.vmem [shape: bf16[896,128], index: 1, kind: input, shape index: {}]   ;;  %s1044_s2 = inlined_call_operand.vmem [shape: f32[1,896], index: 2, kind: input, shape index: {}]   ;;  %s1045_s3 = inlined_call_operand.vmem [shape: f32[1,896], index: 3, kind: input, shape index: {}]   ;;  %s1046_s4 = inlined_call_operand.vmem [shape: f32[1,128], index: 4, kind: input, shape index: {}]   ;;  %s1047_s5 = inlined_call_operand.vmem [shape: f32[1,128], index: 5, kind: input, shape index: {}]   ;;  %s1048_s6 = inlined_call_operand.vmem [shape: f32[16,128], index: 6, kind: output, shape index: {}]  }
   0x1   :  { %s913_s23 = smov 0   ;;  %s915_s24 = smov 0  }
   0x2   :  { %s917_s25 = smov 0  }
   0x3 LB: > { %s28_s26 = sadd.s32 1, %s865_s24  ;;  %p51_p1 = scmp.ne.s32.totalorder %s857_s22, %s853_s21  ;;  %s869_s25 = sphi %s917_s25, %s16_s25   ;;  %s865_s24 = sphi %s915_s24, %s1052_s24   ;;  %s861_s23 = sphi %s913_s23, %s1051_s23   ;;  %s857_s22 = sphi %s911_s22, %s1050_s22   ;;  %s853_s21 = sphi %s909_s21, %s1049_s21  }
   0x4   : > { %p29_p0 = scmp.ge.s32.totalorder %s28_s26, 7  ;;  %p52_p2 = scmp.eq.s32.totalorder %s869_s25, 0 }
   0x5   : > { %s44_s28 = sadd.s32 1, %s857_s22  ;;  %p726_p5 = scmp.ge.s32.totalorder %s869_s25, 7 }
   0x6   : > { %s1054_s26 = smov (%p29_p0, %s28_s26), 0  ;;  %p53_p3 = por %p52_p2, %p51_p1 }
   0x7   : > { %s40_s27 = ssub.s32 %s865_s24, %s1054_s26  ;;  %249 = sbr.rel (%p726_p5) target bundleno = 21 (0x15), region = 24 }
   0x8   : > { %p42_p4 = scmp.eq.s32.totalorder %s40_s27, 0 }
   0xa   : > { %s944_s29 = scalar_select %p42_p4, %s857_s22, %s44_s28  }
   0xe   : > { %252 = sbr.rel (!%p53_p3) target bundleno = 21 (0x15), region = 28  ;;  %s254_s30 = sand.u32 (%p53_p3), 1, %s857_s22  }
   0xf   : > { %s728_s7 = sshll.u32 (%p53_p3), %s865_s24, 3  ;;  %s727_s8 = sshll.u32 (%p53_p3), %s254_s30, 4 }
  0x10   : > { %s261_s11 = scalar_lea.vmem (%p53_p3), %s1042_s0, %s728_s7  ;;  %s256_s12 = scalar_lea.vmem (%p53_p3), [#allocation2], %s727_s8 }
  0x11   : > { %v291_v0 = vld [vmem:[%s261_s11] sm:$0xff] (%p53_p3)  ;;  %v293_v1 = vld [vmem:[%s261_s11 + $0x38] sm:$0xff] (%p53_p3) }
  0x12   : > { %292 = vst [vmem:[%s256_s12] sm:$0xff] (%p53_p3), %v291_v0  ;;  %294 = vst [vmem:[%s256_s12 + $0x8] sm:$0xff] (%p53_p3), %v293_v1 }
  0x15 PF: > { %p729_p6 = scmp.ge.s32.totalorder %s869_s25, 1  ;;  %p323_p7 = scmp.lt.s32.totalorder %s869_s25, 8 }
  0x17   : > { %p324_p8 = pnand %p729_p6, %p323_p7 }
  0x18   : > { %s330_s13 = sand.u32 (!%p324_p8), 1, %s853_s21   ;;  %s731_s14 = sshll.u32 (!%p324_p8), %s861_s23, 4 }
  0x19   : > { %327 = sbr.rel (%p324_p8) target bundleno = 303 (0x12f), region = 78  ;;  %s956_s15 = sshll.u32 (!%p324_p8), %s330_s13, 4 }
  0x1a   : > { %p384_p9 = scmp.lt.s32.totalorder (!%p324_p8), %s731_s14, 111  ;;  %p392_p10 = scmp.lt.s32.totalorder (!%p324_p8), %s861_s23, 6 }
  0x1b   : > { %s332_s9 = scalar_lea.vmem (!%p324_p8), [#allocation2], %s956_s15  ;;  %p733_p11 = scmp.ne.s32.totalorder (!%p324_p8), %s861_s23, 0 }
  0x20   : > { %s1056_s14 = smov (!%p384_p9, %s731_s14), 111  ;;  %417 = sbr.rel (%p733_p11) target bundleno = 39 (0x27), region = 86 }
  0x21   : > { %s960_s16 = scalar_select %p392_p10, %s861_s23, 6 }
  0x22   : > { %s732_s17 = sshll.u32 %s1056_s14, 2  ;;  %v871_v2 = vmov (!%p733_p11), 0.0  }
  0x23   : > { %s965_s20 = scalar_lea.vmem %s1043_s1, %s732_s17  ;;  %s394_s21 = scalar_lea.vmem %s1044_s2, %s960_s16  ;;  %418 = vst [vmem:[%s1048_s6] sm:$0xff] (!%p733_p11), %v871_v2  ;;  %419 = vst [vmem:[%s1048_s6 + $0x8] sm:$0xff] (!%p733_p11), %v871_v2 }
  0x24   : > { %s397_s8 = scalar_lea.vmem %s1045_s3, %s960_s16 }
  0x27 PF: > { %v823_v3 = vld [vmem:[%s965_s20] sm:$0xff]   ;;  %v872_v4 = vmov 0.0   ;;  %v824_v5 = vld [vmem:[%s965_s20 + $0x8] sm:$0xff]   ;;  %vm873_vm0 = vmmov 0   ;;  %v825_v6 = vld [vmem:[%s965_s20 + $0x10] sm:$0xff]   ;;  %p744_p12 = scmp.ne.s32.totalorder %s861_s23, 6 }
  0x28   : > { %760 = vmatprep.subr.bf16.mxu0 %v872_v4  ;;  %776 = vmatprep.mubr.msk.bf16.mxu0 %vm873_vm0, %v872_v4  ;;  %v826_v7 = vld [vmem:[%s965_s20 + $0x18] sm:$0xff]   ;;  %v827_v8 = vld [vmem:[%s965_s20 + $0x20] sm:$0xff]   ;;  %v828_v14 = vld [vmem:[%s965_s20 + $0x28] sm:$0xff]  }
  0x29   : > { %761 = vmatpush3.bf16.msra.mxu0 %v823_v3  ;;  %v420_v9 = vld [vmem:[%s332_s9] sm:$0xff]  ;;  %v421_v10 = vld [vmem:[%s332_s9 + $0x8] sm:$0xff] }
  0x2a   : > { %762 = vmatprep.subr.bf16.mxu0 %v872_v4  ;;  %v734_v11 = vld [vmem:[%s394_s21] ss:$0 sm:$0xff]  ;;  %v829_v18 = vld [vmem:[%s965_s20 + $0x30] sm:$0xff]   ;;  %v830_v21 = vld [vmem:[%s965_s20 + $0x38] sm:$0xff]  }
  0x2b   : > { %v429_v12 = vmul.f32 %v734_v11, %v420_v9  ;;  %v430_v13 = vmul.f32 %v734_v11, %v421_v10  ;;  %v735_v15 = vld [vmem:[%s397_s8] ss:$0 sm:$0xff]  ;;  %v443_v25 = vld [vmem:[%s1048_s6 + $0x8] sm:$0xff] }
  0x2c   : > { %v442_v23 = vld [vmem:[%s1048_s6] sm:$0xff] }
  0x2d   : > { %763 = vmatpush3.bf16.msra.mxu0 %v824_v5  ;;  %v438_v16 = vadd.f32 %v735_v15, %v429_v12  ;;  %v439_v17 = vadd.f32 %v735_v15, %v430_v13  ;;  %v745_v32 = vld [vmem:[%s1046_s4] ss:$0 sm:$0xff] (!%p744_p12) }
  0x2e   : > { %764 = vmatprep.subr.bf16.mxu0 %v872_v4  ;;  %v746_v33 = vld [vmem:[%s1047_s5] ss:$0 sm:$0xff] (!%p744_p12) }
  0x2f   : > { %v440_v19 = vmax.f32 %v438_v16, 0.0  ;;  %v441_v20 = vmax.f32 %v439_v17, 0.0 }
  0x31   : > { %765 = vmatpush3.bf16.msra.mxu0 %v825_v6  ;;  %v444_v22 = vpack.c.bf16 %v441_v20, %v440_v19 }
  0x32   : > { %766 = vmatprep.subr.bf16.mxu0 %v872_v4 }
  0x35   : > { %767 = vmatpush3.bf16.msra.mxu0 %v826_v7 }
  0x36   : > { %768 = vmatprep.subr.bf16.mxu0 %v872_v4 }
  0x39   : > { %769 = vmatpush3.bf16.msra.mxu0 %v827_v8 }
  0x3a   : > { %770 = vmatprep.subr.bf16.mxu0 %v872_v4 }
  0x3d   : > { %771 = vmatpush3.bf16.msra.mxu0 %v828_v14 }
  0x3e   : > { %772 = vmatprep.subr.bf16.mxu0 %v872_v4 }
  0x41   : > { %773 = vmatpush3.bf16.msra.mxu0 %v829_v18 }
  0x42   : > { %774 = vmatprep.subr.bf16.mxu0 %v872_v4 }
  0x45   : > { %775 = vmatpush3.bf16.msra.mxu0 %v830_v21 }
  0x48   : > { %777 = vmatmul.mubr.bf16.vlgmr.msra.gmra.mrb[0].mxu0 %v444_v22 }
 0x11a   : > { %557 = sbr.rel (%p744_p12) target bundleno = 303 (0x12f), region = 90 }
 0x11b   : > { %v543_v24 = vpop.f32.mrb[0].mxu0 }
 0x11c   : > { %v550_v26 = vadd.f32 %v543_v24, %v442_v23  ;;  %v778_v27 = vpop.f32.mrb[1].mxu0 }
 0x11d   : > { %v546_v28 = vpop.f32.mrb[2].mxu0 }
 0x11e   : > { %552 = vst [vmem:[%s1048_s6] sm:$0xff] %v550_v26  ;;  %v551_v29 = vadd.f32 %v546_v28, %v443_v25  ;;  %v779_v30 = vpop.f32.mrb[3].mxu0 }
 0x120   : > { %553 = vst [vmem:[%s1048_s6 + $0x8] sm:$0xff] %v551_v29 }
 0x125   : > { %v558_v31 = vld [vmem:[%s1048_s6] sm:$0xff] }
 0x126   : > { %v567_v34 = vmul.f32 %v745_v32, %v558_v31 }
 0x127   : > { %v559_v35 = vld [vmem:[%s1048_s6 + $0x8] sm:$0xff] }
 0x128   : > { %v568_v36 = vmul.f32 %v745_v32, %v559_v35  ;;  %v576_v37 = vadd.f32 %v746_v33, %v567_v34 }
 0x12a   : > { %v577_v38 = vadd.f32 %v746_v33, %v568_v36  ;;  %v578_v39 = vmax.f32 %v576_v37, 0.0 }
 0x12c   : > { %v579_v40 = vmax.f32 %v577_v38, 0.0  ;;  %580 = vst [vmem:[%s1048_s6] sm:$0xff] %v578_v39 }
 0x12e   : > { %581 = vst [vmem:[%s1048_s6 + $0x8] sm:$0xff] %v579_v40 }
 0x12f PF: > { %s16_s25 = sadd.s32 1, %s869_s25   ;;  %s1049_s21 = smov %s857_s22 }
 0x130   : > { %p13_p13 = scmp.ge.s32.totalorder %s16_s25, 9   ;;  %s1050_s22 = smov %s944_s29 }
 0x131   : > { %s1051_s23 = smov %s865_s24  ;;  %s1052_s24 = smov %s1054_s26 }
 0x132   :  { %15 = sbr.rel (!%p13_p13) target bundleno = 3 (0x3), region = 140 }

// kernel: densenet_forward.182
= control target key start
LH: loop header
LB: loop body
LE: loop exit
PB: predicated region body
PF: predicated region fallthrough
CT: control target
= control target key end

     0   :  { %v24_v0 = vlaneseq  ;;  %v397_v1 = vmov 1983009808   ;;  %vm154_vm0 = vcmask 1043456   ;;  %vm373_vm1 = vcmask 1041409   ;;  %s518_s1 = inlined_call_operand.vmem [shape: f32[1,1,1024], index: 1, kind: input, shape index: {}]   ;;  %s519_s2 = inlined_call_operand.vmem [shape: f32[1,1,1024], index: 2, kind: input, shape index: {}]   ;;  %s520_s0 = inlined_call_operand.vmem [shape: f32[2,4,1024], index: 0, kind: input, shape index: {}]   ;;  %s521_s3 = inlined_call_operand.vmem [shape: f32[2,1024], index: 3, kind: output, shape index: {}]  }
   0x1   :  { %v303_v2 = vunpack.c.l.s4 %v397_v1  ;;  %v22_v4 = vld [vmem:[%s518_s1] sm:$0xff]  ;;  %v15_v16 = vld [vmem:[%s520_s0 + $0x8] sm:$0xff]  ;;  %v16_v21 = vld [vmem:[%s520_s0 + $0x10] sm:$0xff]  ;;  %vm375_vm2 = vcmask 1043459   ;;  %vm377_vm3 = vcmask 1045509   ;;  %vm379_vm4 = vcmask 1047559  }
   0x2   :  { %v25_v3 = vshrl.u32 %v24_v0, 7  ;;  %v72_v14 = vld [vmem:[%s519_s2] sm:$0xff]  ;;  %v19_v23 = vld [vmem:[%s520_s0 + $0x28] sm:$0xff]  ;;  %v17_v28 = vld [vmem:[%s520_s0 + $0x18] sm:$0xff] }
   0x3   :  { %v304_v5 = vunpack.c.0.s8 %v303_v2  ;;  %v14_v15 = vld [vmem:[%s520_s0] sm:$0xff]  ;;  %v20_v29 = vld [vmem:[%s520_s0 + $0x30] sm:$0xff]  ;;  %v21_v30 = vld [vmem:[%s520_s0 + $0x38] sm:$0xff] }
   0x4   :  { %v26_v6 = vsub.s32 0, %v25_v3  ;;  %v30_v7 = vsub.s32 1, %v25_v3  ;;  %v34_v8 = vsub.s32 2, %v25_v3  ;;  %v38_v9 = vsub.s32 3, %v25_v3  ;;  %v18_v22 = vld [vmem:[%s520_s0 + $0x20] sm:$0xff] }
   0x5   :  { %v42_v10 = vsub.s32 4, %v25_v3  ;;  %v46_v11 = vsub.s32 5, %v25_v3  ;;  %v50_v12 = vsub.s32 6, %v25_v3  ;;  %v54_v13 = vsub.s32 7, %v25_v3 }
   0x6   :  { %v27_v17 = vrot.slane %v22_v4, %v26_v6  ;;  %v31_v18 = vrot.slane %v22_v4, %v30_v7  ;;  %v35_v19 = vrot.slane %v22_v4, %v34_v8  ;;  %v39_v20 = vrot.slane %v22_v4, %v38_v9 }
   0x7   :  { %v43_v24 = vrot.slane %v22_v4, %v42_v10  ;;  %v47_v25 = vrot.slane %v22_v4, %v46_v11  ;;  %v51_v26 = vrot.slane %v22_v4, %v50_v12  ;;  %v55_v27 = vrot.slane %v22_v4, %v54_v13 }
   0x8   :  { %v56_v31 = vcombine.low %v27_v17, %v31_v18  ;;  %v57_v32 = vcombine.low %v35_v19, %v39_v20  ;;  %v77_v33 = vrot.slane %v72_v14, %v26_v6  ;;  %v81_v34 = vrot.slane %v72_v14, %v30_v7 }
   0x9   :  { %v58_v35 = vcombine.low %v43_v24, %v47_v25  ;;  %v59_v36 = vcombine.low %v51_v26, %v55_v27  ;;  %v85_v37 = vrot.slane %v72_v14, %v34_v8  ;;  %v89_v38 = vrot.slane %v72_v14, %v38_v9 }
   0xa   :  { %v64_v39 = vmul.f32 %v56_v31, %v14_v15  ;;  %v65_v40 = vmul.f32 %v57_v32, %v15_v16  ;;  %v68_v41 = vmul.f32 %v56_v31, %v18_v22  ;;  %v69_v42 = vmul.f32 %v57_v32, %v19_v23 }
   0xb   :  { %v66_v43 = vmul.f32 %v58_v35, %v16_v21  ;;  %v67_v44 = vmul.f32 %v59_v36, %v17_v28  ;;  %v70_v45 = vmul.f32 %v58_v35, %v20_v29  ;;  %v71_v46 = vmul.f32 %v59_v36, %v21_v30 }
   0xc   :  { %v93_v47 = vrot.slane %v72_v14, %v42_v10  ;;  %v97_v48 = vrot.slane %v72_v14, %v46_v11  ;;  %v101_v49 = vrot.slane %v72_v14, %v50_v12  ;;  %v105_v50 = vrot.slane %v72_v14, %v54_v13 }
   0xd   :  { %v106_v51 = vcombine.low %v77_v33, %v81_v34  ;;  %v107_v52 = vcombine.low %v85_v37, %v89_v38  ;;  %v448_v55 = vsub.s32 %v304_v5, %v25_v3 }
   0xe   :  { %v108_v53 = vcombine.low %v93_v47, %v97_v48  ;;  %v109_v54 = vcombine.low %v101_v49, %v105_v50 }
   0xf   :  { %v114_v56 = vadd.f32 %v106_v51, %v64_v39  ;;  %v115_v57 = vadd.f32 %v107_v52, %v65_v40  ;;  %v118_v58 = vadd.f32 %v106_v51, %v68_v41  ;;  %v119_v59 = vadd.f32 %v107_v52, %v69_v42 }
  0x10   :  { %v116_v60 = vadd.f32 %v108_v53, %v66_v43  ;;  %v117_v61 = vadd.f32 %v109_v54, %v67_v44  ;;  %v120_v62 = vadd.f32 %v108_v53, %v70_v45  ;;  %v121_v63 = vadd.f32 %v109_v54, %v71_v46 }
  0x11   :  { %v122_v0 = vmax.f32 %v114_v56, 0.0  ;;  %v123_v1 = vmax.f32 %v115_v57, 0.0  ;;  %v450_v2 = vmax.f32 %v118_v58, 0.0  ;;  %v452_v4 = vmax.f32 %v119_v59, 0.0 }
  0x12   :  { %v124_v6 = vmax.f32 %v116_v60, 0.0  ;;  %v125_v7 = vmax.f32 %v117_v61, 0.0  ;;  %v454_v8 = vmax.f32 %v120_v62, 0.0  ;;  %v456_v3 = vmax.f32 %v121_v63, 0.0 }
  0x13   :  { %v138_v5 = vcombine.high %v122_v0, %v122_v0  ;;  %v139_v9 = vcombine.high %v123_v1, %v123_v1  ;;  %v142_v10 = vcombine.high %v450_v2, %v450_v2  ;;  %v143_v11 = vcombine.high %v452_v4, %v452_v4 }
  0x14   :  { %v140_v12 = vcombine.high %v124_v6, %v124_v6  ;;  %v141_v13 = vcombine.high %v125_v7, %v125_v7  ;;  %v144_v14 = vcombine.high %v454_v8, %v454_v8  ;;  %v145_v15 = vcombine.high %v456_v3, %v456_v3 }
  0x15   :  { %v155_v16 = vsel %vm154_vm0, %v122_v0, 0.0  ;;  %v162_v17 = vsel %vm154_vm0, %v138_v5, 0.0  ;;  %v169_v18 = vsel %vm154_vm0, %v123_v1, 0.0  ;;  %v176_v19 = vsel %vm154_vm0, %v139_v9, 0.0 }
  0x16   :  { %v156_v20 = vrot.slane %v155_v16, 4  ;;  %v163_v21 = vrot.slane %v162_v17, 4  ;;  %v170_v22 = vrot.slane %v169_v18, 4  ;;  %v177_v23 = vrot.slane %v176_v19, 4 }
  0x17   :  { %v183_v24 = vsel %vm154_vm0, %v124_v6, 0.0  ;;  %v190_v25 = vsel %vm154_vm0, %v140_v12, 0.0  ;;  %v197_v26 = vsel %vm154_vm0, %v125_v7, 0.0  ;;  %v204_v27 = vsel %vm154_vm0, %v141_v13, 0.0 }
  0x18   :  { %v157_v28 = vadd.f32 %v156_v20, %v155_v16  ;;  %v164_v29 = vadd.f32 %v163_v21, %v162_v17  ;;  %v171_v30 = vadd.f32 %v170_v22, %v169_v18  ;;  %v178_v31 = vadd.f32 %v177_v23, %v176_v19 }
  0x19   :  { %v184_v32 = vrot.slane %v183_v24, 4  ;;  %v191_v33 = vrot.slane %v190_v25, 4  ;;  %v198_v34 = vrot.slane %v197_v26, 4  ;;  %v205_v35 = vrot.slane %v204_v27, 4 }
  0x1a   :  { %v158_v36 = vrot.slane %v157_v28, 2  ;;  %v165_v37 = vrot.slane %v164_v29, 2  ;;  %v172_v38 = vrot.slane %v171_v30, 2  ;;  %v179_v39 = vrot.slane %v178_v31, 2 }
  0x1b   :  { %v185_v40 = vadd.f32 %v184_v32, %v183_v24  ;;  %v192_v41 = vadd.f32 %v191_v33, %v190_v25  ;;  %v199_v42 = vadd.f32 %v198_v34, %v197_v26  ;;  %v206_v43 = vadd.f32 %v205_v35, %v204_v27 }
  0x1c   :  { %v159_v44 = vadd.f32 %v158_v36, %v157_v28  ;;  %v166_v45 = vadd.f32 %v165_v37, %v164_v29  ;;  %v173_v46 = vadd.f32 %v172_v38, %v171_v30  ;;  %v180_v47 = vadd.f32 %v179_v39, %v178_v31 }
  0x1d   :  { %v186_v48 = vrot.slane %v185_v40, 2  ;;  %v193_v49 = vrot.slane %v192_v41, 2  ;;  %v200_v50 = vrot.slane %v199_v42, 2  ;;  %v207_v51 = vrot.slane %v206_v43, 2 }
  0x1e   :  { %v160_v52 = vrot.slane %v159_v44, 1  ;;  %v167_v53 = vrot.slane %v166_v45, 1  ;;  %v174_v54 = vrot.slane %v173_v46, 1  ;;  %v181_v56 = vrot.slane %v180_v47, 1 }
  0x1f   :  { %v187_v57 = vadd.f32 %v186_v48, %v185_v40  ;;  %v194_v58 = vadd.f32 %v193_v49, %v192_v41  ;;  %v201_v59 = vadd.f32 %v200_v50, %v199_v42  ;;  %v208_v60 = vadd.f32 %v207_v51, %v206_v43 }
  0x20   :  { %v474_v61 = vadd.f32 %v160_v52, %v159_v44  ;;  %v476_v62 = vadd.f32 %v167_v53, %v166_v45  ;;  %v478_v63 = vadd.f32 %v174_v54, %v173_v46  ;;  %v480_v0 = vadd.f32 %v181_v56, %v180_v47 }
  0x21   :  { %v188_v1 = vrot.slane %v187_v57, 1  ;;  %v195_v6 = vrot.slane %v194_v58, 1  ;;  %v202_v7 = vrot.slane %v201_v59, 1  ;;  %v209_v5 = vrot.slane %v208_v60, 1 }
  0x22   :  { %v211_v9 = vsel %vm154_vm0, %v450_v2, 0.0  ;;  %v218_v12 = vsel %vm154_vm0, %v142_v10, 0.0  ;;  %v225_v13 = vsel %vm154_vm0, %v452_v4, 0.0  ;;  %v232_v16 = vsel %vm154_vm0, %v143_v11, 0.0 }
  0x23   :  { %v189_v17 = vadd.f32 %v188_v1, %v187_v57  ;;  %v196_v18 = vadd.f32 %v195_v6, %v194_v58  ;;  %v203_v19 = vadd.f32 %v202_v7, %v201_v59  ;;  %v210_v20 = vadd.f32 %v209_v5, %v208_v60 }
  0x24   :  { %v212_v21 = vrot.slane %v211_v9, 4  ;;  %v219_v22 = vrot.slane %v218_v12, 4  ;;  %v226_v23 = vrot.slane %v225_v13, 4  ;;  %v233_v24 = vrot.slane %v232_v16, 4 }
  0x25   :  { %v239_v25 = vsel %vm154_vm0, %v454_v8, 0.0  ;;  %v246_v2 = vsel %vm154_vm0, %v144_v14, 0.0  ;;  %v253_v4 = vsel %vm154_vm0, %v456_v3, 0.0  ;;  %v260_v10 = vsel %vm154_vm0, %v145_v15, 0.0 }
  0x26   :  { %v213_v11 = vadd.f32 %v212_v21, %v211_v9  ;;  %v220_v26 = vadd.f32 %v219_v22, %v218_v12  ;;  %v227_v27 = vadd.f32 %v226_v23, %v225_v13  ;;  %v234_v28 = vadd.f32 %v233_v24, %v232_v16 }
  0x27   :  { %v240_v29 = vrot.slane %v239_v25, 4  ;;  %v247_v30 = vrot.slane %v246_v2, 4  ;;  %v254_v31 = vrot.slane %v253_v4, 4  ;;  %v261_v32 = vrot.slane %v260_v10, 4 }
  0x28   :  { %v214_v33 = vrot.slane %v213_v11, 2  ;;  %v221_v8 = vrot.slane %v220_v26, 2  ;;  %v228_v34 = vrot.slane %v227_v27, 2  ;;  %v235_v14 = vrot.slane %v234_v28, 2 }
  0x29   :  { %v241_v35 = vadd.f32 %v240_v29, %v239_v25  ;;  %v248_v36 = vadd.f32 %v247_v30, %v246_v2  ;;  %v255_v37 = vadd.f32 %v254_v31, %v253_v4  ;;  %v262_v38 = vadd.f32 %v261_v32, %v260_v10 }
  0x2a   :  { %v215_v39 = vadd.f32 %v214_v33, %v213_v11  ;;  %v222_v3 = vadd.f32 %v221_v8, %v220_v26  ;;  %v229_v40 = vadd.f32 %v228_v34, %v227_v27  ;;  %v236_v15 = vadd.f32 %v235_v14, %v234_v28 }
  0x2b   :  { %v242_v41 = vrot.slane %v241_v35, 2  ;;  %v249_v42 = vrot.slane %v248_v36, 2  ;;  %v256_v43 = vrot.slane %v255_v37, 2  ;;  %v263_v44 = vrot.slane %v262_v38, 2 }
  0x2c   :  { %v216_v45 = vrot.slane %v215_v39, 1  ;;  %v223_v46 = vrot.slane %v222_v3, 1  ;;  %v230_v47 = vrot.slane %v229_v40, 1  ;;  %v237_v48 = vrot.slane %v236_v15, 1 }
  0x2d   :  { %v243_v49 = vadd.f32 %v242_v41, %v241_v35  ;;  %v250_v50 = vadd.f32 %v249_v42, %v248_v36  ;;  %v257_v51 = vadd.f32 %v256_v43, %v255_v37  ;;  %v264_v52 = vadd.f32 %v263_v44, %v262_v38 }
  0x2e   :  { %v217_v53 = vadd.f32 %v216_v45, %v215_v39  ;;  %v224_v54 = vadd.f32 %v223_v46, %v222_v3  ;;  %v231_v56 = vadd.f32 %v230_v47, %v229_v40  ;;  %v238_v57 = vadd.f32 %v237_v48, %v236_v15 }
  0x2f   :  { %v244_v58 = vrot.slane %v243_v49, 1  ;;  %v251_v59 = vrot.slane %v250_v50, 1  ;;  %v258_v60 = vrot.slane %v257_v51, 1  ;;  %v265_v1 = vrot.slane %v264_v52, 1 }
  0x30   :  { %v268_v6 = vmul.f32 0.25, %v474_v61  ;;  %v269_v7 = vmul.f32 0.25, %v476_v62  ;;  %v270_v5 = vmul.f32 0.25, %v478_v63  ;;  %v271_v9 = vmul.f32 0.25, %v480_v0 }
  0x31   :  { %v245_v12 = vadd.f32 %v244_v58, %v243_v49  ;;  %v252_v13 = vadd.f32 %v251_v59, %v250_v50  ;;  %v259_v16 = vadd.f32 %v258_v60, %v257_v51  ;;  %v266_v21 = vadd.f32 %v265_v1, %v264_v52 }
  0x32   :  { %v272_v22 = vmul.f32 0.25, %v189_v17  ;;  %v273_v23 = vmul.f32 0.25, %v196_v18  ;;  %v274_v24 = vmul.f32 0.25, %v203_v19  ;;  %v275_v25 = vmul.f32 0.25, %v210_v20 }
  0x33   :  { %v276_v2 = vmul.f32 0.25, %v217_v53  ;;  %v277_v4 = vmul.f32 0.25, %v224_v54  ;;  %v278_v10 = vmul.f32 0.25, %v231_v56  ;;  %v279_v11 = vmul.f32 0.25, %v238_v57 }
  0x34   :  { %v280_v26 = vmul.f32 0.25, %v245_v12  ;;  %v281_v61 = vmul.f32 0.25, %v252_v13  ;;  %v282_v27 = vmul.f32 0.25, %v259_v16  ;;  %v283_v62 = vmul.f32 0.25, %v266_v21 }
  0x35   :  { %v300_v28 = vcombine.low %v268_v6, %v269_v7  ;;  %v301_v63 = vcombine.low %v270_v5, %v271_v9  ;;  %v317_v29 = vcombine.low %v272_v22, %v273_v23  ;;  %v318_v0 = vcombine.low %v274_v24, %v275_v25 }
  0x36   :  { %v334_v30 = vcombine.low %v276_v2, %v277_v4  ;;  %v335_v31 = vcombine.low %v278_v10, %v279_v11  ;;  %v351_v32 = vcombine.low %v280_v26, %v281_v61  ;;  %v352_v33 = vcombine.low %v282_v27, %v283_v62 }
  0x37   :  { %v308_v17 = vrot.slane %v300_v28, %v448_v55  ;;  %v315_v18 = vrot.slane %v301_v63, %v448_v55  ;;  %v325_v19 = vrot.slane %v317_v29, %v448_v55  ;;  %v332_v20 = vrot.slane %v318_v0, %v448_v55 }
  0x38   :  { %v342_v8 = vrot.slane %v334_v30, %v448_v55  ;;  %v349_v34 = vrot.slane %v335_v31, %v448_v55  ;;  %v359_v14 = vrot.slane %v351_v32, %v448_v55  ;;  %v366_v35 = vrot.slane %v352_v33, %v448_v55 }
  0x39   :  { %v316_v36 = vcombine.low %v308_v17, %v315_v18  ;;  %v333_v37 = vcombine.low %v325_v19, %v332_v20 }
  0x3a   :  { %v350_v38 = vcombine.low %v342_v8, %v349_v34  ;;  %v367_v39 = vcombine.low %v359_v14, %v366_v35 }
  0x3c   :  { %v372_v3 = vrot.slane %v350_v38, 7  ;;  %v383_v40 = vrot.slane %v367_v39, 7 }
  0x3e   :  { %v374_v15 = vsel %vm373_vm1, %v372_v3, %v316_v36  ;;  %v384_v41 = vsel %vm373_vm1, %v383_v40, %v333_v37 }
  0x3f   :  { %v376_v42 = vsel %vm375_vm2, %v372_v3, %v374_v15  ;;  %v385_v43 = vsel %vm375_vm2, %v383_v40, %v384_v41 }
  0x40   :  { %v378_v44 = vsel %vm377_vm3, %v372_v3, %v376_v42  ;;  %v386_v45 = vsel %vm377_vm3, %v383_v40, %v385_v43 }
  0x41   :  { %v380_v46 = vsel %vm379_vm4, %v372_v3, %v378_v44  ;;  %v387_v47 = vsel %vm379_vm4, %v383_v40, %v386_v45 }
  0x42   :  { %390 = vst [vmem:[%s521_s3] sm:$0xff] %v380_v46  ;;  %391 = vst [vmem:[%s521_s3 + $0x8] sm:$0xff] %v387_v47 }

// kernel: densenet_forward.176
= control target key start
LH: loop header
LB: loop body
LE: loop exit
PB: predicated region body
PF: predicated region fallthrough
CT: control target
= control target key end

     0   :  { %s999_s21 = smov 0   ;;  %s1001_s22 = smov 0   ;;  %s1147_s0 = inlined_call_operand.vmem [shape: f32[16,1024], index: 0, kind: input, shape index: {}]   ;;  %s1148_s1 = inlined_call_operand.vmem [shape: bf16[1024,128], index: 1, kind: input, shape index: {}]   ;;  %s1149_s2 = inlined_call_operand.vmem [shape: f32[1,1024], index: 2, kind: input, shape index: {}]   ;;  %s1150_s3 = inlined_call_operand.vmem [shape: f32[1,1024], index: 3, kind: input, shape index: {}]   ;;  %s1151_s4 = inlined_call_operand.vmem [shape: f32[1,128], index: 4, kind: input, shape index: {}]   ;;  %s1152_s5 = inlined_call_operand.vmem [shape: f32[1,128], index: 5, kind: input, shape index: {}]   ;;  %s1153_s6 = inlined_call_operand.vmem [shape: f32[16,128], index: 6, kind: output, shape index: {}]  }
   0x1   :  { %s1003_s23 = smov 0   ;;  %s1005_s24 = smov 0  }
   0x2   :  { %s1007_s25 = smov 0  }
   0x3 LB: > { %s28_s26 = sadd.s32 1, %s957_s24  ;;  %p51_p1 = scmp.ne.s32.totalorder %s949_s22, %s945_s21  ;;  %s961_s25 = sphi %s1007_s25, %s16_s25   ;;  %s957_s24 = sphi %s1005_s24, %s1157_s24   ;;  %s953_s23 = sphi %s1003_s23, %s1156_s23   ;;  %s949_s22 = sphi %s1001_s22, %s1155_s22   ;;  %s945_s21 = sphi %s999_s21, %s1154_s21  }
   0x4   : > { %p29_p0 = scmp.ge.s32.totalorder %s28_s26, 4  ;;  %p52_p2 = scmp.eq.s32.totalorder %s961_s25, 0 }
   0x5   : > { %s44_s28 = sadd.s32 1, %s949_s22  ;;  %p809_p5 = scmp.ge.s32.totalorder %s961_s25, 4 }
   0x6   : > { %s1159_s26 = smov (%p29_p0, %s28_s26), 0  ;;  %p53_p3 = por %p52_p2, %p51_p1 }
   0x7   : > { %s40_s27 = ssub.s32 %s957_s24, %s1159_s26  ;;  %249 = sbr.rel (%p809_p5) target bundleno = 21 (0x15), region = 24 }
   0x8   : > { %p42_p4 = scmp.eq.s32.totalorder %s40_s27, 0 }
   0xa   : > { %s1034_s29 = scalar_select %p42_p4, %s949_s22, %s44_s28  }
   0xe   : > { %252 = sbr.rel (!%p53_p3) target bundleno = 21 (0x15), region = 28  ;;  %s254_s30 = sand.u32 (%p53_p3), 1, %s949_s22  }
   0xf   : > { %s843_s7 = sshll.u32 (%p53_p3), %s957_s24, 4  ;;  %s810_s8 = sshll.u32 (%p53_p3), %s254_s30, 5 }
  0x10   : > { %s262_s11 = scalar_lea.vmem (%p53_p3), %s1147_s0, %s843_s7  ;;  %s256_s12 = scalar_lea.vmem (%p53_p3), [#allocation2], %s810_s8 }
  0x11   : > { %v275_v0 = vld [vmem:[%s262_s11] sm:$0xff] (%p53_p3)  ;;  %v277_v1 = vld [vmem:[%s262_s11 + $0x8] sm:$0xff] (%p53_p3) }
  0x12   : > { %v279_v2 = vld [vmem:[%s262_s11 + $0x40] sm:$0xff] (%p53_p3)  ;;  %276 = vst [vmem:[%s256_s12] sm:$0xff] (%p53_p3), %v275_v0  ;;  %278 = vst [vmem:[%s256_s12 + $0x8] sm:$0xff] (%p53_p3), %v277_v1  ;;  %v281_v3 = vld [vmem:[%s262_s11 + $0x48] sm:$0xff] (%p53_p3) }
  0x13   : > { %280 = vst [vmem:[%s256_s12 + $0x10] sm:$0xff] (%p53_p3), %v279_v2  ;;  %282 = vst [vmem:[%s256_s12 + $0x18] sm:$0xff] (%p53_p3), %v281_v3 }
  0x15 PF: > { %p813_p6 = scmp.ge.s32.totalorder %s961_s25, 1  ;;  %p315_p7 = scmp.lt.s32.totalorder %s961_s25, 5 }
  0x17   : > { %p316_p8 = pnand %p813_p6, %p315_p7 }
  0x18   : > { %s322_s13 = sand.u32 (!%p316_p8), 1, %s945_s21   ;;  %s815_s14 = sshll.u32 (!%p316_p8), %s953_s23, 5 }
  0x19   : > { %319 = sbr.rel (%p316_p8) target bundleno = 309 (0x135), region = 63  ;;  %s814_s15 = sshll.u32 (!%p316_p8), %s322_s13, 5 }
  0x1a   : > { %p379_p9 = scmp.lt.s32.totalorder (!%p316_p8), %s815_s14, 127  ;;  %s817_s16 = sshll.u32 (!%p316_p8), %s953_s23, 1 }
  0x1b   : > { %p388_p10 = scmp.lt.s32.totalorder (!%p316_p8), %s817_s16, 7  ;;  %s1062_s9 = scalar_lea.vmem (!%p316_p8), [#allocation2], %s814_s15 }
  0x1c   : > { %p819_p11 = scmp.ne.s32.totalorder (!%p316_p8), %s953_s23, 0 }
  0x20   : > { %s1161_s14 = smov (!%p379_p9, %s815_s14), 127  ;;  %s1163_s16 = smov (!%p388_p10, %s817_s16), 7 }
  0x21   : > { %s816_s17 = sshll.u32 %s1161_s14, 2  ;;  %s390_s21 = scalar_lea.vmem %s1149_s2, %s1163_s16  ;;  %v963_v4 = vmov (!%p819_p11), 0.0  }
  0x22   : > { %s1050_s20 = scalar_lea.vmem %s1148_s1, %s816_s17  ;;  %s395_s8 = scalar_lea.vmem %s1150_s3, %s1163_s16  ;;  %417 = vst [vmem:[%s1153_s6] sm:$0xff] (!%p819_p11), %v963_v4  ;;  %418 = vst [vmem:[%s1153_s6 + $0x8] sm:$0xff] (!%p819_p11), %v963_v4 }
  0x23   : > { %416 = sbr.rel (%p819_p11) target bundleno = 42 (0x2a), region = 71 }
  0x2a PF: > { %v907_v5 = vld [vmem:[%s1050_s20 + $0x40] sm:$0xff]   ;;  %v909_v7 = vld [vmem:[%s1050_s20 + $0x48] sm:$0xff]   ;;  %v911_v9 = vld [vmem:[%s1050_s20 + $0x50] sm:$0xff]   ;;  %v425_v10 = vlaneseq  ;;  %p836_p12 = scmp.ne.s32.totalorder %s953_s23, 3 }
  0x2b   : > { %v908_v6 = vld [vmem:[%s1050_s20] sm:$0xff]   ;;  %844 = vmatprep.subr.bf16.mxu0 %v907_v5  ;;  %v910_v8 = vld [vmem:[%s1050_s20 + $0x8] sm:$0xff]   ;;  %v912_v11 = vld [vmem:[%s1050_s20 + $0x10] sm:$0xff]  }
  0x2c   : > { %845 = vmatpush3.bf16.msra.mxu0 %v908_v6  ;;  %v913_v12 = vld [vmem:[%s1050_s20 + $0x58] sm:$0xff]   ;;  %v426_v13 = vshrl.u32 %v425_v10, 7  ;;  %v915_v15 = vld [vmem:[%s1050_s20 + $0x60] sm:$0xff]   ;;  %v917_v19 = vld [vmem:[%s1050_s20 + $0x68] sm:$0xff]  }
  0x2d   : > { %846 = vmatprep.subr.bf16.mxu0 %v909_v7  ;;  %v914_v14 = vld [vmem:[%s1050_s20 + $0x18] sm:$0xff]   ;;  %v916_v18 = vld [vmem:[%s1050_s20 + $0x20] sm:$0xff]   ;;  %v420_v20 = vld [vmem:[%s1062_s9 + $0x8] sm:$0xff] }
  0x2e   : > { %v427_v16 = vsub.s32 0, %v426_v13  ;;  %v431_v17 = vsub.s32 1, %v426_v13  ;;  %v422_v21 = vld [vmem:[%s1062_s9 + $0x18] sm:$0xff]  ;;  %v423_v22 = vld [vmem:[%s390_s21] sm:$0x3]  ;;  %v421_v27 = vld [vmem:[%s1062_s9 + $0x10] sm:$0xff] }
  0x2f   : > { %v439_v25 = vld [vmem:[%s395_s8] sm:$0x3]  ;;  %v918_v30 = vld [vmem:[%s1050_s20 + $0x28] sm:$0xff]   ;;  %v919_v35 = vld [vmem:[%s1050_s20 + $0x70] sm:$0xff]  }
  0x30   : > { %847 = vmatpush3.bf16.msra.mxu0 %v910_v8  ;;  %v428_v23 = vrot.slane %v423_v22, %v427_v16  ;;  %v432_v24 = vrot.slane %v423_v22, %v431_v17  ;;  %v419_v26 = vld [vmem:[%s1062_s9] sm:$0xff]  ;;  %v444_v28 = vrot.slane %v439_v25, %v427_v16  ;;  %v448_v29 = vrot.slane %v439_v25, %v431_v17  ;;  %v920_v40 = vld [vmem:[%s1050_s20 + $0x30] sm:$0xff]   ;;  %v921_v43 = vld [vmem:[%s1050_s20 + $0x78] sm:$0xff]  }
  0x31   : > { %848 = vmatprep.subr.bf16.mxu0 %v911_v9  ;;  %v922_v47 = vld [vmem:[%s1050_s20 + $0x38] sm:$0xff]   ;;  %v459_v50 = vld [vmem:[%s1153_s6] sm:$0xff]  ;;  %v460_v54 = vld [vmem:[%s1153_s6 + $0x8] sm:$0xff] }
  0x32   : > { %v436_v31 = vmul.f32 %v432_v24, %v420_v20  ;;  %v438_v32 = vmul.f32 %v432_v24, %v422_v21  ;;  %v435_v33 = vmul.f32 %v428_v23, %v419_v26  ;;  %v437_v34 = vmul.f32 %v428_v23, %v421_v27  ;;  %v837_v60 = vld [vmem:[%s1151_s4] ss:$0 sm:$0xff] (!%p836_p12) }
  0x33   : > { %v838_v61 = vld [vmem:[%s1152_s5] ss:$0 sm:$0xff] (!%p836_p12) }
  0x34   : > { %849 = vmatpush3.bf16.msra.mxu0 %v912_v11  ;;  %v452_v36 = vadd.f32 %v448_v29, %v436_v31  ;;  %v454_v37 = vadd.f32 %v448_v29, %v438_v32  ;;  %v451_v38 = vadd.f32 %v444_v28, %v435_v33  ;;  %v453_v39 = vadd.f32 %v444_v28, %v437_v34 }
  0x35   : > { %850 = vmatprep.subr.bf16.mxu0 %v913_v12 }
  0x36   : > { %v456_v41 = vmax.f32 %v452_v36, 0.0  ;;  %v458_v42 = vmax.f32 %v454_v37, 0.0  ;;  %v455_v45 = vmax.f32 %v451_v38, 0.0  ;;  %v457_v46 = vmax.f32 %v453_v39, 0.0 }
  0x38   : > { %851 = vmatpush3.bf16.msra.mxu0 %v914_v14  ;;  %v462_v44 = vpack.c.bf16 %v458_v42, %v456_v41  ;;  %v461_v48 = vpack.c.bf16 %v457_v46, %v455_v45 }
  0x39   : > { %852 = vmatprep.subr.bf16.mxu0 %v915_v15 }
  0x3a   : > { %623 = vmatprep.mubr.bf16.mxu0 %v462_v44 }
  0x3c   : > { %853 = vmatpush3.bf16.msra.mxu0 %v916_v18 }
  0x3d   : > { %854 = vmatprep.subr.bf16.mxu0 %v917_v19 }
  0x40   : > { %855 = vmatpush3.bf16.msra.mxu0 %v918_v30 }
  0x41   : > { %856 = vmatprep.subr.bf16.mxu0 %v919_v35 }
  0x44   : > { %857 = vmatpush3.bf16.msra.mxu0 %v920_v40 }
  0x45   : > { %858 = vmatprep.subr.bf16.mxu0 %v921_v43 }
  0x48   : > { %859 = vmatpush3.bf16.msra.mxu0 %v922_v47 }
  0x4b   : > { %624 = vmatmul.mubr.bf16.vlgmr.msra.gmra.mrb[0].mxu0 %v461_v48 }
 0x11e   : > { %v860_v49 = vpop.f32.mrb[0].mxu0 }
 0x11f   : > { %v861_v51 = vpop.f32.mrb[1].mxu0 }
 0x120   : > { %v862_v52 = vadd.f32 %v861_v51, %v860_v49  ;;  %v863_v53 = vpop.f32.mrb[2].mxu0  ;;  %639 = sbr.rel (%p836_p12) target bundleno = 309 (0x135), region = 75 }
 0x121   : > { %v864_v55 = vpop.f32.mrb[3].mxu0 }
 0x122   : > { %v632_v56 = vadd.f32 %v862_v52, %v459_v50  ;;  %v865_v57 = vadd.f32 %v864_v55, %v863_v53 }
 0x124   : > { %634 = vst [vmem:[%s1153_s6] sm:$0xff] %v632_v56  ;;  %v633_v58 = vadd.f32 %v865_v57, %v460_v54 }
 0x126   : > { %635 = vst [vmem:[%s1153_s6 + $0x8] sm:$0xff] %v633_v58 }
 0x12b   : > { %v640_v59 = vld [vmem:[%s1153_s6] sm:$0xff] }
 0x12c   : > { %v649_v62 = vmul.f32 %v837_v60, %v640_v59 }
 0x12d   : > { %v641_v63 = vld [vmem:[%s1153_s6 + $0x8] sm:$0xff] }
 0x12e   : > { %v650_v0 = vmul.f32 %v837_v60, %v641_v63  ;;  %v658_v1 = vadd.f32 %v838_v61, %v649_v62 }
 0x130   : > { %v659_v2 = vadd.f32 %v838_v61, %v650_v0  ;;  %v660_v3 = vmax.f32 %v658_v1, 0.0 }
 0x132   : > { %v661_v4 = vmax.f32 %v659_v2, 0.0  ;;  %662 = vst [vmem:[%s1153_s6] sm:$0xff] %v660_v3 }
 0x134   : > { %663 = vst [vmem:[%s1153_s6 + $0x8] sm:$0xff] %v661_v4 }
 0x135 PF: > { %s16_s25 = sadd.s32 1, %s961_s25   ;;  %s1154_s21 = smov %s949_s22 }
 0x136   : > { %p13_p13 = scmp.ge.s32.totalorder %s16_s25, 6   ;;  %s1155_s22 = smov %s1034_s29 }
 0x137   : > { %s1156_s23 = smov %s957_s24  ;;  %s1157_s24 = smov %s1159_s26 }
 0x138   :  { %15 = sbr.rel (!%p13_p13) target bundleno = 3 (0x3), region = 125 }

// kernel: densenet_forward.183
= control target key start
LH: loop header
LB: loop body
LE: loop exit
PB: predicated region body
PF: predicated region fallthrough
CT: control target
= control target key end

     0   :  { %s983_s21 = smov 0   ;;  %s985_s22 = smov 0   ;;  %s1111_s0 = inlined_call_operand.vmem [shape: bf16[16,1024], index: 0, kind: input, shape index: {}]   ;;  %s1112_s1 = inlined_call_operand.vmem [shape: bf16[1024,128], index: 1, kind: input, shape index: {}]   ;;  %s1113_s2 = inlined_call_operand.vmem [shape: f32[1,1024], index: 2, kind: input, shape index: {}, may-alias: {2,3}]   ;;  %s1114_s3 = inlined_call_operand.vmem [shape: f32[1,1024], index: 3, kind: input, shape index: {}, may-alias: {2,3}]   ;;  %s1115_s4 = inlined_call_operand.vmem [shape: f32[1,128], index: 4, kind: input, shape index: {}]   ;;  %s1116_s5 = inlined_call_operand.vmem [shape: f32[1,128], index: 5, kind: input, shape index: {}]   ;;  %s1117_s6 = inlined_call_operand.vmem [shape: f32[16,128], index: 6, kind: output, shape index: {}]  }
   0x1   :  { %s987_s23 = smov 0   ;;  %s989_s24 = smov 0  }
   0x2   :  { %s991_s2 = smov 0  }
   0x3 LB: > { %s28_s3 = sadd.s32 1, %s941_s24  ;;  %p51_p1 = scmp.ne.s32.totalorder %s933_s22, %s929_s21  ;;  %s945_s2 = sphi %s991_s2, %s16_s2   ;;  %s941_s24 = sphi %s989_s24, %s1121_s24   ;;  %s937_s23 = sphi %s987_s23, %s1120_s23   ;;  %s933_s22 = sphi %s985_s22, %s1119_s22   ;;  %s929_s21 = sphi %s983_s21, %s1118_s21  }
   0x4   : > { %p29_p0 = scmp.ge.s32.totalorder %s28_s3, 4  ;;  %p52_p2 = scmp.eq.s32.totalorder %s945_s2, 0 }
   0x5   : > { %s44_s26 = sadd.s32 1, %s933_s22  ;;  %p790_p5 = scmp.ge.s32.totalorder %s945_s2, 4 }
   0x6   : > { %s1123_s3 = smov (%p29_p0, %s28_s3), 0  ;;  %p53_p3 = por %p52_p2, %p51_p1 }
   0x7   : > { %s40_s25 = ssub.s32 %s941_s24, %s1123_s3  ;;  %249 = sbr.rel (%p790_p5) target bundleno = 21 (0x15), region = 24 }
   0x8   : > { %p42_p4 = scmp.eq.s32.totalorder %s40_s25, 0 }
   0xa   : > { %s1018_s27 = scalar_select %p42_p4, %s933_s22, %s44_s26  }
   0xe   : > { %252 = sbr.rel (!%p53_p3) target bundleno = 21 (0x15), region = 28  ;;  %s254_s28 = sand.u32 (%p53_p3), 1, %s933_s22  }
   0xf   : > { %s824_s29 = sshll.u32 (%p53_p3), %s941_s24, 3  ;;  %s791_s30 = sshll.u32 (%p53_p3), %s254_s28, 4 }
  0x10   : > { %s262_s9 = scalar_lea.vmem (%p53_p3), %s1111_s0, %s824_s29  ;;  %s256_s10 = scalar_lea.vmem (%p53_p3), [#allocation2], %s791_s30 }
  0x11   : > { %v292_v0 = vld [vmem:[%s262_s9] sm:$0xff] (%p53_p3) }
  0x12   : > { %v294_v1 = vld [vmem:[%s262_s9 + $0x20] sm:$0xff] (%p53_p3)  ;;  %293 = vst [vmem:[%s256_s10] sm:$0xff] (%p53_p3), %v292_v0 }
  0x13   : > { %295 = vst [vmem:[%s256_s10 + $0x8] sm:$0xff] (%p53_p3), %v294_v1 }
  0x15 PF: > { %p794_p6 = scmp.ge.s32.totalorder %s945_s2, 1  ;;  %p328_p7 = scmp.lt.s32.totalorder %s945_s2, 5 }
  0x17   : > { %p329_p8 = pnand %p794_p6, %p328_p7 }
  0x18   : > { %s335_s11 = sand.u32 (!%p329_p8), 1, %s929_s21   ;;  %s796_s12 = sshll.u32 (!%p329_p8), %s937_s23, 5 }
  0x19   : > { %332 = sbr.rel (%p329_p8) target bundleno = 304 (0x130), region = 78  ;;  %s1030_s13 = sshll.u32 (!%p329_p8), %s335_s11, 4 }
  0x1a   : > { %p392_p9 = scmp.lt.s32.totalorder (!%p329_p8), %s796_s12, 127  ;;  %s337_s18 = scalar_lea.vmem (!%p329_p8), [#allocation2], %s1030_s13 }
  0x1b   : > { %p798_p10 = scmp.ne.s32.totalorder (!%p329_p8), %s937_s23, 0 }
  0x20   : > { %s1125_s12 = smov (!%p392_p9, %s796_s12), 127  ;;  %429 = sbr.rel (%p798_p10) target bundleno = 39 (0x27), region = 86 }
  0x21   : > { %s797_s14 = sshll.u32 %s1125_s12, 2  ;;  %v947_v2 = vmov (!%p798_p10), 0.0  }
  0x22   : > { %s1035_s17 = scalar_lea.vmem %s1112_s1, %s797_s14  ;;  %430 = vst [vmem:[%s1117_s6] sm:$0xff] (!%p798_p10), %v947_v2  ;;  %431 = vst [vmem:[%s1117_s6 + $0x8] sm:$0xff] (!%p798_p10), %v947_v2 }
  0x27 PF: > { %v888_v3 = vld [vmem:[%s1035_s17 + $0x40] sm:$0xff]   ;;  %v890_v5 = vld [vmem:[%s1035_s17 + $0x48] sm:$0xff]   ;;  %v892_v7 = vld [vmem:[%s1035_s17 + $0x50] sm:$0xff]   ;;  %p817_p11 = scmp.ne.s32.totalorder %s937_s23, 3 }
  0x28   : > { %v889_v4 = vld [vmem:[%s1035_s17] sm:$0xff]   ;;  %825 = vmatprep.subr.bf16.mxu0 %v888_v3  ;;  %v891_v6 = vld [vmem:[%s1035_s17 + $0x8] sm:$0xff]   ;;  %v893_v8 = vld [vmem:[%s1035_s17 + $0x10] sm:$0xff]  }
  0x29   : > { %826 = vmatpush3.bf16.msra.mxu0 %v889_v4  ;;  %v894_v9 = vld [vmem:[%s1035_s17 + $0x58] sm:$0xff]   ;;  %v896_v11 = vld [vmem:[%s1035_s17 + $0x60] sm:$0xff]   ;;  %v898_v13 = vld [vmem:[%s1035_s17 + $0x68] sm:$0xff]  }
  0x2a   : > { %827 = vmatprep.subr.bf16.mxu0 %v890_v5  ;;  %v895_v10 = vld [vmem:[%s1035_s17 + $0x18] sm:$0xff]   ;;  %v897_v12 = vld [vmem:[%s1035_s17 + $0x20] sm:$0xff]   ;;  %v899_v15 = vld [vmem:[%s1035_s17 + $0x28] sm:$0xff]  }
  0x2b   : > { %v906_v14 = vld [vmem:[%s337_s18 + $0x4] ss:$8 sps:$4 sm:$0xff]   ;;  %v904_v20 = vld [vmem:[%s337_s18] ss:$8 sps:$4 sm:$0xff]  }
  0x2c   : > { %606 = vmatprep.mubr.bf16.mxu0 %v906_v14  ;;  %v900_v16 = vld [vmem:[%s1035_s17 + $0x70] sm:$0xff]   ;;  %v902_v18 = vld [vmem:[%s1035_s17 + $0x78] sm:$0xff]   ;;  %v434_v22 = vld [vmem:[%s1117_s6] sm:$0xff] }
  0x2d   : > { %828 = vmatpush3.bf16.msra.mxu0 %v891_v6  ;;  %v901_v17 = vld [vmem:[%s1035_s17 + $0x30] sm:$0xff]   ;;  %v903_v19 = vld [vmem:[%s1035_s17 + $0x38] sm:$0xff]   ;;  %v435_v26 = vld [vmem:[%s1117_s6 + $0x8] sm:$0xff] }
  0x2e   : > { %829 = vmatprep.subr.bf16.mxu0 %v892_v7  ;;  %v818_v32 = vld [vmem:[%s1115_s4] ss:$0 sm:$0xff] (!%p817_p11) }
  0x2f   : > { %v819_v33 = vld [vmem:[%s1116_s5] ss:$0 sm:$0xff] (!%p817_p11) }
  0x31   : > { %830 = vmatpush3.bf16.msra.mxu0 %v893_v8 }
  0x32   : > { %831 = vmatprep.subr.bf16.mxu0 %v894_v9 }
  0x35   : > { %832 = vmatpush3.bf16.msra.mxu0 %v895_v10 }
  0x36   : > { %833 = vmatprep.subr.bf16.mxu0 %v896_v11 }
  0x39   : > { %834 = vmatpush3.bf16.msra.mxu0 %v897_v12 }
  0x3a   : > { %835 = vmatprep.subr.bf16.mxu0 %v898_v13 }
  0x3d   : > { %836 = vmatpush3.bf16.msra.mxu0 %v899_v15 }
  0x3e   : > { %837 = vmatprep.subr.bf16.mxu0 %v900_v16 }
  0x41   : > { %838 = vmatpush3.bf16.msra.mxu0 %v901_v17 }
  0x42   : > { %839 = vmatprep.subr.bf16.mxu0 %v902_v18 }
  0x45   : > { %840 = vmatpush3.bf16.msra.mxu0 %v903_v19 }
  0x48   : > { %607 = vmatmul.mubr.bf16.vlgmr.msra.gmra.mrb[0].mxu0 %v904_v20 }
 0x11b   : > { %v841_v21 = vpop.f32.mrb[0].mxu0 }
 0x11c   : > { %v842_v23 = vpop.f32.mrb[1].mxu0 }
 0x11d   : > { %v843_v24 = vadd.f32 %v842_v23, %v841_v21  ;;  %v844_v25 = vpop.f32.mrb[2].mxu0  ;;  %622 = sbr.rel (%p817_p11) target bundleno = 304 (0x130), region = 90 }
 0x11e   : > { %v845_v27 = vpop.f32.mrb[3].mxu0 }
 0x11f   : > { %v615_v28 = vadd.f32 %v843_v24, %v434_v22  ;;  %v846_v29 = vadd.f32 %v845_v27, %v844_v25 }
 0x121   : > { %617 = vst [vmem:[%s1117_s6] sm:$0xff] %v615_v28  ;;  %v616_v30 = vadd.f32 %v846_v29, %v435_v26 }
 0x123   : > { %618 = vst [vmem:[%s1117_s6 + $0x8] sm:$0xff] %v616_v30 }
 0x128   : > { %v623_v31 = vld [vmem:[%s1117_s6] sm:$0xff] }
 0x129   : > { %v632_v34 = vmul.f32 %v818_v32, %v623_v31 }
 0x12a   : > { %v624_v35 = vld [vmem:[%s1117_s6 + $0x8] sm:$0xff] }
 0x12b   : > { %v633_v36 = vmul.f32 %v818_v32, %v624_v35  ;;  %v641_v37 = vadd.f32 %v819_v33, %v632_v34 }
 0x12d   : > { %v642_v38 = vadd.f32 %v819_v33, %v633_v36  ;;  %643 = vst [vmem:[%s1117_s6] sm:$0xff] %v641_v37 }
 0x12f   : > { %644 = vst [vmem:[%s1117_s6 + $0x8] sm:$0xff] %v642_v38 }
 0x130 PF: > { %s16_s2 = sadd.s32 1, %s945_s2   ;;  %s1118_s21 = smov %s933_s22 }
 0x131   : > { %p13_p12 = scmp.ge.s32.totalorder %s16_s2, 6   ;;  %s1119_s22 = smov %s1018_s27 }
 0x132   : > { %s1120_s23 = smov %s941_s24  ;;  %s1121_s24 = smov %s1123_s3 }
 0x133   :  { %15 = sbr.rel (!%p13_p12) target bundleno = 3 (0x3), region = 140 }

</bundles_post_ra>
